<compile_context>
chip_gen: v6e
topology: v6e:2x2x1
jax: 0.10.0
libtpu: 0.0.40
codegen_flags: <defaults>
</compile_context>

<pallas_src>
import math
import functools

import numpy as np
import jax
import jax.numpy as jnp
from jax.experimental import pallas as pl
from jax.experimental.pallas import tpu as pltpu

EPS_BN = 1e-5
EPS_LN = 1e-5
MXU_DTYPE = jnp.bfloat16          # matmul-operand dtype; accumulation stays f32


# ---------------------------------------------------------------------------
# One-time parameter preparation (hoisted out of the per-call path).
# ---------------------------------------------------------------------------

def _stacked_band_weights(w_hwio, w_in, stride, w_out):
    """Fold the kx taps + width padding/stride of a 3x3 conv into a single
    (3*w_in*cin, w_out*cout) matrix.  The three ky blocks are stacked along K
    so the whole conv is ONE matmul against [band_up | band_mid | band_dn]."""
    kh, kw, cin, cout = w_hwio.shape
    sel = np.zeros((kw, w_in, w_out), np.float32)
    for kx in range(kw):
        for ox in range(w_out):
            wi = stride * ox + kx - 1
            if 0 <= wi < w_in:
                sel[kx, wi, ox] = 1.0
    a = jnp.einsum('kwo,ykcd->ywcod', jnp.asarray(sel), w_hwio)
    return a.reshape(kh * w_in * cin, w_out * cout)


def _w_pool(w, c):
    """(w*c, w*c): averages each channel over the w lane-groups and broadcasts
    the result back to every lane-group (BatchNorm statistics helper)."""
    return jnp.asarray(
        np.kron(np.ones((w, w), np.float32), np.eye(c, dtype=np.float32)) / w)


def _tile_mat(c, w):
    """(c, w*c): broadcast a per-channel row vector to the w-major slab lanes."""
    return jnp.asarray(np.tile(np.eye(c, dtype=np.float32), (1, w)))


def _row_repeat(n, h):
    """(n*h, n): replicate one row per batch element h times."""
    return jnp.asarray(
        np.kron(np.eye(n, dtype=np.float32), np.ones((h, 1), np.float32)))


def _tile_vec(v, reps):
    """Per-channel vector -> (1, reps*C) slab-lane vector."""
    return jnp.tile(v, reps)[None, :]


def _prep_attention(p, nf, attn_chans, dtype):
    nheads = nf // attn_chans
    d = attn_chans
    scale = math.sqrt(nf / nheads)
    # Reorder qkv columns from torch's per-head [q|k|v] interleave to
    # [all-Q | all-K | all-V] (heads contiguous) -- free wrapper-side permute.
    perm = np.concatenate([
        np.concatenate([np.arange(hd * 3 * d + off * d, hd * 3 * d + (off + 1) * d)
                        for hd in range(nheads)])
        for off in range(3)]).astype(np.int32)
    qw = jnp.take(p["qkv_w"], jnp.asarray(perm), axis=1)
    qb = jnp.take(p["qkv_b"], jnp.asarray(perm), axis=0)
    qscale = np.ones((3 * nf,), np.float32)
    qscale[:nf] = 1.0 / scale                       # fold 1/scale into q (exact)
    qscale = jnp.asarray(qscale)
    return {
        "ln_g": p["ln_g"][None, :], "ln_b": p["ln_b"][None, :],
        "qkv_w": (qw * qscale[None, :]).astype(dtype),
        "qkv_b": (qb * qscale)[None, :],            # bias stays f32
        "proj_w": p["proj_w"].reshape(nheads, d, nf).astype(dtype),
        "proj_b": p["proj_b"][None, :],
    }


def prepare_params(params, *, n, h, w, ni, nf, attn_chans, add_down,
                   mxu_dtype=MXU_DTYPE):
    pr = {"resnets": []}
    for i, p in enumerate(params["resnets"]):
        cin = ni if i == 0 else nf
        pp = {
            "a1": _stacked_band_weights(p["w1"], w, 1, w).astype(mxu_dtype),
            "b1": _tile_vec(p["b1"], w),
            "a2": _stacked_band_weights(p["w2"], w, 1, w).astype(mxu_dtype),
            "b2": _tile_vec(p["b2"], w),
            "bn1_g": _tile_vec(p["bn1_g"], w), "bn1_b": _tile_vec(p["bn1_b"], w),
            "bn2_g": _tile_vec(p["bn2_g"], w), "bn2_b": _tile_vec(p["bn2_b"], w),
            "pool1": _w_pool(w, cin), "pool2": _w_pool(w, nf),
            "tf": _tile_mat(nf, w),
            "rrep": _row_repeat(n, h),
            "emb_w": p["emb_w"], "emb_b": p["emb_b"][None, :],
        }
        if "idw" in p:
            pp["idw"] = jnp.kron(jnp.eye(w, dtype=jnp.float32),
                                 p["idw"][0, 0]).astype(mxu_dtype)
            pp["idb"] = _tile_vec(p["idb"], w)
        if attn_chans:
            pp.update(_prep_attention(p, nf, attn_chans, mxu_dtype))
        pr["resnets"].append(pp)
    if add_down:
        pr["down_a"] = _stacked_band_weights(
            params["down_w"], w, 2, w // 2).astype(mxu_dtype)
        pr["down_b"] = _tile_vec(params["down_b"], w // 2)
    return pr


def _whole_spec(a):
    nd = a.ndim
    return pl.BlockSpec(a.shape, lambda i, _nd=nd: (0,) * _nd)


# ---------------------------------------------------------------------------
# Fused EmbResBlock kernel: BN+SiLU -> conv1 -> FiLM -> BN+SiLU -> conv2
#                           -> (+ idconv residual), slab layout (N*H, W*C).
# ---------------------------------------------------------------------------

def _res_block_kernel(*refs, h, cf, has_idconv):
    if has_idconv:
        (x_ref, t_ref, a1_ref, b1_ref, a2_ref, b2_ref,
         g1_ref, be1_ref, g2_ref, be2_ref, p1_ref, p2_ref,
         tf_ref, r_ref, ew_ref, eb_ref, idw_ref, idb_ref, o_ref) = refs
    else:
        (x_ref, t_ref, a1_ref, b1_ref, a2_ref, b2_ref,
         g1_ref, be1_ref, g2_ref, be2_ref, p1_ref, p2_ref,
         tf_ref, r_ref, ew_ref, eb_ref, o_ref) = refs

    x = x_ref[...]                                   # (N*H, W*Cin) slab, f32
    nh = x.shape[0]
    inv_rows = 1.0 / nh
    oy = jax.lax.broadcasted_iota(jnp.int32, (nh, 1), 0) % h
    not_top = oy != 0                                # per-batch boundary masks
    not_bot = oy != (h - 1)

    def bn_silu(v, pool_ref, g_ref, b_ref):
        # Training-mode BatchNorm2d (per-channel stats over N,H,W; biased var).
        # Row-reduce first, then a tiny (1,WC)x(WC,WC) pool matmul; centered var.
        mean = jnp.dot(jnp.sum(v, axis=0, keepdims=True) * inv_rows,
                       pool_ref[...], preferred_element_type=jnp.float32)
        cent = v - mean
        var = jnp.dot(jnp.sum(cent * cent, axis=0, keepdims=True) * inv_rows,
                      pool_ref[...], preferred_element_type=jnp.float32)
        y = cent * jax.lax.rsqrt(var + EPS_BN) * g_ref[...] + b_ref[...]
        return y * jax.nn.sigmoid(y)

    def conv3x3(v, a_ref, b_ref):
        # 3x3 / pad 1 conv as ONE stacked-K bf16 matmul.  ky shifts = sublane
        # shifts + boundary masks; kx taps + width padding live in a_ref.
        zero = jnp.zeros((1, v.shape[1]), v.dtype)
        up = jnp.where(not_top, jnp.concatenate([zero, v[:-1, :]], axis=0), 0.0)
        dn = jnp.where(not_bot, jnp.concatenate([v[1:, :], zero], axis=0), 0.0)
        stacked = jnp.concatenate([up, v, dn], axis=1).astype(a_ref.dtype)
        return jnp.dot(stacked, a_ref[...],
                       preferred_element_type=jnp.float32) + b_ref[...]

    h1 = conv3x3(bn_silu(x, p1_ref, g1_ref, be1_ref), a1_ref, b1_ref)

    # FiLM from the time embedding: emb_proj(silu(t)); chunk into scale/shift.
    t = t_ref[...]
    t = t * jax.nn.sigmoid(t)
    emb = jnp.dot(t, ew_ref[...], preferred_element_type=jnp.float32) + eb_ref[...]
    emb_rows = jnp.dot(r_ref[...], emb, preferred_element_type=jnp.float32)
    scale = jnp.dot(emb_rows[:, :cf], tf_ref[...],
                    preferred_element_type=jnp.float32)
    shift = jnp.dot(emb_rows[:, cf:], tf_ref[...],
                    preferred_element_type=jnp.float32)
    h1 = h1 * (1.0 + scale) + shift

    h2 = conv3x3(bn_silu(h1, p2_ref, g2_ref, be2_ref), a2_ref, b2_ref)

    if has_idconv:
        idres = jnp.dot(x.astype(idw_ref.dtype), idw_ref[...],
                        preferred_element_type=jnp.float32) + idb_ref[...]
    else:
        idres = x
    o_ref[...] = (h2 + idres).astype(o_ref.dtype)


def emb_res_block(x_slab, t, pp, *, n, h, w, cf):
    has_idconv = "idw" in pp
    args = [x_slab, t, pp["a1"], pp["b1"], pp["a2"], pp["b2"],
            pp["bn1_g"], pp["bn1_b"], pp["bn2_g"], pp["bn2_b"],
            pp["pool1"], pp["pool2"], pp["tf"], pp["rrep"],
            pp["emb_w"], pp["emb_b"]]
    if has_idconv:
        args += [pp["idw"], pp["idb"]]
    # TODO(synk): at production N*H the BN needs a two-pass/accumulated-stats
    # scheme so this kernel can be tiled over rows with a "parallel" grid.
    return pl.pallas_call(
        functools.partial(_res_block_kernel, h=h, cf=cf, has_idconv=has_idconv),
        out_shape=jax.ShapeDtypeStruct((n * h, w * cf), jnp.float32),
        grid=(1,),
        in_specs=[_whole_spec(a) for a in args],
        out_specs=pl.BlockSpec((n * h, w * cf), lambda i: (0, 0)),
        compiler_params=pltpu.CompilerParams(
            dimension_semantics=("arbitrary",),
            vmem_limit_bytes=32 * 1024 * 1024),
    )(*args)


# ---------------------------------------------------------------------------
# Fused SelfAttention2D kernel (LayerNorm -> qkv -> attention -> proj -> +x),
# grid over batch ("parallel": megacore on v7x).
# ---------------------------------------------------------------------------

def _attn_kernel(x_ref, lng_ref, lnb_ref, qw_ref, qb_ref, pw_ref, pb_ref,
                 o_ref, *, nheads, d):
    x = x_ref[0]                                     # (S, C) f32
    c = x.shape[-1]
    mean = jnp.mean(x, axis=-1, keepdims=True)
    var = jnp.mean((x - mean) ** 2, axis=-1, keepdims=True)
    xn = (x - mean) * jax.lax.rsqrt(var + EPS_LN) * lng_ref[...] + lnb_ref[...]
    # qkv columns are pre-permuted to [Q | K | V] and q is pre-scaled.
    qkv = jnp.dot(xn.astype(qw_ref.dtype), qw_ref[...],
                  preferred_element_type=jnp.float32) + qb_ref[...]

    # TODO(synk): flash-style kv tiling once S*S scores no longer fit VMEM.
    acc = jnp.zeros((x.shape[0], c), jnp.float32)
    for hd in range(nheads):
        q = qkv[:, hd * d:(hd + 1) * d]
        k = qkv[:, c + hd * d: c + (hd + 1) * d]
        v = qkv[:, 2 * c + hd * d: 2 * c + (hd + 1) * d]
        s = jax.lax.dot_general(q.astype(jnp.bfloat16), k.astype(jnp.bfloat16),
                                (((1,), (1,)), ((), ())),
                                preferred_element_type=jnp.float32)
        s = s - jnp.max(s, axis=-1, keepdims=True)
        p = jnp.exp(s)
        p = p * pl.reciprocal(jnp.sum(p, axis=-1, keepdims=True), approx=True)
        oh = jnp.dot(p.astype(jnp.bfloat16), v.astype(jnp.bfloat16),
                     preferred_element_type=jnp.float32)
        # proj of the per-head slice, accumulated (== proj(concat(heads)))
        acc = acc + jnp.dot(oh.astype(pw_ref.dtype), pw_ref[hd],
                            preferred_element_type=jnp.float32)

    out = x + acc + pb_ref[...]                      # residual + proj bias
    o_ref[...] = out.reshape(o_ref.shape).astype(o_ref.dtype)


def self_attention_2d(x_nsc, pp, *, attn_chans):
    n, s, c = x_nsc.shape
    nheads = c // attn_chans
    args = [x_nsc, pp["ln_g"], pp["ln_b"], pp["qkv_w"], pp["qkv_b"],
            pp["proj_w"], pp["proj_b"]]
    in_specs = [
        pl.BlockSpec((1, s, c), lambda i: (i, 0, 0)),
        pl.BlockSpec((1, c), lambda i: (0, 0)),
        pl.BlockSpec((1, c), lambda i: (0, 0)),
        pl.BlockSpec((c, 3 * c), lambda i: (0, 0)),
        pl.BlockSpec((1, 3 * c), lambda i: (0, 0)),
        pl.BlockSpec((nheads, attn_chans, c), lambda i: (0, 0, 0)),
        pl.BlockSpec((1, c), lambda i: (0, 0)),
    ]
    # TODO(synk): for small C (<128 lanes) the output stores are masked; at
    # production nf >= 128 the out block is lane-dense automatically.
    return pl.pallas_call(
        functools.partial(_attn_kernel, nheads=nheads, d=attn_chans),
        out_shape=jax.ShapeDtypeStruct((n, s, c), jnp.float32),
        grid=(n,),
        in_specs=in_specs,
        out_specs=pl.BlockSpec((1, s, c), lambda i: (i, 0, 0)),
        compiler_params=pltpu.CompilerParams(dimension_semantics=("parallel",)),
    )(*args)


# ---------------------------------------------------------------------------
# Stride-2 3x3 "down" conv at output resolution, grid over batch.
# Even/odd input rows are split in the wrapper (free XLA slice); the kernel
# does one sublane shift + mask and ONE stacked-K bf16 matmul.
# ---------------------------------------------------------------------------

def _down_kernel(xe_ref, xo_ref, a_ref, b_ref, o_ref):
    xe = xe_ref[...]                                  # rows 2*oy   (ky = 1)
    xo = xo_ref[...]                                  # rows 2*oy+1 (ky = 2)
    zero = jnp.zeros((1, xo.shape[1]), xo.dtype)
    up = jnp.concatenate([zero, xo[:-1, :]], axis=0)  # rows 2*oy-1 (ky = 0)
    stacked = jnp.concatenate([up, xe, xo], axis=1).astype(a_ref.dtype)
    o_ref[...] = (jnp.dot(stacked, a_ref[...], preferred_element_type=jnp.float32)
                  + b_ref[...]).astype(o_ref.dtype)


def down_conv_s2(x_nhwc, a, b, *, n, h, w, c):
    ho, wo = h // 2, w // 2
    xe = x_nhwc[:, 0::2].reshape(n * ho, w * c)
    xo = x_nhwc[:, 1::2].reshape(n * ho, w * c)
    return pl.pallas_call(
        _down_kernel,
        out_shape=jax.ShapeDtypeStruct((n * ho, wo * c), jnp.float32),
        grid=(n,),
        in_specs=[pl.BlockSpec((ho, w * c), lambda i: (i, 0)),
                  pl.BlockSpec((ho, w * c), lambda i: (i, 0)),
                  pl.BlockSpec((3 * w * c, wo * c), lambda i: (0, 0)),
                  pl.BlockSpec((1, wo * c), lambda i: (0, 0))],
        out_specs=pl.BlockSpec((ho, wo * c), lambda i: (i, 0)),
        compiler_params=pltpu.CompilerParams(dimension_semantics=("parallel",)),
    )(xe, xo, a, b)


# ---------------------------------------------------------------------------
# DownBlock forward
# ---------------------------------------------------------------------------

def down_block_forward(x_nchw, t, prepped, *, nf, attn_chans, add_down):
    n, _, h, w = x_nchw.shape
    x = jnp.transpose(x_nchw, (0, 2, 3, 1))          # NCHW -> NHWC (once)
    for pp in prepped["resnets"]:
        cin = x.shape[-1]
        y = emb_res_block(x.reshape(n * h, w * cin), t, pp, n=n, h=h, w=w, cf=nf)
        x = y.reshape(n, h, w, nf)
        if attn_chans:
            att = self_attention_2d(x.reshape(n, h * w, nf), pp,
                                    attn_chans=attn_chans)
            x = att.reshape(n, h, w, nf)
    if add_down:
        # TODO(synk): fuse the down conv into the last res/attn epilogue to
        # save one HBM round trip.
        y = down_conv_s2(x, prepped["down_a"], prepped["down_b"],
                         n=n, h=h, w=w, c=nf)
        x = y.reshape(n, h // 2, w // 2, nf)
    return jnp.transpose(x, (0, 3, 1, 2))            # NHWC -> NCHW (once)


# ---------------------------------------------------------------------------
# Parameters
# ---------------------------------------------------------------------------

def init_params(key, n_emb, ni, nf, num_layers, attn_chans, add_down):
    params = {"resnets": []}
    for i in range(num_layers):
        cin = ni if i == 0 else nf
        key, *ks = jax.random.split(key, 16)
        p = {
            "bn1_g": jax.random.normal(ks[0], (cin,)) * 0.1 + 1.0,
            "bn1_b": jax.random.normal(ks[1], (cin,)) * 0.1,
            "w1": jax.random.normal(ks[2], (3, 3, cin, nf)) * 0.1,
            "b1": jax.random.normal(ks[3], (nf,)) * 0.1,
            "emb_w": jax.random.normal(ks[4], (n_emb, 2 * nf)) * 0.1,
            "emb_b": jax.random.normal(ks[5], (2 * nf,)) * 0.1,
            "bn2_g": jax.random.normal(ks[6], (nf,)) * 0.1 + 1.0,
            "bn2_b": jax.random.normal(ks[7], (nf,)) * 0.1,
            "w2": jax.random.normal(ks[8], (3, 3, nf, nf)) * 0.1,
            "b2": jax.random.normal(ks[9], (nf,)) * 0.1,
        }
        if cin != nf:
            p["idw"] = jax.random.normal(ks[10], (1, 1, cin, nf)) * 0.1
            p["idb"] = jax.random.normal(ks[11], (nf,)) * 0.1
        if attn_chans:
            p["ln_g"] = jax.random.normal(ks[12], (nf,)) * 0.1 + 1.0
            p["ln_b"] = jax.random.normal(ks[13], (nf,)) * 0.1
            key, k1, k2, k3, k4 = jax.random.split(key, 5)
            p["qkv_w"] = jax.random.normal(k1, (nf, 3 * nf)) * 0.1
            p["qkv_b"] = jax.random.normal(k2, (3 * nf,)) * 0.1
            p["proj_w"] = jax.random.normal(k3, (nf, nf)) * 0.1
            p["proj_b"] = jax.random.normal(k4, (nf,)) * 0.1
        params["resnets"].append(p)
    if add_down:
        key, k1, k2 = jax.random.split(key, 3)
        params["down_w"] = jax.random.normal(k1, (3, 3, nf, nf)) * 0.1
        params["down_b"] = jax.random.normal(k2, (nf,)) * 0.1
    return params


# ---------------------------------------------------------------------------
# main
# ---------------------------------------------------------------------------

if __name__ == "__main__":
    key = jax.random.PRNGKey(0)
    kx, kt, kp = jax.random.split(key, 3)

    # DownBlock(n_emb=32, ni=4, nf=8, add_down=True, num_layers=2, attn_chans=4)
    N, n_emb, ni, nf = 2, 32, 4, 8
    H = W = 16
    num_layers, attn_chans, add_down = 2, 4, True

    x = jax.random.normal(kx, (N, ni, H, W), jnp.float32)    # NCHW like torch
    t = jax.random.normal(kt, (N, n_emb), jnp.float32)
    params = init_params(kp, n_emb, ni, nf, num_layers, attn_chans, add_down)

    # Constant / weight matrices built exactly once, outside the jitted forward.
    prepped = prepare_params(params, n=N, h=H, w=W, ni=ni, nf=nf,
                             attn_chans=attn_chans, add_down=add_down)

    fwd = jax.jit(functools.partial(down_block_forward, nf=nf,
                                    attn_chans=attn_chans, add_down=add_down))
    out = jax.block_until_ready(fwd(x, t, prepped))

    assert out.shape == (N, nf, H // 2, W // 2), out.shape
    assert bool(jnp.all(jnp.isfinite(out)))
    print("KERNEL_OK")
</pallas_src>

<mosaic_0001>
module attributes {stable_mosaic.version = 11 : i64} {
  func.func @_attn_kernel(%arg0: i32, %arg1: memref<1x256x8xf32, #tpu.memory_space<vmem>>, %arg2: memref<1x8xf32, #tpu.memory_space<vmem>>, %arg3: memref<1x8xf32, #tpu.memory_space<vmem>>, %arg4: memref<8x24xbf16, #tpu.memory_space<vmem>>, %arg5: memref<1x24xf32, #tpu.memory_space<vmem>>, %arg6: memref<2x4x8xbf16, #tpu.memory_space<vmem>>, %arg7: memref<1x8xf32, #tpu.memory_space<vmem>>, %arg8: memref<1x256x8xf32, #tpu.memory_space<vmem>>) attributes {dimension_semantics = [#tpu.dimension_semantics<parallel>], iteration_bounds = array<i64: 2>, scalar_prefetch = 0 : i64, scratch_operands = 0 : i64, tpu.core_type = #tpu.core_type<tc>, window_params = [{transform_indices = @transform_0, window_bounds = array<i64: 1, 256, 8>}, {pipeline_mode = #tpu.pipeline_mode<synchronous>, transform_indices = @transform_1, window_bounds = array<i64: 1, 8>}, {pipeline_mode = #tpu.pipeline_mode<synchronous>, transform_indices = @transform_2, window_bounds = array<i64: 1, 8>}, {pipeline_mode = #tpu.pipeline_mode<synchronous>, transform_indices = @transform_3, window_bounds = array<i64: 8, 24>}, {pipeline_mode = #tpu.pipeline_mode<synchronous>, transform_indices = @transform_4, window_bounds = array<i64: 1, 24>}, {pipeline_mode = #tpu.pipeline_mode<synchronous>, transform_indices = @transform_5, window_bounds = array<i64: 2, 4, 8>}, {pipeline_mode = #tpu.pipeline_mode<synchronous>, transform_indices = @transform_6, window_bounds = array<i64: 1, 8>}, {transform_indices = @transform_7, window_bounds = array<i64: 1, 256, 8>}]} {
    %c0 = arith.constant 0 : index
    %c0_0 = arith.constant 0 : index
    %c0_1 = arith.constant 0 : index
    %0 = vector.load %arg1[%c0, %c0_0, %c0_1] : memref<1x256x8xf32, #tpu.memory_space<vmem>>, vector<1x256x8xf32>
    %1 = vector.shape_cast %0 : vector<1x256x8xf32> to vector<256x8xf32>
    %cst = arith.constant dense<0.000000e+00> : vector<256xf32>
    %2 = vector.multi_reduction <add>, %1, %cst [1] : vector<256x8xf32> to vector<256xf32>
    %3 = vector.shape_cast %2 : vector<256xf32> to vector<256x1xf32>
    %cst_2 = arith.constant 8.000000e+00 : f32
    %4 = vector.broadcast %cst_2 : f32 to vector<256x1xf32>
    %5 = arith.divf %3, %4 : vector<256x1xf32>
    %6 = vector.broadcast %5 : vector<256x1xf32> to vector<256x8xf32>
    %7 = arith.subf %1, %6 : vector<256x8xf32>
    %8 = arith.mulf %7, %7 : vector<256x8xf32>
    %cst_3 = arith.constant dense<0.000000e+00> : vector<256xf32>
    %9 = vector.multi_reduction <add>, %8, %cst_3 [1] : vector<256x8xf32> to vector<256xf32>
    %10 = vector.shape_cast %9 : vector<256xf32> to vector<256x1xf32>
    %cst_4 = arith.constant 8.000000e+00 : f32
    %11 = vector.broadcast %cst_4 : f32 to vector<256x1xf32>
    %12 = arith.divf %10, %11 : vector<256x1xf32>
    %13 = vector.broadcast %5 : vector<256x1xf32> to vector<256x8xf32>
    %14 = arith.subf %1, %13 : vector<256x8xf32>
    %cst_5 = arith.constant 9.99999974E-6 : f32
    %15 = vector.broadcast %cst_5 : f32 to vector<256x1xf32>
    %16 = arith.addf %12, %15 : vector<256x1xf32>
    %17 = math.rsqrt %16 : vector<256x1xf32>
    %18 = vector.broadcast %17 : vector<256x1xf32> to vector<256x8xf32>
    %19 = arith.mulf %14, %18 : vector<256x8xf32>
    %c0_6 = arith.constant 0 : index
    %c0_7 = arith.constant 0 : index
    %20 = vector.load %arg2[%c0_6, %c0_7] : memref<1x8xf32, #tpu.memory_space<vmem>>, vector<1x8xf32>
    %21 = vector.broadcast %20 : vector<1x8xf32> to vector<256x8xf32>
    %22 = arith.mulf %19, %21 : vector<256x8xf32>
    %c0_8 = arith.constant 0 : index
    %c0_9 = arith.constant 0 : index
    %23 = vector.load %arg3[%c0_8, %c0_9] : memref<1x8xf32, #tpu.memory_space<vmem>>, vector<1x8xf32>
    %24 = vector.broadcast %23 : vector<1x8xf32> to vector<256x8xf32>
    %25 = arith.addf %22, %24 : vector<256x8xf32>
    %26 = arith.truncf %25 : vector<256x8xf32> to vector<256x8xbf16>
    %c0_10 = arith.constant 0 : index
    %c0_11 = arith.constant 0 : index
    %27 = vector.load %arg4[%c0_10, %c0_11] : memref<8x24xbf16, #tpu.memory_space<vmem>>, vector<8x24xbf16>
    %cst_12 = arith.constant dense<0.000000e+00> : vector<256x24xf32>
    %28 = tpu.matmul %26, %27, %cst_12 {dimension_numbers = #tpu.dot_dimension_numbers<[1], [0], [0], [1], [0, 0, 1, 1], [], []>} : vector<256x8xbf16>, vector<8x24xbf16>, vector<256x24xf32> -> vector<256x24xf32>
    %c0_13 = arith.constant 0 : index
    %c0_14 = arith.constant 0 : index
    %29 = vector.load %arg5[%c0_13, %c0_14] : memref<1x24xf32, #tpu.memory_space<vmem>>, vector<1x24xf32>
    %30 = vector.broadcast %29 : vector<1x24xf32> to vector<256x24xf32>
    %31 = arith.addf %28, %30 : vector<256x24xf32>
    %cst_15 = arith.constant 0.000000e+00 : f32
    %32 = vector.broadcast %cst_15 : f32 to vector<256x8xf32>
    %33 = vector.extract_strided_slice %31 {offsets = [0, 0], sizes = [256, 4], strides = [1, 1]} : vector<256x24xf32> to vector<256x4xf32>
    %34 = vector.extract_strided_slice %31 {offsets = [0, 8], sizes = [256, 4], strides = [1, 1]} : vector<256x24xf32> to vector<256x4xf32>
    %35 = vector.extract_strided_slice %31 {offsets = [0, 16], sizes = [256, 4], strides = [1, 1]} : vector<256x24xf32> to vector<256x4xf32>
    %36 = arith.truncf %33 : vector<256x4xf32> to vector<256x4xbf16>
    %37 = arith.truncf %34 : vector<256x4xf32> to vector<256x4xbf16>
    %cst_16 = arith.constant dense<0.000000e+00> : vector<256x256xf32>
    %38 = tpu.matmul %36, %37, %cst_16 {dimension_numbers = #tpu.dot_dimension_numbers<[1], [1], [0], [0], [0, 0, 1, 0], [], []>} : vector<256x4xbf16>, vector<256x4xbf16>, vector<256x256xf32> -> vector<256x256xf32>
    %cst_17 = arith.constant dense<0xFF800000> : vector<256xf32>
    %39 = vector.multi_reduction <maximumf>, %38, %cst_17 [1] : vector<256x256xf32> to vector<256xf32>
    %40 = vector.shape_cast %39 : vector<256xf32> to vector<256x1xf32>
    %41 = vector.broadcast %40 : vector<256x1xf32> to vector<256x256xf32>
    %42 = arith.subf %38, %41 : vector<256x256xf32>
    %43 = math.exp %42 : vector<256x256xf32>
    %cst_18 = arith.constant dense<0.000000e+00> : vector<256xf32>
    %44 = vector.multi_reduction <add>, %43, %cst_18 [1] : vector<256x256xf32> to vector<256xf32>
    %45 = vector.shape_cast %44 : vector<256xf32> to vector<256x1xf32>
    %46 = tpu.reciprocal %45 {approx = true} : vector<256x1xf32> -> vector<256x1xf32>
    %47 = vector.broadcast %46 : vector<256x1xf32> to vector<256x256xf32>
    %48 = arith.mulf %43, %47 : vector<256x256xf32>
    %49 = arith.truncf %48 : vector<256x256xf32> to vector<256x256xbf16>
    %50 = arith.truncf %35 : vector<256x4xf32> to vector<256x4xbf16>
    %cst_19 = arith.constant dense<0.000000e+00> : vector<256x4xf32>
    %51 = tpu.matmul %49, %50, %cst_19 {dimension_numbers = #tpu.dot_dimension_numbers<[1], [0], [0], [1], [0, 0, 1, 1], [], []>} : vector<256x256xbf16>, vector<256x4xbf16>, vector<256x4xf32> -> vector<256x4xf32>
    %52 = arith.truncf %51 : vector<256x4xf32> to vector<256x4xbf16>
    %c0_20 = arith.constant 0 : index
    %c0_21 = arith.constant 0 : index
    %c0_22 = arith.constant 0 : index
    %53 = vector.load %arg6[%c0_20, %c0_21, %c0_22] : memref<2x4x8xbf16, #tpu.memory_space<vmem>>, vector<1x4x8xbf16>
    %54 = vector.shape_cast %53 : vector<1x4x8xbf16> to vector<4x8xbf16>
    %cst_23 = arith.constant dense<0.000000e+00> : vector<256x8xf32>
    %55 = tpu.matmul %52, %54, %cst_23 {dimension_numbers = #tpu.dot_dimension_numbers<[1], [0], [0], [1], [0, 0, 1, 1], [], []>} : vector<256x4xbf16>, vector<4x8xbf16>, vector<256x8xf32> -> vector<256x8xf32>
    %56 = arith.addf %32, %55 : vector<256x8xf32>
    %57 = vector.extract_strided_slice %31 {offsets = [0, 4], sizes = [256, 4], strides = [1, 1]} : vector<256x24xf32> to vector<256x4xf32>
    %58 = vector.extract_strided_slice %31 {offsets = [0, 12], sizes = [256, 4], strides = [1, 1]} : vector<256x24xf32> to vector<256x4xf32>
    %59 = vector.extract_strided_slice %31 {offsets = [0, 20], sizes = [256, 4], strides = [1, 1]} : vector<256x24xf32> to vector<256x4xf32>
    %60 = arith.truncf %57 : vector<256x4xf32> to vector<256x4xbf16>
    %61 = arith.truncf %58 : vector<256x4xf32> to vector<256x4xbf16>
    %cst_24 = arith.constant dense<0.000000e+00> : vector<256x256xf32>
    %62 = tpu.matmul %60, %61, %cst_24 {dimension_numbers = #tpu.dot_dimension_numbers<[1], [1], [0], [0], [0, 0, 1, 0], [], []>} : vector<256x4xbf16>, vector<256x4xbf16>, vector<256x256xf32> -> vector<256x256xf32>
    %cst_25 = arith.constant dense<0xFF800000> : vector<256xf32>
    %63 = vector.multi_reduction <maximumf>, %62, %cst_25 [1] : vector<256x256xf32> to vector<256xf32>
    %64 = vector.shape_cast %63 : vector<256xf32> to vector<256x1xf32>
    %65 = vector.broadcast %64 : vector<256x1xf32> to vector<256x256xf32>
    %66 = arith.subf %62, %65 : vector<256x256xf32>
    %67 = math.exp %66 : vector<256x256xf32>
    %cst_26 = arith.constant dense<0.000000e+00> : vector<256xf32>
    %68 = vector.multi_reduction <add>, %67, %cst_26 [1] : vector<256x256xf32> to vector<256xf32>
    %69 = vector.shape_cast %68 : vector<256xf32> to vector<256x1xf32>
    %70 = tpu.reciprocal %69 {approx = true} : vector<256x1xf32> -> vector<256x1xf32>
    %71 = vector.broadcast %70 : vector<256x1xf32> to vector<256x256xf32>
    %72 = arith.mulf %67, %71 : vector<256x256xf32>
    %73 = arith.truncf %72 : vector<256x256xf32> to vector<256x256xbf16>
    %74 = arith.truncf %59 : vector<256x4xf32> to vector<256x4xbf16>
    %cst_27 = arith.constant dense<0.000000e+00> : vector<256x4xf32>
    %75 = tpu.matmul %73, %74, %cst_27 {dimension_numbers = #tpu.dot_dimension_numbers<[1], [0], [0], [1], [0, 0, 1, 1], [], []>} : vector<256x256xbf16>, vector<256x4xbf16>, vector<256x4xf32> -> vector<256x4xf32>
    %76 = arith.truncf %75 : vector<256x4xf32> to vector<256x4xbf16>
    %c1 = arith.constant 1 : index
    %c0_28 = arith.constant 0 : index
    %c0_29 = arith.constant 0 : index
    %77 = vector.load %arg6[%c1, %c0_28, %c0_29] : memref<2x4x8xbf16, #tpu.memory_space<vmem>>, vector<1x4x8xbf16>
    %78 = vector.shape_cast %77 : vector<1x4x8xbf16> to vector<4x8xbf16>
    %cst_30 = arith.constant dense<0.000000e+00> : vector<256x8xf32>
    %79 = tpu.matmul %76, %78, %cst_30 {dimension_numbers = #tpu.dot_dimension_numbers<[1], [0], [0], [1], [0, 0, 1, 1], [], []>} : vector<256x4xbf16>, vector<4x8xbf16>, vector<256x8xf32> -> vector<256x8xf32>
    %80 = arith.addf %56, %79 : vector<256x8xf32>
    %81 = arith.addf %1, %80 : vector<256x8xf32>
    %c0_31 = arith.constant 0 : index
    %c0_32 = arith.constant 0 : index
    %82 = vector.load %arg7[%c0_31, %c0_32] : memref<1x8xf32, #tpu.memory_space<vmem>>, vector<1x8xf32>
    %83 = vector.broadcast %82 : vector<1x8xf32> to vector<256x8xf32>
    %84 = arith.addf %81, %83 : vector<256x8xf32>
    %85 = vector.shape_cast %84 : vector<256x8xf32> to vector<1x256x8xf32>
    %c0_33 = arith.constant 0 : index
    %c0_34 = arith.constant 0 : index
    %c0_35 = arith.constant 0 : index
    %86 = vector.load %arg8[%c0_33, %c0_34, %c0_35] : memref<1x256x8xf32, #tpu.memory_space<vmem>>, vector<1x256x8xf32>
    tpu.vector_store %arg8[%c0_33, %c0_34, %c0_35], %85 {strides = array<i32>} : memref<1x256x8xf32, #tpu.memory_space<vmem>>, vector<1x256x8xf32>,
    return
  }
  func.func @transform_0(%arg0: i32) -> (i32, i32, i32) {
    %c0_i32 = arith.constant 0 : i32
    %c0_i32_0 = arith.constant 0 : i32
    %c0_i32_1 = arith.constant 0 : i32
    return %arg0, %c0_i32, %c0_i32_0 : i32, i32, i32
  }
  func.func @transform_1(%arg0: i32) -> (i32, i32) {
    %c0_i32 = arith.constant 0 : i32
    %c0_i32_0 = arith.constant 0 : i32
    %c0_i32_1 = arith.constant 0 : i32
    return %c0_i32, %c0_i32_0 : i32, i32
  }
  func.func @transform_2(%arg0: i32) -> (i32, i32) {
    %c0_i32 = arith.constant 0 : i32
    %c0_i32_0 = arith.constant 0 : i32
    %c0_i32_1 = arith.constant 0 : i32
    return %c0_i32, %c0_i32_0 : i32, i32
  }
  func.func @transform_3(%arg0: i32) -> (i32, i32) {
    %c0_i32 = arith.constant 0 : i32
    %c0_i32_0 = arith.constant 0 : i32
    %c0_i32_1 = arith.constant 0 : i32
    return %c0_i32, %c0_i32_0 : i32, i32
  }
  func.func @transform_4(%arg0: i32) -> (i32, i32) {
    %c0_i32 = arith.constant 0 : i32
    %c0_i32_0 = arith.constant 0 : i32
    %c0_i32_1 = arith.constant 0 : i32
    return %c0_i32, %c0_i32_0 : i32, i32
  }
  func.func @transform_5(%arg0: i32) -> (i32, i32, i32) {
    %c0_i32 = arith.constant 0 : i32
    %c0_i32_0 = arith.constant 0 : i32
    %c0_i32_1 = arith.constant 0 : i32
    %c0_i32_2 = arith.constant 0 : i32
    return %c0_i32, %c0_i32_0, %c0_i32_1 : i32, i32, i32
  }
  func.func @transform_6(%arg0: i32) -> (i32, i32) {
    %c0_i32 = arith.constant 0 : i32
    %c0_i32_0 = arith.constant 0 : i32
    %c0_i32_1 = arith.constant 0 : i32
    return %c0_i32, %c0_i32_0 : i32, i32
  }
  func.func @transform_7(%arg0: i32) -> (i32, i32, i32) {
    %c0_i32 = arith.constant 0 : i32
    %c0_i32_0 = arith.constant 0 : i32
    %c0_i32_1 = arith.constant 0 : i32
    return %arg0, %c0_i32, %c0_i32_0 : i32, i32, i32
  }
}

module attributes {stable_mosaic.version = 11 : i64} {
  func.func @_res_block_kernel(%arg0: i32, %arg1: memref<32x64xf32, #tpu.memory_space<vmem>>, %arg2: memref<2x32xf32, #tpu.memory_space<vmem>>, %arg3: memref<192x128xbf16, #tpu.memory_space<vmem>>, %arg4: memref<1x128xf32, #tpu.memory_space<vmem>>, %arg5: memref<384x128xbf16, #tpu.memory_space<vmem>>, %arg6: memref<1x128xf32, #tpu.memory_space<vmem>>, %arg7: memref<1x64xf32, #tpu.memory_space<vmem>>, %arg8: memref<1x64xf32, #tpu.memory_space<vmem>>, %arg9: memref<1x128xf32, #tpu.memory_space<vmem>>, %arg10: memref<1x128xf32, #tpu.memory_space<vmem>>, %arg11: memref<64x64xf32, #tpu.memory_space<vmem>>, %arg12: memref<128x128xf32, #tpu.memory_space<vmem>>, %arg13: memref<8x128xf32, #tpu.memory_space<vmem>>, %arg14: memref<32x2xf32, #tpu.memory_space<vmem>>, %arg15: memref<32x16xf32, #tpu.memory_space<vmem>>, %arg16: memref<1x16xf32, #tpu.memory_space<vmem>>, %arg17: memref<64x128xbf16, #tpu.memory_space<vmem>>, %arg18: memref<1x128xf32, #tpu.memory_space<vmem>>, %arg19: memref<32x128xf32, #tpu.memory_space<vmem>>) attributes {dimension_semantics = [#tpu.dimension_semantics<arbitrary>], iteration_bounds = array<i64: 1>, scalar_prefetch = 0 : i64, scratch_operands = 0 : i64, tpu.core_type = #tpu.core_type<tc>, window_params = [{pipeline_mode = #tpu.pipeline_mode<synchronous>, transform_indices = @transform_0, window_bounds = array<i64: 32, 64>}, {pipeline_mode = #tpu.pipeline_mode<synchronous>, transform_indices = @transform_1, window_bounds = array<i64: 2, 32>}, {pipeline_mode = #tpu.pipeline_mode<synchronous>, transform_indices = @transform_2, window_bounds = array<i64: 192, 128>}, {pipeline_mode = #tpu.pipeline_mode<synchronous>, transform_indices = @transform_3, window_bounds = array<i64: 1, 128>}, {pipeline_mode = #tpu.pipeline_mode<synchronous>, transform_indices = @transform_4, window_bounds = array<i64: 384, 128>}, {pipeline_mode = #tpu.pipeline_mode<synchronous>, transform_indices = @transform_5, window_bounds = array<i64: 1, 128>}, {pipeline_mode = #tpu.pipeline_mode<synchronous>, transform_indices = @transform_6, window_bounds = array<i64: 1, 64>}, {pipeline_mode = #tpu.pipeline_mode<synchronous>, transform_indices = @transform_7, window_bounds = array<i64: 1, 64>}, {pipeline_mode = #tpu.pipeline_mode<synchronous>, transform_indices = @transform_8, window_bounds = array<i64: 1, 128>}, {pipeline_mode = #tpu.pipeline_mode<synchronous>, transform_indices = @transform_9, window_bounds = array<i64: 1, 128>}, {pipeline_mode = #tpu.pipeline_mode<synchronous>, transform_indices = @transform_10, window_bounds = array<i64: 64, 64>}, {pipeline_mode = #tpu.pipeline_mode<synchronous>, transform_indices = @transform_11, window_bounds = array<i64: 128, 128>}, {pipeline_mode = #tpu.pipeline_mode<synchronous>, transform_indices = @transform_12, window_bounds = array<i64: 8, 128>}, {pipeline_mode = #tpu.pipeline_mode<synchronous>, transform_indices = @transform_13, window_bounds = array<i64: 32, 2>}, {pipeline_mode = #tpu.pipeline_mode<synchronous>, transform_indices = @transform_14, window_bounds = array<i64: 32, 16>}, {pipeline_mode = #tpu.pipeline_mode<synchronous>, transform_indices = @transform_15, window_bounds = array<i64: 1, 16>}, {pipeline_mode = #tpu.pipeline_mode<synchronous>, transform_indices = @transform_16, window_bounds = array<i64: 64, 128>}, {pipeline_mode = #tpu.pipeline_mode<synchronous>, transform_indices = @transform_17, window_bounds = array<i64: 1, 128>}, {pipeline_mode = #tpu.pipeline_mode<synchronous>, transform_indices = @transform_18, window_bounds = array<i64: 32, 128>}]} {
    %c0 = arith.constant 0 : index
    %c0_0 = arith.constant 0 : index
    %0 = vector.load %arg1[%c0, %c0_0] : memref<32x64xf32, #tpu.memory_space<vmem>>, vector<32x64xf32>
    %1 = tpu.iota {dimensions = array<i32: 0>} : vector<32x1xi32>
    %c16_i32 = arith.constant 16 : i32
    %c0_i32 = arith.constant 0 : i32
    %2 = arith.cmpi eq, %c16_i32, %c0_i32 : i32
    %c1_i32 = arith.constant 1 : i32
    %3 = arith.select %2, %c1_i32, %c16_i32 : i32
    %4 = vector.broadcast %3 : i32 to vector<32x1xi32>
    %5 = arith.remsi %1, %4 : vector<32x1xi32>
    %c0_i32_1 = arith.constant 0 : i32
    %6 = vector.broadcast %c0_i32_1 : i32 to vector<32x1xi32>
    %7 = arith.cmpi ne, %5, %6 : vector<32x1xi32>
    %c0_i32_2 = arith.constant 0 : i32
    %8 = vector.broadcast %c0_i32_2 : i32 to vector<32x1xi32>
    %9 = arith.cmpi slt, %5, %8 : vector<32x1xi32>
    %c0_i32_3 = arith.constant 0 : i32
    %10 = arith.cmpi slt, %3, %c0_i32_3 : i32
    %11 = vector.broadcast %10 : i1 to vector<32x1xi1>
    %12 = vector.broadcast %11 : vector<32x1xi1> to vector<32x1xi1>
    %13 = arith.xori %9, %12 : vector<32x1xi1>
    %14 = arith.andi %13, %7 : vector<32x1xi1>
    %15 = vector.broadcast %3 : i32 to vector<32x1xi32>
    %16 = arith.addi %5, %15 : vector<32x1xi32>
    %17 = arith.select %14, %16, %5 : vector<32x1xi1>, vector<32x1xi32>
    %c0_i32_4 = arith.constant 0 : i32
    %18 = vector.broadcast %c0_i32_4 : i32 to vector<32x1xi32>
    %19 = arith.cmpi ne, %17, %18 : vector<32x1xi32>
    %c15_i32 = arith.constant 15 : i32
    %20 = vector.broadcast %c15_i32 : i32 to vector<32x1xi32>
    %21 = arith.cmpi ne, %17, %20 : vector<32x1xi32>
    %cst = arith.constant dense<0.000000e+00> : vector<64xf32>
    %22 = vector.multi_reduction <add>, %0, %cst [0] : vector<32x64xf32> to vector<64xf32>
    %23 = vector.shape_cast %22 : vector<64xf32> to vector<1x64xf32>
    %cst_5 = arith.constant 3.125000e-02 : f32
    %24 = vector.broadcast %cst_5 : f32 to vector<1x64xf32>
    %25 = arith.mulf %23, %24 : vector<1x64xf32>
    %c0_6 = arith.constant 0 : index
    %c0_7 = arith.constant 0 : index
    %26 = vector.load %arg11[%c0_6, %c0_7] : memref<64x64xf32, #tpu.memory_space<vmem>>, vector<64x64xf32>
    %cst_8 = arith.constant dense<0.000000e+00> : vector<1x64xf32>
    %27 = tpu.matmul %25, %26, %cst_8 {dimension_numbers = #tpu.dot_dimension_numbers<[1], [0], [0], [1], [0, 0, 1, 1], [], []>} : vector<1x64xf32>, vector<64x64xf32>, vector<1x64xf32> -> vector<1x64xf32>
    %28 = vector.broadcast %27 : vector<1x64xf32> to vector<32x64xf32>
    %29 = arith.subf %0, %28 : vector<32x64xf32>
    %30 = arith.mulf %29, %29 : vector<32x64xf32>
    %cst_9 = arith.constant dense<0.000000e+00> : vector<64xf32>
    %31 = vector.multi_reduction <add>, %30, %cst_9 [0] : vector<32x64xf32> to vector<64xf32>
    %32 = vector.shape_cast %31 : vector<64xf32> to vector<1x64xf32>
    %cst_10 = arith.constant 3.125000e-02 : f32
    %33 = vector.broadcast %cst_10 : f32 to vector<1x64xf32>
    %34 = arith.mulf %32, %33 : vector<1x64xf32>
    %c0_11 = arith.constant 0 : index
    %c0_12 = arith.constant 0 : index
    %35 = vector.load %arg11[%c0_11, %c0_12] : memref<64x64xf32, #tpu.memory_space<vmem>>, vector<64x64xf32>
    %cst_13 = arith.constant dense<0.000000e+00> : vector<1x64xf32>
    %36 = tpu.matmul %34, %35, %cst_13 {dimension_numbers = #tpu.dot_dimension_numbers<[1], [0], [0], [1], [0, 0, 1, 1], [], []>} : vector<1x64xf32>, vector<64x64xf32>, vector<1x64xf32> -> vector<1x64xf32>
    %cst_14 = arith.constant 9.99999974E-6 : f32
    %37 = vector.broadcast %cst_14 : f32 to vector<1x64xf32>
    %38 = arith.addf %36, %37 : vector<1x64xf32>
    %39 = math.rsqrt %38 : vector<1x64xf32>
    %40 = vector.broadcast %39 : vector<1x64xf32> to vector<32x64xf32>
    %41 = arith.mulf %29, %40 : vector<32x64xf32>
    %c0_15 = arith.constant 0 : index
    %c0_16 = arith.constant 0 : index
    %42 = vector.load %arg7[%c0_15, %c0_16] : memref<1x64xf32, #tpu.memory_space<vmem>>, vector<1x64xf32>
    %43 = vector.broadcast %42 : vector<1x64xf32> to vector<32x64xf32>
    %44 = arith.mulf %41, %43 : vector<32x64xf32>
    %c0_17 = arith.constant 0 : index
    %c0_18 = arith.constant 0 : index
    %45 = vector.load %arg8[%c0_17, %c0_18] : memref<1x64xf32, #tpu.memory_space<vmem>>, vector<1x64xf32>
    %46 = vector.broadcast %45 : vector<1x64xf32> to vector<32x64xf32>
    %47 = arith.addf %44, %46 : vector<32x64xf32>
    %48 = arith.negf %47 : vector<32x64xf32>
    %49 = math.exp %48 : vector<32x64xf32>
    %cst_19 = arith.constant 1.000000e+00 : f32
    %50 = vector.broadcast %cst_19 : f32 to vector<32x64xf32>
    %51 = arith.addf %50, %49 : vector<32x64xf32>
    %52 = arith.divf %50, %51 : vector<32x64xf32>
    %53 = arith.mulf %47, %52 : vector<32x64xf32>
    %cst_20 = arith.constant 0.000000e+00 : f32
    %54 = vector.broadcast %cst_20 : f32 to vector<1x64xf32>
    %55 = vector.extract_strided_slice %53 {offsets = [0, 0], sizes = [31, 64], strides = [1, 1]} : vector<32x64xf32> to vector<31x64xf32>
    %56 = tpu.concatenate %54, %55 in 0 : vector<1x64xf32>, vector<31x64xf32> -> vector<32x64xf32>
    %cst_21 = arith.constant 0.000000e+00 : f32
    %57 = vector.shape_cast %19 : vector<32x1xi1> to vector<32x1xi1>
    %58 = vector.broadcast %57 : vector<32x1xi1> to vector<32x64xi1>
    %59 = vector.broadcast %cst_21 : f32 to vector<32x64xf32>
    %60 = arith.select %58, %56, %59 : vector<32x64xi1>, vector<32x64xf32>
    %61 = vector.extract_strided_slice %53 {offsets = [1, 0], sizes = [31, 64], strides = [1, 1]} : vector<32x64xf32> to vector<31x64xf32>
    %62 = tpu.concatenate %61, %54 in 0 : vector<31x64xf32>, vector<1x64xf32> -> vector<32x64xf32>
    %cst_22 = arith.constant 0.000000e+00 : f32
    %63 = vector.shape_cast %21 : vector<32x1xi1> to vector<32x1xi1>
    %64 = vector.broadcast %63 : vector<32x1xi1> to vector<32x64xi1>
    %65 = vector.broadcast %cst_22 : f32 to vector<32x64xf32>
    %66 = arith.select %64, %62, %65 : vector<32x64xi1>, vector<32x64xf32>
    %67 = tpu.concatenate %60, %53, %66 in 1 : vector<32x64xf32>, vector<32x64xf32>, vector<32x64xf32> -> vector<32x192xf32>
    %68 = arith.truncf %67 : vector<32x192xf32> to vector<32x192xbf16>
    %c0_23 = arith.constant 0 : index
    %c0_24 = arith.constant 0 : index
    %69 = vector.load %arg3[%c0_23, %c0_24] : memref<192x128xbf16, #tpu.memory_space<vmem>>, vector<192x128xbf16>
    %cst_25 = arith.constant dense<0.000000e+00> : vector<32x128xf32>
    %70 = tpu.matmul %68, %69, %cst_25 {dimension_numbers = #tpu.dot_dimension_numbers<[1], [0], [0], [1], [0, 0, 1, 1], [], []>} : vector<32x192xbf16>, vector<192x128xbf16>, vector<32x128xf32> -> vector<32x128xf32>
    %c0_26 = arith.constant 0 : index
    %c0_27 = arith.constant 0 : index
    %71 = vector.load %arg4[%c0_26, %c0_27] : memref<1x128xf32, #tpu.memory_space<vmem>>, vector<1x128xf32>
    %72 = vector.broadcast %71 : vector<1x128xf32> to vector<32x128xf32>
    %73 = arith.addf %70, %72 : vector<32x128xf32>
    %c0_28 = arith.constant 0 : index
    %c0_29 = arith.constant 0 : index
    %74 = vector.load %arg2[%c0_28, %c0_29] : memref<2x32xf32, #tpu.memory_space<vmem>>, vector<2x32xf32>
    %75 = arith.negf %74 : vector<2x32xf32>
    %76 = math.exp %75 : vector<2x32xf32>
    %cst_30 = arith.constant 1.000000e+00 : f32
    %77 = vector.broadcast %cst_30 : f32 to vector<2x32xf32>
    %78 = arith.addf %77, %76 : vector<2x32xf32>
    %79 = arith.divf %77, %78 : vector<2x32xf32>
    %80 = arith.mulf %74, %79 : vector<2x32xf32>
    %c0_31 = arith.constant 0 : index
    %c0_32 = arith.constant 0 : index
    %81 = vector.load %arg15[%c0_31, %c0_32] : memref<32x16xf32, #tpu.memory_space<vmem>>, vector<32x16xf32>
    %cst_33 = arith.constant dense<0.000000e+00> : vector<2x16xf32>
    %82 = tpu.matmul %80, %81, %cst_33 {dimension_numbers = #tpu.dot_dimension_numbers<[1], [0], [0], [1], [0, 0, 1, 1], [], []>} : vector<2x32xf32>, vector<32x16xf32>, vector<2x16xf32> -> vector<2x16xf32>
    %c0_34 = arith.constant 0 : index
    %c0_35 = arith.constant 0 : index
    %83 = vector.load %arg16[%c0_34, %c0_35] : memref<1x16xf32, #tpu.memory_space<vmem>>, vector<1x16xf32>
    %84 = vector.broadcast %83 : vector<1x16xf32> to vector<2x16xf32>
    %85 = arith.addf %82, %84 : vector<2x16xf32>
    %c0_36 = arith.constant 0 : index
    %c0_37 = arith.constant 0 : index
    %86 = vector.load %arg14[%c0_36, %c0_37] : memref<32x2xf32, #tpu.memory_space<vmem>>, vector<32x2xf32>
    %cst_38 = arith.constant dense<0.000000e+00> : vector<32x16xf32>
    %87 = tpu.matmul %86, %85, %cst_38 {dimension_numbers = #tpu.dot_dimension_numbers<[1], [0], [0], [1], [0, 0, 1, 1], [], []>} : vector<32x2xf32>, vector<2x16xf32>, vector<32x16xf32> -> vector<32x16xf32>
    %88 = vector.extract_strided_slice %87 {offsets = [0, 0], sizes = [32, 8], strides = [1, 1]} : vector<32x16xf32> to vector<32x8xf32>
    %c0_39 = arith.constant 0 : index
    %c0_40 = arith.constant 0 : index
    %89 = vector.load %arg13[%c0_39, %c0_40] : memref<8x128xf32, #tpu.memory_space<vmem>>, vector<8x128xf32>
    %cst_41 = arith.constant dense<0.000000e+00> : vector<32x128xf32>
    %90 = tpu.matmul %88, %89, %cst_41 {dimension_numbers = #tpu.dot_dimension_numbers<[1], [0], [0], [1], [0, 0, 1, 1], [], []>} : vector<32x8xf32>, vector<8x128xf32>, vector<32x128xf32> -> vector<32x128xf32>
    %91 = vector.extract_strided_slice %87 {offsets = [0, 8], sizes = [32, 8], strides = [1, 1]} : vector<32x16xf32> to vector<32x8xf32>
    %c0_42 = arith.constant 0 : index
    %c0_43 = arith.constant 0 : index
    %92 = vector.load %arg13[%c0_42, %c0_43] : memref<8x128xf32, #tpu.memory_space<vmem>>, vector<8x128xf32>
    %cst_44 = arith.constant dense<0.000000e+00> : vector<32x128xf32>
    %93 = tpu.matmul %91, %92, %cst_44 {dimension_numbers = #tpu.dot_dimension_numbers<[1], [0], [0], [1], [0, 0, 1, 1], [], []>} : vector<32x8xf32>, vector<8x128xf32>, vector<32x128xf32> -> vector<32x128xf32>
    %cst_45 = arith.constant 1.000000e+00 : f32
    %94 = vector.broadcast %cst_45 : f32 to vector<32x128xf32>
    %95 = arith.addf %94, %90 : vector<32x128xf32>
    %96 = arith.mulf %73, %95 : vector<32x128xf32>
    %97 = arith.addf %96, %93 : vector<32x128xf32>
    %cst_46 = arith.constant dense<0.000000e+00> : vector<128xf32>
    %98 = vector.multi_reduction <add>, %97, %cst_46 [0] : vector<32x128xf32> to vector<128xf32>
    %99 = vector.shape_cast %98 : vector<128xf32> to vector<1x128xf32>
    %cst_47 = arith.constant 3.125000e-02 : f32
    %100 = vector.broadcast %cst_47 : f32 to vector<1x128xf32>
    %101 = arith.mulf %99, %100 : vector<1x128xf32>
    %c0_48 = arith.constant 0 : index
    %c0_49 = arith.constant 0 : index
    %102 = vector.load %arg12[%c0_48, %c0_49] : memref<128x128xf32, #tpu.memory_space<vmem>>, vector<128x128xf32>
    %cst_50 = arith.constant dense<0.000000e+00> : vector<1x128xf32>
    %103 = tpu.matmul %101, %102, %cst_50 {dimension_numbers = #tpu.dot_dimension_numbers<[1], [0], [0], [1], [0, 0, 1, 1], [], []>} : vector<1x128xf32>, vector<128x128xf32>, vector<1x128xf32> -> vector<1x128xf32>
    %104 = vector.broadcast %103 : vector<1x128xf32> to vector<32x128xf32>
    %105 = arith.subf %97, %104 : vector<32x128xf32>
    %106 = arith.mulf %105, %105 : vector<32x128xf32>
    %cst_51 = arith.constant dense<0.000000e+00> : vector<128xf32>
    %107 = vector.multi_reduction <add>, %106, %cst_51 [0] : vector<32x128xf32> to vector<128xf32>
    %108 = vector.shape_cast %107 : vector<128xf32> to vector<1x128xf32>
    %cst_52 = arith.constant 3.125000e-02 : f32
    %109 = vector.broadcast %cst_52 : f32 to vector<1x128xf32>
    %110 = arith.mulf %108, %109 : vector<1x128xf32>
    %c0_53 = arith.constant 0 : index
    %c0_54 = arith.constant 0 : index
    %111 = vector.load %arg12[%c0_53, %c0_54] : memref<128x128xf32, #tpu.memory_space<vmem>>, vector<128x128xf32>
    %cst_55 = arith.constant dense<0.000000e+00> : vector<1x128xf32>
    %112 = tpu.matmul %110, %111, %cst_55 {dimension_numbers = #tpu.dot_dimension_numbers<[1], [0], [0], [1], [0, 0, 1, 1], [], []>} : vector<1x128xf32>, vector<128x128xf32>, vector<1x128xf32> -> vector<1x128xf32>
    %cst_56 = arith.constant 9.99999974E-6 : f32
    %113 = vector.broadcast %cst_56 : f32 to vector<1x128xf32>
    %114 = arith.addf %112, %113 : vector<1x128xf32>
    %115 = math.rsqrt %114 : vector<1x128xf32>
    %116 = vector.broadcast %115 : vector<1x128xf32> to vector<32x128xf32>
    %117 = arith.mulf %105, %116 : vector<32x128xf32>
    %c0_57 = arith.constant 0 : index
    %c0_58 = arith.constant 0 : index
    %118 = vector.load %arg9[%c0_57, %c0_58] : memref<1x128xf32, #tpu.memory_space<vmem>>, vector<1x128xf32>
    %119 = vector.broadcast %118 : vector<1x128xf32> to vector<32x128xf32>
    %120 = arith.mulf %117, %119 : vector<32x128xf32>
    %c0_59 = arith.constant 0 : index
    %c0_60 = arith.constant 0 : index
    %121 = vector.load %arg10[%c0_59, %c0_60] : memref<1x128xf32, #tpu.memory_space<vmem>>, vector<1x128xf32>
    %122 = vector.broadcast %121 : vector<1x128xf32> to vector<32x128xf32>
    %123 = arith.addf %120, %122 : vector<32x128xf32>
    %124 = arith.negf %123 : vector<32x128xf32>
    %125 = math.exp %124 : vector<32x128xf32>
    %cst_61 = arith.constant 1.000000e+00 : f32
    %126 = vector.broadcast %cst_61 : f32 to vector<32x128xf32>
    %127 = arith.addf %126, %125 : vector<32x128xf32>
    %128 = arith.divf %126, %127 : vector<32x128xf32>
    %129 = arith.mulf %123, %128 : vector<32x128xf32>
    %cst_62 = arith.constant 0.000000e+00 : f32
    %130 = vector.broadcast %cst_62 : f32 to vector<1x128xf32>
    %131 = vector.extract_strided_slice %129 {offsets = [0, 0], sizes = [31, 128], strides = [1, 1]} : vector<32x128xf32> to vector<31x128xf32>
    %132 = tpu.concatenate %130, %131 in 0 : vector<1x128xf32>, vector<31x128xf32> -> vector<32x128xf32>
    %cst_63 = arith.constant 0.000000e+00 : f32
    %133 = vector.shape_cast %19 : vector<32x1xi1> to vector<32x1xi1>
    %134 = vector.broadcast %133 : vector<32x1xi1> to vector<32x128xi1>
    %135 = vector.broadcast %cst_63 : f32 to vector<32x128xf32>
    %136 = arith.select %134, %132, %135 : vector<32x128xi1>, vector<32x128xf32>
    %137 = vector.extract_strided_slice %129 {offsets = [1, 0], sizes = [31, 128], strides = [1, 1]} : vector<32x128xf32> to vector<31x128xf32>
    %138 = tpu.concatenate %137, %130 in 0 : vector<31x128xf32>, vector<1x128xf32> -> vector<32x128xf32>
    %cst_64 = arith.constant 0.000000e+00 : f32
    %139 = vector.shape_cast %21 : vector<32x1xi1> to vector<32x1xi1>
    %140 = vector.broadcast %139 : vector<32x1xi1> to vector<32x128xi1>
    %141 = vector.broadcast %cst_64 : f32 to vector<32x128xf32>
    %142 = arith.select %140, %138, %141 : vector<32x128xi1>, vector<32x128xf32>
    %143 = tpu.concatenate %136, %129, %142 in 1 : vector<32x128xf32>, vector<32x128xf32>, vector<32x128xf32> -> vector<32x384xf32>
    %144 = arith.truncf %143 : vector<32x384xf32> to vector<32x384xbf16>
    %c0_65 = arith.constant 0 : index
    %c0_66 = arith.constant 0 : index
    %145 = vector.load %arg5[%c0_65, %c0_66] : memref<384x128xbf16, #tpu.memory_space<vmem>>, vector<384x128xbf16>
    %cst_67 = arith.constant dense<0.000000e+00> : vector<32x128xf32>
    %146 = tpu.matmul %144, %145, %cst_67 {dimension_numbers = #tpu.dot_dimension_numbers<[1], [0], [0], [1], [0, 0, 1, 1], [], []>} : vector<32x384xbf16>, vector<384x128xbf16>, vector<32x128xf32> -> vector<32x128xf32>
    %c0_68 = arith.constant 0 : index
    %c0_69 = arith.constant 0 : index
    %147 = vector.load %arg6[%c0_68, %c0_69] : memref<1x128xf32, #tpu.memory_space<vmem>>, vector<1x128xf32>
    %148 = vector.broadcast %147 : vector<1x128xf32> to vector<32x128xf32>
    %149 = arith.addf %146, %148 : vector<32x128xf32>
    %150 = arith.truncf %0 : vector<32x64xf32> to vector<32x64xbf16>
    %c0_70 = arith.constant 0 : index
    %c0_71 = arith.constant 0 : index
    %151 = vector.load %arg17[%c0_70, %c0_71] : memref<64x128xbf16, #tpu.memory_space<vmem>>, vector<64x128xbf16>
    %cst_72 = arith.constant dense<0.000000e+00> : vector<32x128xf32>
    %152 = tpu.matmul %150, %151, %cst_72 {dimension_numbers = #tpu.dot_dimension_numbers<[1], [0], [0], [1], [0, 0, 1, 1], [], []>} : vector<32x64xbf16>, vector<64x128xbf16>, vector<32x128xf32> -> vector<32x128xf32>
    %c0_73 = arith.constant 0 : index
    %c0_74 = arith.constant 0 : index
    %153 = vector.load %arg18[%c0_73, %c0_74] : memref<1x128xf32, #tpu.memory_space<vmem>>, vector<1x128xf32>
    %154 = vector.broadcast %153 : vector<1x128xf32> to vector<32x128xf32>
    %155 = arith.addf %152, %154 : vector<32x128xf32>
    %156 = arith.addf %149, %155 : vector<32x128xf32>
    %c0_75 = arith.constant 0 : index
    %c0_76 = arith.constant 0 : index
    %157 = vector.load %arg19[%c0_75, %c0_76] : memref<32x128xf32, #tpu.memory_space<vmem>>, vector<32x128xf32>
    tpu.vector_store %arg19[%c0_75, %c0_76], %156 {strides = array<i32>} : memref<32x128xf32, #tpu.memory_space<vmem>>, vector<32x128xf32>,
    return
  }
  func.func @transform_0(%arg0: i32) -> (i32, i32) {
    %c0_i32 = arith.constant 0 : i32
    %c0_i32_0 = arith.constant 0 : i32
    %c0_i32_1 = arith.constant 0 : i32
    return %c0_i32, %c0_i32_0 : i32, i32
  }
  func.func @transform_1(%arg0: i32) -> (i32, i32) {
    %c0_i32 = arith.constant 0 : i32
    %c0_i32_0 = arith.constant 0 : i32
    %c0_i32_1 = arith.constant 0 : i32
    return %c0_i32, %c0_i32_0 : i32, i32
  }
  func.func @transform_2(%arg0: i32) -> (i32, i32) {
    %c0_i32 = arith.constant 0 : i32
    %c0_i32_0 = arith.constant 0 : i32
    %c0_i32_1 = arith.constant 0 : i32
    return %c0_i32, %c0_i32_0 : i32, i32
  }
  func.func @transform_3(%arg0: i32) -> (i32, i32) {
    %c0_i32 = arith.constant 0 : i32
    %c0_i32_0 = arith.constant 0 : i32
    %c0_i32_1 = arith.constant 0 : i32
    return %c0_i32, %c0_i32_0 : i32, i32
  }
  func.func @transform_4(%arg0: i32) -> (i32, i32) {
    %c0_i32 = arith.constant 0 : i32
    %c0_i32_0 = arith.constant 0 : i32
    %c0_i32_1 = arith.constant 0 : i32
    return %c0_i32, %c0_i32_0 : i32, i32
  }
  func.func @transform_5(%arg0: i32) -> (i32, i32) {
    %c0_i32 = arith.constant 0 : i32
    %c0_i32_0 = arith.constant 0 : i32
    %c0_i32_1 = arith.constant 0 : i32
    return %c0_i32, %c0_i32_0 : i32, i32
  }
  func.func @transform_6(%arg0: i32) -> (i32, i32) {
    %c0_i32 = arith.constant 0 : i32
    %c0_i32_0 = arith.constant 0 : i32
    %c0_i32_1 = arith.constant 0 : i32
    return %c0_i32, %c0_i32_0 : i32, i32
  }
  func.func @transform_7(%arg0: i32) -> (i32, i32) {
    %c0_i32 = arith.constant 0 : i32
    %c0_i32_0 = arith.constant 0 : i32
    %c0_i32_1 = arith.constant 0 : i32
    return %c0_i32, %c0_i32_0 : i32, i32
  }
  func.func @transform_8(%arg0: i32) -> (i32, i32) {
    %c0_i32 = arith.constant 0 : i32
    %c0_i32_0 = arith.constant 0 : i32
    %c0_i32_1 = arith.constant 0 : i32
    return %c0_i32, %c0_i32_0 : i32, i32
  }
  func.func @transform_9(%arg0: i32) -> (i32, i32) {
    %c0_i32 = arith.constant 0 : i32
    %c0_i32_0 = arith.constant 0 : i32
    %c0_i32_1 = arith.constant 0 : i32
    return %c0_i32, %c0_i32_0 : i32, i32
  }
  func.func @transform_10(%arg0: i32) -> (i32, i32) {
    %c0_i32 = arith.constant 0 : i32
    %c0_i32_0 = arith.constant 0 : i32
    %c0_i32_1 = arith.constant 0 : i32
    return %c0_i32, %c0_i32_0 : i32, i32
  }
  func.func @transform_11(%arg0: i32) -> (i32, i32) {
    %c0_i32 = arith.constant 0 : i32
    %c0_i32_0 = arith.constant 0 : i32
    %c0_i32_1 = arith.constant 0 : i32
    return %c0_i32, %c0_i32_0 : i32, i32
  }
  func.func @transform_12(%arg0: i32) -> (i32, i32) {
    %c0_i32 = arith.constant 0 : i32
    %c0_i32_0 = arith.constant 0 : i32
    %c0_i32_1 = arith.constant 0 : i32
    return %c0_i32, %c0_i32_0 : i32, i32
  }
  func.func @transform_13(%arg0: i32) -> (i32, i32) {
    %c0_i32 = arith.constant 0 : i32
    %c0_i32_0 = arith.constant 0 : i32
    %c0_i32_1 = arith.constant 0 : i32
    return %c0_i32, %c0_i32_0 : i32, i32
  }
  func.func @transform_14(%arg0: i32) -> (i32, i32) {
    %c0_i32 = arith.constant 0 : i32
    %c0_i32_0 = arith.constant 0 : i32
    %c0_i32_1 = arith.constant 0 : i32
    return %c0_i32, %c0_i32_0 : i32, i32
  }
  func.func @transform_15(%arg0: i32) -> (i32, i32) {
    %c0_i32 = arith.constant 0 : i32
    %c0_i32_0 = arith.constant 0 : i32
    %c0_i32_1 = arith.constant 0 : i32
    return %c0_i32, %c0_i32_0 : i32, i32
  }
  func.func @transform_16(%arg0: i32) -> (i32, i32) {
    %c0_i32 = arith.constant 0 : i32
    %c0_i32_0 = arith.constant 0 : i32
    %c0_i32_1 = arith.constant 0 : i32
    return %c0_i32, %c0_i32_0 : i32, i32
  }
  func.func @transform_17(%arg0: i32) -> (i32, i32) {
    %c0_i32 = arith.constant 0 : i32
    %c0_i32_0 = arith.constant 0 : i32
    %c0_i32_1 = arith.constant 0 : i32
    return %c0_i32, %c0_i32_0 : i32, i32
  }
  func.func @transform_18(%arg0: i32) -> (i32, i32) {
    %c0_i32 = arith.constant 0 : i32
    %c0_i32_0 = arith.constant 0 : i32
    %c0_i32_1 = arith.constant 0 : i32
    return %c0_i32, %c0_i32_0 : i32, i32
  }
}

module attributes {stable_mosaic.version = 11 : i64} {
  func.func @_res_block_kernel(%arg0: i32, %arg1: memref<32x128xf32, #tpu.memory_space<vmem>>, %arg2: memref<2x32xf32, #tpu.memory_space<vmem>>, %arg3: memref<384x128xbf16, #tpu.memory_space<vmem>>, %arg4: memref<1x128xf32, #tpu.memory_space<vmem>>, %arg5: memref<384x128xbf16, #tpu.memory_space<vmem>>, %arg6: memref<1x128xf32, #tpu.memory_space<vmem>>, %arg7: memref<1x128xf32, #tpu.memory_space<vmem>>, %arg8: memref<1x128xf32, #tpu.memory_space<vmem>>, %arg9: memref<1x128xf32, #tpu.memory_space<vmem>>, %arg10: memref<1x128xf32, #tpu.memory_space<vmem>>, %arg11: memref<128x128xf32, #tpu.memory_space<vmem>>, %arg12: memref<128x128xf32, #tpu.memory_space<vmem>>, %arg13: memref<8x128xf32, #tpu.memory_space<vmem>>, %arg14: memref<32x2xf32, #tpu.memory_space<vmem>>, %arg15: memref<32x16xf32, #tpu.memory_space<vmem>>, %arg16: memref<1x16xf32, #tpu.memory_space<vmem>>, %arg17: memref<32x128xf32, #tpu.memory_space<vmem>>) attributes {dimension_semantics = [#tpu.dimension_semantics<arbitrary>], iteration_bounds = array<i64: 1>, scalar_prefetch = 0 : i64, scratch_operands = 0 : i64, tpu.core_type = #tpu.core_type<tc>, window_params = [{pipeline_mode = #tpu.pipeline_mode<synchronous>, transform_indices = @transform_0, window_bounds = array<i64: 32, 128>}, {pipeline_mode = #tpu.pipeline_mode<synchronous>, transform_indices = @transform_1, window_bounds = array<i64: 2, 32>}, {pipeline_mode = #tpu.pipeline_mode<synchronous>, transform_indices = @transform_2, window_bounds = array<i64: 384, 128>}, {pipeline_mode = #tpu.pipeline_mode<synchronous>, transform_indices = @transform_3, window_bounds = array<i64: 1, 128>}, {pipeline_mode = #tpu.pipeline_mode<synchronous>, transform_indices = @transform_4, window_bounds = array<i64: 384, 128>}, {pipeline_mode = #tpu.pipeline_mode<synchronous>, transform_indices = @transform_5, window_bounds = array<i64: 1, 128>}, {pipeline_mode = #tpu.pipeline_mode<synchronous>, transform_indices = @transform_6, window_bounds = array<i64: 1, 128>}, {pipeline_mode = #tpu.pipeline_mode<synchronous>, transform_indices = @transform_7, window_bounds = array<i64: 1, 128>}, {pipeline_mode = #tpu.pipeline_mode<synchronous>, transform_indices = @transform_8, window_bounds = array<i64: 1, 128>}, {pipeline_mode = #tpu.pipeline_mode<synchronous>, transform_indices = @transform_9, window_bounds = array<i64: 1, 128>}, {pipeline_mode = #tpu.pipeline_mode<synchronous>, transform_indices = @transform_10, window_bounds = array<i64: 128, 128>}, {pipeline_mode = #tpu.pipeline_mode<synchronous>, transform_indices = @transform_11, window_bounds = array<i64: 128, 128>}, {pipeline_mode = #tpu.pipeline_mode<synchronous>, transform_indices = @transform_12, window_bounds = array<i64: 8, 128>}, {pipeline_mode = #tpu.pipeline_mode<synchronous>, transform_indices = @transform_13, window_bounds = array<i64: 32, 2>}, {pipeline_mode = #tpu.pipeline_mode<synchronous>, transform_indices = @transform_14, window_bounds = array<i64: 32, 16>}, {pipeline_mode = #tpu.pipeline_mode<synchronous>, transform_indices = @transform_15, window_bounds = array<i64: 1, 16>}, {pipeline_mode = #tpu.pipeline_mode<synchronous>, transform_indices = @transform_16, window_bounds = array<i64: 32, 128>}]} {
    %c0 = arith.constant 0 : index
    %c0_0 = arith.constant 0 : index
    %0 = vector.load %arg1[%c0, %c0_0] : memref<32x128xf32, #tpu.memory_space<vmem>>, vector<32x128xf32>
    %1 = tpu.iota {dimensions = array<i32: 0>} : vector<32x1xi32>
    %c16_i32 = arith.constant 16 : i32
    %c0_i32 = arith.constant 0 : i32
    %2 = arith.cmpi eq, %c16_i32, %c0_i32 : i32
    %c1_i32 = arith.constant 1 : i32
    %3 = arith.select %2, %c1_i32, %c16_i32 : i32
    %4 = vector.broadcast %3 : i32 to vector<32x1xi32>
    %5 = arith.remsi %1, %4 : vector<32x1xi32>
    %c0_i32_1 = arith.constant 0 : i32
    %6 = vector.broadcast %c0_i32_1 : i32 to vector<32x1xi32>
    %7 = arith.cmpi ne, %5, %6 : vector<32x1xi32>
    %c0_i32_2 = arith.constant 0 : i32
    %8 = vector.broadcast %c0_i32_2 : i32 to vector<32x1xi32>
    %9 = arith.cmpi slt, %5, %8 : vector<32x1xi32>
    %c0_i32_3 = arith.constant 0 : i32
    %10 = arith.cmpi slt, %3, %c0_i32_3 : i32
    %11 = vector.broadcast %10 : i1 to vector<32x1xi1>
    %12 = vector.broadcast %11 : vector<32x1xi1> to vector<32x1xi1>
    %13 = arith.xori %9, %12 : vector<32x1xi1>
    %14 = arith.andi %13, %7 : vector<32x1xi1>
    %15 = vector.broadcast %3 : i32 to vector<32x1xi32>
    %16 = arith.addi %5, %15 : vector<32x1xi32>
    %17 = arith.select %14, %16, %5 : vector<32x1xi1>, vector<32x1xi32>
    %c0_i32_4 = arith.constant 0 : i32
    %18 = vector.broadcast %c0_i32_4 : i32 to vector<32x1xi32>
    %19 = arith.cmpi ne, %17, %18 : vector<32x1xi32>
    %c15_i32 = arith.constant 15 : i32
    %20 = vector.broadcast %c15_i32 : i32 to vector<32x1xi32>
    %21 = arith.cmpi ne, %17, %20 : vector<32x1xi32>
    %cst = arith.constant dense<0.000000e+00> : vector<128xf32>
    %22 = vector.multi_reduction <add>, %0, %cst [0] : vector<32x128xf32> to vector<128xf32>
    %23 = vector.shape_cast %22 : vector<128xf32> to vector<1x128xf32>
    %cst_5 = arith.constant 3.125000e-02 : f32
    %24 = vector.broadcast %cst_5 : f32 to vector<1x128xf32>
    %25 = arith.mulf %23, %24 : vector<1x128xf32>
    %c0_6 = arith.constant 0 : index
    %c0_7 = arith.constant 0 : index
    %26 = vector.load %arg11[%c0_6, %c0_7] : memref<128x128xf32, #tpu.memory_space<vmem>>, vector<128x128xf32>
    %cst_8 = arith.constant dense<0.000000e+00> : vector<1x128xf32>
    %27 = tpu.matmul %25, %26, %cst_8 {dimension_numbers = #tpu.dot_dimension_numbers<[1], [0], [0], [1], [0, 0, 1, 1], [], []>} : vector<1x128xf32>, vector<128x128xf32>, vector<1x128xf32> -> vector<1x128xf32>
    %28 = vector.broadcast %27 : vector<1x128xf32> to vector<32x128xf32>
    %29 = arith.subf %0, %28 : vector<32x128xf32>
    %30 = arith.mulf %29, %29 : vector<32x128xf32>
    %cst_9 = arith.constant dense<0.000000e+00> : vector<128xf32>
    %31 = vector.multi_reduction <add>, %30, %cst_9 [0] : vector<32x128xf32> to vector<128xf32>
    %32 = vector.shape_cast %31 : vector<128xf32> to vector<1x128xf32>
    %cst_10 = arith.constant 3.125000e-02 : f32
    %33 = vector.broadcast %cst_10 : f32 to vector<1x128xf32>
    %34 = arith.mulf %32, %33 : vector<1x128xf32>
    %c0_11 = arith.constant 0 : index
    %c0_12 = arith.constant 0 : index
    %35 = vector.load %arg11[%c0_11, %c0_12] : memref<128x128xf32, #tpu.memory_space<vmem>>, vector<128x128xf32>
    %cst_13 = arith.constant dense<0.000000e+00> : vector<1x128xf32>
    %36 = tpu.matmul %34, %35, %cst_13 {dimension_numbers = #tpu.dot_dimension_numbers<[1], [0], [0], [1], [0, 0, 1, 1], [], []>} : vector<1x128xf32>, vector<128x128xf32>, vector<1x128xf32> -> vector<1x128xf32>
    %cst_14 = arith.constant 9.99999974E-6 : f32
    %37 = vector.broadcast %cst_14 : f32 to vector<1x128xf32>
    %38 = arith.addf %36, %37 : vector<1x128xf32>
    %39 = math.rsqrt %38 : vector<1x128xf32>
    %40 = vector.broadcast %39 : vector<1x128xf32> to vector<32x128xf32>
    %41 = arith.mulf %29, %40 : vector<32x128xf32>
    %c0_15 = arith.constant 0 : index
    %c0_16 = arith.constant 0 : index
    %42 = vector.load %arg7[%c0_15, %c0_16] : memref<1x128xf32, #tpu.memory_space<vmem>>, vector<1x128xf32>
    %43 = vector.broadcast %42 : vector<1x128xf32> to vector<32x128xf32>
    %44 = arith.mulf %41, %43 : vector<32x128xf32>
    %c0_17 = arith.constant 0 : index
    %c0_18 = arith.constant 0 : index
    %45 = vector.load %arg8[%c0_17, %c0_18] : memref<1x128xf32, #tpu.memory_space<vmem>>, vector<1x128xf32>
    %46 = vector.broadcast %45 : vector<1x128xf32> to vector<32x128xf32>
    %47 = arith.addf %44, %46 : vector<32x128xf32>
    %48 = arith.negf %47 : vector<32x128xf32>
    %49 = math.exp %48 : vector<32x128xf32>
    %cst_19 = arith.constant 1.000000e+00 : f32
    %50 = vector.broadcast %cst_19 : f32 to vector<32x128xf32>
    %51 = arith.addf %50, %49 : vector<32x128xf32>
    %52 = arith.divf %50, %51 : vector<32x128xf32>
    %53 = arith.mulf %47, %52 : vector<32x128xf32>
    %cst_20 = arith.constant 0.000000e+00 : f32
    %54 = vector.broadcast %cst_20 : f32 to vector<1x128xf32>
    %55 = vector.extract_strided_slice %53 {offsets = [0, 0], sizes = [31, 128], strides = [1, 1]} : vector<32x128xf32> to vector<31x128xf32>
    %56 = tpu.concatenate %54, %55 in 0 : vector<1x128xf32>, vector<31x128xf32> -> vector<32x128xf32>
    %cst_21 = arith.constant 0.000000e+00 : f32
    %57 = vector.shape_cast %19 : vector<32x1xi1> to vector<32x1xi1>
    %58 = vector.broadcast %57 : vector<32x1xi1> to vector<32x128xi1>
    %59 = vector.broadcast %cst_21 : f32 to vector<32x128xf32>
    %60 = arith.select %58, %56, %59 : vector<32x128xi1>, vector<32x128xf32>
    %61 = vector.extract_strided_slice %53 {offsets = [1, 0], sizes = [31, 128], strides = [1, 1]} : vector<32x128xf32> to vector<31x128xf32>
    %62 = tpu.concatenate %61, %54 in 0 : vector<31x128xf32>, vector<1x128xf32> -> vector<32x128xf32>
    %cst_22 = arith.constant 0.000000e+00 : f32
    %63 = vector.shape_cast %21 : vector<32x1xi1> to vector<32x1xi1>
    %64 = vector.broadcast %63 : vector<32x1xi1> to vector<32x128xi1>
    %65 = vector.broadcast %cst_22 : f32 to vector<32x128xf32>
    %66 = arith.select %64, %62, %65 : vector<32x128xi1>, vector<32x128xf32>
    %67 = tpu.concatenate %60, %53, %66 in 1 : vector<32x128xf32>, vector<32x128xf32>, vector<32x128xf32> -> vector<32x384xf32>
    %68 = arith.truncf %67 : vector<32x384xf32> to vector<32x384xbf16>
    %c0_23 = arith.constant 0 : index
    %c0_24 = arith.constant 0 : index
    %69 = vector.load %arg3[%c0_23, %c0_24] : memref<384x128xbf16, #tpu.memory_space<vmem>>, vector<384x128xbf16>
    %cst_25 = arith.constant dense<0.000000e+00> : vector<32x128xf32>
    %70 = tpu.matmul %68, %69, %cst_25 {dimension_numbers = #tpu.dot_dimension_numbers<[1], [0], [0], [1], [0, 0, 1, 1], [], []>} : vector<32x384xbf16>, vector<384x128xbf16>, vector<32x128xf32> -> vector<32x128xf32>
    %c0_26 = arith.constant 0 : index
    %c0_27 = arith.constant 0 : index
    %71 = vector.load %arg4[%c0_26, %c0_27] : memref<1x128xf32, #tpu.memory_space<vmem>>, vector<1x128xf32>
    %72 = vector.broadcast %71 : vector<1x128xf32> to vector<32x128xf32>
    %73 = arith.addf %70, %72 : vector<32x128xf32>
    %c0_28 = arith.constant 0 : index
    %c0_29 = arith.constant 0 : index
    %74 = vector.load %arg2[%c0_28, %c0_29] : memref<2x32xf32, #tpu.memory_space<vmem>>, vector<2x32xf32>
    %75 = arith.negf %74 : vector<2x32xf32>
    %76 = math.exp %75 : vector<2x32xf32>
    %cst_30 = arith.constant 1.000000e+00 : f32
    %77 = vector.broadcast %cst_30 : f32 to vector<2x32xf32>
    %78 = arith.addf %77, %76 : vector<2x32xf32>
    %79 = arith.divf %77, %78 : vector<2x32xf32>
    %80 = arith.mulf %74, %79 : vector<2x32xf32>
    %c0_31 = arith.constant 0 : index
    %c0_32 = arith.constant 0 : index
    %81 = vector.load %arg15[%c0_31, %c0_32] : memref<32x16xf32, #tpu.memory_space<vmem>>, vector<32x16xf32>
    %cst_33 = arith.constant dense<0.000000e+00> : vector<2x16xf32>
    %82 = tpu.matmul %80, %81, %cst_33 {dimension_numbers = #tpu.dot_dimension_numbers<[1], [0], [0], [1], [0, 0, 1, 1], [], []>} : vector<2x32xf32>, vector<32x16xf32>, vector<2x16xf32> -> vector<2x16xf32>
    %c0_34 = arith.constant 0 : index
    %c0_35 = arith.constant 0 : index
    %83 = vector.load %arg16[%c0_34, %c0_35] : memref<1x16xf32, #tpu.memory_space<vmem>>, vector<1x16xf32>
    %84 = vector.broadcast %83 : vector<1x16xf32> to vector<2x16xf32>
    %85 = arith.addf %82, %84 : vector<2x16xf32>
    %c0_36 = arith.constant 0 : index
    %c0_37 = arith.constant 0 : index
    %86 = vector.load %arg14[%c0_36, %c0_37] : memref<32x2xf32, #tpu.memory_space<vmem>>, vector<32x2xf32>
    %cst_38 = arith.constant dense<0.000000e+00> : vector<32x16xf32>
    %87 = tpu.matmul %86, %85, %cst_38 {dimension_numbers = #tpu.dot_dimension_numbers<[1], [0], [0], [1], [0, 0, 1, 1], [], []>} : vector<32x2xf32>, vector<2x16xf32>, vector<32x16xf32> -> vector<32x16xf32>
    %88 = vector.extract_strided_slice %87 {offsets = [0, 0], sizes = [32, 8], strides = [1, 1]} : vector<32x16xf32> to vector<32x8xf32>
    %c0_39 = arith.constant 0 : index
    %c0_40 = arith.constant 0 : index
    %89 = vector.load %arg13[%c0_39, %c0_40] : memref<8x128xf32, #tpu.memory_space<vmem>>, vector<8x128xf32>
    %cst_41 = arith.constant dense<0.000000e+00> : vector<32x128xf32>
    %90 = tpu.matmul %88, %89, %cst_41 {dimension_numbers = #tpu.dot_dimension_numbers<[1], [0], [0], [1], [0, 0, 1, 1], [], []>} : vector<32x8xf32>, vector<8x128xf32>, vector<32x128xf32> -> vector<32x128xf32>
    %91 = vector.extract_strided_slice %87 {offsets = [0, 8], sizes = [32, 8], strides = [1, 1]} : vector<32x16xf32> to vector<32x8xf32>
    %c0_42 = arith.constant 0 : index
    %c0_43 = arith.constant 0 : index
    %92 = vector.load %arg13[%c0_42, %c0_43] : memref<8x128xf32, #tpu.memory_space<vmem>>, vector<8x128xf32>
    %cst_44 = arith.constant dense<0.000000e+00> : vector<32x128xf32>
    %93 = tpu.matmul %91, %92, %cst_44 {dimension_numbers = #tpu.dot_dimension_numbers<[1], [0], [0], [1], [0, 0, 1, 1], [], []>} : vector<32x8xf32>, vector<8x128xf32>, vector<32x128xf32> -> vector<32x128xf32>
    %cst_45 = arith.constant 1.000000e+00 : f32
    %94 = vector.broadcast %cst_45 : f32 to vector<32x128xf32>
    %95 = arith.addf %94, %90 : vector<32x128xf32>
    %96 = arith.mulf %73, %95 : vector<32x128xf32>
    %97 = arith.addf %96, %93 : vector<32x128xf32>
    %cst_46 = arith.constant dense<0.000000e+00> : vector<128xf32>
    %98 = vector.multi_reduction <add>, %97, %cst_46 [0] : vector<32x128xf32> to vector<128xf32>
    %99 = vector.shape_cast %98 : vector<128xf32> to vector<1x128xf32>
    %cst_47 = arith.constant 3.125000e-02 : f32
    %100 = vector.broadcast %cst_47 : f32 to vector<1x128xf32>
    %101 = arith.mulf %99, %100 : vector<1x128xf32>
    %c0_48 = arith.constant 0 : index
    %c0_49 = arith.constant 0 : index
    %102 = vector.load %arg12[%c0_48, %c0_49] : memref<128x128xf32, #tpu.memory_space<vmem>>, vector<128x128xf32>
    %cst_50 = arith.constant dense<0.000000e+00> : vector<1x128xf32>
    %103 = tpu.matmul %101, %102, %cst_50 {dimension_numbers = #tpu.dot_dimension_numbers<[1], [0], [0], [1], [0, 0, 1, 1], [], []>} : vector<1x128xf32>, vector<128x128xf32>, vector<1x128xf32> -> vector<1x128xf32>
    %104 = vector.broadcast %103 : vector<1x128xf32> to vector<32x128xf32>
    %105 = arith.subf %97, %104 : vector<32x128xf32>
    %106 = arith.mulf %105, %105 : vector<32x128xf32>
    %cst_51 = arith.constant dense<0.000000e+00> : vector<128xf32>
    %107 = vector.multi_reduction <add>, %106, %cst_51 [0] : vector<32x128xf32> to vector<128xf32>
    %108 = vector.shape_cast %107 : vector<128xf32> to vector<1x128xf32>
    %cst_52 = arith.constant 3.125000e-02 : f32
    %109 = vector.broadcast %cst_52 : f32 to vector<1x128xf32>
    %110 = arith.mulf %108, %109 : vector<1x128xf32>
    %c0_53 = arith.constant 0 : index
    %c0_54 = arith.constant 0 : index
    %111 = vector.load %arg12[%c0_53, %c0_54] : memref<128x128xf32, #tpu.memory_space<vmem>>, vector<128x128xf32>
    %cst_55 = arith.constant dense<0.000000e+00> : vector<1x128xf32>
    %112 = tpu.matmul %110, %111, %cst_55 {dimension_numbers = #tpu.dot_dimension_numbers<[1], [0], [0], [1], [0, 0, 1, 1], [], []>} : vector<1x128xf32>, vector<128x128xf32>, vector<1x128xf32> -> vector<1x128xf32>
    %cst_56 = arith.constant 9.99999974E-6 : f32
    %113 = vector.broadcast %cst_56 : f32 to vector<1x128xf32>
    %114 = arith.addf %112, %113 : vector<1x128xf32>
    %115 = math.rsqrt %114 : vector<1x128xf32>
    %116 = vector.broadcast %115 : vector<1x128xf32> to vector<32x128xf32>
    %117 = arith.mulf %105, %116 : vector<32x128xf32>
    %c0_57 = arith.constant 0 : index
    %c0_58 = arith.constant 0 : index
    %118 = vector.load %arg9[%c0_57, %c0_58] : memref<1x128xf32, #tpu.memory_space<vmem>>, vector<1x128xf32>
    %119 = vector.broadcast %118 : vector<1x128xf32> to vector<32x128xf32>
    %120 = arith.mulf %117, %119 : vector<32x128xf32>
    %c0_59 = arith.constant 0 : index
    %c0_60 = arith.constant 0 : index
    %121 = vector.load %arg10[%c0_59, %c0_60] : memref<1x128xf32, #tpu.memory_space<vmem>>, vector<1x128xf32>
    %122 = vector.broadcast %121 : vector<1x128xf32> to vector<32x128xf32>
    %123 = arith.addf %120, %122 : vector<32x128xf32>
    %124 = arith.negf %123 : vector<32x128xf32>
    %125 = math.exp %124 : vector<32x128xf32>
    %cst_61 = arith.constant 1.000000e+00 : f32
    %126 = vector.broadcast %cst_61 : f32 to vector<32x128xf32>
    %127 = arith.addf %126, %125 : vector<32x128xf32>
    %128 = arith.divf %126, %127 : vector<32x128xf32>
    %129 = arith.mulf %123, %128 : vector<32x128xf32>
    %cst_62 = arith.constant 0.000000e+00 : f32
    %130 = vector.broadcast %cst_62 : f32 to vector<1x128xf32>
    %131 = vector.extract_strided_slice %129 {offsets = [0, 0], sizes = [31, 128], strides = [1, 1]} : vector<32x128xf32> to vector<31x128xf32>
    %132 = tpu.concatenate %130, %131 in 0 : vector<1x128xf32>, vector<31x128xf32> -> vector<32x128xf32>
    %cst_63 = arith.constant 0.000000e+00 : f32
    %133 = vector.shape_cast %19 : vector<32x1xi1> to vector<32x1xi1>
    %134 = vector.broadcast %133 : vector<32x1xi1> to vector<32x128xi1>
    %135 = vector.broadcast %cst_63 : f32 to vector<32x128xf32>
    %136 = arith.select %134, %132, %135 : vector<32x128xi1>, vector<32x128xf32>
    %137 = vector.extract_strided_slice %129 {offsets = [1, 0], sizes = [31, 128], strides = [1, 1]} : vector<32x128xf32> to vector<31x128xf32>
    %138 = tpu.concatenate %137, %130 in 0 : vector<31x128xf32>, vector<1x128xf32> -> vector<32x128xf32>
    %cst_64 = arith.constant 0.000000e+00 : f32
    %139 = vector.shape_cast %21 : vector<32x1xi1> to vector<32x1xi1>
    %140 = vector.broadcast %139 : vector<32x1xi1> to vector<32x128xi1>
    %141 = vector.broadcast %cst_64 : f32 to vector<32x128xf32>
    %142 = arith.select %140, %138, %141 : vector<32x128xi1>, vector<32x128xf32>
    %143 = tpu.concatenate %136, %129, %142 in 1 : vector<32x128xf32>, vector<32x128xf32>, vector<32x128xf32> -> vector<32x384xf32>
    %144 = arith.truncf %143 : vector<32x384xf32> to vector<32x384xbf16>
    %c0_65 = arith.constant 0 : index
    %c0_66 = arith.constant 0 : index
    %145 = vector.load %arg5[%c0_65, %c0_66] : memref<384x128xbf16, #tpu.memory_space<vmem>>, vector<384x128xbf16>
    %cst_67 = arith.constant dense<0.000000e+00> : vector<32x128xf32>
    %146 = tpu.matmul %144, %145, %cst_67 {dimension_numbers = #tpu.dot_dimension_numbers<[1], [0], [0], [1], [0, 0, 1, 1], [], []>} : vector<32x384xbf16>, vector<384x128xbf16>, vector<32x128xf32> -> vector<32x128xf32>
    %c0_68 = arith.constant 0 : index
    %c0_69 = arith.constant 0 : index
    %147 = vector.load %arg6[%c0_68, %c0_69] : memref<1x128xf32, #tpu.memory_space<vmem>>, vector<1x128xf32>
    %148 = vector.broadcast %147 : vector<1x128xf32> to vector<32x128xf32>
    %149 = arith.addf %146, %148 : vector<32x128xf32>
    %150 = arith.addf %149, %0 : vector<32x128xf32>
    %c0_70 = arith.constant 0 : index
    %c0_71 = arith.constant 0 : index
    %151 = vector.load %arg17[%c0_70, %c0_71] : memref<32x128xf32, #tpu.memory_space<vmem>>, vector<32x128xf32>
    tpu.vector_store %arg17[%c0_70, %c0_71], %150 {strides = array<i32>} : memref<32x128xf32, #tpu.memory_space<vmem>>, vector<32x128xf32>,
    return
  }
  func.func @transform_0(%arg0: i32) -> (i32, i32) {
    %c0_i32 = arith.constant 0 : i32
    %c0_i32_0 = arith.constant 0 : i32
    %c0_i32_1 = arith.constant 0 : i32
    return %c0_i32, %c0_i32_0 : i32, i32
  }
  func.func @transform_1(%arg0: i32) -> (i32, i32) {
    %c0_i32 = arith.constant 0 : i32
    %c0_i32_0 = arith.constant 0 : i32
    %c0_i32_1 = arith.constant 0 : i32
    return %c0_i32, %c0_i32_0 : i32, i32
  }
  func.func @transform_2(%arg0: i32) -> (i32, i32) {
    %c0_i32 = arith.constant 0 : i32
    %c0_i32_0 = arith.constant 0 : i32
    %c0_i32_1 = arith.constant 0 : i32
    return %c0_i32, %c0_i32_0 : i32, i32
  }
  func.func @transform_3(%arg0: i32) -> (i32, i32) {
    %c0_i32 = arith.constant 0 : i32
    %c0_i32_0 = arith.constant 0 : i32
    %c0_i32_1 = arith.constant 0 : i32
    return %c0_i32, %c0_i32_0 : i32, i32
  }
  func.func @transform_4(%arg0: i32) -> (i32, i32) {
    %c0_i32 = arith.constant 0 : i32
    %c0_i32_0 = arith.constant 0 : i32
    %c0_i32_1 = arith.constant 0 : i32
    return %c0_i32, %c0_i32_0 : i32, i32
  }
  func.func @transform_5(%arg0: i32) -> (i32, i32) {
    %c0_i32 = arith.constant 0 : i32
    %c0_i32_0 = arith.constant 0 : i32
    %c0_i32_1 = arith.constant 0 : i32
    return %c0_i32, %c0_i32_0 : i32, i32
  }
  func.func @transform_6(%arg0: i32) -> (i32, i32) {
    %c0_i32 = arith.constant 0 : i32
    %c0_i32_0 = arith.constant 0 : i32
    %c0_i32_1 = arith.constant 0 : i32
    return %c0_i32, %c0_i32_0 : i32, i32
  }
  func.func @transform_7(%arg0: i32) -> (i32, i32) {
    %c0_i32 = arith.constant 0 : i32
    %c0_i32_0 = arith.constant 0 : i32
    %c0_i32_1 = arith.constant 0 : i32
    return %c0_i32, %c0_i32_0 : i32, i32
  }
  func.func @transform_8(%arg0: i32) -> (i32, i32) {
    %c0_i32 = arith.constant 0 : i32
    %c0_i32_0 = arith.constant 0 : i32
    %c0_i32_1 = arith.constant 0 : i32
    return %c0_i32, %c0_i32_0 : i32, i32
  }
  func.func @transform_9(%arg0: i32) -> (i32, i32) {
    %c0_i32 = arith.constant 0 : i32
    %c0_i32_0 = arith.constant 0 : i32
    %c0_i32_1 = arith.constant 0 : i32
    return %c0_i32, %c0_i32_0 : i32, i32
  }
  func.func @transform_10(%arg0: i32) -> (i32, i32) {
    %c0_i32 = arith.constant 0 : i32
    %c0_i32_0 = arith.constant 0 : i32
    %c0_i32_1 = arith.constant 0 : i32
    return %c0_i32, %c0_i32_0 : i32, i32
  }
  func.func @transform_11(%arg0: i32) -> (i32, i32) {
    %c0_i32 = arith.constant 0 : i32
    %c0_i32_0 = arith.constant 0 : i32
    %c0_i32_1 = arith.constant 0 : i32
    return %c0_i32, %c0_i32_0 : i32, i32
  }
  func.func @transform_12(%arg0: i32) -> (i32, i32) {
    %c0_i32 = arith.constant 0 : i32
    %c0_i32_0 = arith.constant 0 : i32
    %c0_i32_1 = arith.constant 0 : i32
    return %c0_i32, %c0_i32_0 : i32, i32
  }
  func.func @transform_13(%arg0: i32) -> (i32, i32) {
    %c0_i32 = arith.constant 0 : i32
    %c0_i32_0 = arith.constant 0 : i32
    %c0_i32_1 = arith.constant 0 : i32
    return %c0_i32, %c0_i32_0 : i32, i32
  }
  func.func @transform_14(%arg0: i32) -> (i32, i32) {
    %c0_i32 = arith.constant 0 : i32
    %c0_i32_0 = arith.constant 0 : i32
    %c0_i32_1 = arith.constant 0 : i32
    return %c0_i32, %c0_i32_0 : i32, i32
  }
  func.func @transform_15(%arg0: i32) -> (i32, i32) {
    %c0_i32 = arith.constant 0 : i32
    %c0_i32_0 = arith.constant 0 : i32
    %c0_i32_1 = arith.constant 0 : i32
    return %c0_i32, %c0_i32_0 : i32, i32
  }
  func.func @transform_16(%arg0: i32) -> (i32, i32) {
    %c0_i32 = arith.constant 0 : i32
    %c0_i32_0 = arith.constant 0 : i32
    %c0_i32_1 = arith.constant 0 : i32
    return %c0_i32, %c0_i32_0 : i32, i32
  }
}

module attributes {stable_mosaic.version = 11 : i64} {
  func.func @_down_kernel(%arg0: i32, %arg1: memref<8x128xf32, #tpu.memory_space<vmem>>, %arg2: memref<8x128xf32, #tpu.memory_space<vmem>>, %arg3: memref<384x64xbf16, #tpu.memory_space<vmem>>, %arg4: memref<1x64xf32, #tpu.memory_space<vmem>>, %arg5: memref<8x64xf32, #tpu.memory_space<vmem>>) attributes {dimension_semantics = [#tpu.dimension_semantics<parallel>], iteration_bounds = array<i64: 2>, scalar_prefetch = 0 : i64, scratch_operands = 0 : i64, tpu.core_type = #tpu.core_type<tc>, window_params = [{transform_indices = @transform_0, window_bounds = array<i64: 8, 128>}, {transform_indices = @transform_1, window_bounds = array<i64: 8, 128>}, {pipeline_mode = #tpu.pipeline_mode<synchronous>, transform_indices = @transform_2, window_bounds = array<i64: 384, 64>}, {pipeline_mode = #tpu.pipeline_mode<synchronous>, transform_indices = @transform_3, window_bounds = array<i64: 1, 64>}, {transform_indices = @transform_4, window_bounds = array<i64: 8, 64>}]} {
    %c0 = arith.constant 0 : index
    %c0_0 = arith.constant 0 : index
    %0 = vector.load %arg1[%c0, %c0_0] : memref<8x128xf32, #tpu.memory_space<vmem>>, vector<8x128xf32>
    %c0_1 = arith.constant 0 : index
    %c0_2 = arith.constant 0 : index
    %1 = vector.load %arg2[%c0_1, %c0_2] : memref<8x128xf32, #tpu.memory_space<vmem>>, vector<8x128xf32>
    %cst = arith.constant 0.000000e+00 : f32
    %2 = vector.broadcast %cst : f32 to vector<1x128xf32>
    %3 = vector.extract_strided_slice %1 {offsets = [0, 0], sizes = [7, 128], strides = [1, 1]} : vector<8x128xf32> to vector<7x128xf32>
    %4 = tpu.concatenate %2, %3 in 0 : vector<1x128xf32>, vector<7x128xf32> -> vector<8x128xf32>
    %5 = tpu.concatenate %4, %0, %1 in 1 : vector<8x128xf32>, vector<8x128xf32>, vector<8x128xf32> -> vector<8x384xf32>
    %6 = arith.truncf %5 : vector<8x384xf32> to vector<8x384xbf16>
    %c0_3 = arith.constant 0 : index
    %c0_4 = arith.constant 0 : index
    %7 = vector.load %arg3[%c0_3, %c0_4] : memref<384x64xbf16, #tpu.memory_space<vmem>>, vector<384x64xbf16>
    %cst_5 = arith.constant dense<0.000000e+00> : vector<8x64xf32>
    %8 = tpu.matmul %6, %7, %cst_5 {dimension_numbers = #tpu.dot_dimension_numbers<[1], [0], [0], [1], [0, 0, 1, 1], [], []>} : vector<8x384xbf16>, vector<384x64xbf16>, vector<8x64xf32> -> vector<8x64xf32>
    %c0_6 = arith.constant 0 : index
    %c0_7 = arith.constant 0 : index
    %9 = vector.load %arg4[%c0_6, %c0_7] : memref<1x64xf32, #tpu.memory_space<vmem>>, vector<1x64xf32>
    %10 = vector.broadcast %9 : vector<1x64xf32> to vector<8x64xf32>
    %11 = arith.addf %8, %10 : vector<8x64xf32>
    %c0_8 = arith.constant 0 : index
    %c0_9 = arith.constant 0 : index
    %12 = vector.load %arg5[%c0_8, %c0_9] : memref<8x64xf32, #tpu.memory_space<vmem>>, vector<8x64xf32>
    tpu.vector_store %arg5[%c0_8, %c0_9], %11 {strides = array<i32>} : memref<8x64xf32, #tpu.memory_space<vmem>>, vector<8x64xf32>,
    return
  }
  func.func @transform_0(%arg0: i32) -> (i32, i32) {
    %c0_i32 = arith.constant 0 : i32
    %c0_i32_0 = arith.constant 0 : i32
    return %arg0, %c0_i32 : i32, i32
  }
  func.func @transform_1(%arg0: i32) -> (i32, i32) {
    %c0_i32 = arith.constant 0 : i32
    %c0_i32_0 = arith.constant 0 : i32
    return %arg0, %c0_i32 : i32, i32
  }
  func.func @transform_2(%arg0: i32) -> (i32, i32) {
    %c0_i32 = arith.constant 0 : i32
    %c0_i32_0 = arith.constant 0 : i32
    %c0_i32_1 = arith.constant 0 : i32
    return %c0_i32, %c0_i32_0 : i32, i32
  }
  func.func @transform_3(%arg0: i32) -> (i32, i32) {
    %c0_i32 = arith.constant 0 : i32
    %c0_i32_0 = arith.constant 0 : i32
    %c0_i32_1 = arith.constant 0 : i32
    return %c0_i32, %c0_i32_0 : i32, i32
  }
  func.func @transform_4(%arg0: i32) -> (i32, i32) {
    %c0_i32 = arith.constant 0 : i32
    %c0_i32_0 = arith.constant 0 : i32
    return %arg0, %c0_i32 : i32, i32
  }
}

</mosaic_0001>

<bundles_post_ra>
// kernel: down_block_forward.7
= control target key start
LH: loop header
LB: loop body
LE: loop exit
PB: predicated region body
PF: predicated region fallthrough
CT: control target
= control target key end

     0   :  { %v2305_v0 = vmov 0.0   ;;  %vm2306_vm0 = vmmov 0   ;;  %v58_v31 = vlaneseq  ;;  %vm370_vm1 = vcmask 1040384   ;;  %s2308_s25 = smov 120   ;;  %s2966_s10 = inlined_call_operand.vmem [shape: f32[128,128], index: 10, kind: input, shape index: {}]   ;;  %s2967_s0 = inlined_call_operand.vmem [shape: f32[32,128], index: 0, kind: input, shape index: {}]   ;;  %s2968_s2 = inlined_call_operand.vmem [shape: bf16[384,128], index: 2, kind: input, shape index: {}]   ;;  %s2969_s6 = inlined_call_operand.vmem [shape: f32[1,128], index: 6, kind: input, shape index: {}]   ;;  %s2970_s7 = inlined_call_operand.vmem [shape: f32[1,128], index: 7, kind: input, shape index: {}]   ;;  %s2971_s1 = inlined_call_operand.vmem [shape: f32[2,32], index: 1, kind: input, shape index: {}]   ;;  %s2972_s14 = inlined_call_operand.vmem [shape: f32[32,16], index: 14, kind: input, shape index: {}]   ;;  %s2973_s13 = inlined_call_operand.vmem [shape: f32[32,2], index: 13, kind: input, shape index: {}]   ;;  %s2974_s15 = inlined_call_operand.vmem [shape: f32[1,16], index: 15, kind: input, shape index: {}]   ;;  %s2975_s12 = inlined_call_operand.vmem [shape: f32[8,128], index: 12, kind: input, shape index: {}]   ;;  %s2976_s11 = inlined_call_operand.vmem [shape: f32[128,128], index: 11, kind: input, shape index: {}]   ;;  %s2977_s3 = inlined_call_operand.vmem [shape: f32[1,128], index: 3, kind: input, shape index: {}]   ;;  %s2978_s4 = inlined_call_operand.vmem [shape: bf16[384,128], index: 4, kind: input, shape index: {}]   ;;  %s2979_s8 = inlined_call_operand.vmem [shape: f32[1,128], index: 8, kind: input, shape index: {}]   ;;  %s2980_s9 = inlined_call_operand.vmem [shape: f32[1,128], index: 9, kind: input, shape index: {}]   ;;  %s2981_s5 = inlined_call_operand.vmem [shape: f32[1,128], index: 5, kind: input, shape index: {}]   ;;  %s2982_s16 = inlined_call_operand.vmem [shape: f32[32,128], index: 16, kind: output, shape index: {}]  }
   0x1   :  { %2984 = sst [smem:[#allocation2_spill]] %s2966_s10  ;;  %1994 = vmatprep.subr.mxu0 %v2305_v0  ;;  %2026 = vmatprep.mubr.msk.f32.mxu0 %vm2306_vm0, %v2305_v0  ;;  %v2416_v5 = vld [vmem:[%s2967_s0] sm:$0xff]  ;;  %v2421_v6 = vld [vmem:[%s2967_s0 + $0x8] sm:$0xff]  ;;  %v2431_v8 = vld [vmem:[%s2967_s0 + $0x10] sm:$0xff]  ;;  %vm395_vm3 = vcmask 1046528   ;;  %vm2307_vm6 = vmmov 1  }
   0x2   :  { %s2985_s23 = sld [smem:[#allocation2_spill]]  ;;  %2029 = vmatprep.subr.mxu1 %v2305_v0  ;;  %v119_v9 = vadd.f32 %v2421_v6, %v2416_v5  ;;  %v2438_v10 = vld [vmem:[%s2967_s0 + $0x18] sm:$0xff]  ;;  %2061 = vmatprep.mubr.msk.f32.mxu1 %vm2306_vm0, %v2305_v0  ;;  %v2502_v32 = vshrl.u32 %v58_v31, 7  ;;  %v2216_v58 = vld [vmem:[%s2968_s2 + $0x70] sm:$0xff]   ;;  %v2219_v61 = vld [vmem:[%s2968_s2 + $0x68] sm:$0xff]   ;;  %vm742_vm12 = vcmask 261120  }
   0x3   :  { %v2213_v55 = vld [vmem:[%s2968_s2 + $0x78] sm:$0xff]   ;;  %v2217_v59 = vld [vmem:[%s2968_s2 + $0x30] sm:$0xff]   ;;  %v2220_v62 = vld [vmem:[%s2968_s2 + $0x28] sm:$0xff]   ;;  %vm820_vm13 = vcmask 15360   ;;  %vm833_vm14 = vcmask 1041408   ;;  %vm935_vm15 = vcmask 64512  }
   0x4   :  { %v120_v12 = vadd.f32 %v119_v9, %v2431_v8  ;;  %v2505_v33 = vsub.s32 0, %v2502_v32  ;;  %v2214_v56 = vld [vmem:[%s2968_s2 + $0x38] sm:$0xff]   ;;  %v2218_v60 = vld [vmem:[%s2968_s2 + $0xb0] sm:$0xff]   ;;  %v2221_v63 = vld [vmem:[%s2968_s2 + $0xa8] sm:$0xff]  }
   0x5   :  { %v2215_v57 = vld [vmem:[%s2968_s2 + $0xb8] sm:$0xff]   ;;  %v2229_v9 = vld [vmem:[%s2968_s2 + $0x10] sm:$0xff]  }
   0x6   :  { %v121_v14 = vadd.f32 %v120_v12, %v2438_v10  ;;  %v2232_v12 = vld [vmem:[%s2968_s2 + $0x8] sm:$0xff]  }
   0x8   :  { %v144_v1 = vld [vmem:[%s2985_s23 + $0x78] sm:$0xff]  ;;  %v143_v2 = vld [vmem:[%s2985_s23 + $0x70] sm:$0xff]  ;;  %v142_v3 = vld [vmem:[%s2985_s23 + $0x68] sm:$0xff]  ;;  %v122_v16 = vrot.slane %v121_v14, 4 }
   0x9   :  { %1995 = vmatpush3.msra.mxu0 %v144_v1  ;;  %2030 = vmatpush3.msra.mxu1 %v144_v1  ;;  %v141_v4 = vld [vmem:[%s2985_s23 + $0x60] sm:$0xff]  ;;  %v140_v7 = vld [vmem:[%s2985_s23 + $0x58] sm:$0xff]  ;;  %v139_v11 = vld [vmem:[%s2985_s23 + $0x50] sm:$0xff] }
   0xa   :  { %1996 = vmatprep.subr.mxu0 %v2305_v0  ;;  %2031 = vmatprep.subr.mxu1 %v2305_v0  ;;  %v138_v13 = vld [vmem:[%s2985_s23 + $0x48] sm:$0xff]  ;;  %v137_v15 = vld [vmem:[%s2985_s23 + $0x40] sm:$0xff]  ;;  %v136_v17 = vld [vmem:[%s2985_s23 + $0x38] sm:$0xff]  ;;  %v123_v18 = vadd.f32 %v122_v16, %v121_v14 }
   0xb   :  { %1997 = vmatpush3.msra.mxu0 %v143_v2  ;;  %2032 = vmatpush3.msra.mxu1 %v143_v2  ;;  %v135_v19 = vld [vmem:[%s2985_s23 + $0x30] sm:$0xff]  ;;  %v134_v21 = vld [vmem:[%s2985_s23 + $0x28] sm:$0xff]  ;;  %v133_v23 = vld [vmem:[%s2985_s23 + $0x20] sm:$0xff] }
   0xc   :  { %1998 = vmatprep.subr.mxu0 %v2305_v0  ;;  %2033 = vmatprep.subr.mxu1 %v2305_v0  ;;  %v124_v20 = vrot.slane %v123_v18, 2  ;;  %v132_v25 = vld [vmem:[%s2985_s23 + $0x18] sm:$0xff]  ;;  %v131_v26 = vld [vmem:[%s2985_s23 + $0x10] sm:$0xff]  ;;  %v130_v28 = vld [vmem:[%s2985_s23 + $0x8] sm:$0xff] }
   0xd   :  { %1999 = vmatpush3.msra.mxu0 %v142_v3  ;;  %2034 = vmatpush3.msra.mxu1 %v142_v3  ;;  %v129_v29 = vld [vmem:[%s2985_s23] sm:$0xff] }
   0xe   :  { %2000 = vmatprep.subr.mxu0 %v2305_v0  ;;  %2035 = vmatprep.subr.mxu1 %v2305_v0  ;;  %v125_v22 = vadd.f32 %v124_v20, %v123_v18  ;;  %v2222_v1 = vld [vmem:[%s2968_s2 + $0x60] sm:$0xff]  }
   0xf   :  { %2001 = vmatpush3.msra.mxu0 %v141_v4  ;;  %2036 = vmatpush3.msra.mxu1 %v141_v4  ;;  %v2223_v2 = vld [vmem:[%s2968_s2 + $0x20] sm:$0xff]   ;;  %v2225_v4 = vld [vmem:[%s2968_s2 + $0x58] sm:$0xff]  }
  0x10   :  { %2002 = vmatprep.subr.mxu0 %v2305_v0  ;;  %2037 = vmatprep.subr.mxu1 %v2305_v0  ;;  %v126_v24 = vrot.slane %v125_v22, 1  ;;  %v2224_v3 = vld [vmem:[%s2968_s2 + $0xa0] sm:$0xff]  }
  0x11   :  { %2003 = vmatpush3.msra.mxu0 %v140_v7  ;;  %2038 = vmatpush3.msra.mxu1 %v140_v7  ;;  %v2228_v7 = vld [vmem:[%s2968_s2 + $0x50] sm:$0xff]   ;;  %v2235_v14 = vld [vmem:[%s2968_s2] sm:$0xff]  }
  0x12   :  { %2004 = vmatprep.subr.mxu0 %v2305_v0  ;;  %2039 = vmatprep.subr.mxu1 %v2305_v0  ;;  %v127_v27 = vadd.f32 %v126_v24, %v125_v22 }
  0x13   :  { %2005 = vmatpush3.msra.mxu0 %v139_v11  ;;  %2040 = vmatpush3.msra.mxu1 %v139_v11  ;;  %v2233_v11 = vld [vmem:[%s2968_s2 + $0x88] sm:$0xff]  }
  0x14   :  { %2006 = vmatprep.subr.mxu0 %v2305_v0  ;;  %2041 = vmatprep.subr.mxu1 %v2305_v0  ;;  %v128_v30 = vmul.f32 0.03125, %v127_v27 }
  0x15   :  { %2007 = vmatpush3.msra.mxu0 %v138_v13  ;;  %2042 = vmatpush3.msra.mxu1 %v138_v13  ;;  %v2234_v13 = vld [vmem:[%s2968_s2 + $0x40] sm:$0xff]  }
  0x16   :  { %2008 = vmatprep.subr.mxu0 %v2305_v0  ;;  %2043 = vmatprep.subr.mxu1 %v2305_v0 }
  0x17   :  { %2009 = vmatpush3.msra.mxu0 %v137_v15  ;;  %2044 = vmatpush3.msra.mxu1 %v137_v15  ;;  %v2236_v15 = vld [vmem:[%s2968_s2 + $0x80] sm:$0xff]  }
  0x18   :  { %2010 = vmatprep.subr.mxu0 %v2305_v0  ;;  %2045 = vmatprep.subr.mxu1 %v2305_v0 }
  0x19   :  { %2011 = vmatpush3.msra.mxu0 %v136_v17  ;;  %2046 = vmatpush3.msra.mxu1 %v136_v17 }
  0x1a   :  { %2012 = vmatprep.subr.mxu0 %v2305_v0  ;;  %2047 = vmatprep.subr.mxu1 %v2305_v0 }
  0x1b   :  { %2013 = vmatpush3.msra.mxu0 %v135_v19  ;;  %2048 = vmatpush3.msra.mxu1 %v135_v19 }
  0x1c   :  { %2014 = vmatprep.subr.mxu0 %v2305_v0  ;;  %2049 = vmatprep.subr.mxu1 %v2305_v0 }
  0x1d   :  { %2015 = vmatpush3.msra.mxu0 %v134_v21  ;;  %2050 = vmatpush3.msra.mxu1 %v134_v21  ;;  %v1728_v21 = vld [vmem:[%s2969_s6] ss:$0 sm:$0xff] }
  0x1e   :  { %2016 = vmatprep.subr.mxu0 %v2305_v0  ;;  %2051 = vmatprep.subr.mxu1 %v2305_v0 }
  0x1f   :  { %2017 = vmatpush3.msra.mxu0 %v133_v23  ;;  %2052 = vmatpush3.msra.mxu1 %v133_v23 }
  0x20   :  { %2018 = vmatprep.subr.mxu0 %v2305_v0  ;;  %2053 = vmatprep.subr.mxu1 %v2305_v0 }
  0x21   :  { %2019 = vmatpush3.msra.mxu0 %v132_v25  ;;  %2054 = vmatpush3.msra.mxu1 %v132_v25 }
  0x22   :  { %2020 = vmatprep.subr.mxu0 %v2305_v0  ;;  %2055 = vmatprep.subr.mxu1 %v2305_v0 }
  0x23   :  { %2021 = vmatpush3.msra.mxu0 %v131_v26  ;;  %2056 = vmatpush3.msra.mxu1 %v131_v26  ;;  %v1729_v26 = vld [vmem:[%s2970_s7] ss:$0 sm:$0xff] }
  0x24   :  { %2022 = vmatprep.subr.mxu0 %v2305_v0  ;;  %2057 = vmatprep.subr.mxu1 %v2305_v0 }
  0x25   :  { %2023 = vmatpush3.msra.mxu0 %v130_v28  ;;  %2058 = vmatpush3.msra.mxu1 %v130_v28 }
  0x26   :  { %2024 = vmatprep.subr.mxu0 %v2305_v0  ;;  %2059 = vmatprep.subr.mxu1 %v2305_v0 }
  0x27   :  { %2025 = vmatpush3.msra.mxu0 %v129_v29  ;;  %2060 = vmatpush3.msra.mxu1 %v129_v29 }
  0x28   :  { %2027 = vmatmul.mubr.f32.vlgmr.msra.gmra.mxu0 %v128_v30  ;;  %1864 = vmatprep.subr.bf16.mxu0 %v2213_v55  ;;  %v67_v55 = vand.u32 15, %v2502_v32 }
  0x29   :  { %1865 = vmatpush3.bf16.msra.mxu0 %v2214_v56  ;;  %2064 = vmatprep.subr.bf16.mxu1 %v2215_v57 }
  0x2a   :  { %1866 = vmatprep.subr.bf16.mxu0 %v2216_v58  ;;  %vm2621_vm2 = vcmp.ne.s32.totalorder %v67_v55, 0 }
  0x2b   :  { %vm2639_vm7 = vmpackc.low %vm2307_vm6, %vm2621_vm2 }
  0x2d   :  { %1867 = vmatpush3.bf16.msra.mxu0 %v2217_v59 }
  0x2e   :  { %1868 = vmatprep.subr.bf16.mxu0 %v2219_v61 }
  0x31   :  { %1869 = vmatpush3.bf16.msra.mxu0 %v2220_v62 }
  0x32   :  { %1870 = vmatprep.subr.bf16.mxu0 %v2222_v1  ;;  %v61_v1 = vadd.s32 16, %v2502_v32 }
  0x35   :  { %1871 = vmatpush3.bf16.msra.mxu0 %v2223_v2 }
  0x36   :  { %1872 = vmatprep.subr.bf16.mxu0 %v2225_v4  ;;  %v1150_v4 = vld [vmem:[%s2976_s11 + $0x50] sm:$0xff] }
  0xe8   :  { %v211_v34 = vpop.f32.mrf.mxu0 }
  0xe9   :  { %v218_v35 = vrot.slane %v211_v34, %v2505_v33 }
  0xea   :  { %v2028_v36 = vpop.f32.mrf.mxu0 }
  0xeb   :  { %v2509_v37 = vsub.f32 %v2416_v5, %v218_v35  ;;  %v2512_v38 = vsub.f32 %v2421_v6, %v218_v35  ;;  %v2515_v39 = vsub.f32 %v2431_v8, %v218_v35  ;;  %v2518_v40 = vsub.f32 %v2438_v10, %v218_v35  ;;  %v2227_v5 = vld [vmem:[%s2968_s2 + $0x98] sm:$0xff]   ;;  %v2230_v8 = vld [vmem:[%s2968_s2 + $0x90] sm:$0xff]   ;;  %v2231_v10 = vld [vmem:[%s2968_s2 + $0x48] sm:$0xff]  }
  0xec   :  { %v2226_v6 = vld [vmem:[%s2968_s2 + $0x18] sm:$0xff]  }
  0xed   :  { %v223_v41 = vmul.f32 %v2509_v37, %v2509_v37  ;;  %v224_v42 = vmul.f32 %v2512_v38, %v2512_v38  ;;  %v225_v43 = vmul.f32 %v2515_v39, %v2515_v39  ;;  %v226_v45 = vmul.f32 %v2518_v40, %v2518_v40  ;;  %1873 = vmatpush3.bf16.msra.mxu0 %v2226_v6 }
  0xee   :  { %1874 = vmatprep.subr.bf16.mxu0 %v2228_v7 }
  0xef   :  { %v227_v44 = vadd.f32 %v224_v42, %v223_v41 }
  0xf1   :  { %v228_v46 = vadd.f32 %v227_v44, %v225_v43  ;;  %1875 = vmatpush3.bf16.msra.mxu0 %v2229_v9 }
  0xf2   :  { %1876 = vmatprep.subr.bf16.mxu0 %v2231_v10 }
  0xf3   :  { %v229_v47 = vadd.f32 %v228_v46, %v226_v45 }
  0xf5   :  { %v230_v48 = vrot.slane %v229_v47, 4  ;;  %1877 = vmatpush3.bf16.msra.mxu0 %v2232_v12 }
  0xf6   :  { %1878 = vmatprep.subr.bf16.mxu0 %v2234_v13  ;;  %v1141_v13 = vld [vmem:[%s2976_s11 + $0x8] sm:$0xff] }
  0xf7   :  { %v231_v49 = vadd.f32 %v230_v48, %v229_v47 }
  0xf9   :  { %v232_v50 = vrot.slane %v231_v49, 2  ;;  %1879 = vmatpush3.bf16.msra.mxu0 %v2235_v14 }
  0xfb   :  { %v233_v51 = vadd.f32 %v232_v50, %v231_v49 }
  0xfd   :  { %v234_v52 = vrot.slane %v233_v51, 1 }
  0xff   :  { %v235_v53 = vadd.f32 %v234_v52, %v233_v51  ;;  %v60_v52 = vadd.s32 8, %v2502_v32 }
 0x101   :  { %v236_v54 = vmul.f32 0.03125, %v235_v53  ;;  %v74_v56 = vand.u32 15, %v60_v52  ;;  %v819_v52 = vld [vmem:[%s2973_s13 + $0x18] sm:$0xff] }
 0x103   :  { %2062 = vmatmul.mubr.f32.vlgmr.msra.gmra.mxu1 %v236_v54  ;;  %v62_v54 = vadd.s32 24, %v2502_v32  ;;  %vm2626_vm4 = vcmp.ne.s32.totalorder %v74_v56, 15 }
 0x104   :  { %2065 = vmatpush3.bf16.msra.mxu1 %v2215_v57  ;;  %vm2648_vm8 = vmpackc.low %vm2626_vm4, %vm2307_vm6 }
 0x105   :  { %2066 = vmatprep.subr.bf16.mxu1 %v2218_v60 }
 0x108   :  { %2067 = vmatpush3.bf16.msra.mxu1 %v2218_v60  ;;  %v88_v60 = vand.u32 15, %v62_v54 }
 0x109   :  { %2068 = vmatprep.subr.bf16.mxu1 %v2221_v63 }
 0x10a   :  { %vm2631_vm5 = vcmp.ne.s32.totalorder %v88_v60, 15 }
 0x10b   :  { %vm2657_vm9 = vmpackc.low %vm2631_vm5, %vm2307_vm6 }
 0x10c   :  { %2069 = vmatpush3.bf16.msra.mxu1 %v2221_v63 }
 0x10d   :  { %2070 = vmatprep.subr.bf16.mxu1 %v2224_v3 }
 0x110   :  { %2071 = vmatpush3.bf16.msra.mxu1 %v2224_v3 }
 0x111   :  { %2072 = vmatprep.subr.bf16.mxu1 %v2227_v5 }
 0x114   :  { %2073 = vmatpush3.bf16.msra.mxu1 %v2227_v5 }
 0x115   :  { %2074 = vmatprep.subr.bf16.mxu1 %v2230_v8 }
 0x118   :  { %2075 = vmatpush3.bf16.msra.mxu1 %v2230_v8 }
 0x119   :  { %2076 = vmatprep.subr.bf16.mxu1 %v2233_v11 }
 0x11c   :  { %2077 = vmatpush3.bf16.msra.mxu1 %v2233_v11 }
 0x11d   :  { %2078 = vmatprep.subr.bf16.mxu1 %v2236_v15 }
 0x120   :  { %2079 = vmatpush3.bf16.msra.mxu1 %v2236_v15 }
 0x121   :  { %2084 = vmatprep.subr.mxu1 %v2305_v0 }
 0x1c3   :  { %v303_v16 = vpop.f32.mrf.mxu1 }
 0x1c4   :  { %v304_v17 = vadd.f32 1e-05, %v303_v16 }
 0x1c5   :  { %v2063_v18 = vpop.f32.mrf.mxu1 }
 0x1c6   :  { %2261 = vrsqrt.f32 %v304_v17  ;;  %v81_v17 = vand.u32 15, %v61_v1  ;;  %v1153_v1 = vld [vmem:[%s2976_s11 + $0x68] sm:$0xff] }
 0x1c8   :  { %vm113_vm10 = vcmp.ne.s32.totalorder %v81_v17, 0 }
 0x1c9   :  { %vm2682_vm11 = vmpackc.low %vm2307_vm6, %vm113_vm10 }
 0x1d3   :  { %v2262_v19 = vpop.eup %2261 }
 0x1d4   :  { %v311_v20 = vrot.slane %v2262_v19, %v2505_v33 }
 0x1d6   :  { %v312_v22 = vmul.f32 %v311_v20, %v2509_v37  ;;  %v313_v23 = vmul.f32 %v311_v20, %v2512_v38  ;;  %v314_v24 = vmul.f32 %v311_v20, %v2515_v39  ;;  %v315_v25 = vmul.f32 %v311_v20, %v2518_v40  ;;  %v2615_v39 = vld [vmem:[%s2971_s1] sm:$0x3] }
 0x1d7   :  { %v1771_v40 = vmul.f32 -1.442695, %v2615_v39  ;;  %v1793_v20 = vld [vmem:[%s2981_s5] ss:$0 sm:$0xff] }
 0x1d8   :  { %v323_v27 = vmul.f32 %v1728_v21, %v312_v22  ;;  %v324_v28 = vmul.f32 %v1728_v21, %v313_v23  ;;  %v325_v29 = vmul.f32 %v1728_v21, %v314_v24  ;;  %v326_v30 = vmul.f32 %v1728_v21, %v315_v25 }
 0x1da   :  { %v334_v31 = vadd.f32 %v1729_v26, %v323_v27  ;;  %v335_v34 = vadd.f32 %v1729_v26, %v324_v28  ;;  %v336_v35 = vadd.f32 %v1729_v26, %v325_v29  ;;  %v337_v36 = vadd.f32 %v1729_v26, %v326_v30  ;;  %v734_v29 = vld [vmem:[%s2972_s14 + $0x18] sm:$0xff]  ;;  %v733_v30 = vld [vmem:[%s2972_s14 + $0x10] sm:$0xff] }
 0x1dc   :  { %v1730_v41 = vmul.f32 -1.442695, %v334_v31  ;;  %v1731_v37 = vmul.f32 -1.442695, %v335_v34  ;;  %v1732_v42 = vmul.f32 -1.442695, %v336_v35 }
 0x1dd   :  { %v1733_v38 = vmul.f32 -1.442695, %v337_v36 }
 0x1de   :  { %2263 = vpow2.f32 %v1730_v41  ;;  %v2301_v41 = vld [vmem:[%s2967_s0] sm:$0xff] }
 0x1df   :  { %2265 = vpow2.f32 %v1731_v37 }
 0x1e0   :  { %2267 = vpow2.f32 %v1732_v42  ;;  %v731_v42 = vld [vmem:[%s2972_s14] sm:$0xff] }
 0x1e1   :  { %2269 = vpow2.f32 %v1733_v38 }
 0x1e2   :  { %2271 = vpow2.f32 %v1771_v40  ;;  %v816_v40 = vld [vmem:[%s2973_s13] sm:$0xff] }
 0x1eb   :  { %v2264_v43 = vpop.eup %2263 }
 0x1ec   :  { %v2266_v44 = vpop.eup %2265  ;;  %v350_v45 = vadd.f32 1.0, %v2264_v43 }
 0x1ed   :  { %v2268_v46 = vpop.eup %2267  ;;  %v351_v47 = vadd.f32 1.0, %v2266_v44 }
 0x1ee   :  { %v2270_v48 = vpop.eup %2269  ;;  %v352_v49 = vadd.f32 1.0, %v2268_v46  ;;  %2273 = vrcp.f32 %v350_v45  ;;  %v1772_v46 = vld [vmem:[%s2974_s15] ss:$0 sm:$0xff] }
 0x1ef   :  { %2275 = vrcp.f32 %v351_v47  ;;  %v353_v50 = vadd.f32 1.0, %v2270_v48  ;;  %v2272_v51 = vpop.eup %2271 }
 0x1f0   :  { %2277 = vrcp.f32 %v352_v49  ;;  %v727_v53 = vadd.f32 1.0, %v2272_v51  ;;  %v818_v51 = vld [vmem:[%s2973_s13 + $0x10] sm:$0xff] }
 0x1f1   :  { %2279 = vrcp.f32 %v353_v50  ;;  %v817_v50 = vld [vmem:[%s2973_s13 + $0x8] sm:$0xff] }
 0x1f2   :  { %2281 = vrcp.f32 %v727_v53  ;;  %v922_v53 = vld [vmem:[%s2975_s12] sm:$0xff] }
 0x1f3   :  { %2103 = vmatprep.subr.mxu0 %v922_v53 }
 0x1fb   :  { %v2274_v57 = vpop.eup %2273 }
 0x1fc   :  { %v2276_v58 = vpop.eup %2275  ;;  %v362_v59 = vmul.f32 %v2274_v57, %v334_v31 }
 0x1fd   :  { %v2278_v61 = vpop.eup %2277  ;;  %v363_v62 = vmul.f32 %v2276_v58, %v335_v34  ;;  %v1155_v58 = vld [vmem:[%s2976_s11 + $0x78] sm:$0xff] }
 0x1fe   :  { %v2280_v2 = vpop.eup %2279  ;;  %v371_v3 = vrot.slane %v362_v59, 7  ;;  %v364_v5 = vmul.f32 %v2278_v61, %v336_v35  ;;  %v396_v6 = vrot.slane %v362_v59, 1 }
 0x1ff   :  { %v372_v7 = vrot.slane %v363_v62, 7  ;;  %v421_v8 = vpack.c.bf16 %v363_v62, %v362_v59  ;;  %v397_v9 = vrot.slane %v363_v62, 1  ;;  %v365_v10 = vmul.f32 %v2280_v2, %v337_v36  ;;  %v2282_v31 = vpop.eup %2281  ;;  %v732_v36 = vld [vmem:[%s2972_s14 + $0x8] sm:$0xff]  ;;  %v1154_v59 = vld [vmem:[%s2976_s11 + $0x70] sm:$0xff]  ;;  %v1152_v2 = vld [vmem:[%s2976_s11 + $0x60] sm:$0xff] }
 0x200   :  { %v382_v11 = vsel %vm370_vm1, 0.0, %v371_v3  ;;  %v399_v12 = vrot.slane %v364_v5, 1  ;;  %v374_v22 = vrot.slane %v364_v5, 7  ;;  %v730_v38 = vmul.f32 %v2282_v31, %v2615_v39 }
 0x201   :  { %657 = vmatprep.mubr.bf16.mxu0 %v421_v8  ;;  %v373_v32 = vsel %vm370_vm1, %v371_v3, %v372_v7  ;;  %v398_v15 = vsel %vm395_vm3, %v396_v6, %v397_v9  ;;  %v401_v16 = vrot.slane %v365_v10, 1  ;;  %v424_v21 = vpack.c.bf16 %v365_v10, %v364_v5  ;;  %v1151_v3 = vld [vmem:[%s2976_s11 + $0x58] sm:$0xff]  ;;  %v1149_v5 = vld [vmem:[%s2976_s11 + $0x48] sm:$0xff]  ;;  %v1148_v6 = vld [vmem:[%s2976_s11 + $0x40] sm:$0xff] }
 0x202   :  { %v1760_v18 = vpack.c.bf16 %v373_v32, %v382_v11  ;;  %v400_v19 = vsel %vm395_vm3, %v397_v9, %v399_v12  ;;  %v376_v27 = vrot.slane %v365_v10, 7  ;;  %v375_v34 = vsel %vm370_vm1, %v372_v7, %v374_v22  ;;  %v1147_v7 = vld [vmem:[%s2976_s11 + $0x38] sm:$0xff]  ;;  %v1146_v8 = vld [vmem:[%s2976_s11 + $0x30] sm:$0xff]  ;;  %v1145_v9 = vld [vmem:[%s2976_s11 + $0x28] sm:$0xff] }
 0x203   :  { %v1766_v23 = vpack.c.bf16 %v400_v19, %v398_v15  ;;  %v402_v24 = vsel %vm395_vm3, %v399_v12, %v401_v16  ;;  %v407_v25 = vsel %vm395_vm3, %v401_v16, 0.0  ;;  %v1144_v10 = vld [vmem:[%s2976_s11 + $0x20] sm:$0xff]  ;;  %v1143_v11 = vld [vmem:[%s2976_s11 + $0x18] sm:$0xff]  ;;  %v1142_v12 = vld [vmem:[%s2976_s11 + $0x10] sm:$0xff] }
 0x204   :  { %1761 = vmatmul.mubr.msk.bf16.vlgmr.msra.gmra.mxu0 %vm2639_vm7, %v1760_v18  ;;  %v1769_v28 = vpack.c.bf16 %v407_v25, %v402_v24  ;;  %v377_v35 = vsel %vm370_vm1, %v374_v22, %v376_v27  ;;  %v1140_v32 = vld [vmem:[%s2976_s11] sm:$0xff] }
 0x205   :  { %2080 = vmatprep.mubr.msk.bf16.mxu1 %vm2648_vm8, %v1766_v23  ;;  %665 = vmatprep.mubr.bf16.mxu0 %v424_v21  ;;  %v1763_v37 = vpack.c.bf16 %v377_v35, %v375_v34  ;;  %v1734_v27 = vld [vmem:[%s2977_s3] ss:$0 sm:$0xff] }
 0x206   :  { %2081 = vmatmul.mubr.msk.bf16.vlgmr.msra.gmra.mxu1 %vm2657_vm9, %v1769_v28  ;;  %2104 = vmatpush3.msra.mxu0 %v922_v53 }
 0x207   :  { %2085 = vmatpush3.msra.mxu1 %v734_v29  ;;  %2092 = vmatprep.mubr.msk.f32.mxu1 %vm2306_vm0, %v2305_v0 }
 0x208   :  { %2086 = vmatprep.subr.mxu1 %v2305_v0  ;;  %2119 = vmatprep.subr.mxu0 %v2305_v0 }
 0x209   :  { %2087 = vmatpush3.msra.mxu1 %v733_v30 }
 0x20a   :  { %2088 = vmatprep.subr.mxu1 %v2305_v0 }
 0x20b   :  { %2089 = vmatpush3.msra.mxu1 %v732_v36 }
 0x20c   :  { %2090 = vmatprep.subr.mxu1 %v2305_v0  ;;  %1764 = vmatmul.mubr.msk.bf16.gmra.mxu0 %vm2682_vm11, %v1763_v37 }
 0x20d   :  { %2091 = vmatpush3.msra.mxu1 %v731_v42 }
 0x20e   :  { %2093 = vmatmul.mubr.msk.f32.vlgmr.msra.gmra.mxu1 %vm742_vm12, %v730_v38 }
 0x20f   :  { %2097 = vmatprep.mubr.msk.f32.mxu1 %vm820_vm13, %v816_v40 }
 0x2c4   :  { %v1880_v15 = vpop.f32.mrf.mxu0 }
 0x2c6   :  { %v2698_v43 = vpop.f32.mrf.mxu1  ;;  %v1881_v16 = vpop.f32.mrf.mxu0 }
 0x2c7   :  { %v1882_v25 = vadd.f32 %v1881_v16, %v1880_v15 }
 0x2c8   :  { %v2700_v44 = vpop.f32.mrf.mxu1  ;;  %v1883_v17 = vpop.f32.mrf.mxu0 }
 0x2ca   :  { %v2702_v39 = vpop.f32.mrf.mxu1  ;;  %v1884_v18 = vpop.f32.mrf.mxu0 }
 0x2cb   :  { %v1885_v28 = vadd.f32 %v1884_v18, %v1883_v17 }
 0x2cc   :  { %v2704_v45 = vpop.f32.mrf.mxu1  ;;  %v1886_v19 = vpop.f32.mrf.mxu0 }
 0x2cd   :  { %v663_v34 = vadd.f32 %v1885_v28, %v1734_v27 }
 0x2ce   :  { %v812_v47 = vpop.f32.mrf.mxu1  ;;  %v1887_v21 = vpop.f32.mrf.mxu0 }
 0x2cf   :  { %v813_v48 = vadd.f32 %v1772_v46, %v812_v47  ;;  %v1888_v31 = vadd.f32 %v1887_v21, %v1886_v19  ;;  %v712_v47 = vadd.f32 %v2704_v45, %v663_v34  ;;  %v2240_v34 = vld [vmem:[%s2978_s4 + $0x70] sm:$0xff]  }
 0x2d0   :  { %v2094_v49 = vpop.f32.mrf.mxu1  ;;  %v1889_v23 = vpop.f32.mrf.mxu0 }
 0x2d1   :  { %2095 = vmatprep.subr.msk.mxu1 %vm833_vm14, %v813_v48  ;;  %v668_v38 = vadd.f32 %v1888_v31, %v1734_v27  ;;  %v2239_v31 = vld [vmem:[%s2978_s4 + $0xb8] sm:$0xff]  }
 0x2d2   :  { %2096 = vmatpush3.msk.msra.mxu1 %vm833_vm14, %v813_v48  ;;  %v1890_v29 = vpop.f32.mrf.mxu0 }
 0x2d3   :  { %2098 = vmatmul.mubr.msk.f32.vlgmr.msra.gmra.mxu1 %vm820_vm13, %v817_v50  ;;  %2111 = vmatprep.subr.mxu1 %v922_v53  ;;  %v1891_v35 = vadd.f32 %v1890_v29, %v1889_v23 }
 0x2d4   :  { %2100 = vmatprep.mubr.msk.f32.mxu1 %vm820_vm13, %v818_v51  ;;  %2112 = vmatpush3.msra.mxu1 %v922_v53 }
 0x2d5   :  { %2154 = vmatprep.subr.mxu1 %v2305_v0  ;;  %v671_v48 = vadd.f32 %v1891_v35, %v1734_v27  ;;  %v2241_v35 = vld [vmem:[%s2978_s4 + $0x30] sm:$0xff]  }
 0x2d7   :  { %2101 = vmatmul.mubr.msk.f32.gmra.mxu1 %vm820_vm13, %v819_v52 }
 0x393   :  { %v2099_v54 = vpop.f32.mrf.mxu1 }
 0x395   :  { %v903_v55 = vpop.f32.mrf.mxu1 }
 0x396   :  { %927 = vrot.lane.b32.xlu0 %v903_v55, %s2308_s25  ;;  %2113 = vmatprep.mubr.msk.f32.mxu1 %vm935_vm15, %v903_v55  ;;  %v717_v55 = vadd.f32 %v2698_v43, %v668_v38  ;;  %v2245_v38 = vld [vmem:[%s2978_s4 + $0xa8] sm:$0xff]  }
 0x397   :  { %v2102_v56 = vpop.f32.mrf.mxu1  ;;  %2114 = vmatmul.mubr.msk.f32.vlgmr.msra.gmra.mxu1 %vm935_vm15, %v2099_v54 }
 0x398   :  { %2155 = vmatpush3.msra.mxu1 %v1155_v58 }
 0x399   :  { %v913_v57 = vpop.f32.mrf.mxu1  ;;  %2156 = vmatprep.subr.mxu1 %v2305_v0 }
 0x39a   :  { %929 = vrot.lane.b32.xlu0 %v2099_v54, %s2308_s25  ;;  %931 = vrot.lane.b32.xlu1 %v913_v57, %s2308_s25 }
 0x39b   :  { %2116 = vmatprep.mubr.msk.f32.mxu1 %vm935_vm15, %v913_v57  ;;  %2157 = vmatpush3.msra.mxu1 %v1154_v59 }
 0x39c   :  { %2117 = vmatmul.mubr.msk.f32.gmra.mxu1 %vm935_vm15, %v2102_v56  ;;  %2158 = vmatprep.subr.mxu1 %v2305_v0 }
 0x39d   :  { %2186 = vmatprep.mubr.msk.f32.mxu1 %vm2306_vm0, %v2305_v0  ;;  %2159 = vmatpush3.msra.mxu1 %v1153_v1 }
 0x39e   :  { %933 = vrot.lane.b32.xlu1 %v2102_v56, %s2308_s25  ;;  %2160 = vmatprep.subr.mxu1 %v2305_v0 }
 0x39f   :  { %2161 = vmatpush3.msra.mxu1 %v1152_v2 }
 0x3a0   :  { %2162 = vmatprep.subr.mxu1 %v2305_v0 }
 0x3a1   :  { %2163 = vmatpush3.msra.mxu1 %v1151_v3 }
 0x3a2   :  { %2164 = vmatprep.subr.mxu1 %v2305_v0 }
 0x3a3   :  { %2165 = vmatpush3.msra.mxu1 %v1150_v4 }
 0x3a4   :  { %2166 = vmatprep.subr.mxu1 %v2305_v0 }
 0x3a5   :  { %2167 = vmatpush3.msra.mxu1 %v1149_v5 }
 0x3a6   :  { %2168 = vmatprep.subr.mxu1 %v2305_v0 }
 0x3a7   :  { %2169 = vmatpush3.msra.mxu1 %v1148_v6 }
 0x3a8   :  { %2170 = vmatprep.subr.mxu1 %v2305_v0 }
 0x3a9   :  { %2171 = vmatpush3.msra.mxu1 %v1147_v7 }
 0x3aa   :  { %2172 = vmatprep.subr.mxu1 %v2305_v0 }
 0x3ab   :  { %2173 = vmatpush3.msra.mxu1 %v1146_v8 }
 0x3ac   :  { %2174 = vmatprep.subr.mxu1 %v2305_v0 }
 0x3ad   :  { %2175 = vmatpush3.msra.mxu1 %v1145_v9 }
 0x3ae   :  { %2176 = vmatprep.subr.mxu1 %v2305_v0 }
 0x3af   :  { %2177 = vmatpush3.msra.mxu1 %v1144_v10 }
 0x3b0   :  { %2178 = vmatprep.subr.mxu1 %v2305_v0 }
 0x3b1   :  { %2179 = vmatpush3.msra.mxu1 %v1143_v11 }
 0x3b2   :  { %2180 = vmatprep.subr.mxu1 %v2305_v0 }
 0x3b3   :  { %2181 = vmatpush3.msra.mxu1 %v1142_v12 }
 0x3b4   :  { %2182 = vmatprep.subr.mxu1 %v2305_v0 }
 0x3b5   :  { %2183 = vmatpush3.msra.mxu1 %v1141_v13 }
 0x3b6   :  { %2184 = vmatprep.subr.mxu1 %v2305_v0 }
 0x3b7   :  { %2185 = vmatpush3.msra.mxu1 %v1140_v32 }
 0x3b8   :  { %2189 = vmatprep.subr.bf16.mxu1 %v2239_v31 }
 0x408   :  { %v928_v60 = vpop.permute.xlu0 %927 }
 0x409   :  { %2105 = vmatprep.mubr.msk.f32.mxu0 %vm935_vm15, %v928_v60 }
 0x40c   :  { %v930_v61 = vpop.permute.xlu0 %929  ;;  %v932_v62 = vpop.permute.xlu1 %931 }
 0x40d   :  { %2106 = vmatmul.mubr.msk.f32.vlgmr.msra.gmra.mxu0 %vm935_vm15, %v930_v61 }
 0x40e   :  { %2108 = vmatprep.mubr.msk.f32.mxu0 %vm935_vm15, %v932_v62  ;;  %2120 = vmatpush3.msra.mxu0 %v1155_v58  ;;  %v720_v58 = vadd.f32 %v2702_v39, %v671_v48  ;;  %v2249_v48 = vld [vmem:[%s2978_s4 + $0x58] sm:$0xff]  }
 0x40f   :  { %2121 = vmatprep.subr.mxu0 %v2305_v0 }
 0x410   :  { %v934_v63 = vpop.permute.xlu1 %933  ;;  %2122 = vmatpush3.msra.mxu0 %v1154_v59 }
 0x411   :  { %2109 = vmatmul.mubr.msk.f32.gmra.mxu0 %vm935_vm15, %v934_v63  ;;  %2123 = vmatprep.subr.mxu0 %v2305_v0 }
 0x412   :  { %2151 = vmatprep.mubr.msk.f32.mxu0 %vm2306_vm0, %v2305_v0  ;;  %2124 = vmatpush3.msra.mxu0 %v1153_v1 }
 0x413   :  { %2125 = vmatprep.subr.mxu0 %v2305_v0 }
 0x414   :  { %2126 = vmatpush3.msra.mxu0 %v1152_v2 }
 0x415   :  { %2127 = vmatprep.subr.mxu0 %v2305_v0 }
 0x416   :  { %2128 = vmatpush3.msra.mxu0 %v1151_v3 }
 0x417   :  { %2129 = vmatprep.subr.mxu0 %v2305_v0 }
 0x418   :  { %2130 = vmatpush3.msra.mxu0 %v1150_v4 }
 0x419   :  { %2131 = vmatprep.subr.mxu0 %v2305_v0 }
 0x41a   :  { %2132 = vmatpush3.msra.mxu0 %v1149_v5 }
 0x41b   :  { %2133 = vmatprep.subr.mxu0 %v2305_v0 }
 0x41c   :  { %2134 = vmatpush3.msra.mxu0 %v1148_v6 }
 0x41d   :  { %2135 = vmatprep.subr.mxu0 %v2305_v0 }
 0x41e   :  { %2136 = vmatpush3.msra.mxu0 %v1147_v7 }
 0x41f   :  { %2137 = vmatprep.subr.mxu0 %v2305_v0 }
 0x420   :  { %2138 = vmatpush3.msra.mxu0 %v1146_v8 }
 0x421   :  { %2139 = vmatprep.subr.mxu0 %v2305_v0 }
 0x422   :  { %2140 = vmatpush3.msra.mxu0 %v1145_v9 }
 0x423   :  { %2141 = vmatprep.subr.mxu0 %v2305_v0 }
 0x424   :  { %2142 = vmatpush3.msra.mxu0 %v1144_v10 }
 0x425   :  { %2143 = vmatprep.subr.mxu0 %v2305_v0 }
 0x426   :  { %2144 = vmatpush3.msra.mxu0 %v1143_v11 }
 0x427   :  { %2145 = vmatprep.subr.mxu0 %v2305_v0 }
 0x428   :  { %2146 = vmatpush3.msra.mxu0 %v1142_v12 }
 0x429   :  { %2147 = vmatprep.subr.mxu0 %v2305_v0 }
 0x42a   :  { %2148 = vmatpush3.msra.mxu0 %v1141_v13 }
 0x42b   :  { %2149 = vmatprep.subr.mxu0 %v2305_v0  ;;  %v660_v0 = vadd.f32 %v1882_v25, %v1734_v27 }
 0x42c   :  { %2150 = vmatpush3.msra.mxu0 %v1140_v32 }
 0x42d   :  { %v709_v42 = vadd.f32 %v2700_v44, %v660_v0  ;;  %v2238_v0 = vld [vmem:[%s2978_s4 + $0x38] sm:$0xff]  }
 0x457   :  { %v2115_v22 = vpop.f32.mrf.mxu1 }
 0x458   :  { %v1109_v40 = vadd.f32 1.0, %v2115_v22 }
 0x459   :  { %v1103_v24 = vpop.f32.mrf.mxu1 }
 0x45a   :  { %v1104_v36 = vadd.f32 1.0, %v1103_v24  ;;  %v1123_v53 = vmul.f32 %v1109_v40, %v712_v47  ;;  %v2246_v40 = vld [vmem:[%s2978_s4 + $0x60] sm:$0xff]  }
 0x45b   :  { %v2248_v47 = vld [vmem:[%s2978_s4 + $0xa0] sm:$0xff]  }
 0x45c   :  { %v2118_v30 = vpop.f32.mrf.mxu1  ;;  %v1122_v50 = vmul.f32 %v1104_v36, %v709_v42  ;;  %v2242_v36 = vld [vmem:[%s2978_s4 + $0xb0] sm:$0xff]   ;;  %v2244_v42 = vld [vmem:[%s2978_s4 + $0x28] sm:$0xff]  }
 0x45d   :  { %v1119_v52 = vadd.f32 1.0, %v2118_v30  ;;  %v2237_v30 = vld [vmem:[%s2978_s4 + $0x78] sm:$0xff]  }
 0x45e   :  { %v1113_v37 = vpop.f32.mrf.mxu1  ;;  %1956 = vmatprep.subr.bf16.mxu0 %v2237_v30 }
 0x45f   :  { %v1114_v49 = vadd.f32 1.0, %v1113_v37  ;;  %v1125_v61 = vmul.f32 %v1119_v52, %v720_v58  ;;  %v2243_v37 = vld [vmem:[%s2978_s4 + $0x68] sm:$0xff]   ;;  %v2254_v52 = vld [vmem:[%s2978_s4 + $0x90] sm:$0xff]   ;;  %v2259_v58 = vld [vmem:[%s2978_s4] sm:$0xff]  }
 0x461   :  { %v1124_v59 = vmul.f32 %v1114_v49, %v717_v55  ;;  %v2251_v49 = vld [vmem:[%s2978_s4 + $0x98] sm:$0xff]   ;;  %v2257_v55 = vld [vmem:[%s2978_s4 + $0x88] sm:$0xff]  }
 0x4cd   :  { %v2107_v46 = vpop.f32.mrf.mxu0 }
 0x4ce   :  { %v1127_v57 = vadd.f32 %v2107_v46, %v1123_v53  ;;  %v2247_v46 = vld [vmem:[%s2978_s4 + $0x20] sm:$0xff]   ;;  %v2253_v53 = vld [vmem:[%s2978_s4 + $0x10] sm:$0xff]  }
 0x4cf   :  { %v1010_v51 = vpop.f32.mrf.mxu0 }
 0x4d0   :  { %v1126_v54 = vadd.f32 %v1122_v50, %v1010_v51  ;;  %v2250_v50 = vld [vmem:[%s2978_s4 + $0x18] sm:$0xff]   ;;  %v2252_v51 = vld [vmem:[%s2978_s4 + $0x50] sm:$0xff]  }
 0x4d1   :  { %v2110_v56 = vpop.f32.mrf.mxu0 }
 0x4d2   :  { %v1130_v60 = vadd.f32 %v1127_v57, %v1126_v54  ;;  %v1129_v63 = vadd.f32 %v2110_v56, %v1125_v61  ;;  %v2256_v56 = vld [vmem:[%s2978_s4 + $0x8] sm:$0xff]  }
 0x4d3   :  { %v1020_v44 = vpop.f32.mrf.mxu0 }
 0x4d4   :  { %v1128_v62 = vadd.f32 %v1124_v59, %v1020_v44  ;;  %v2260_v59 = vld [vmem:[%s2978_s4 + $0x80] sm:$0xff]  }
 0x4d6   :  { %v1131_v45 = vadd.f32 %v1130_v60, %v1128_v62 }
 0x4d8   :  { %v1132_v1 = vadd.f32 %v1131_v45, %v1129_v63  ;;  %v1787_v45 = vld [vmem:[%s2979_s8] ss:$0 sm:$0xff] }
 0x4da   :  { %v1133_v2 = vrot.slane %v1132_v1, 4 }
 0x4dc   :  { %v1134_v3 = vadd.f32 %v1133_v2, %v1132_v1 }
 0x4de   :  { %v1135_v4 = vrot.slane %v1134_v3, 2 }
 0x4e0   :  { %v1136_v5 = vadd.f32 %v1135_v4, %v1134_v3 }
 0x4e2   :  { %v1137_v6 = vrot.slane %v1136_v5, 1 }
 0x4e4   :  { %v1138_v7 = vadd.f32 %v1137_v6, %v1136_v5  ;;  %v1788_v5 = vld [vmem:[%s2980_s9] ss:$0 sm:$0xff] }
 0x4e6   :  { %v1139_v8 = vmul.f32 0.03125, %v1138_v7 }
 0x4e8   :  { %2152 = vmatmul.mubr.f32.vlgmr.msra.gmra.mxu0 %v1139_v8 }
 0x4e9   :  { %1957 = vmatpush3.bf16.msra.mxu0 %v2238_v0 }
 0x4ea   :  { %1958 = vmatprep.subr.bf16.mxu0 %v2240_v34 }
 0x4ed   :  { %1959 = vmatpush3.bf16.msra.mxu0 %v2241_v35 }
 0x4ee   :  { %1960 = vmatprep.subr.bf16.mxu0 %v2243_v37 }
 0x4f1   :  { %1961 = vmatpush3.bf16.msra.mxu0 %v2244_v42 }
 0x4f2   :  { %1962 = vmatprep.subr.bf16.mxu0 %v2246_v40 }
 0x4f5   :  { %1963 = vmatpush3.bf16.msra.mxu0 %v2247_v46 }
 0x4f6   :  { %1964 = vmatprep.subr.bf16.mxu0 %v2249_v48 }
 0x4f9   :  { %1965 = vmatpush3.bf16.msra.mxu0 %v2250_v50 }
 0x4fa   :  { %1966 = vmatprep.subr.bf16.mxu0 %v2252_v51 }
 0x4fd   :  { %1967 = vmatpush3.bf16.msra.mxu0 %v2253_v53 }
 0x5a8   :  { %v1222_v43 = vpop.f32.mrf.mxu0 }
 0x5a9   :  { %v1229_v9 = vrot.slane %v1222_v43, %v2505_v33 }
 0x5aa   :  { %v2153_v39 = vpop.f32.mrf.mxu0 }
 0x5ab   :  { %v2824_v10 = vsub.f32 %v1126_v54, %v1229_v9  ;;  %v2826_v11 = vsub.f32 %v1127_v57, %v1229_v9  ;;  %v2828_v12 = vsub.f32 %v1128_v62, %v1229_v9  ;;  %v2830_v13 = vsub.f32 %v1129_v63, %v1229_v9  ;;  %v2255_v54 = vld [vmem:[%s2978_s4 + $0x48] sm:$0xff]   ;;  %v2258_v57 = vld [vmem:[%s2978_s4 + $0x40] sm:$0xff]  }
 0x5ac   :  { %1968 = vmatprep.subr.bf16.mxu0 %v2255_v54 }
 0x5ad   :  { %v1234_v32 = vmul.f32 %v2824_v10, %v2824_v10  ;;  %v1235_v15 = vmul.f32 %v2826_v11, %v2826_v11  ;;  %v1236_v16 = vmul.f32 %v2828_v12, %v2828_v12  ;;  %v1237_v18 = vmul.f32 %v2830_v13, %v2830_v13  ;;  %1969 = vmatpush3.bf16.msra.mxu0 %v2256_v56 }
 0x5ae   :  { %1970 = vmatprep.subr.bf16.mxu0 %v2258_v57 }
 0x5af   :  { %v1238_v17 = vadd.f32 %v1235_v15, %v1234_v32 }
 0x5b1   :  { %v1239_v19 = vadd.f32 %v1238_v17, %v1236_v16  ;;  %1971 = vmatpush3.bf16.msra.mxu0 %v2259_v58 }
 0x5b3   :  { %v1240_v21 = vadd.f32 %v1239_v19, %v1237_v18 }
 0x5b5   :  { %v1241_v22 = vrot.slane %v1240_v21, 4 }
 0x5b7   :  { %v1242_v23 = vadd.f32 %v1241_v22, %v1240_v21 }
 0x5b9   :  { %v1243_v24 = vrot.slane %v1242_v23, 2 }
 0x5bb   :  { %v1244_v25 = vadd.f32 %v1243_v24, %v1242_v23 }
 0x5bd   :  { %v1245_v27 = vrot.slane %v1244_v25, 1 }
 0x5bf   :  { %v1246_v28 = vadd.f32 %v1245_v27, %v1244_v25 }
 0x5c1   :  { %v1247_v29 = vmul.f32 0.03125, %v1246_v28 }
 0x5c3   :  { %2187 = vmatmul.mubr.f32.vlgmr.msra.gmra.mxu1 %v1247_v29 }
 0x5c4   :  { %2190 = vmatpush3.bf16.msra.mxu1 %v2239_v31 }
 0x5c5   :  { %2191 = vmatprep.subr.bf16.mxu1 %v2242_v36 }
 0x5c8   :  { %2192 = vmatpush3.bf16.msra.mxu1 %v2242_v36 }
 0x5c9   :  { %2193 = vmatprep.subr.bf16.mxu1 %v2245_v38 }
 0x5cc   :  { %2194 = vmatpush3.bf16.msra.mxu1 %v2245_v38 }
 0x5cd   :  { %2195 = vmatprep.subr.bf16.mxu1 %v2248_v47 }
 0x5d0   :  { %2196 = vmatpush3.bf16.msra.mxu1 %v2248_v47 }
 0x5d1   :  { %2197 = vmatprep.subr.bf16.mxu1 %v2251_v49 }
 0x5d4   :  { %2198 = vmatpush3.bf16.msra.mxu1 %v2251_v49 }
 0x5d5   :  { %2199 = vmatprep.subr.bf16.mxu1 %v2254_v52 }
 0x5d8   :  { %2200 = vmatpush3.bf16.msra.mxu1 %v2254_v52 }
 0x5d9   :  { %2201 = vmatprep.subr.bf16.mxu1 %v2257_v55 }
 0x5dc   :  { %2202 = vmatpush3.bf16.msra.mxu1 %v2257_v55 }
 0x5dd   :  { %2203 = vmatprep.subr.bf16.mxu1 %v2260_v59 }
 0x5e0   :  { %2204 = vmatpush3.bf16.msra.mxu1 %v2260_v59 }
 0x683   :  { %v1314_v44 = vpop.f32.mrf.mxu1 }
 0x684   :  { %v1315_v60 = vadd.f32 1e-05, %v1314_v44 }
 0x685   :  { %v2188_v61 = vpop.f32.mrf.mxu1 }
 0x686   :  { %2283 = vrsqrt.f32 %v1315_v60 }
 0x693   :  { %v2284_v62 = vpop.eup %2283 }
 0x694   :  { %v1322_v63 = vrot.slane %v2284_v62, %v2505_v33 }
 0x696   :  { %v1323_v1 = vmul.f32 %v1322_v63, %v2824_v10  ;;  %v1324_v2 = vmul.f32 %v1322_v63, %v2826_v11  ;;  %v1325_v3 = vmul.f32 %v1322_v63, %v2828_v12  ;;  %v1326_v4 = vmul.f32 %v1322_v63, %v2830_v13 }
 0x698   :  { %v1334_v6 = vmul.f32 %v1787_v45, %v1323_v1  ;;  %v1335_v7 = vmul.f32 %v1787_v45, %v1324_v2  ;;  %v1336_v8 = vmul.f32 %v1787_v45, %v1325_v3  ;;  %v1337_v33 = vmul.f32 %v1787_v45, %v1326_v4 }
 0x69a   :  { %v1345_v43 = vadd.f32 %v1788_v5, %v1334_v6  ;;  %v1346_v9 = vadd.f32 %v1788_v5, %v1335_v7  ;;  %v1347_v39 = vadd.f32 %v1788_v5, %v1336_v8  ;;  %v1348_v32 = vadd.f32 %v1788_v5, %v1337_v33 }
 0x69c   :  { %v1789_v15 = vmul.f32 -1.442695, %v1345_v43  ;;  %v1790_v10 = vmul.f32 -1.442695, %v1346_v9  ;;  %v1791_v16 = vmul.f32 -1.442695, %v1347_v39 }
 0x69d   :  { %v1792_v11 = vmul.f32 -1.442695, %v1348_v32 }
 0x69e   :  { %2285 = vpow2.f32 %v1789_v15 }
 0x69f   :  { %2287 = vpow2.f32 %v1790_v10 }
 0x6a0   :  { %2289 = vpow2.f32 %v1791_v16 }
 0x6a1   :  { %2291 = vpow2.f32 %v1792_v11 }
 0x6ab   :  { %v2286_v12 = vpop.eup %2285 }
 0x6ac   :  { %v2288_v13 = vpop.eup %2287  ;;  %v1361_v17 = vadd.f32 1.0, %v2286_v12 }
 0x6ad   :  { %v2290_v18 = vpop.eup %2289  ;;  %v1362_v19 = vadd.f32 1.0, %v2288_v13  ;;  %v2303_v13 = vld [vmem:[%s2967_s0 + $0x10] sm:$0xff] }
 0x6ae   :  { %v2292_v21 = vpop.eup %2291  ;;  %v1363_v22 = vadd.f32 1.0, %v2290_v18  ;;  %2293 = vrcp.f32 %v1361_v17 }
 0x6af   :  { %2295 = vrcp.f32 %v1362_v19  ;;  %v1364_v23 = vadd.f32 1.0, %v2292_v21  ;;  %v2304_v21 = vld [vmem:[%s2967_s0 + $0x18] sm:$0xff] }
 0x6b0   :  { %2297 = vrcp.f32 %v1363_v22 }
 0x6b1   :  { %2299 = vrcp.f32 %v1364_v23 }
 0x6bb   :  { %v2294_v24 = vpop.eup %2293 }
 0x6bc   :  { %v2296_v25 = vpop.eup %2295  ;;  %v1373_v27 = vmul.f32 %v2294_v24, %v1345_v43 }
 0x6bd   :  { %v2298_v28 = vpop.eup %2297  ;;  %v1374_v29 = vmul.f32 %v2296_v25, %v1346_v9 }
 0x6be   :  { %v2300_v30 = vpop.eup %2299  ;;  %v1381_v0 = vrot.slane %v1373_v27, 7  ;;  %v1375_v31 = vmul.f32 %v2298_v28, %v1347_v39  ;;  %v1397_v34 = vrot.slane %v1373_v27, 1 }
 0x6bf   :  { %v1382_v35 = vrot.slane %v1374_v29, 7  ;;  %v1414_v36 = vpack.c.bf16 %v1374_v29, %v1373_v27  ;;  %v1398_v37 = vrot.slane %v1374_v29, 1  ;;  %v1376_v42 = vmul.f32 %v2300_v30, %v1348_v32  ;;  %v2302_v32 = vld [vmem:[%s2967_s0 + $0x8] sm:$0xff] }
 0x6c0   :  { %v1392_v38 = vsel %vm370_vm1, 0.0, %v1381_v0  ;;  %v1400_v40 = vrot.slane %v1375_v31, 1  ;;  %v1384_v52 = vrot.slane %v1375_v31, 7 }
 0x6c1   :  { %1650 = vmatprep.mubr.bf16.mxu0 %v1414_v36  ;;  %v1383_v46 = vsel %vm370_vm1, %v1381_v0, %v1382_v35  ;;  %v1399_v47 = vsel %vm395_vm3, %v1397_v34, %v1398_v37  ;;  %v1402_v48 = vrot.slane %v1376_v42, 1  ;;  %v1417_v51 = vpack.c.bf16 %v1376_v42, %v1375_v31 }
 0x6c2   :  { %v1819_v49 = vpack.c.bf16 %v1383_v46, %v1392_v38  ;;  %v1401_v50 = vsel %vm395_vm3, %v1398_v37, %v1400_v40  ;;  %v1386_v56 = vrot.slane %v1376_v42, 7  ;;  %v1385_v58 = vsel %vm370_vm1, %v1382_v35, %v1384_v52 }
 0x6c3   :  { %v1825_v53 = vpack.c.bf16 %v1401_v50, %v1399_v47  ;;  %v1403_v54 = vsel %vm395_vm3, %v1400_v40, %v1402_v48  ;;  %v1408_v55 = vsel %vm395_vm3, %v1402_v48, 0.0 }
 0x6c4   :  { %1820 = vmatmul.mubr.msk.bf16.vlgmr.msra.gmra.mxu0 %vm2639_vm7, %v1819_v49  ;;  %v1828_v57 = vpack.c.bf16 %v1408_v55, %v1403_v54  ;;  %v1387_v59 = vsel %vm370_vm1, %v1384_v52, %v1386_v56 }
 0x6c5   :  { %2205 = vmatprep.mubr.msk.bf16.mxu1 %vm2648_vm8, %v1825_v53  ;;  %1658 = vmatprep.mubr.bf16.mxu0 %v1417_v51  ;;  %v1822_v44 = vpack.c.bf16 %v1387_v59, %v1385_v58 }
 0x6c6   :  { %2206 = vmatmul.mubr.msk.bf16.vlgmr.msra.gmra.mxu1 %vm2657_vm9, %v1828_v57 }
 0x6cc   :  { %1823 = vmatmul.mubr.msk.bf16.gmra.mxu0 %vm2682_vm11, %v1822_v44 }
 0x784   :  { %v1972_v60 = vpop.f32.mrf.mxu0 }
 0x786   :  { %v2207_v61 = vpop.f32.mrf.mxu1  ;;  %v1973_v14 = vpop.f32.mrf.mxu0 }
 0x787   :  { %v1974_v62 = vadd.f32 %v1973_v14, %v1972_v60 }
 0x788   :  { %v1701_v63 = vpop.f32.mrf.mxu1  ;;  %v1975_v45 = vpop.f32.mrf.mxu0 }
 0x789   :  { %v1653_v26 = vadd.f32 %v1974_v62, %v1793_v20 }
 0x78a   :  { %v2208_v1 = vpop.f32.mrf.mxu1  ;;  %v1976_v2 = vpop.f32.mrf.mxu0 }
 0x78b   :  { %v1702_v3 = vadd.f32 %v1701_v63, %v1653_v26  ;;  %v1977_v4 = vadd.f32 %v1976_v2, %v1975_v45 }
 0x78c   :  { %v1978_v5 = vpop.f32.mrf.mxu0  ;;  %v1704_v8 = vpop.f32.mrf.mxu1 }
 0x78d   :  { %v1716_v6 = vadd.f32 %v2301_v41, %v1702_v3  ;;  %v1656_v7 = vadd.f32 %v1977_v4, %v1793_v20 }
 0x78e   :  { %v1979_v33 = vpop.f32.mrf.mxu0 }
 0x78f   :  { %1720 = vst [vmem:[%s2982_s16] sm:$0xff] %v1716_v6  ;;  %v1705_v43 = vadd.f32 %v1704_v8, %v1656_v7  ;;  %v1980_v9 = vadd.f32 %v1979_v33, %v1978_v5 }
 0x790   :  { %v1981_v39 = vpop.f32.mrf.mxu0 }
 0x791   :  { %v1717_v15 = vadd.f32 %v2302_v32, %v1705_v43  ;;  %v1661_v10 = vadd.f32 %v1980_v9, %v1793_v20 }
 0x792   :  { %v1982_v16 = vpop.f32.mrf.mxu0 }
 0x793   :  { %1721 = vst [vmem:[%s2982_s16 + $0x8] sm:$0xff] %v1717_v15  ;;  %v1710_v11 = vadd.f32 %v2207_v61, %v1661_v10  ;;  %v1983_v12 = vadd.f32 %v1982_v16, %v1981_v39 }
 0x795   :  { %v1718_v17 = vadd.f32 %v2303_v13, %v1710_v11  ;;  %v1664_v18 = vadd.f32 %v1983_v12, %v1793_v20 }
 0x797   :  { %1722 = vst [vmem:[%s2982_s16 + $0x10] sm:$0xff] %v1718_v17  ;;  %v1713_v19 = vadd.f32 %v2208_v1, %v1664_v18 }
 0x799   :  { %v1719_v22 = vadd.f32 %v2304_v21, %v1713_v19 }
 0x79b   :  { %1723 = vst [vmem:[%s2982_s16 + $0x18] sm:$0xff] %v1719_v22 }

// kernel: down_block_forward.5
= control target key start
LH: loop header
LB: loop body
LE: loop exit
PB: predicated region body
PF: predicated region fallthrough
CT: control target
= control target key end

     0   :  { %v2192_v0 = vmov 0.0   ;;  %vm2193_vm0 = vmmov 0   ;;  %vm125_vm1 = vcmask 523264   ;;  %v64_v27 = vlaneseq  ;;  %s2788_s10 = inlined_call_operand.vmem [shape: f32[64,64], index: 10, kind: input, shape index: {}]   ;;  %s2789_s0 = inlined_call_operand.vmem [shape: f32[32,64], index: 0, kind: input, shape index: {}]   ;;  %s2790_s1 = inlined_call_operand.vmem [shape: f32[2,32], index: 1, kind: input, shape index: {}]   ;;  %s2791_s14 = inlined_call_operand.vmem [shape: f32[32,16], index: 14, kind: input, shape index: {}]   ;;  %s2792_s13 = inlined_call_operand.vmem [shape: f32[32,2], index: 13, kind: input, shape index: {}]   ;;  %s2793_s2 = inlined_call_operand.vmem [shape: bf16[192,128], index: 2, kind: input, shape index: {}]   ;;  %s2794_s15 = inlined_call_operand.vmem [shape: f32[1,16], index: 15, kind: input, shape index: {}]   ;;  %s2795_s6 = inlined_call_operand.vmem [shape: f32[1,64], index: 6, kind: input, shape index: {}]   ;;  %s2796_s7 = inlined_call_operand.vmem [shape: f32[1,64], index: 7, kind: input, shape index: {}]   ;;  %s2797_s12 = inlined_call_operand.vmem [shape: f32[8,128], index: 12, kind: input, shape index: {}]   ;;  %s2798_s11 = inlined_call_operand.vmem [shape: f32[128,128], index: 11, kind: input, shape index: {}]   ;;  %s2799_s3 = inlined_call_operand.vmem [shape: f32[1,128], index: 3, kind: input, shape index: {}]   ;;  %s2800_s4 = inlined_call_operand.vmem [shape: bf16[384,128], index: 4, kind: input, shape index: {}]   ;;  %s2801_s16 = inlined_call_operand.vmem [shape: bf16[64,128], index: 16, kind: input, shape index: {}]   ;;  %s2802_s8 = inlined_call_operand.vmem [shape: f32[1,128], index: 8, kind: input, shape index: {}]   ;;  %s2803_s9 = inlined_call_operand.vmem [shape: f32[1,128], index: 9, kind: input, shape index: {}]   ;;  %s2804_s5 = inlined_call_operand.vmem [shape: f32[1,128], index: 5, kind: input, shape index: {}]   ;;  %s2805_s17 = inlined_call_operand.vmem [shape: f32[1,128], index: 17, kind: input, shape index: {}]   ;;  %s2806_s18 = inlined_call_operand.vmem [shape: f32[32,128], index: 18, kind: output, shape index: {}]  }
   0x1   :  { %2809 = sst [smem:[#allocation2_spill]] %s2788_s10  ;;  %1917 = vmatprep.subr.mxu0 %v2192_v0  ;;  %1933 = vmatprep.mubr.msk.f32.mxu0 %vm2193_vm0, %v2192_v0  ;;  %v622_v59 = vld [vmem:[%s2791_s14 + $0x18] sm:$0xff]  ;;  %v621_v60 = vld [vmem:[%s2791_s14 + $0x10] sm:$0xff]  ;;  %v620_v62 = vld [vmem:[%s2791_s14 + $0x8] sm:$0xff]  ;;  %vm630_vm2 = vcmask 261120   ;;  %vm708_vm3 = vcmask 15360  }
   0x2   :  { %2810 = sst [smem:[#allocation3_spill]] %s2789_s0  ;;  %1936 = vmatprep.subr.mxu1 %v2192_v0  ;;  %1952 = vmatprep.mubr.msk.f32.mxu1 %vm2193_vm0, %v2192_v0  ;;  %v2361_v30 = vshrl.u32 %v64_v27, 7  ;;  %v619_v63 = vld [vmem:[%s2791_s14] sm:$0xff]  ;;  %vm721_vm4 = vcmask 1041408   ;;  %vm408_vm5 = vcmask 1046528   ;;  %vm383_vm6 = vcmask 1040384  }
   0x3   :  { %2811 = sst [smem:[#allocation4_spill]] %s2790_s1  ;;  %v1714_v27 = vld [vmem:[%s2795_s6] ss:$0 sm:$0xff]  ;;  %vm823_vm10 = vcmask 64512   ;;  %vm2197_vm12 = vmmov 1  }
   0x4   :  { %s2812_s29 = sld [smem:[#allocation2_spill]]  ;;  %v2364_v31 = vsub.s32 0, %v2361_v30 }
   0x5   :  { %s2813_s22 = sld [smem:[#allocation3_spill]] }
   0x6   :  { %s2814_s26 = sld [smem:[#allocation4_spill]] }
   0xa   :  { %v147_v1 = vld [vmem:[%s2812_s29 + $0x38] sm:$0xff]  ;;  %v146_v2 = vld [vmem:[%s2812_s29 + $0x30] sm:$0xff]  ;;  %v145_v3 = vld [vmem:[%s2812_s29 + $0x28] sm:$0xff] }
   0xb   :  { %1918 = vmatpush3.msra.mxu0 %v147_v1  ;;  %v2310_v4 = vld [vmem:[%s2813_s22] sm:$0xff]  ;;  %1937 = vmatpush3.msra.mxu1 %v147_v1  ;;  %v61_v5 = vld [vmem:[%s2813_s22 + $0x8] sm:$0xff]  ;;  %v62_v6 = vld [vmem:[%s2813_s22 + $0x10] sm:$0xff] }
   0xc   :  { %1919 = vmatprep.subr.mxu0 %v2192_v0  ;;  %v63_v7 = vld [vmem:[%s2813_s22 + $0x18] sm:$0xff]  ;;  %v126_v8 = vsel %vm125_vm1, %v2310_v4, 0.0  ;;  %1938 = vmatprep.subr.mxu1 %v2192_v0  ;;  %v144_v9 = vld [vmem:[%s2812_s29 + $0x20] sm:$0xff]  ;;  %v127_v10 = vsel %vm125_vm1, %v61_v5, 0.0  ;;  %v129_v11 = vsel %vm125_vm1, %v62_v6, 0.0  ;;  %v142_v16 = vld [vmem:[%s2812_s29 + $0x10] sm:$0xff] }
   0xd   :  { %1920 = vmatpush3.msra.mxu0 %v146_v2  ;;  %1939 = vmatpush3.msra.mxu1 %v146_v2  ;;  %v128_v12 = vadd.f32 %v127_v10, %v126_v8  ;;  %v143_v13 = vld [vmem:[%s2812_s29 + $0x18] sm:$0xff]  ;;  %v131_v14 = vsel %vm125_vm1, %v63_v7, 0.0  ;;  %v141_v18 = vld [vmem:[%s2812_s29 + $0x8] sm:$0xff]  ;;  %v140_v20 = vld [vmem:[%s2812_s29] sm:$0xff] }
   0xe   :  { %1921 = vmatprep.subr.mxu0 %v2192_v0  ;;  %1940 = vmatprep.subr.mxu1 %v2192_v0  ;;  %v611_v28 = vld [vmem:[%s2814_s26] sm:$0x3]  ;;  %v2112_v8 = vld [vmem:[%s2793_s2 + $0x18] sm:$0xff]   ;;  %v2114_v10 = vld [vmem:[%s2793_s2 + $0x8] sm:$0xff]  }
   0xf   :  { %1922 = vmatpush3.msra.mxu0 %v145_v3  ;;  %1941 = vmatpush3.msra.mxu1 %v145_v3  ;;  %v130_v15 = vadd.f32 %v129_v11, %v128_v12  ;;  %v1735_v29 = vmul.f32 -1.442695, %v611_v28  ;;  %v704_v2 = vld [vmem:[%s2792_s13] sm:$0xff]  ;;  %v2194_v3 = vmov 0   ;;  %v2116_v12 = vld [vmem:[%s2793_s2 + $0x58] sm:$0xff]  }
  0x10   :  { %1923 = vmatprep.subr.mxu0 %v2192_v0  ;;  %1942 = vmatprep.subr.mxu1 %v2192_v0  ;;  %v2115_v11 = vld [vmem:[%s2793_s2] sm:$0xff]  }
  0x11   :  { %1924 = vmatpush3.msra.mxu0 %v144_v9  ;;  %1943 = vmatpush3.msra.mxu1 %v144_v9  ;;  %v132_v17 = vadd.f32 %v131_v14, %v130_v15  ;;  %2148 = vpow2.f32 %v1735_v29  ;;  %v2113_v9 = vld [vmem:[%s2793_s2 + $0x10] sm:$0xff]   ;;  %v2118_v14 = vld [vmem:[%s2793_s2 + $0x48] sm:$0xff]  }
  0x12   :  { %1925 = vmatprep.subr.mxu0 %v2192_v0  ;;  %1944 = vmatprep.subr.mxu1 %v2192_v0 }
  0x13   :  { %1926 = vmatpush3.msra.mxu0 %v143_v13  ;;  %1945 = vmatpush3.msra.mxu1 %v143_v13  ;;  %v133_v19 = vrot.slane %v132_v17, 4  ;;  %v2117_v13 = vld [vmem:[%s2793_s2 + $0x50] sm:$0xff]  }
  0x14   :  { %1927 = vmatprep.subr.mxu0 %v2192_v0  ;;  %1946 = vmatprep.subr.mxu1 %v2192_v0 }
  0x15   :  { %1928 = vmatpush3.msra.mxu0 %v142_v16  ;;  %1947 = vmatpush3.msra.mxu1 %v142_v16  ;;  %v134_v21 = vadd.f32 %v133_v19, %v132_v17 }
  0x16   :  { %1929 = vmatprep.subr.mxu0 %v2192_v0  ;;  %1948 = vmatprep.subr.mxu1 %v2192_v0 }
  0x17   :  { %1930 = vmatpush3.msra.mxu0 %v141_v18  ;;  %1949 = vmatpush3.msra.mxu1 %v141_v18  ;;  %v135_v22 = vrot.slane %v134_v21, 2  ;;  %v1736_v18 = vld [vmem:[%s2794_s15] ss:$0 sm:$0xff] }
  0x18   :  { %1931 = vmatprep.subr.mxu0 %v2192_v0  ;;  %1950 = vmatprep.subr.mxu1 %v2192_v0 }
  0x19   :  { %1932 = vmatpush3.msra.mxu0 %v140_v20  ;;  %1951 = vmatpush3.msra.mxu1 %v140_v20  ;;  %v136_v23 = vadd.f32 %v135_v22, %v134_v21  ;;  %v705_v22 = vld [vmem:[%s2792_s13 + $0x8] sm:$0xff] }
  0x1a   :  { %1955 = vmatprep.subr.mxu1 %v2192_v0  ;;  %562 = vmatprep.subr.bf16.mxu0 %v2194_v3 }
  0x1b   :  { %v137_v24 = vrot.slane %v136_v23, 1 }
  0x1d   :  { %v138_v25 = vadd.f32 %v137_v24, %v136_v23  ;;  %v706_v23 = vld [vmem:[%s2792_s13 + $0x10] sm:$0xff]  ;;  %v707_v24 = vld [vmem:[%s2792_s13 + $0x18] sm:$0xff] }
  0x1e   :  { %v2149_v46 = vpop.eup %2148 }
  0x1f   :  { %v139_v26 = vmul.f32 0.03125, %v138_v25  ;;  %v615_v51 = vadd.f32 1.0, %v2149_v46 }
  0x21   :  { %1934 = vmatmul.mubr.msk.f32.vlgmr.msra.gmra.mxu0 %vm125_vm1, %v139_v26  ;;  %2150 = vrcp.f32 %v615_v51 }
  0x2e   :  { %v2151_v61 = vpop.eup %2150 }
  0x2f   :  { %v618_v1 = vmul.f32 %v2151_v61, %v611_v28 }
  0xe1   :  { %v217_v32 = vpop.f32.mrf.mxu0 }
  0xe2   :  { %v224_v33 = vrot.slane %v217_v32, %v2364_v31 }
  0xe3   :  { %v1935_v34 = vpop.f32.mrf.mxu0 }
  0xe4   :  { %v2368_v35 = vsub.f32 %v2310_v4, %v224_v33  ;;  %v2370_v36 = vsub.f32 %v61_v5, %v224_v33  ;;  %v2372_v37 = vsub.f32 %v62_v6, %v224_v33  ;;  %v2374_v38 = vsub.f32 %v63_v7, %v224_v33  ;;  %v2108_v4 = vld [vmem:[%s2793_s2 + $0x38] sm:$0xff]   ;;  %v2109_v5 = vld [vmem:[%s2793_s2 + $0x30] sm:$0xff]   ;;  %v2110_v6 = vld [vmem:[%s2793_s2 + $0x28] sm:$0xff]  }
  0xe5   :  { %563 = vmatpush1.bf16.msra.mxu0 %v2108_v4  ;;  %v2111_v7 = vld [vmem:[%s2793_s2 + $0x20] sm:$0xff]  }
  0xe6   :  { %v229_v39 = vmul.f32 %v2368_v35, %v2368_v35  ;;  %v230_v40 = vmul.f32 %v2370_v36, %v2370_v36  ;;  %v231_v41 = vmul.f32 %v2372_v37, %v2372_v37  ;;  %v232_v42 = vmul.f32 %v2374_v38, %v2374_v38  ;;  %564 = vmatprep.subr.bf16.mxu0 %v2194_v3  ;;  %v1715_v34 = vld [vmem:[%s2796_s7] ss:$0 sm:$0xff] }
  0xe8   :  { %v233_v43 = vsel %vm125_vm1, %v229_v39, 0.0  ;;  %v234_v44 = vsel %vm125_vm1, %v230_v40, 0.0  ;;  %v236_v47 = vsel %vm125_vm1, %v231_v41, 0.0  ;;  %v238_v49 = vsel %vm125_vm1, %v232_v42, 0.0 }
  0xe9   :  { %v235_v45 = vadd.f32 %v234_v44, %v233_v43  ;;  %565 = vmatpush1.bf16.msra.mxu0 %v2109_v5 }
  0xea   :  { %566 = vmatprep.subr.bf16.mxu0 %v2194_v3 }
  0xeb   :  { %v237_v48 = vadd.f32 %v236_v47, %v235_v45 }
  0xed   :  { %v239_v50 = vadd.f32 %v238_v49, %v237_v48  ;;  %567 = vmatpush1.bf16.msra.mxu0 %v2110_v6 }
  0xee   :  { %568 = vmatprep.subr.bf16.mxu0 %v2194_v3 }
  0xef   :  { %v240_v52 = vrot.slane %v239_v50, 4 }
  0xf1   :  { %v241_v53 = vadd.f32 %v240_v52, %v239_v50  ;;  %569 = vmatpush1.bf16.msra.mxu0 %v2111_v7 }
  0xf2   :  { %570 = vmatprep.subr.bf16.mxu0 %v2194_v3 }
  0xf3   :  { %v242_v54 = vrot.slane %v241_v53, 2 }
  0xf5   :  { %v243_v55 = vadd.f32 %v242_v54, %v241_v53  ;;  %571 = vmatpush1.bf16.msra.mxu0 %v2112_v8 }
  0xf6   :  { %572 = vmatprep.subr.bf16.mxu0 %v2194_v3 }
  0xf7   :  { %v244_v56 = vrot.slane %v243_v55, 1 }
  0xf9   :  { %v245_v57 = vadd.f32 %v244_v56, %v243_v55  ;;  %573 = vmatpush1.bf16.msra.mxu0 %v2113_v9  ;;  %v2119_v55 = vld [vmem:[%s2793_s2 + $0x40] sm:$0xff]   ;;  %v66_v56 = vadd.s32 8, %v2361_v30  ;;  %s2195_s2 = smov 64  }
  0xfa   :  { %574 = vmatprep.subr.bf16.mxu0 %v2194_v3 }
  0xfb   :  { %v246_v58 = vmul.f32 0.03125, %v245_v57  ;;  %v68_v57 = vadd.s32 24, %v2361_v30  ;;  %v80_v61 = vand.u32 15, %v66_v56 }
  0xfd   :  { %1953 = vmatmul.mubr.msk.f32.vlgmr.msra.gmra.mxu1 %vm125_vm1, %v246_v58  ;;  %575 = vmatpush1.bf16.msra.mxu0 %v2114_v10  ;;  %vm2475_vm7 = vcmp.ne.s32.totalorder %v80_v61, 15 }
  0xfe   :  { %1956 = vmatpush3.msra.mxu1 %v622_v59  ;;  %1963 = vmatprep.mubr.msk.f32.mxu1 %vm2193_vm0, %v2192_v0  ;;  %vm1788_vm14 = vmpackc.low %vm2475_vm7, %vm2197_vm12 }
  0xff   :  { %1957 = vmatprep.subr.mxu1 %v2192_v0  ;;  %576 = vmatprep.subr.bf16.mxu0 %v2194_v3 }
 0x100   :  { %1958 = vmatpush3.msra.mxu1 %v621_v60 }
 0x101   :  { %1959 = vmatprep.subr.mxu1 %v2192_v0  ;;  %577 = vmatpush1.bf16.msra.mxu0 %v2115_v11 }
 0x102   :  { %1960 = vmatpush3.msra.mxu1 %v620_v62  ;;  %586 = vmatprep.subr.bf16.mxu0 %v2194_v3 }
 0x103   :  { %1961 = vmatprep.subr.mxu1 %v2192_v0 }
 0x104   :  { %1962 = vmatpush3.msra.mxu1 %v619_v63 }
 0x105   :  { %1964 = vmatmul.mubr.msk.f32.vlgmr.msra.gmra.mxu1 %vm630_vm2, %v618_v1  ;;  %587 = vmatpush2.bf16.msra.mxu0 %v2116_v12  ;;  %v94_v1 = vand.u32 15, %v68_v57 }
 0x106   :  { %1968 = vmatprep.mubr.msk.f32.mxu1 %vm708_vm3, %v704_v2  ;;  %588 = vmatprep.subr.bf16.mxu0 %v2194_v3 }
 0x107   :  { %vm2482_vm8 = vcmp.ne.s32.totalorder %v94_v1, 15  ;;  %v1041_v1 = vld [vmem:[%s2798_s11 + $0x68] sm:$0xff] }
 0x108   :  { %vm1791_vm15 = vmpackc.low %vm2482_vm8, %vm2197_vm12 }
 0x109   :  { %589 = vmatpush2.bf16.msra.mxu0 %v2117_v13 }
 0x10a   :  { %590 = vmatprep.subr.bf16.mxu0 %v2194_v3 }
 0x10d   :  { %591 = vmatpush2.bf16.msra.mxu0 %v2118_v14 }
 0x10e   :  { %592 = vmatprep.subr.bf16.mxu0 %v2194_v3 }
 0x111   :  { %593 = vmatpush2.bf16.msra.mxu0 %v2119_v55 }
 0x112   :  { %2025 = vmatprep.subr.mxu0 %v2192_v0 }
 0x1bd   :  { %v316_v15 = vpop.f32.mrf.mxu1 }
 0x1be   :  { %v317_v16 = vadd.f32 1e-05, %v316_v15  ;;  %v2146_v15 = vld [vmem:[%s2801_s16 + $0x8] sm:$0xff]  }
 0x1bf   :  { %v1954_v17 = vpop.f32.mrf.mxu1 }
 0x1c0   :  { %2152 = vrsqrt.f32 %v317_v16 }
 0x1c5   :  { %v700_v19 = vpop.f32.mrf.mxu1 }
 0x1c6   :  { %v701_v20 = vadd.f32 %v1736_v18, %v700_v19 }
 0x1c7   :  { %v1965_v21 = vpop.f32.mrf.mxu1 }
 0x1c8   :  { %1966 = vmatprep.subr.msk.mxu1 %vm721_vm4, %v701_v20 }
 0x1c9   :  { %1967 = vmatpush3.msk.msra.mxu1 %vm721_vm4, %v701_v20 }
 0x1ca   :  { %1969 = vmatmul.mubr.msk.f32.vlgmr.msra.gmra.mxu1 %vm708_vm3, %v705_v22 }
 0x1cb   :  { %1971 = vmatprep.mubr.msk.f32.mxu1 %vm708_vm3, %v706_v23 }
 0x1cd   :  { %v2153_v25 = vpop.eup %2152 }
 0x1ce   :  { %v324_v26 = vrot.slane %v2153_v25, %v2364_v31  ;;  %1972 = vmatmul.mubr.msk.f32.gmra.mxu1 %vm708_vm3, %v707_v24 }
 0x1d0   :  { %v325_v28 = vmul.f32 %v324_v26, %v2368_v35  ;;  %v326_v29 = vmul.f32 %v324_v26, %v2370_v36  ;;  %v327_v32 = vmul.f32 %v324_v26, %v2372_v37  ;;  %v328_v33 = vmul.f32 %v324_v26, %v2374_v38 }
 0x1d2   :  { %v336_v39 = vmul.f32 %v1714_v27, %v325_v28  ;;  %v337_v40 = vmul.f32 %v1714_v27, %v326_v29  ;;  %v338_v41 = vmul.f32 %v1714_v27, %v327_v32  ;;  %v339_v42 = vmul.f32 %v1714_v27, %v328_v33  ;;  %v810_v28 = vld [vmem:[%s2797_s12] sm:$0xff]  ;;  %s2196_s12 = smov 120   ;;  %v2145_v32 = vld [vmem:[%s2801_s16 + $0x10] sm:$0xff]  }
 0x1d3   :  { %1974 = vmatprep.subr.mxu1 %v810_v28  ;;  %v73_v29 = vand.u32 15, %v2361_v30 }
 0x1d4   :  { %v347_v43 = vadd.f32 %v1715_v34, %v336_v39  ;;  %v348_v44 = vadd.f32 %v1715_v34, %v337_v40  ;;  %v349_v45 = vadd.f32 %v1715_v34, %v338_v41  ;;  %v350_v46 = vadd.f32 %v1715_v34, %v339_v42  ;;  %1975 = vmatpush3.msra.mxu1 %v810_v28 }
 0x1d5   :  { %1982 = vmatprep.subr.mxu1 %v810_v28  ;;  %vm2500_vm9 = vcmp.ne.s32.totalorder %v73_v29, 0 }
 0x1d6   :  { %v1716_v47 = vmul.f32 -1.442695, %v347_v43  ;;  %v1717_v35 = vmul.f32 -1.442695, %v348_v44  ;;  %v1718_v48 = vmul.f32 -1.442695, %v349_v45  ;;  %vm1782_vm13 = vmpackc.low %vm2197_vm12, %vm2500_vm9 }
 0x1d7   :  { %v1719_v36 = vmul.f32 -1.442695, %v350_v46 }
 0x1d8   :  { %2154 = vpow2.f32 %v1716_v47 }
 0x1d9   :  { %2156 = vpow2.f32 %v1717_v35 }
 0x1da   :  { %2158 = vpow2.f32 %v1718_v48  ;;  %v67_v48 = vadd.s32 16, %v2361_v30 }
 0x1db   :  { %2160 = vpow2.f32 %v1719_v36 }
 0x1e5   :  { %v2155_v37 = vpop.eup %2154 }
 0x1e6   :  { %v2157_v38 = vpop.eup %2156  ;;  %v363_v49 = vadd.f32 1.0, %v2155_v37  ;;  %v87_v37 = vand.u32 15, %v67_v48 }
 0x1e7   :  { %v2159_v50 = vpop.eup %2158  ;;  %v364_v51 = vadd.f32 1.0, %v2157_v38 }
 0x1e8   :  { %v2161_v52 = vpop.eup %2160  ;;  %v365_v53 = vadd.f32 1.0, %v2159_v50  ;;  %2162 = vrcp.f32 %v363_v49  ;;  %vm2515_vm11 = vcmp.ne.s32.totalorder %v87_v37, 0  ;;  %v2190_v50 = vld [vmem:[%s2813_s22 + $0x10] sm:$0xff] }
 0x1e9   :  { %v366_v54 = vadd.f32 1.0, %v2161_v52  ;;  %2164 = vrcp.f32 %v364_v51 }
 0x1ea   :  { %2166 = vrcp.f32 %v365_v53 }
 0x1eb   :  { %2168 = vrcp.f32 %v366_v54 }
 0x1f5   :  { %v2163_v58 = vpop.eup %2162 }
 0x1f6   :  { %v2165_v59 = vpop.eup %2164  ;;  %v375_v60 = vmul.f32 %v2163_v58, %v347_v43 }
 0x1f7   :  { %v2167_v62 = vpop.eup %2166  ;;  %v376_v63 = vmul.f32 %v2165_v59, %v348_v44 }
 0x1f8   :  { %v2169_v2 = vpop.eup %2168  ;;  %v377_v3 = vmul.f32 %v2167_v62, %v349_v45  ;;  %v384_v4 = vrot.slane %v375_v60, 7  ;;  %v409_v5 = vrot.slane %v375_v60, 1  ;;  %v1043_v62 = vld [vmem:[%s2798_s11 + $0x78] sm:$0xff] }
 0x1f9   :  { %v385_v6 = vrot.slane %v376_v63, 7  ;;  %v410_v7 = vrot.slane %v376_v63, 1  ;;  %v2098_v8 = vpack.i.bf16 %v376_v63, %v375_v60  ;;  %v378_v9 = vmul.f32 %v2169_v2, %v350_v46  ;;  %v1042_v63 = vld [vmem:[%s2798_s11 + $0x70] sm:$0xff]  ;;  %v1040_v2 = vld [vmem:[%s2798_s11 + $0x60] sm:$0xff] }
 0x1fa   :  { %v412_v11 = vrot.slane %v377_v3, 1  ;;  %v387_v12 = vrot.slane %v377_v3, 7  ;;  %v395_v33 = vsel %vm383_vm6, 0.0, %v384_v4 }
 0x1fb   :  { %2099 = vrot.lane.b32.xlu1 %v2098_v8, %s2195_s2  ;;  %v411_v13 = vsel %vm408_vm5, %v409_v5, %v410_v7  ;;  %v386_v14 = vsel %vm383_vm6, %v384_v4, %v385_v6  ;;  %v414_v16 = vrot.slane %v378_v9, 1  ;;  %v2103_v18 = vpack.i.bf16 %v378_v9, %v377_v3  ;;  %v1039_v3 = vld [vmem:[%s2798_s11 + $0x58] sm:$0xff]  ;;  %v1038_v4 = vld [vmem:[%s2798_s11 + $0x50] sm:$0xff]  ;;  %v1037_v5 = vld [vmem:[%s2798_s11 + $0x48] sm:$0xff] }
 0x1fc   :  { %v413_v17 = vsel %vm408_vm5, %v410_v7, %v412_v11  ;;  %v388_v19 = vsel %vm383_vm6, %v385_v6, %v387_v12  ;;  %v389_v20 = vrot.slane %v378_v9, 7  ;;  %v404_v41 = vsel %vm2500_vm9, %v395_v33, 0.0  ;;  %v1036_v6 = vld [vmem:[%s2798_s11 + $0x40] sm:$0xff]  ;;  %v1035_v7 = vld [vmem:[%s2798_s11 + $0x38] sm:$0xff]  ;;  %v1034_v8 = vld [vmem:[%s2798_s11 + $0x30] sm:$0xff] }
 0x1fd   :  { %v430_v21 = vsel %vm2475_vm7, %v413_v17, 0.0  ;;  %v415_v22 = vsel %vm408_vm5, %v412_v11, %v414_v16  ;;  %v420_v23 = vsel %vm408_vm5, %v414_v16, 0.0  ;;  %v406_v54 = vsel %vm2515_vm11, %v388_v19, 0.0  ;;  %v1033_v9 = vld [vmem:[%s2798_s11 + $0x28] sm:$0xff]  ;;  %v1032_v11 = vld [vmem:[%s2798_s11 + $0x20] sm:$0xff] }
 0x1fe   :  { %v450_v24 = vpack.c.bf16 %v430_v21, %v411_v13  ;;  %v432_v25 = vsel %vm2482_vm8, %v420_v23, 0.0  ;;  %v390_v26 = vsel %vm383_vm6, %v387_v12, %v389_v20  ;;  %v1031_v12 = vld [vmem:[%s2798_s11 + $0x18] sm:$0xff]  ;;  %v1030_v13 = vld [vmem:[%s2798_s11 + $0x10] sm:$0xff]  ;;  %v1028_v16 = vld [vmem:[%s2798_s11] sm:$0xff] }
 0x1ff   :  { %v452_v27 = vpack.c.bf16 %v432_v25, %v415_v22  ;;  %v1720_v21 = vld [vmem:[%s2799_s3] ss:$0 sm:$0xff] }
 0x200   :  { %1733 = vmatprep.mubr.msk.bf16.mxu0 %vm125_vm1, %v450_v24 }
 0x26d   :  { %v2100_v34 = vpop.permute.xlu1 %2099 }
 0x26e   :  { %v2102_v39 = vunpack.i.h.bf16 %v2100_v34  ;;  %v2101_v40 = vunpack.i.l.bf16 %v2100_v34 }
 0x270   :  { %v445_v42 = vsel %vm125_vm1, %v404_v41, %v2101_v40  ;;  %v446_v43 = vsel %vm125_vm1, %v386_v14, %v2102_v39  ;;  %v1029_v14 = vld [vmem:[%s2798_s11 + $0x8] sm:$0xff] }
 0x271   :  { %v449_v44 = vpack.c.bf16 %v446_v43, %v445_v42 }
 0x273   :  { %595 = vmatmul.mubr.bf16.vlgmr.msra.gmra.mxu0 %v449_v44 }
 0x274   :  { %1734 = vmatprep.mubr.msk.bf16.mxu0 %vm125_vm1, %v452_v27  ;;  %2026 = vmatpush3.msra.mxu0 %v1043_v62 }
 0x275   :  { %2027 = vmatprep.subr.mxu0 %v2192_v0 }
 0x276   :  { %2028 = vmatpush3.msra.mxu0 %v1042_v63 }
 0x277   :  { %2029 = vmatprep.subr.mxu0 %v2192_v0 }
 0x278   :  { %2030 = vmatpush3.msra.mxu0 %v1041_v1 }
 0x279   :  { %2031 = vmatprep.subr.mxu0 %v2192_v0 }
 0x27a   :  { %2032 = vmatpush3.msra.mxu0 %v1040_v2 }
 0x27b   :  { %2033 = vmatprep.subr.mxu0 %v2192_v0 }
 0x27c   :  { %2034 = vmatpush3.msra.mxu0 %v1039_v3 }
 0x27d   :  { %2035 = vmatprep.subr.mxu0 %v2192_v0 }
 0x27e   :  { %2036 = vmatpush3.msra.mxu0 %v1038_v4 }
 0x27f   :  { %2037 = vmatprep.subr.mxu0 %v2192_v0 }
 0x280   :  { %2038 = vmatpush3.msra.mxu0 %v1037_v5 }
 0x281   :  { %2039 = vmatprep.subr.mxu0 %v2192_v0 }
 0x282   :  { %2040 = vmatpush3.msra.mxu0 %v1036_v6 }
 0x283   :  { %2041 = vmatprep.subr.mxu0 %v2192_v0 }
 0x284   :  { %2042 = vmatpush3.msra.mxu0 %v1035_v7 }
 0x285   :  { %2043 = vmatprep.subr.mxu0 %v2192_v0 }
 0x286   :  { %2044 = vmatpush3.msra.mxu0 %v1034_v8 }
 0x287   :  { %2045 = vmatprep.subr.mxu0 %v2192_v0 }
 0x288   :  { %2046 = vmatpush3.msra.mxu0 %v1033_v9 }
 0x289   :  { %2047 = vmatprep.subr.mxu0 %v2192_v0 }
 0x28a   :  { %v1970_v45 = vpop.f32.mrf.mxu1  ;;  %2048 = vmatpush3.msra.mxu0 %v1032_v11 }
 0x28b   :  { %2049 = vmatprep.subr.mxu0 %v2192_v0 }
 0x28c   :  { %v791_v46 = vpop.f32.mrf.mxu1  ;;  %2050 = vmatpush3.msra.mxu0 %v1031_v12 }
 0x28d   :  { %815 = vrot.lane.b32.xlu0 %v791_v46, %s2196_s12  ;;  %2051 = vmatprep.subr.mxu0 %v2192_v0 }
 0x28e   :  { %v1973_v47 = vpop.f32.mrf.mxu1  ;;  %2052 = vmatpush3.msra.mxu0 %v1030_v13 }
 0x28f   :  { %2053 = vmatprep.subr.mxu0 %v2192_v0 }
 0x290   :  { %v801_v35 = vpop.f32.mrf.mxu1  ;;  %2054 = vmatpush3.msra.mxu0 %v1029_v14 }
 0x291   :  { %817 = vrot.lane.b32.xlu0 %v1970_v45, %s2196_s12  ;;  %819 = vrot.lane.b32.xlu1 %v801_v35, %s2196_s12 }
 0x292   :  { %2055 = vmatprep.subr.mxu0 %v2192_v0 }
 0x293   :  { %2056 = vmatpush3.msra.mxu0 %v1028_v16 }
 0x295   :  { %821 = vrot.lane.b32.xlu0 %v1973_v47, %s2196_s12  ;;  %2104 = vrot.lane.b32.xlu1 %v2103_v18, %s2195_s2 }
 0x2ff   :  { %v816_v36 = vpop.permute.xlu0 %815 }
 0x300   :  { %1976 = vmatprep.mubr.msk.f32.mxu1 %vm823_vm10, %v816_v36 }
 0x303   :  { %v818_v38 = vpop.permute.xlu0 %817  ;;  %v820_v49 = vpop.permute.xlu1 %819 }
 0x304   :  { %1977 = vmatmul.mubr.msk.f32.vlgmr.msra.gmra.mxu1 %vm823_vm10, %v818_v38 }
 0x305   :  { %1983 = vmatpush3.msra.mxu1 %v810_v28  ;;  %1979 = vmatprep.mubr.msk.f32.mxu1 %vm823_vm10, %v820_v49 }
 0x306   :  { %1990 = vmatprep.subr.mxu1 %v2192_v0 }
 0x307   :  { %v822_v51 = vpop.permute.xlu0 %821  ;;  %v2105_v52 = vpop.permute.xlu1 %2104 }
 0x308   :  { %v2107_v30 = vunpack.i.h.bf16 %v2105_v52  ;;  %v2106_v53 = vunpack.i.l.bf16 %v2105_v52  ;;  %1980 = vmatmul.mubr.msk.f32.gmra.mxu1 %vm823_vm10, %v822_v51 }
 0x309   :  { %1984 = vmatprep.mubr.msk.f32.mxu1 %vm823_vm10, %v791_v46 }
 0x30a   :  { %v447_v55 = vsel %vm125_vm1, %v406_v54, %v2106_v53  ;;  %v448_v56 = vsel %vm125_vm1, %v390_v26, %v2107_v30 }
 0x30b   :  { %v451_v57 = vpack.c.bf16 %v448_v56, %v447_v55 }
 0x30c   :  { %1985 = vmatmul.mubr.msk.f32.vlgmr.msra.gmra.mxu1 %vm823_vm10, %v1970_v45 }
 0x30d   :  { %603 = vmatmul.mubr.bf16.gmra.mxu0 %v451_v57  ;;  %1987 = vmatprep.mubr.msk.f32.mxu1 %vm823_vm10, %v801_v35 }
 0x30e   :  { %2057 = vmatprep.mubr.msk.f32.mxu0 %vm2193_vm0, %v2192_v0  ;;  %1991 = vmatpush3.msra.mxu1 %v1043_v62 }
 0x30f   :  { %1992 = vmatprep.subr.mxu1 %v2192_v0 }
 0x310   :  { %1988 = vmatmul.mubr.msk.f32.gmra.mxu1 %vm823_vm10, %v1973_v47 }
 0x311   :  { %2022 = vmatprep.mubr.msk.f32.mxu1 %vm2193_vm0, %v2192_v0  ;;  %1993 = vmatpush3.msra.mxu1 %v1042_v63  ;;  %vm1785_vm0 = vmpackc.low %vm2197_vm12, %vm2515_vm11 }
 0x312   :  { %1994 = vmatprep.subr.mxu1 %v2192_v0 }
 0x313   :  { %1995 = vmatpush3.msra.mxu1 %v1041_v1 }
 0x314   :  { %1996 = vmatprep.subr.mxu1 %v2192_v0 }
 0x315   :  { %1997 = vmatpush3.msra.mxu1 %v1040_v2 }
 0x316   :  { %1998 = vmatprep.subr.mxu1 %v2192_v0 }
 0x317   :  { %1999 = vmatpush3.msra.mxu1 %v1039_v3 }
 0x318   :  { %2000 = vmatprep.subr.mxu1 %v2192_v0 }
 0x319   :  { %2001 = vmatpush3.msra.mxu1 %v1038_v4 }
 0x31a   :  { %2002 = vmatprep.subr.mxu1 %v2192_v0 }
 0x31b   :  { %2003 = vmatpush3.msra.mxu1 %v1037_v5 }
 0x31c   :  { %2004 = vmatprep.subr.mxu1 %v2192_v0 }
 0x31d   :  { %2005 = vmatpush3.msra.mxu1 %v1036_v6 }
 0x31e   :  { %2006 = vmatprep.subr.mxu1 %v2192_v0 }
 0x31f   :  { %2007 = vmatpush3.msra.mxu1 %v1035_v7 }
 0x320   :  { %2008 = vmatprep.subr.mxu1 %v2192_v0 }
 0x321   :  { %2009 = vmatpush3.msra.mxu1 %v1034_v8 }
 0x322   :  { %2010 = vmatprep.subr.mxu1 %v2192_v0 }
 0x323   :  { %2011 = vmatpush3.msra.mxu1 %v1033_v9 }
 0x324   :  { %2012 = vmatprep.subr.mxu1 %v2192_v0 }
 0x325   :  { %2013 = vmatpush3.msra.mxu1 %v1032_v11 }
 0x326   :  { %2014 = vmatprep.subr.mxu1 %v2192_v0 }
 0x327   :  { %2015 = vmatpush3.msra.mxu1 %v1031_v12 }
 0x328   :  { %2016 = vmatprep.subr.mxu1 %v2192_v0 }
 0x329   :  { %2017 = vmatpush3.msra.mxu1 %v1030_v13 }
 0x32a   :  { %2018 = vmatprep.subr.mxu1 %v2192_v0 }
 0x32b   :  { %2019 = vmatpush3.msra.mxu1 %v1029_v14 }
 0x32c   :  { %2020 = vmatprep.subr.mxu1 %v2192_v0 }
 0x32d   :  { %2021 = vmatpush3.msra.mxu1 %v1028_v16 }
 0x333   :  { %v2533_v58 = vpop.f32.mrf.mxu0 }
 0x334   :  { %v597_v26 = vadd.f32 %v1720_v21, %v2533_v58 }
 0x335   :  { %v598_v59 = vpop.f32.mrf.mxu0 }
 0x337   :  { %v2535_v60 = vpop.f32.mrf.mxu0 }
 0x338   :  { %v600_v27 = vadd.f32 %v1720_v21, %v2535_v60 }
 0x339   :  { %v601_v61 = vpop.f32.mrf.mxu0 }
 0x3c4   :  { %v1978_v17 = vpop.f32.mrf.mxu1 }
 0x3c6   :  { %v898_v18 = vpop.f32.mrf.mxu1 }
 0x3c8   :  { %v1981_v19 = vpop.f32.mrf.mxu1 }
 0x3ca   :  { %v908_v20 = vpop.f32.mrf.mxu1 }
 0x3cc   :  { %v1986_v22 = vpop.f32.mrf.mxu1 }
 0x3cd   :  { %v997_v23 = vadd.f32 1.0, %v1986_v22  ;;  %v604_v24 = vpop.f32.mrf.mxu0  ;;  %v2124_v22 = vld [vmem:[%s2800_s4 + $0x30] sm:$0xff]  }
 0x3ce   :  { %v991_v25 = vpop.f32.mrf.mxu1  ;;  %v605_v43 = vadd.f32 %v1720_v21, %v604_v24  ;;  %v2126_v24 = vld [vmem:[%s2800_s4 + $0x68] sm:$0xff]  }
 0x3cf   :  { %v992_v28 = vadd.f32 1.0, %v991_v25  ;;  %v606_v0 = vpop.f32.mrf.mxu0  ;;  %v1011_v33 = vmul.f32 %v997_v23, %v600_v27  ;;  %v2125_v23 = vld [vmem:[%s2800_s4 + $0xb0] sm:$0xff]   ;;  %v2127_v25 = vld [vmem:[%s2800_s4 + $0x28] sm:$0xff]   ;;  %v2129_v27 = vld [vmem:[%s2800_s4 + $0x60] sm:$0xff]  }
 0x3d0   :  { %v1989_v29 = vpop.f32.mrf.mxu1  ;;  %v2131_v0 = vld [vmem:[%s2800_s4 + $0xa0] sm:$0xff]  }
 0x3d1   :  { %v1010_v34 = vmul.f32 %v992_v28, %v597_v26  ;;  %v1007_v39 = vadd.f32 1.0, %v1989_v29  ;;  %v607_v40 = vpop.f32.mrf.mxu0  ;;  %v1015_v47 = vadd.f32 %v1978_v17, %v1011_v33  ;;  %v2128_v26 = vld [vmem:[%s2800_s4 + $0xa8] sm:$0xff]   ;;  %v2130_v28 = vld [vmem:[%s2800_s4 + $0x20] sm:$0xff]   ;;  %v2132_v29 = vld [vmem:[%s2800_s4 + $0x58] sm:$0xff]  }
 0x3d2   :  { %v608_v41 = vadd.f32 %v1720_v21, %v607_v40  ;;  %v1001_v42 = vpop.f32.mrf.mxu1  ;;  %v2123_v21 = vld [vmem:[%s2800_s4 + $0x70] sm:$0xff]   ;;  %v2134_v33 = vld [vmem:[%s2800_s4 + $0x98] sm:$0xff]  }
 0x3d3   :  { %v1014_v44 = vadd.f32 %v1010_v34, %v898_v18  ;;  %v1002_v45 = vadd.f32 1.0, %v1001_v42  ;;  %v609_v46 = vpop.f32.mrf.mxu0  ;;  %v2120_v18 = vld [vmem:[%s2800_s4 + $0x78] sm:$0xff]   ;;  %v2137_v40 = vld [vmem:[%s2800_s4 + $0x90] sm:$0xff]   ;;  %v2138_v42 = vld [vmem:[%s2800_s4 + $0x48] sm:$0xff]  }
 0x3d4   :  { %v1013_v35 = vmul.f32 %v1007_v39, %v608_v41  ;;  %1873 = vmatprep.subr.bf16.mxu1 %v2120_v18  ;;  %v2133_v34 = vld [vmem:[%s2800_s4 + $0x18] sm:$0xff]   ;;  %v2135_v39 = vld [vmem:[%s2800_s4 + $0x50] sm:$0xff]   ;;  %v2142_v46 = vld [vmem:[%s2800_s4] sm:$0xff]  }
 0x3d5   :  { %v1012_v48 = vmul.f32 %v1002_v45, %v605_v43  ;;  %v1018_v36 = vadd.f32 %v1015_v47, %v1014_v44  ;;  %v2136_v41 = vld [vmem:[%s2800_s4 + $0x10] sm:$0xff]   ;;  %v2140_v43 = vld [vmem:[%s2800_s4 + $0x88] sm:$0xff]   ;;  %v2141_v45 = vld [vmem:[%s2800_s4 + $0x40] sm:$0xff]  }
 0x3d6   :  { %v1017_v38 = vadd.f32 %v1981_v19, %v1013_v35  ;;  %v2121_v19 = vld [vmem:[%s2800_s4 + $0x38] sm:$0xff]  }
 0x3d7   :  { %v1016_v37 = vadd.f32 %v1012_v48, %v908_v20  ;;  %v2122_v20 = vld [vmem:[%s2800_s4 + $0xb8] sm:$0xff]  }
 0x3d8   :  { %2060 = vmatprep.subr.bf16.mxu0 %v2122_v20  ;;  %v2712_v35 = vld [vmem:[%s2801_s16 + $0x18] sm:$0xff]  }
 0x3d9   :  { %v1019_v49 = vadd.f32 %v1018_v36, %v1016_v37 }
 0x3db   :  { %v1020_v51 = vadd.f32 %v1019_v49, %v1017_v38 }
 0x3dd   :  { %v1021_v52 = vrot.slane %v1020_v51, 4 }
 0x3df   :  { %v1022_v30 = vadd.f32 %v1021_v52, %v1020_v51  ;;  %v1751_v51 = vld [vmem:[%s2802_s8] ss:$0 sm:$0xff] }
 0x3e1   :  { %v1023_v53 = vrot.slane %v1022_v30, 2 }
 0x3e3   :  { %v1024_v54 = vadd.f32 %v1023_v53, %v1022_v30 }
 0x3e5   :  { %v1025_v55 = vrot.slane %v1024_v54, 1 }
 0x3e7   :  { %v1026_v56 = vadd.f32 %v1025_v55, %v1024_v54  ;;  %v1752_v55 = vld [vmem:[%s2803_s9] ss:$0 sm:$0xff] }
 0x3e9   :  { %v1027_v57 = vmul.f32 0.03125, %v1026_v56 }
 0x3eb   :  { %2023 = vmatmul.mubr.f32.vlgmr.msra.gmra.mxu1 %v1027_v57 }
 0x3ec   :  { %1874 = vmatpush3.bf16.msra.mxu1 %v2121_v19 }
 0x3ed   :  { %1875 = vmatprep.subr.bf16.mxu1 %v2123_v21 }
 0x3f0   :  { %1876 = vmatpush3.bf16.msra.mxu1 %v2124_v22 }
 0x3f1   :  { %1877 = vmatprep.subr.bf16.mxu1 %v2126_v24 }
 0x3f4   :  { %1878 = vmatpush3.bf16.msra.mxu1 %v2127_v25 }
 0x3f5   :  { %1879 = vmatprep.subr.bf16.mxu1 %v2129_v27 }
 0x3f8   :  { %1880 = vmatpush3.bf16.msra.mxu1 %v2130_v28 }
 0x3f9   :  { %1881 = vmatprep.subr.bf16.mxu1 %v2132_v29 }
 0x3fc   :  { %1882 = vmatpush3.bf16.msra.mxu1 %v2133_v34 }
 0x3fd   :  { %1883 = vmatprep.subr.bf16.mxu1 %v2135_v39 }
 0x400   :  { %1884 = vmatpush3.bf16.msra.mxu1 %v2136_v41 }
 0x401   :  { %1885 = vmatprep.subr.bf16.mxu1 %v2138_v42 }
 0x4ab   :  { %v1110_v58 = vpop.f32.mrf.mxu1 }
 0x4ac   :  { %v1117_v59 = vrot.slane %v1110_v58, %v2364_v31 }
 0x4ad   :  { %v2024_v60 = vpop.f32.mrf.mxu1 }
 0x4ae   :  { %v2621_v61 = vsub.f32 %v1014_v44, %v1117_v59  ;;  %v2623_v62 = vsub.f32 %v1015_v47, %v1117_v59  ;;  %v2625_v63 = vsub.f32 %v1016_v37, %v1117_v59  ;;  %v2627_v1 = vsub.f32 %v1017_v38, %v1117_v59  ;;  %v2139_v44 = vld [vmem:[%s2800_s4 + $0x8] sm:$0xff]   ;;  %v2143_v47 = vld [vmem:[%s2800_s4 + $0x80] sm:$0xff]  }
 0x4af   :  { %1886 = vmatpush3.bf16.msra.mxu1 %v2139_v44 }
 0x4b0   :  { %v1122_v2 = vmul.f32 %v2621_v61, %v2621_v61  ;;  %v1123_v3 = vmul.f32 %v2623_v62, %v2623_v62  ;;  %v1124_v4 = vmul.f32 %v2625_v63, %v2625_v63  ;;  %v1125_v6 = vmul.f32 %v2627_v1, %v2627_v1  ;;  %1887 = vmatprep.subr.bf16.mxu1 %v2141_v45 }
 0x4b2   :  { %v1126_v5 = vadd.f32 %v1123_v3, %v1122_v2 }
 0x4b3   :  { %1888 = vmatpush3.bf16.msra.mxu1 %v2142_v46 }
 0x4b4   :  { %v1127_v7 = vadd.f32 %v1126_v5, %v1124_v4  ;;  %2080 = vmatprep.subr.bf16.mxu1 %v2712_v35 }
 0x4b6   :  { %v1128_v8 = vadd.f32 %v1127_v7, %v1125_v6 }
 0x4b8   :  { %v1129_v9 = vrot.slane %v1128_v8, 4 }
 0x4ba   :  { %v1130_v11 = vadd.f32 %v1129_v9, %v1128_v8 }
 0x4bc   :  { %v1131_v12 = vrot.slane %v1130_v11, 2 }
 0x4be   :  { %v1132_v13 = vadd.f32 %v1131_v12, %v1130_v11 }
 0x4c0   :  { %v1133_v14 = vrot.slane %v1132_v13, 1 }
 0x4c2   :  { %v1134_v16 = vadd.f32 %v1133_v14, %v1132_v13 }
 0x4c4   :  { %v1135_v17 = vmul.f32 0.03125, %v1134_v16 }
 0x4c6   :  { %2058 = vmatmul.mubr.f32.vlgmr.msra.gmra.mxu0 %v1135_v17 }
 0x4c7   :  { %2061 = vmatpush3.bf16.msra.mxu0 %v2122_v20 }
 0x4c8   :  { %2062 = vmatprep.subr.bf16.mxu0 %v2125_v23 }
 0x4cb   :  { %2063 = vmatpush3.bf16.msra.mxu0 %v2125_v23 }
 0x4cc   :  { %2064 = vmatprep.subr.bf16.mxu0 %v2128_v26 }
 0x4cf   :  { %2065 = vmatpush3.bf16.msra.mxu0 %v2128_v26 }
 0x4d0   :  { %2066 = vmatprep.subr.bf16.mxu0 %v2131_v0 }
 0x4d3   :  { %2067 = vmatpush3.bf16.msra.mxu0 %v2131_v0 }
 0x4d4   :  { %2068 = vmatprep.subr.bf16.mxu0 %v2134_v33 }
 0x4d7   :  { %2069 = vmatpush3.bf16.msra.mxu0 %v2134_v33 }
 0x4d8   :  { %2070 = vmatprep.subr.bf16.mxu0 %v2137_v40 }
 0x4db   :  { %2071 = vmatpush3.bf16.msra.mxu0 %v2137_v40 }
 0x4dc   :  { %2072 = vmatprep.subr.bf16.mxu0 %v2140_v43 }
 0x4df   :  { %2073 = vmatpush3.bf16.msra.mxu0 %v2140_v43 }
 0x4e0   :  { %2074 = vmatprep.subr.bf16.mxu0 %v2143_v47 }
 0x4e3   :  { %2075 = vmatpush3.bf16.msra.mxu0 %v2143_v47 }
 0x586   :  { %v1202_v48 = vpop.f32.mrf.mxu0 }
 0x587   :  { %v1203_v36 = vadd.f32 1e-05, %v1202_v48  ;;  %v2188_v48 = vld [vmem:[%s2813_s22] sm:$0xff] }
 0x588   :  { %v2059_v37 = vpop.f32.mrf.mxu0 }
 0x589   :  { %2170 = vrsqrt.f32 %v1203_v36 }
 0x596   :  { %v2171_v38 = vpop.eup %2170 }
 0x597   :  { %v1210_v49 = vrot.slane %v2171_v38, %v2364_v31  ;;  %v2147_v38 = vld [vmem:[%s2801_s16] sm:$0xff]  }
 0x599   :  { %v1211_v52 = vmul.f32 %v1210_v49, %v2621_v61  ;;  %v1212_v30 = vmul.f32 %v1210_v49, %v2623_v62  ;;  %v1213_v53 = vmul.f32 %v1210_v49, %v2625_v63  ;;  %v1214_v54 = vmul.f32 %v1210_v49, %v2627_v1  ;;  %v2191_v49 = vld [vmem:[%s2813_s22 + $0x18] sm:$0xff] }
 0x59b   :  { %v1222_v56 = vmul.f32 %v1751_v51, %v1211_v52  ;;  %v1223_v57 = vmul.f32 %v1751_v51, %v1212_v30  ;;  %v1224_v58 = vmul.f32 %v1751_v51, %v1213_v53  ;;  %v1225_v31 = vmul.f32 %v1751_v51, %v1214_v54 }
 0x59c   :  { %v1605_v51 = vpack.c.bf16 %v2191_v49, %v2190_v50 }
 0x59d   :  { %v1233_v59 = vadd.f32 %v1752_v55, %v1222_v56  ;;  %v1234_v60 = vadd.f32 %v1752_v55, %v1223_v57  ;;  %v1235_v2 = vadd.f32 %v1752_v55, %v1224_v58  ;;  %v1236_v3 = vadd.f32 %v1752_v55, %v1225_v31 }
 0x59f   :  { %v1753_v4 = vmul.f32 -1.442695, %v1233_v59  ;;  %v1754_v61 = vmul.f32 -1.442695, %v1234_v60  ;;  %v1755_v5 = vmul.f32 -1.442695, %v1235_v2 }
 0x5a0   :  { %v1756_v62 = vmul.f32 -1.442695, %v1236_v3 }
 0x5a1   :  { %2172 = vpow2.f32 %v1753_v4 }
 0x5a2   :  { %2174 = vpow2.f32 %v1754_v61 }
 0x5a3   :  { %2176 = vpow2.f32 %v1755_v5  ;;  %v1794_v5 = vld [vmem:[%s2805_s17] ss:$0 sm:$0xff] }
 0x5a4   :  { %2178 = vpow2.f32 %v1756_v62 }
 0x5ae   :  { %v2173_v63 = vpop.eup %2172 }
 0x5af   :  { %v2175_v1 = vpop.eup %2174  ;;  %v1249_v6 = vadd.f32 1.0, %v2173_v63 }
 0x5b0   :  { %v2177_v7 = vpop.eup %2176  ;;  %v1250_v8 = vadd.f32 1.0, %v2175_v1 }
 0x5b1   :  { %v2179_v9 = vpop.eup %2178  ;;  %v1251_v11 = vadd.f32 1.0, %v2177_v7  ;;  %2180 = vrcp.f32 %v1249_v6 }
 0x5b2   :  { %2182 = vrcp.f32 %v1250_v8  ;;  %v1252_v12 = vadd.f32 1.0, %v2179_v9 }
 0x5b3   :  { %2184 = vrcp.f32 %v1251_v11 }
 0x5b4   :  { %2186 = vrcp.f32 %v1252_v12 }
 0x5be   :  { %v2181_v13 = vpop.eup %2180 }
 0x5bf   :  { %v2183_v14 = vpop.eup %2182  ;;  %v1261_v16 = vmul.f32 %v2181_v13, %v1233_v59 }
 0x5c0   :  { %v2185_v17 = vpop.eup %2184  ;;  %v1262_v18 = vmul.f32 %v2183_v14, %v1234_v60  ;;  %v1757_v60 = vld [vmem:[%s2804_s5] ss:$0 sm:$0xff] }
 0x5c1   :  { %v2187_v19 = vpop.eup %2186  ;;  %v1269_v20 = vrot.slane %v1261_v16, 7  ;;  %v1263_v21 = vmul.f32 %v2185_v17, %v1235_v2  ;;  %v1285_v22 = vrot.slane %v1261_v16, 1 }
 0x5c2   :  { %v1270_v23 = vrot.slane %v1262_v18, 7  ;;  %v1302_v24 = vpack.c.bf16 %v1262_v18, %v1261_v16  ;;  %v1286_v25 = vrot.slane %v1262_v18, 1  ;;  %v1264_v26 = vmul.f32 %v2187_v19, %v1236_v3 }
 0x5c3   :  { %v1280_v27 = vsel %vm383_vm6, 0.0, %v1269_v20  ;;  %v1288_v28 = vrot.slane %v1263_v21, 1  ;;  %v1272_v41 = vrot.slane %v1263_v21, 7 }
 0x5c4   :  { %1538 = vmatprep.mubr.bf16.mxu1 %v1302_v24  ;;  %v1271_v0 = vsel %vm383_vm6, %v1269_v20, %v1270_v23  ;;  %v1287_v29 = vsel %vm408_vm5, %v1285_v22, %v1286_v25  ;;  %v1290_v33 = vrot.slane %v1264_v26, 1  ;;  %v1305_v40 = vpack.c.bf16 %v1264_v26, %v1263_v21 }
 0x5c5   :  { %v1783_v34 = vpack.c.bf16 %v1271_v0, %v1280_v27  ;;  %v1289_v39 = vsel %vm408_vm5, %v1286_v25, %v1288_v28  ;;  %v1274_v45 = vrot.slane %v1264_v26, 7  ;;  %v1273_v10 = vsel %vm383_vm6, %v1270_v23, %v1272_v41 }
 0x5c6   :  { %v1789_v42 = vpack.c.bf16 %v1289_v39, %v1287_v29  ;;  %v1291_v43 = vsel %vm408_vm5, %v1288_v28, %v1290_v33  ;;  %v1296_v44 = vsel %vm408_vm5, %v1290_v33, 0.0 }
 0x5c7   :  { %1784 = vmatmul.mubr.msk.bf16.vlgmr.msra.gmra.mxu1 %vm1782_vm13, %v1783_v34  ;;  %v1792_v46 = vpack.c.bf16 %v1296_v44, %v1291_v43  ;;  %v1275_v47 = vsel %vm383_vm6, %v1272_v41, %v1274_v45 }
 0x5c8   :  { %2076 = vmatprep.mubr.msk.bf16.mxu0 %vm1788_vm14, %v1789_v42  ;;  %1546 = vmatprep.mubr.bf16.mxu1 %v1305_v40  ;;  %v1786_v37 = vpack.c.bf16 %v1275_v47, %v1273_v10 }
 0x5c9   :  { %2077 = vmatmul.mubr.msk.bf16.vlgmr.msra.gmra.mxu0 %vm1791_vm15, %v1792_v46  ;;  %2081 = vmatpush3.bf16.msra.mxu1 %v2712_v35  ;;  %v2189_v35 = vld [vmem:[%s2813_s22 + $0x8] sm:$0xff] }
 0x5ca   :  { %2082 = vmatprep.subr.bf16.mxu1 %v2145_v32  ;;  %v1604_v36 = vpack.c.bf16 %v2189_v35, %v2188_v48 }
 0x5cd   :  { %2083 = vmatpush3.bf16.msra.mxu1 %v2145_v32 }
 0x5ce   :  { %2084 = vmatprep.subr.bf16.mxu1 %v2146_v15 }
 0x5cf   :  { %1787 = vmatmul.mubr.msk.bf16.gmra.mxu1 %vm1785_vm0, %v1786_v37 }
 0x5d0   :  { %2088 = vmatprep.mubr.msk.bf16.mxu1 %vm125_vm1, %v1604_v36 }
 0x5d1   :  { %2085 = vmatpush3.bf16.msra.mxu1 %v2146_v15 }
 0x5d2   :  { %2086 = vmatprep.subr.bf16.mxu1 %v2147_v38 }
 0x5d5   :  { %2087 = vmatpush3.bf16.msra.mxu1 %v2147_v38 }
 0x5d8   :  { %2089 = vmatmul.mubr.msk.bf16.vlgmr.msra.gmra.mxu1 %vm125_vm1, %v1605_v51 }
 0x687   :  { %v1889_v52 = vpop.f32.mrf.mxu1 }
 0x689   :  { %v1890_v30 = vpop.f32.mrf.mxu1  ;;  %v2078_v57 = vpop.f32.mrf.mxu0 }
 0x68a   :  { %v1891_v31 = vadd.f32 %v1890_v30, %v1889_v52 }
 0x68b   :  { %v1892_v53 = vpop.f32.mrf.mxu1  ;;  %v1589_v4 = vpop.f32.mrf.mxu0 }
 0x68c   :  { %v1541_v62 = vadd.f32 %v1891_v31, %v1757_v60 }
 0x68d   :  { %v1893_v54 = vpop.f32.mrf.mxu1  ;;  %v2079_v9 = vpop.f32.mrf.mxu0 }
 0x68e   :  { %v1894_v63 = vadd.f32 %v1893_v54, %v1892_v53  ;;  %v1590_v12 = vadd.f32 %v1589_v4, %v1541_v62 }
 0x68f   :  { %v1895_v55 = vpop.f32.mrf.mxu1  ;;  %v1592_v21 = vpop.f32.mrf.mxu0 }
 0x690   :  { %v1544_v13 = vadd.f32 %v1894_v63, %v1757_v60 }
 0x691   :  { %v1896_v56 = vpop.f32.mrf.mxu1 }
 0x692   :  { %v1897_v58 = vadd.f32 %v1896_v56, %v1895_v55  ;;  %v1593_v23 = vadd.f32 %v1592_v21, %v1544_v13 }
 0x693   :  { %v1898_v59 = vpop.f32.mrf.mxu1 }
 0x694   :  { %v1549_v2 = vadd.f32 %v1897_v58, %v1757_v60 }
 0x695   :  { %v1899_v3 = vpop.f32.mrf.mxu1 }
 0x696   :  { %v1900_v61 = vadd.f32 %v1899_v3, %v1898_v59  ;;  %v1598_v7 = vadd.f32 %v2078_v57, %v1549_v2 }
 0x698   :  { %v2090_v1 = vpop.f32.mrf.mxu1  ;;  %v1552_v6 = vadd.f32 %v1900_v61, %v1757_v60 }
 0x699   :  { %v1694_v8 = vadd.f32 %v2090_v1, %v1794_v5 }
 0x69a   :  { %v1685_v11 = vpop.f32.mrf.mxu1  ;;  %v1601_v19 = vadd.f32 %v2079_v9, %v1552_v6 }
 0x69b   :  { %v1702_v14 = vadd.f32 %v1694_v8, %v1598_v7  ;;  %v1686_v16 = vadd.f32 %v1794_v5, %v1685_v11 }
 0x69c   :  { %v2091_v17 = vpop.f32.mrf.mxu1 }
 0x69d   :  { %1706 = vst [vmem:[%s2806_s18 + $0x10] sm:$0xff] %v1702_v14  ;;  %v1700_v18 = vadd.f32 %v1686_v16, %v1590_v12  ;;  %v1697_v20 = vadd.f32 %v2091_v17, %v1794_v5 }
 0x69e   :  { %v1688_v22 = vpop.f32.mrf.mxu1 }
 0x69f   :  { %1704 = vst [vmem:[%s2806_s18] sm:$0xff] %v1700_v18  ;;  %v1703_v24 = vadd.f32 %v1697_v20, %v1601_v19  ;;  %v1689_v25 = vadd.f32 %v1794_v5, %v1688_v22 }
 0x6a1   :  { %1707 = vst [vmem:[%s2806_s18 + $0x18] sm:$0xff] %v1703_v24  ;;  %v1701_v26 = vadd.f32 %v1689_v25, %v1593_v23 }
 0x6a3   :  { %1705 = vst [vmem:[%s2806_s18 + $0x8] sm:$0xff] %v1701_v26 }

// kernel: down_block_forward.6
= control target key start
LH: loop header
LB: loop body
LE: loop exit
PB: predicated region body
PF: predicated region fallthrough
CT: control target
= control target key end

     0   :  { %s4948_s24 = smov 0   ;;  %s7421_s0 = inlined_call_operand.vmem [shape: f32[2,256,8], index: 0, kind: input, shape index: {}]   ;;  %s7422_s1 = inlined_call_operand.vmem [shape: f32[1,8], index: 1, kind: input, shape index: {}]   ;;  %s7423_s2 = inlined_call_operand.vmem [shape: f32[1,8], index: 2, kind: input, shape index: {}]   ;;  %s7424_s3 = inlined_call_operand.vmem [shape: bf16[8,24], index: 3, kind: input, shape index: {}]   ;;  %s7425_s4 = inlined_call_operand.vmem [shape: f32[1,24], index: 4, kind: input, shape index: {}]   ;;  %s7426_s5 = inlined_call_operand.vmem [shape: bf16[2,4,8], index: 5, kind: input, shape index: {}]   ;;  %s7427_s6 = inlined_call_operand.vmem [shape: f32[1,8], index: 6, kind: input, shape index: {}]   ;;  %s7428_s7 = inlined_call_operand.vmem [shape: f32[2,256,8], index: 7, kind: output, shape index: {}]  }
   0x1 LB: > { %s3812_s25 = sadd.s32 4294967295, %s4901_s24   ;;  %p3816_p0 = scmp.ge.s32.totalorder %s4901_s24, 1  ;;  %s4901_s24 = sphi %s4948_s24, %s17_s24  }
   0x2   : > { %p237_p1 = scmp.lt.s32.totalorder %s4901_s24, 3 }
   0x4   : > { %p238_p2 = pnand %p3816_p0, %p237_p1 }
   0x6   : > { %241 = sbr.rel (%p238_p2) target bundleno = 2065 (0x811), region = 48 }
   0xb   : > { %p269_p3 = scmp.lt.s32.totalorder %s3812_s25, 1  ;;  %vm312_vm0 = vcmask 64512   ;;  %vm880_vm1 = vcmask 1043456   ;;  %vm1109_vm2 = vcmask 31744   ;;  %s4903_s15 = smov 120   ;;  %vm3277_vm3 = vcmask 1041408  }
   0xc   : > { %s4904_s16 = smov 116   ;;  %s4905_s17 = smov 124  }
   0xd   : > { %s7847_s25 = smov (!%p269_p3, %s3812_s25), 1  ;;  %s4906_s18 = smov 112  }
   0xe   : > { %s3908_s26 = sshll.u32 %s7847_s25, 8  ;;  %s4907_s19 = smov 108  }
   0xf   : > { %s4964_s29 = scalar_lea.vmem %s7421_s0, %s3908_s26  ;;  %s7289_s9 = scalar_lea.vmem %s7428_s7, %s3908_s26 }
  0x10   : > { %v4967_v0 = vld [vmem:[%s4964_s29] sm:$0xff]  ;;  %v4970_v1 = vld [vmem:[%s4964_s29 + $0x10] sm:$0xff]  ;;  %v4973_v2 = vld [vmem:[%s4964_s29 + $0x8] sm:$0xff] }
  0x11   : > { %v313_v3 = vsel %vm312_vm0, %v4967_v0, 0.0  ;;  %v319_v4 = vsel %vm312_vm0, %v4970_v1, 0.0  ;;  %v4980_v5 = vld [vmem:[%s4964_s29 + $0x18] sm:$0xff]  ;;  %v316_v6 = vsel %vm312_vm0, %v4973_v2, 0.0  ;;  %v4987_v8 = vld [vmem:[%s4964_s29 + $0x20] sm:$0xff]  ;;  %v4990_v9 = vld [vmem:[%s4964_s29 + $0x28] sm:$0xff] }
  0x12   : > { %314 = vadd.xlane.f32.xlu0 %v313_v3  ;;  %320 = vadd.xlane.f32.xlu1 %v319_v4  ;;  %v322_v7 = vsel %vm312_vm0, %v4980_v5, 0.0  ;;  %v325_v10 = vsel %vm312_vm0, %v4987_v8, 0.0  ;;  %v328_v11 = vsel %vm312_vm0, %v4990_v9, 0.0  ;;  %v4997_v12 = vld [vmem:[%s4964_s29 + $0x30] sm:$0xff]  ;;  %v5000_v13 = vld [vmem:[%s4964_s29 + $0x38] sm:$0xff]  ;;  %v5007_v16 = vld [vmem:[%s4964_s29 + $0x40] sm:$0xff] }
  0x13   : > { %v331_v14 = vsel %vm312_vm0, %v4997_v12, 0.0  ;;  %v334_v15 = vsel %vm312_vm0, %v5000_v13, 0.0  ;;  %v5010_v17 = vld [vmem:[%s4964_s29 + $0x48] sm:$0xff]  ;;  %v337_v18 = vsel %vm312_vm0, %v5007_v16, 0.0  ;;  %v5017_v20 = vld [vmem:[%s4964_s29 + $0x50] sm:$0xff]  ;;  %v5020_v21 = vld [vmem:[%s4964_s29 + $0x58] sm:$0xff] }
  0x14   : > { %v340_v19 = vsel %vm312_vm0, %v5010_v17, 0.0  ;;  %v343_v22 = vsel %vm312_vm0, %v5017_v20, 0.0  ;;  %v346_v23 = vsel %vm312_vm0, %v5020_v21, 0.0  ;;  %v5027_v24 = vld [vmem:[%s4964_s29 + $0x60] sm:$0xff]  ;;  %v5030_v25 = vld [vmem:[%s4964_s29 + $0x68] sm:$0xff]  ;;  %v5037_v28 = vld [vmem:[%s4964_s29 + $0x70] sm:$0xff] }
  0x15   : > { %v349_v26 = vsel %vm312_vm0, %v5027_v24, 0.0  ;;  %v352_v27 = vsel %vm312_vm0, %v5030_v25, 0.0  ;;  %v5040_v29 = vld [vmem:[%s4964_s29 + $0x78] sm:$0xff]  ;;  %v355_v30 = vsel %vm312_vm0, %v5037_v28, 0.0  ;;  %v5047_v32 = vld [vmem:[%s4964_s29 + $0x80] sm:$0xff]  ;;  %v5050_v33 = vld [vmem:[%s4964_s29 + $0x88] sm:$0xff] }
  0x16   : > { %317 = vadd.xlane.f32.xlu0 %v316_v6  ;;  %323 = vadd.xlane.f32.xlu1 %v322_v7  ;;  %v358_v31 = vsel %vm312_vm0, %v5040_v29, 0.0  ;;  %v361_v34 = vsel %vm312_vm0, %v5047_v32, 0.0  ;;  %v364_v35 = vsel %vm312_vm0, %v5050_v33, 0.0  ;;  %v5057_v36 = vld [vmem:[%s4964_s29 + $0x90] sm:$0xff]  ;;  %v5060_v37 = vld [vmem:[%s4964_s29 + $0x98] sm:$0xff]  ;;  %v5067_v40 = vld [vmem:[%s4964_s29 + $0xa0] sm:$0xff] }
  0x17   : > { %v367_v38 = vsel %vm312_vm0, %v5057_v36, 0.0  ;;  %v370_v39 = vsel %vm312_vm0, %v5060_v37, 0.0  ;;  %v5070_v41 = vld [vmem:[%s4964_s29 + $0xa8] sm:$0xff]  ;;  %v373_v42 = vsel %vm312_vm0, %v5067_v40, 0.0  ;;  %v5077_v44 = vld [vmem:[%s4964_s29 + $0xb0] sm:$0xff]  ;;  %v5080_v45 = vld [vmem:[%s4964_s29 + $0xb8] sm:$0xff] }
  0x18   : > { %v376_v43 = vsel %vm312_vm0, %v5070_v41, 0.0  ;;  %v379_v46 = vsel %vm312_vm0, %v5077_v44, 0.0  ;;  %v382_v47 = vsel %vm312_vm0, %v5080_v45, 0.0  ;;  %v5087_v48 = vld [vmem:[%s4964_s29 + $0xc0] sm:$0xff]  ;;  %v5090_v49 = vld [vmem:[%s4964_s29 + $0xc8] sm:$0xff]  ;;  %v5097_v52 = vld [vmem:[%s4964_s29 + $0xd0] sm:$0xff] }
  0x19   : > { %v385_v50 = vsel %vm312_vm0, %v5087_v48, 0.0  ;;  %v388_v51 = vsel %vm312_vm0, %v5090_v49, 0.0  ;;  %v5100_v53 = vld [vmem:[%s4964_s29 + $0xd8] sm:$0xff]  ;;  %v391_v54 = vsel %vm312_vm0, %v5097_v52, 0.0  ;;  %v5107_v56 = vld [vmem:[%s4964_s29 + $0xe0] sm:$0xff]  ;;  %v5110_v57 = vld [vmem:[%s4964_s29 + $0xe8] sm:$0xff] }
  0x1a   : > { %326 = vadd.xlane.f32.xlu0 %v325_v10  ;;  %329 = vadd.xlane.f32.xlu1 %v328_v11  ;;  %v394_v55 = vsel %vm312_vm0, %v5100_v53, 0.0  ;;  %v397_v58 = vsel %vm312_vm0, %v5107_v56, 0.0  ;;  %v400_v59 = vsel %vm312_vm0, %v5110_v57, 0.0  ;;  %v5117_v60 = vld [vmem:[%s4964_s29 + $0xf0] sm:$0xff]  ;;  %v5120_v61 = vld [vmem:[%s4964_s29 + $0xf8] sm:$0xff] }
  0x1b   : > { %v403_v62 = vsel %vm312_vm0, %v5117_v60, 0.0  ;;  %v406_v63 = vsel %vm312_vm0, %v5120_v61, 0.0 }
  0x1e   : > { %332 = vadd.xlane.f32.xlu0 %v331_v14  ;;  %335 = vadd.xlane.f32.xlu1 %v334_v15 }
  0x22   : > { %338 = vadd.xlane.f32.xlu0 %v337_v18  ;;  %341 = vadd.xlane.f32.xlu1 %v340_v19 }
  0x26   : > { %344 = vadd.xlane.f32.xlu0 %v343_v22  ;;  %347 = vadd.xlane.f32.xlu1 %v346_v23 }
  0x2a   : > { %350 = vadd.xlane.f32.xlu0 %v349_v26  ;;  %353 = vadd.xlane.f32.xlu1 %v352_v27 }
  0x2e   : > { %356 = vadd.xlane.f32.xlu0 %v355_v30  ;;  %359 = vadd.xlane.f32.xlu1 %v358_v31 }
  0x32   : > { %362 = vadd.xlane.f32.xlu0 %v361_v34  ;;  %365 = vadd.xlane.f32.xlu1 %v364_v35 }
  0x36   : > { %368 = vadd.xlane.f32.xlu0 %v367_v38  ;;  %371 = vadd.xlane.f32.xlu1 %v370_v39 }
  0x3a   : > { %374 = vadd.xlane.f32.xlu0 %v373_v42  ;;  %377 = vadd.xlane.f32.xlu1 %v376_v43 }
  0x3e   : > { %380 = vadd.xlane.f32.xlu0 %v379_v46  ;;  %383 = vadd.xlane.f32.xlu1 %v382_v47 }
  0x42   : > { %386 = vadd.xlane.f32.xlu0 %v385_v50  ;;  %389 = vadd.xlane.f32.xlu1 %v388_v51 }
  0x46   : > { %392 = vadd.xlane.f32.xlu0 %v391_v54  ;;  %395 = vadd.xlane.f32.xlu1 %v394_v55 }
  0x4a   : > { %398 = vadd.xlane.f32.xlu0 %v397_v58  ;;  %401 = vadd.xlane.f32.xlu1 %v400_v59 }
  0x4e   : > { %404 = vadd.xlane.f32.xlu0 %v403_v62  ;;  %407 = vadd.xlane.f32.xlu1 %v406_v63 }
  0x9b   : > { %v315_v3 = vpop.xlane.xlu0 %314  ;;  %v321_v4 = vpop.xlane.xlu1 %320 }
  0x9c   : > { %v410_v6 = vmul.f32 0.125, %v315_v3  ;;  %v412_v7 = vmul.f32 0.125, %v321_v4 }
  0x9e   : > { %v5127_v10 = vsub.f32 %v4967_v0, %v410_v6  ;;  %v5130_v11 = vsub.f32 %v4970_v1, %v412_v7 }
  0x9f   : > { %v318_v14 = vpop.xlane.xlu0 %317  ;;  %v324_v15 = vpop.xlane.xlu1 %323 }
  0xa0   : > { %v411_v18 = vmul.f32 0.125, %v318_v14  ;;  %v413_v19 = vmul.f32 0.125, %v324_v15  ;;  %v474_v22 = vmul.f32 %v5127_v10, %v5127_v10  ;;  %v476_v23 = vmul.f32 %v5130_v11, %v5130_v11 }
  0xa2   : > { %v5137_v26 = vsub.f32 %v4973_v2, %v411_v18  ;;  %v5140_v27 = vsub.f32 %v4980_v5, %v413_v19  ;;  %v506_v0 = vsel %vm312_vm0, %v474_v22, 0.0  ;;  %v512_v31 = vsel %vm312_vm0, %v476_v23, 0.0 }
  0xa3   : > { %507 = vadd.xlane.f32.xlu0 %v506_v0  ;;  %v327_v1 = vpop.xlane.xlu0 %326  ;;  %v330_v30 = vpop.xlane.xlu1 %329 }
  0xa4   : > { %v414_v34 = vmul.f32 0.125, %v327_v1  ;;  %v415_v35 = vmul.f32 0.125, %v330_v30  ;;  %v475_v38 = vmul.f32 %v5137_v26, %v5137_v26  ;;  %v477_v39 = vmul.f32 %v5140_v27, %v5140_v27 }
  0xa6   : > { %v5149_v2 = vsub.f32 %v4987_v8, %v414_v34  ;;  %v5152_v5 = vsub.f32 %v4990_v9, %v415_v35  ;;  %v509_v42 = vsel %vm312_vm0, %v475_v38, 0.0  ;;  %v515_v47 = vsel %vm312_vm0, %v477_v39, 0.0 }
  0xa7   : > { %513 = vadd.xlane.f32.xlu0 %v512_v31  ;;  %510 = vadd.xlane.f32.xlu1 %v509_v42  ;;  %v333_v43 = vpop.xlane.xlu0 %332  ;;  %v336_v46 = vpop.xlane.xlu1 %335 }
  0xa8   : > { %v416_v50 = vmul.f32 0.125, %v333_v43  ;;  %v417_v51 = vmul.f32 0.125, %v336_v46  ;;  %v478_v54 = vmul.f32 %v5149_v2, %v5149_v2  ;;  %v479_v8 = vmul.f32 %v5152_v5, %v5152_v5 }
  0xaa   : > { %v5161_v55 = vsub.f32 %v4997_v12, %v416_v50  ;;  %v5164_v9 = vsub.f32 %v5000_v13, %v417_v51  ;;  %v518_v58 = vsel %vm312_vm0, %v478_v54, 0.0  ;;  %v521_v63 = vsel %vm312_vm0, %v479_v8, 0.0 }
  0xab   : > { %516 = vadd.xlane.f32.xlu1 %v515_v47  ;;  %519 = vadd.xlane.f32.xlu0 %v518_v58  ;;  %v339_v59 = vpop.xlane.xlu0 %338  ;;  %v342_v62 = vpop.xlane.xlu1 %341 }
  0xac   : > { %v418_v3 = vmul.f32 0.125, %v339_v59  ;;  %v419_v4 = vmul.f32 0.125, %v342_v62  ;;  %v480_v6 = vmul.f32 %v5161_v55, %v5161_v55  ;;  %v481_v12 = vmul.f32 %v5164_v9, %v5164_v9 }
  0xae   : > { %v5173_v7 = vsub.f32 %v5007_v16, %v418_v3  ;;  %v5176_v13 = vsub.f32 %v5010_v17, %v419_v4  ;;  %v524_v14 = vsel %vm312_vm0, %v480_v6, 0.0  ;;  %v527_v19 = vsel %vm312_vm0, %v481_v12, 0.0 }
  0xaf   : > { %522 = vadd.xlane.f32.xlu1 %v521_v63  ;;  %525 = vadd.xlane.f32.xlu0 %v524_v14  ;;  %v345_v15 = vpop.xlane.xlu0 %344  ;;  %v348_v18 = vpop.xlane.xlu1 %347 }
  0xb0   : > { %v420_v22 = vmul.f32 0.125, %v345_v15  ;;  %v421_v23 = vmul.f32 0.125, %v348_v18  ;;  %v482_v0 = vmul.f32 %v5173_v7, %v5173_v7  ;;  %v483_v16 = vmul.f32 %v5176_v13, %v5176_v13 }
  0xb2   : > { %v5185_v1 = vsub.f32 %v5017_v20, %v420_v22  ;;  %v5188_v17 = vsub.f32 %v5020_v21, %v421_v23  ;;  %v530_v30 = vsel %vm312_vm0, %v482_v0, 0.0  ;;  %v533_v35 = vsel %vm312_vm0, %v483_v16, 0.0 }
  0xb3   : > { %528 = vadd.xlane.f32.xlu1 %v527_v19  ;;  %531 = vadd.xlane.f32.xlu0 %v530_v30  ;;  %v351_v31 = vpop.xlane.xlu0 %350  ;;  %v354_v34 = vpop.xlane.xlu1 %353 }
  0xb4   : > { %v422_v38 = vmul.f32 0.125, %v351_v31  ;;  %v423_v39 = vmul.f32 0.125, %v354_v34  ;;  %v484_v42 = vmul.f32 %v5185_v1, %v5185_v1  ;;  %v485_v20 = vmul.f32 %v5188_v17, %v5188_v17 }
  0xb6   : > { %v5197_v43 = vsub.f32 %v5027_v24, %v422_v38  ;;  %v5200_v21 = vsub.f32 %v5030_v25, %v423_v39  ;;  %v536_v46 = vsel %vm312_vm0, %v484_v42, 0.0  ;;  %v539_v51 = vsel %vm312_vm0, %v485_v20, 0.0 }
  0xb7   : > { %534 = vadd.xlane.f32.xlu1 %v533_v35  ;;  %537 = vadd.xlane.f32.xlu0 %v536_v46  ;;  %v357_v47 = vpop.xlane.xlu0 %356  ;;  %v360_v50 = vpop.xlane.xlu1 %359 }
  0xb8   : > { %v424_v54 = vmul.f32 0.125, %v357_v47  ;;  %v425_v8 = vmul.f32 0.125, %v360_v50  ;;  %v486_v58 = vmul.f32 %v5197_v43, %v5197_v43  ;;  %v487_v24 = vmul.f32 %v5200_v21, %v5200_v21 }
  0xba   : > { %v5209_v59 = vsub.f32 %v5037_v28, %v424_v54  ;;  %v5212_v25 = vsub.f32 %v5040_v29, %v425_v8  ;;  %v542_v62 = vsel %vm312_vm0, %v486_v58, 0.0  ;;  %v545_v4 = vsel %vm312_vm0, %v487_v24, 0.0 }
  0xbb   : > { %540 = vadd.xlane.f32.xlu1 %v539_v51  ;;  %543 = vadd.xlane.f32.xlu0 %v542_v62  ;;  %v363_v63 = vpop.xlane.xlu0 %362  ;;  %v366_v3 = vpop.xlane.xlu1 %365 }
  0xbc   : > { %v426_v6 = vmul.f32 0.125, %v363_v63  ;;  %v427_v12 = vmul.f32 0.125, %v366_v3  ;;  %v488_v14 = vmul.f32 %v5209_v59, %v5209_v59  ;;  %v489_v28 = vmul.f32 %v5212_v25, %v5212_v25 }
  0xbe   : > { %v5221_v15 = vsub.f32 %v5047_v32, %v426_v6  ;;  %v5224_v29 = vsub.f32 %v5050_v33, %v427_v12  ;;  %v548_v18 = vsel %vm312_vm0, %v488_v14, 0.0  ;;  %v551_v23 = vsel %vm312_vm0, %v489_v28, 0.0  ;;  %v824_v14 = vld [vmem:[%s7424_s3] sm:$0xf] }
  0xbf   : > { %546 = vadd.xlane.f32.xlu1 %v545_v4  ;;  %549 = vadd.xlane.f32.xlu0 %v548_v18  ;;  %v369_v19 = vpop.xlane.xlu0 %368  ;;  %v372_v22 = vpop.xlane.xlu1 %371 }
  0xc0   : > { %v428_v0 = vmul.f32 0.125, %v369_v19  ;;  %v429_v16 = vmul.f32 0.125, %v372_v22  ;;  %v490_v30 = vmul.f32 %v5221_v15, %v5221_v15  ;;  %v491_v32 = vmul.f32 %v5224_v29, %v5224_v29  ;;  %4383 = vmatprep.subr.msk.bf16.mxu0 %vm880_vm1, %v824_v14 }
  0xc1   : > { %v882_v19 = vsel %vm880_vm1, %v824_v14, 0 }
  0xc2   : > { %v5233_v31 = vsub.f32 %v5057_v36, %v428_v0  ;;  %v5236_v33 = vsub.f32 %v5060_v37, %v429_v16  ;;  %v554_v34 = vsel %vm312_vm0, %v490_v30, 0.0  ;;  %v557_v39 = vsel %vm312_vm0, %v491_v32, 0.0  ;;  %4282 = vmatpush3.bf16.msra.mxu0 %v882_v19 }
  0xc3   : > { %552 = vadd.xlane.f32.xlu1 %v551_v23  ;;  %555 = vadd.xlane.f32.xlu0 %v554_v34  ;;  %v375_v35 = vpop.xlane.xlu0 %374  ;;  %v378_v38 = vpop.xlane.xlu1 %377 }
  0xc4   : > { %v430_v42 = vmul.f32 0.125, %v375_v35  ;;  %v431_v20 = vmul.f32 0.125, %v378_v38  ;;  %v492_v46 = vmul.f32 %v5233_v31, %v5233_v31  ;;  %v493_v36 = vmul.f32 %v5236_v33, %v5236_v33 }
  0xc6   : > { %v5245_v47 = vsub.f32 %v5067_v40, %v430_v42  ;;  %v5248_v37 = vsub.f32 %v5070_v41, %v431_v20  ;;  %v560_v50 = vsel %vm312_vm0, %v492_v46, 0.0  ;;  %v563_v8 = vsel %vm312_vm0, %v493_v36, 0.0 }
  0xc7   : > { %558 = vadd.xlane.f32.xlu1 %v557_v39  ;;  %561 = vadd.xlane.f32.xlu0 %v560_v50  ;;  %v381_v51 = vpop.xlane.xlu0 %380  ;;  %v384_v54 = vpop.xlane.xlu1 %383 }
  0xc8   : > { %v432_v58 = vmul.f32 0.125, %v381_v51  ;;  %v433_v24 = vmul.f32 0.125, %v384_v54  ;;  %v494_v62 = vmul.f32 %v5245_v47, %v5245_v47  ;;  %v495_v40 = vmul.f32 %v5248_v37, %v5248_v37 }
  0xca   : > { %v5257_v63 = vsub.f32 %v5077_v44, %v432_v58  ;;  %v5260_v41 = vsub.f32 %v5080_v45, %v433_v24  ;;  %v566_v3 = vsel %vm312_vm0, %v494_v62, 0.0  ;;  %v569_v12 = vsel %vm312_vm0, %v495_v40, 0.0 }
  0xcb   : > { %564 = vadd.xlane.f32.xlu1 %v563_v8  ;;  %567 = vadd.xlane.f32.xlu0 %v566_v3  ;;  %v387_v4 = vpop.xlane.xlu0 %386  ;;  %v390_v6 = vpop.xlane.xlu1 %389 }
  0xcc   : > { %v434_v28 = vmul.f32 0.125, %v387_v4  ;;  %v435_v18 = vmul.f32 0.125, %v390_v6  ;;  %v496_v44 = vmul.f32 %v5257_v63, %v5257_v63  ;;  %v497_v45 = vmul.f32 %v5260_v41, %v5260_v41 }
  0xce   : > { %v5272_v22 = vsub.f32 %v5087_v48, %v434_v28  ;;  %v5275_v23 = vsub.f32 %v5090_v49, %v435_v18  ;;  %v572_v0 = vsel %vm312_vm0, %v496_v44, 0.0  ;;  %v575_v32 = vsel %vm312_vm0, %v497_v45, 0.0 }
  0xcf   : > { %570 = vadd.xlane.f32.xlu1 %v569_v12  ;;  %573 = vadd.xlane.f32.xlu0 %v572_v0  ;;  %v393_v16 = vpop.xlane.xlu0 %392  ;;  %v396_v30 = vpop.xlane.xlu1 %395 }
  0xd0   : > { %v436_v34 = vmul.f32 0.125, %v393_v16  ;;  %v437_v35 = vmul.f32 0.125, %v396_v30  ;;  %v498_v38 = vmul.f32 %v5272_v22, %v5272_v22  ;;  %v499_v48 = vmul.f32 %v5275_v23, %v5275_v23 }
  0xd2   : > { %v5284_v49 = vsub.f32 %v5097_v52, %v436_v34  ;;  %v5287_v39 = vsub.f32 %v5100_v53, %v437_v35  ;;  %v578_v42 = vsel %vm312_vm0, %v498_v38, 0.0  ;;  %v581_v36 = vsel %vm312_vm0, %v499_v48, 0.0 }
  0xd3   : > { %576 = vadd.xlane.f32.xlu1 %v575_v32  ;;  %579 = vadd.xlane.f32.xlu0 %v578_v42  ;;  %v399_v20 = vpop.xlane.xlu0 %398  ;;  %v402_v46 = vpop.xlane.xlu1 %401 }
  0xd4   : > { %v438_v50 = vmul.f32 0.125, %v399_v20  ;;  %v439_v51 = vmul.f32 0.125, %v402_v46  ;;  %v500_v54 = vmul.f32 %v5284_v49, %v5284_v49  ;;  %v501_v52 = vmul.f32 %v5287_v39, %v5287_v39 }
  0xd6   : > { %v5296_v8 = vsub.f32 %v5107_v56, %v438_v50  ;;  %v5299_v53 = vsub.f32 %v5110_v57, %v439_v51  ;;  %v584_v58 = vsel %vm312_vm0, %v500_v54, 0.0  ;;  %v587_v40 = vsel %vm312_vm0, %v501_v52, 0.0 }
  0xd7   : > { %582 = vadd.xlane.f32.xlu1 %v581_v36  ;;  %585 = vadd.xlane.f32.xlu0 %v584_v58  ;;  %v405_v24 = vpop.xlane.xlu0 %404  ;;  %v408_v62 = vpop.xlane.xlu1 %407 }
  0xd8   : > { %v440_v3 = vmul.f32 0.125, %v405_v24  ;;  %v441_v4 = vmul.f32 0.125, %v408_v62  ;;  %v502_v6 = vmul.f32 %v5296_v8, %v5296_v8  ;;  %v503_v56 = vmul.f32 %v5299_v53, %v5299_v53 }
  0xda   : > { %v5308_v12 = vsub.f32 %v5117_v60, %v440_v3  ;;  %v5311_v57 = vsub.f32 %v5120_v61, %v441_v4  ;;  %v590_v14 = vsel %vm312_vm0, %v502_v6, 0.0  ;;  %v593_v28 = vsel %vm312_vm0, %v503_v56, 0.0 }
  0xdb   : > { %588 = vadd.xlane.f32.xlu1 %v587_v40  ;;  %591 = vadd.xlane.f32.xlu0 %v590_v14 }
  0xdc   : > { %v504_v18 = vmul.f32 %v5308_v12, %v5308_v12  ;;  %v505_v44 = vmul.f32 %v5311_v57, %v5311_v57 }
  0xde   : > { %v596_v45 = vsel %vm312_vm0, %v504_v18, 0.0  ;;  %v599_v60 = vsel %vm312_vm0, %v505_v44, 0.0  ;;  %v5325_v44 = vld [vmem:[%s7422_s1] ss:$0 sm:$0xff] }
  0xdf   : > { %594 = vadd.xlane.f32.xlu1 %v593_v28  ;;  %597 = vadd.xlane.f32.xlu0 %v596_v45 }
  0xe3   : > { %600 = vadd.xlane.f32.xlu1 %v599_v60 }
 0x12c   : > { %v508_v61 = vpop.xlane.xlu0 %507 }
 0x12d   : > { %v602_v19 = vmul.f32 0.125, %v508_v61 }
 0x12f   : > { %v634_v0 = vadd.f32 1e-05, %v602_v19 }
 0x130   : > { %v511_v16 = vpop.xlane.xlu1 %510  ;;  %v514_v30 = vpop.xlane.xlu0 %513 }
 0x131   : > { %4415 = vrsqrt.f32 %v634_v0  ;;  %v603_v32 = vmul.f32 0.125, %v511_v16  ;;  %v604_v34 = vmul.f32 0.125, %v514_v30 }
 0x133   : > { %v635_v35 = vadd.f32 1e-05, %v603_v32  ;;  %v636_v38 = vadd.f32 1e-05, %v604_v34 }
 0x134   : > { %v517_v48 = vpop.xlane.xlu1 %516  ;;  %v520_v42 = vpop.xlane.xlu0 %519 }
 0x135   : > { %4417 = vrsqrt.f32 %v635_v35  ;;  %v605_v20 = vmul.f32 0.125, %v517_v48  ;;  %v606_v46 = vmul.f32 0.125, %v520_v42 }
 0x136   : > { %4419 = vrsqrt.f32 %v636_v38 }
 0x137   : > { %v637_v36 = vadd.f32 1e-05, %v605_v20  ;;  %v638_v50 = vadd.f32 1e-05, %v606_v46 }
 0x138   : > { %v523_v51 = vpop.xlane.xlu1 %522  ;;  %v526_v54 = vpop.xlane.xlu0 %525 }
 0x139   : > { %4421 = vrsqrt.f32 %v637_v36  ;;  %v607_v52 = vmul.f32 0.125, %v523_v51  ;;  %v608_v58 = vmul.f32 0.125, %v526_v54 }
 0x13a   : > { %4423 = vrsqrt.f32 %v638_v50 }
 0x13b   : > { %v639_v24 = vadd.f32 1e-05, %v607_v52  ;;  %v640_v62 = vadd.f32 1e-05, %v608_v58 }
 0x13c   : > { %v529_v40 = vpop.xlane.xlu1 %528  ;;  %v532_v3 = vpop.xlane.xlu0 %531 }
 0x13d   : > { %4425 = vrsqrt.f32 %v639_v24  ;;  %v609_v4 = vmul.f32 0.125, %v529_v40  ;;  %v610_v6 = vmul.f32 0.125, %v532_v3 }
 0x13e   : > { %v4416_v56 = vpop.eup %4415  ;;  %4427 = vrsqrt.f32 %v640_v62 }
 0x13f   : > { %v641_v14 = vadd.f32 1e-05, %v609_v4  ;;  %v642_v28 = vadd.f32 1e-05, %v610_v6  ;;  %v698_v18 = vmul.f32 %v4416_v56, %v5127_v10  ;;  %v5332_v10 = vld [vmem:[%s7423_s2] ss:$0 sm:$0xff] }
 0x140   : > { %v535_v45 = vpop.xlane.xlu1 %534  ;;  %v538_v60 = vpop.xlane.xlu0 %537 }
 0x141   : > { %4429 = vrsqrt.f32 %v641_v14  ;;  %v611_v61 = vmul.f32 0.125, %v535_v45  ;;  %v612_v19 = vmul.f32 0.125, %v538_v60  ;;  %v737_v16 = vmul.f32 %v5325_v44, %v698_v18 }
 0x142   : > { %v4418_v0 = vpop.eup %4417  ;;  %4431 = vrsqrt.f32 %v642_v28 }
 0x143   : > { %v4420_v30 = vpop.eup %4419  ;;  %v643_v32 = vadd.f32 1e-05, %v611_v61  ;;  %v644_v34 = vadd.f32 1e-05, %v612_v19  ;;  %v699_v35 = vmul.f32 %v4418_v0, %v5137_v26  ;;  %v776_v51 = vadd.f32 %v5332_v10, %v737_v16 }
 0x144   : > { %v541_v38 = vpop.xlane.xlu1 %540  ;;  %v544_v48 = vpop.xlane.xlu0 %543  ;;  %v700_v42 = vmul.f32 %v4420_v30, %v5130_v11 }
 0x145   : > { %4433 = vrsqrt.f32 %v643_v32  ;;  %v613_v20 = vmul.f32 0.125, %v541_v38  ;;  %v614_v46 = vmul.f32 0.125, %v544_v48  ;;  %v738_v36 = vmul.f32 %v5325_v44, %v699_v35 }
 0x146   : > { %v4422_v50 = vpop.eup %4421  ;;  %4435 = vrsqrt.f32 %v644_v34  ;;  %v739_v11 = vmul.f32 %v5325_v44, %v700_v42 }
 0x147   : > { %v4424_v54 = vpop.eup %4423  ;;  %v645_v26 = vadd.f32 1e-05, %v613_v20  ;;  %v646_v52 = vadd.f32 1e-05, %v614_v46  ;;  %v777_v58 = vadd.f32 %v5332_v10, %v738_v36  ;;  %v701_v24 = vmul.f32 %v4422_v50, %v5140_v27 }
 0x148   : > { %v547_v62 = vpop.xlane.xlu1 %546  ;;  %v550_v40 = vpop.xlane.xlu0 %549  ;;  %v702_v3 = vmul.f32 %v4424_v54, %v5149_v2  ;;  %v778_v2 = vadd.f32 %v5332_v10, %v739_v11 }
 0x149   : > { %4437 = vrsqrt.f32 %v645_v26  ;;  %v615_v4 = vmul.f32 0.125, %v547_v62  ;;  %v616_v6 = vmul.f32 0.125, %v550_v40  ;;  %v808_v56 = vpack.c.bf16 %v777_v58, %v776_v51 }
 0x14a   : > { %v4426_v14 = vpop.eup %4425  ;;  %4439 = vrsqrt.f32 %v646_v52  ;;  %v740_v28 = vmul.f32 %v5325_v44, %v701_v24  ;;  %v741_v18 = vmul.f32 %v5325_v44, %v702_v3 }
 0x14b   : > { %v4428_v45 = vpop.eup %4427  ;;  %v647_v60 = vadd.f32 1e-05, %v615_v4  ;;  %v648_v61 = vadd.f32 1e-05, %v616_v6  ;;  %4283 = vmatprep.mubr.msk.bf16.mxu0 %vm312_vm0, %v808_v56  ;;  %v703_v27 = vmul.f32 %v4426_v14, %v5152_v5 }
 0x14c   : > { %v553_v19 = vpop.xlane.xlu1 %552  ;;  %v556_v0 = vpop.xlane.xlu0 %555  ;;  %v779_v16 = vadd.f32 %v5332_v10, %v740_v28  ;;  %v704_v30 = vmul.f32 %v4428_v45, %v5161_v55  ;;  %v780_v42 = vadd.f32 %v5332_v10, %v741_v18 }
 0x14d   : > { %4441 = vrsqrt.f32 %v647_v60  ;;  %v617_v32 = vmul.f32 0.125, %v553_v19  ;;  %v618_v34 = vmul.f32 0.125, %v556_v0  ;;  %v742_v35 = vmul.f32 %v5325_v44, %v703_v27 }
 0x14e   : > { %v4430_v38 = vpop.eup %4429  ;;  %4443 = vrsqrt.f32 %v648_v61  ;;  %v809_v48 = vpack.c.bf16 %v779_v16, %v778_v2  ;;  %v743_v54 = vmul.f32 %v5325_v44, %v704_v30 }
 0x14f   : > { %v4432_v20 = vpop.eup %4431  ;;  %v649_v5 = vadd.f32 1e-05, %v617_v32  ;;  %v650_v46 = vadd.f32 1e-05, %v618_v34  ;;  %v781_v36 = vadd.f32 %v5332_v10, %v742_v35  ;;  %v705_v50 = vmul.f32 %v4430_v38, %v5164_v9 }
 0x150   : > { %4284 = vmatmul.mubr.msk.bf16.vlgmr.msra.gmra.mxu0 %vm312_vm0, %v809_v48  ;;  %v559_v55 = vpop.xlane.xlu1 %558  ;;  %v562_v51 = vpop.xlane.xlu0 %561  ;;  %v706_v26 = vmul.f32 %v4432_v20, %v5173_v7  ;;  %v782_v7 = vadd.f32 %v5332_v10, %v743_v54 }
 0x151   : > { %4445 = vrsqrt.f32 %v649_v5  ;;  %v619_v52 = vmul.f32 0.125, %v559_v55  ;;  %v620_v58 = vmul.f32 0.125, %v562_v51  ;;  %v810_v24 = vpack.c.bf16 %v781_v36, %v780_v42 }
 0x152   : > { %v4434_v62 = vpop.eup %4433  ;;  %4447 = vrsqrt.f32 %v650_v46  ;;  %v744_v40 = vmul.f32 %v5325_v44, %v705_v50  ;;  %v745_v11 = vmul.f32 %v5325_v44, %v706_v26 }
 0x153   : > { %v4436_v3 = vpop.eup %4435  ;;  %v651_v9 = vadd.f32 1e-05, %v619_v52  ;;  %v652_v4 = vadd.f32 1e-05, %v620_v58  ;;  %4287 = vmatprep.mubr.msk.bf16.mxu0 %vm312_vm0, %v810_v24  ;;  %v707_v6 = vmul.f32 %v4434_v62, %v5176_v13 }
 0x154   : > { %v565_v56 = vpop.xlane.xlu1 %564  ;;  %v568_v14 = vpop.xlane.xlu0 %567  ;;  %v783_v28 = vadd.f32 %v5332_v10, %v744_v40  ;;  %v708_v18 = vmul.f32 %v4436_v3, %v5185_v1  ;;  %v784_v0 = vadd.f32 %v5332_v10, %v745_v11 }
 0x155   : > { %4449 = vrsqrt.f32 %v651_v9  ;;  %v621_v45 = vmul.f32 0.125, %v565_v56  ;;  %v622_v60 = vmul.f32 0.125, %v568_v14  ;;  %v746_v61 = vmul.f32 %v5325_v44, %v707_v6 }
 0x156   : > { %v4438_v27 = vpop.eup %4437  ;;  %4451 = vrsqrt.f32 %v652_v4  ;;  %v811_v19 = vpack.c.bf16 %v783_v28, %v782_v7  ;;  %v747_v35 = vmul.f32 %v5325_v44, %v708_v18 }
 0x157   : > { %v4440_v2 = vpop.eup %4439  ;;  %v653_v13 = vadd.f32 1e-05, %v621_v45  ;;  %v654_v16 = vadd.f32 1e-05, %v622_v60  ;;  %v785_v30 = vadd.f32 %v5332_v10, %v746_v61  ;;  %v709_v32 = vmul.f32 %v4438_v27, %v5188_v17 }
 0x158   : > { %4288 = vmatmul.mubr.msk.bf16.gmra.mxu0 %vm312_vm0, %v811_v19  ;;  %v571_v1 = vpop.xlane.xlu1 %570  ;;  %v574_v34 = vpop.xlane.xlu0 %573  ;;  %v710_v38 = vmul.f32 %v4440_v2, %v5197_v43  ;;  %v786_v43 = vadd.f32 %v5332_v10, %v747_v35 }
 0x159   : > { %4453 = vrsqrt.f32 %v653_v13  ;;  %v623_v48 = vmul.f32 0.125, %v571_v1  ;;  %v624_v42 = vmul.f32 0.125, %v574_v34  ;;  %v812_v20 = vpack.c.bf16 %v785_v30, %v784_v0 }
 0x15a   : > { %v4442_v5 = vpop.eup %4441  ;;  %4455 = vrsqrt.f32 %v654_v16  ;;  %v748_v46 = vmul.f32 %v5325_v44, %v709_v32  ;;  %v749_v36 = vmul.f32 %v5325_v44, %v710_v38 }
 0x15b   : > { %v4444_v50 = vpop.eup %4443  ;;  %v655_v17 = vadd.f32 1e-05, %v623_v48  ;;  %v656_v55 = vadd.f32 1e-05, %v624_v42  ;;  %4291 = vmatprep.mubr.msk.bf16.mxu0 %vm312_vm0, %v812_v20  ;;  %v711_v51 = vmul.f32 %v4442_v5, %v5200_v21 }
 0x15c   : > { %v577_v54 = vpop.xlane.xlu1 %576  ;;  %v580_v26 = vpop.xlane.xlu0 %579  ;;  %v787_v52 = vadd.f32 %v5332_v10, %v748_v46  ;;  %v712_v58 = vmul.f32 %v4444_v50, %v5209_v59  ;;  %v788_v9 = vadd.f32 %v5332_v10, %v749_v36 }
 0x15d   : > { %4457 = vrsqrt.f32 %v655_v17  ;;  %v625_v24 = vmul.f32 0.125, %v577_v54  ;;  %v626_v62 = vmul.f32 0.125, %v580_v26  ;;  %v750_v40 = vmul.f32 %v5325_v44, %v711_v51 }
 0x15e   : > { %v4446_v11 = vpop.eup %4445  ;;  %4459 = vrsqrt.f32 %v656_v55  ;;  %v813_v3 = vpack.c.bf16 %v787_v52, %v786_v43  ;;  %v751_v28 = vmul.f32 %v5325_v44, %v712_v58 }
 0x15f   : > { %v4448_v4 = vpop.eup %4447  ;;  %v657_v21 = vadd.f32 1e-05, %v625_v24  ;;  %v658_v6 = vadd.f32 1e-05, %v626_v62  ;;  %v789_v56 = vadd.f32 %v5332_v10, %v750_v40  ;;  %v713_v14 = vmul.f32 %v4446_v11, %v5212_v25 }
 0x160   : > { %4292 = vmatmul.mubr.msk.bf16.gmra.mxu0 %vm312_vm0, %v813_v3  ;;  %v583_v59 = vpop.xlane.xlu1 %582  ;;  %v586_v7 = vpop.xlane.xlu0 %585  ;;  %v714_v18 = vmul.f32 %v4448_v4, %v5221_v15  ;;  %v790_v15 = vadd.f32 %v5332_v10, %v751_v28 }
 0x161   : > { %4461 = vrsqrt.f32 %v657_v21  ;;  %v627_v45 = vmul.f32 0.125, %v583_v59  ;;  %v628_v60 = vmul.f32 0.125, %v586_v7  ;;  %v814_v61 = vpack.c.bf16 %v789_v56, %v788_v9 }
 0x162   : > { %v4450_v27 = vpop.eup %4449  ;;  %4463 = vrsqrt.f32 %v658_v6  ;;  %v752_v19 = vmul.f32 %v5325_v44, %v713_v14  ;;  %v753_v0 = vmul.f32 %v5325_v44, %v714_v18 }
 0x163   : > { %v4452_v2 = vpop.eup %4451  ;;  %v659_v25 = vadd.f32 1e-05, %v627_v45  ;;  %v660_v13 = vadd.f32 1e-05, %v628_v60  ;;  %4295 = vmatprep.mubr.msk.bf16.mxu0 %vm312_vm0, %v814_v61  ;;  %v715_v16 = vmul.f32 %v4450_v27, %v5224_v29 }
 0x164   : > { %v589_v30 = vpop.xlane.xlu1 %588  ;;  %v592_v32 = vpop.xlane.xlu0 %591  ;;  %v791_v1 = vadd.f32 %v5332_v10, %v752_v19  ;;  %v716_v34 = vmul.f32 %v4452_v2, %v5233_v31  ;;  %v792_v5 = vadd.f32 %v5332_v10, %v753_v0 }
 0x165   : > { %4465 = vrsqrt.f32 %v659_v25  ;;  %v629_v35 = vmul.f32 0.125, %v589_v30  ;;  %v630_v38 = vmul.f32 0.125, %v592_v32  ;;  %v754_v48 = vmul.f32 %v5325_v44, %v715_v16 }
 0x166   : > { %v4454_v42 = vpop.eup %4453  ;;  %4467 = vrsqrt.f32 %v660_v13  ;;  %v815_v20 = vpack.c.bf16 %v791_v1, %v790_v15  ;;  %v755_v51 = vmul.f32 %v5325_v44, %v716_v34 }
 0x167   : > { %v4456_v46 = vpop.eup %4455  ;;  %v661_v29 = vadd.f32 1e-05, %v629_v35  ;;  %v662_v36 = vadd.f32 1e-05, %v630_v38  ;;  %v793_v50 = vadd.f32 %v5332_v10, %v754_v48  ;;  %v717_v17 = vmul.f32 %v4454_v42, %v5236_v33 }
 0x168   : > { %4296 = vmatmul.mubr.msk.bf16.gmra.mxu0 %vm312_vm0, %v815_v20  ;;  %v595_v31 = vpop.xlane.xlu1 %594  ;;  %v598_v55 = vpop.xlane.xlu0 %597  ;;  %v718_v54 = vmul.f32 %v4456_v46, %v5245_v47  ;;  %v794_v47 = vadd.f32 %v5332_v10, %v755_v51 }
 0x169   : > { %4469 = vrsqrt.f32 %v661_v29  ;;  %v631_v26 = vmul.f32 0.125, %v595_v31  ;;  %v632_v43 = vmul.f32 0.125, %v598_v55  ;;  %v816_v52 = vpack.c.bf16 %v793_v50, %v792_v5 }
 0x16a   : > { %v4458_v58 = vpop.eup %4457  ;;  %4471 = vrsqrt.f32 %v662_v36  ;;  %v756_v24 = vmul.f32 %v5325_v44, %v717_v17  ;;  %v757_v62 = vmul.f32 %v5325_v44, %v718_v54 }
 0x16b   : > { %v4460_v40 = vpop.eup %4459  ;;  %v663_v33 = vadd.f32 1e-05, %v631_v26  ;;  %v664_v11 = vadd.f32 1e-05, %v632_v43  ;;  %4299 = vmatprep.mubr.msk.bf16.mxu0 %vm312_vm0, %v816_v52  ;;  %v719_v3 = vmul.f32 %v4458_v58, %v5248_v37 }
 0x16c   : > { %v601_v9 = vpop.xlane.xlu1 %600  ;;  %v795_v4 = vadd.f32 %v5332_v10, %v756_v24  ;;  %v720_v21 = vmul.f32 %v4460_v40, %v5257_v63  ;;  %v796_v7 = vadd.f32 %v5332_v10, %v757_v62 }
 0x16d   : > { %4473 = vrsqrt.f32 %v663_v33  ;;  %v633_v6 = vmul.f32 0.125, %v601_v9  ;;  %v758_v56 = vmul.f32 %v5325_v44, %v719_v3 }
 0x16e   : > { %v4462_v14 = vpop.eup %4461  ;;  %4475 = vrsqrt.f32 %v664_v11  ;;  %v817_v59 = vpack.c.bf16 %v795_v4, %v794_v47  ;;  %v759_v60 = vmul.f32 %v5325_v44, %v720_v21 }
 0x16f   : > { %v4464_v28 = vpop.eup %4463  ;;  %v665_v18 = vadd.f32 1e-05, %v633_v6  ;;  %v797_v37 = vadd.f32 %v5332_v10, %v758_v56  ;;  %v721_v45 = vmul.f32 %v4462_v14, %v5260_v41 }
 0x170   : > { %4300 = vmatmul.mubr.msk.bf16.gmra.mxu0 %vm312_vm0, %v817_v59  ;;  %v722_v63 = vmul.f32 %v4464_v28, %v5272_v22  ;;  %v798_v2 = vadd.f32 %v5332_v10, %v759_v60 }
 0x171   : > { %4477 = vrsqrt.f32 %v665_v18  ;;  %v818_v61 = vpack.c.bf16 %v797_v37, %v796_v7  ;;  %v760_v27 = vmul.f32 %v5325_v44, %v721_v45 }
 0x172   : > { %v4466_v19 = vpop.eup %4465  ;;  %v761_v13 = vmul.f32 %v5325_v44, %v722_v63 }
 0x173   : > { %v4468_v0 = vpop.eup %4467  ;;  %4303 = vmatprep.mubr.msk.bf16.mxu0 %vm312_vm0, %v818_v61  ;;  %v799_v25 = vadd.f32 %v5332_v10, %v760_v27  ;;  %v723_v41 = vmul.f32 %v4466_v19, %v5275_v23 }
 0x174   : > { %v724_v16 = vmul.f32 %v4468_v0, %v5284_v49  ;;  %v800_v1 = vadd.f32 %v5332_v10, %v761_v13 }
 0x175   : > { %v819_v30 = vpack.c.bf16 %v799_v25, %v798_v2  ;;  %v762_v22 = vmul.f32 %v5325_v44, %v723_v41 }
 0x176   : > { %v4470_v32 = vpop.eup %4469  ;;  %v763_v38 = vmul.f32 %v5325_v44, %v724_v16 }
 0x177   : > { %v4472_v15 = vpop.eup %4471  ;;  %v801_v34 = vadd.f32 %v5332_v10, %v762_v22  ;;  %v725_v35 = vmul.f32 %v4470_v32, %v5287_v39 }
 0x178   : > { %4304 = vmatmul.mubr.msk.bf16.gmra.mxu0 %vm312_vm0, %v819_v30  ;;  %v726_v23 = vmul.f32 %v4472_v15, %v5296_v8  ;;  %v802_v5 = vadd.f32 %v5332_v10, %v763_v38 }
 0x179   : > { %v820_v48 = vpack.c.bf16 %v801_v34, %v800_v1  ;;  %v764_v49 = vmul.f32 %v5325_v44, %v725_v35 }
 0x17a   : > { %v4474_v42 = vpop.eup %4473  ;;  %v765_v39 = vmul.f32 %v5325_v44, %v726_v23 }
 0x17b   : > { %v4476_v20 = vpop.eup %4475  ;;  %4307 = vmatprep.mubr.msk.bf16.mxu0 %vm312_vm0, %v820_v48  ;;  %v803_v46 = vadd.f32 %v5332_v10, %v764_v49  ;;  %v727_v29 = vmul.f32 %v4474_v42, %v5299_v53 }
 0x17c   : > { %v728_v36 = vmul.f32 %v4476_v20, %v5308_v12  ;;  %v804_v31 = vadd.f32 %v5332_v10, %v765_v39 }
 0x17d   : > { %v821_v50 = vpack.c.bf16 %v803_v46, %v802_v5  ;;  %v766_v8 = vmul.f32 %v5325_v44, %v727_v29 }
 0x17e   : > { %v4478_v17 = vpop.eup %4477  ;;  %v767_v54 = vmul.f32 %v5325_v44, %v728_v36 }
 0x17f   : > { %v805_v55 = vadd.f32 %v5332_v10, %v766_v8  ;;  %v729_v51 = vmul.f32 %v4478_v17, %v5311_v57  ;;  %v5446_v57 = vld [vmem:[%s7425_s4] ss:$0 sm:$0xff] }
 0x180   : > { %4308 = vmatmul.mubr.msk.bf16.gmra.mxu0 %vm312_vm0, %v821_v50  ;;  %v806_v12 = vadd.f32 %v5332_v10, %v767_v54 }
 0x181   : > { %v822_v26 = vpack.c.bf16 %v805_v55, %v804_v31  ;;  %v768_v53 = vmul.f32 %v5325_v44, %v729_v51 }
 0x183   : > { %4311 = vmatprep.mubr.msk.bf16.mxu0 %vm312_vm0, %v822_v26  ;;  %v807_v43 = vadd.f32 %v5332_v10, %v768_v53 }
 0x185   : > { %v823_v52 = vpack.c.bf16 %v807_v43, %v806_v12 }
 0x188   : > { %4312 = vmatmul.mubr.msk.bf16.gmra.mxu0 %vm312_vm0, %v823_v52 }
 0x210   : > { %v4285_v58 = vpop.f32.mrf.mxu0 }
 0x211   : > { %v927_v42 = vadd.f32 %v4285_v58, %v5446_v57 }
 0x212   : > { %v918_v24 = vpop.f32.mrf.mxu0 }
 0x213   : > { %v919_v44 = vadd.f32 %v5446_v57, %v918_v24 }
 0x214   : > { %v4286_v62 = vpop.f32.mrf.mxu0 }
 0x215   : > { %v930_v23 = vadd.f32 %v4286_v62, %v5446_v57 }
 0x216   : > { %v921_v40 = vpop.f32.mrf.mxu0 }
 0x217   : > { %v922_v33 = vadd.f32 %v5446_v57, %v921_v40  ;;  %v5494_v5 = vpack.c.bf16 %v930_v23, %v927_v42 }
 0x218   : > { %v4289_v11 = vpop.f32.mrf.mxu0 }
 0x219   : > { %v5450_v3 = vpack.c.bf16 %v922_v33, %v919_v44  ;;  %v943_v22 = vadd.f32 %v4289_v11, %v5446_v57  ;;  %7561 = vst [vmem:[#allocation3_spill] sm:$0xff] %v5494_v5 }
 0x21a   : > { %v934_v10 = vpop.f32.mrf.mxu0 }
 0x21b   : > { %7560 = vst [vmem:[#allocation2_spill] sm:$0xff] %v5450_v3  ;;  %3943 = vmatprep.mubr.msk.bf16.mxu1 %vm1109_vm2, %v5450_v3  ;;  %v935_v35 = vadd.f32 %v5446_v57, %v934_v10 }
 0x21c   : > { %v4290_v9 = vpop.f32.mrf.mxu0 }
 0x21d   : > { %v946_v13 = vadd.f32 %v4290_v9, %v5446_v57 }
 0x21e   : > { %v937_v47 = vpop.f32.mrf.mxu0 }
 0x21f   : > { %v5482_v15 = vpack.c.bf16 %v946_v13, %v943_v22  ;;  %v938_v1 = vadd.f32 %v5446_v57, %v937_v47 }
 0x220   : > { %v4293_v4 = vpop.f32.mrf.mxu0 }
 0x221   : > { %v959_v61 = vadd.f32 %v4293_v4, %v5446_v57  ;;  %v5489_v48 = vpack.c.bf16 %v938_v1, %v935_v35 }
 0x222   : > { %v950_v21 = vpop.f32.mrf.mxu0 }
 0x223   : > { %v951_v25 = vadd.f32 %v5446_v57, %v950_v21 }
 0x224   : > { %v4294_v6 = vpop.f32.mrf.mxu0 }
 0x225   : > { %v962_v45 = vadd.f32 %v4294_v6, %v5446_v57 }
 0x226   : > { %v953_v56 = vpop.f32.mrf.mxu0 }
 0x227   : > { %v5466_v19 = vpack.c.bf16 %v962_v45, %v959_v61  ;;  %v954_v0 = vadd.f32 %v5446_v57, %v953_v56 }
 0x228   : > { %v4297_v14 = vpop.f32.mrf.mxu0 }
 0x229   : > { %v975_v28 = vadd.f32 %v4297_v14, %v5446_v57  ;;  %v5477_v16 = vpack.c.bf16 %v954_v0, %v951_v25 }
 0x22a   : > { %v966_v59 = vpop.f32.mrf.mxu0 }
 0x22b   : > { %v967_v17 = vadd.f32 %v5446_v57, %v966_v59 }
 0x22c   : > { %v4298_v7 = vpop.f32.mrf.mxu0 }
 0x22d   : > { %v978_v18 = vadd.f32 %v4298_v7, %v5446_v57 }
 0x22e   : > { %v969_v37 = vpop.f32.mrf.mxu0 }
 0x22f   : > { %v5457_v60 = vpack.c.bf16 %v978_v18, %v975_v28  ;;  %v970_v50 = vadd.f32 %v5446_v57, %v969_v37 }
 0x230   : > { %v5459_v63 = vpop.f32.mrf.mxu0 }
 0x231   : > { %1091 = vrot.lane.b32.xlu0 %v5457_v60, %s4903_s15  ;;  %v5506_v51 = vpack.c.bf16 %v970_v50, %v967_v17  ;;  %v991_v6 = vadd.f32 %v5459_v63, %v5446_v57 }
 0x232   : > { %v5464_v27 = vpop.f32.mrf.mxu0 }
 0x233   : > { %v983_v59 = vadd.f32 %v5446_v57, %v5464_v27 }
 0x234   : > { %v5469_v2 = vpop.f32.mrf.mxu0 }
 0x235   : > { %1087 = vrot.lane.b32.xlu0 %v5466_v19, %s4903_s15  ;;  %v994_v4 = vadd.f32 %v5469_v2, %v5446_v57 }
 0x236   : > { %v5474_v41 = vpop.f32.mrf.mxu0 }
 0x237   : > { %v5562_v56 = vpack.c.bf16 %v994_v4, %v991_v6  ;;  %v986_v14 = vadd.f32 %v5446_v57, %v5474_v41 }
 0x238   : > { %v4305_v30 = vpop.f32.mrf.mxu0 }
 0x239   : > { %1085 = vrot.lane.b32.xlu0 %v5477_v16, %s4903_s15  ;;  %v1007_v11 = vadd.f32 %v4305_v30, %v5446_v57  ;;  %v5572_v7 = vpack.c.bf16 %v986_v14, %v983_v59 }
 0x23a   : > { %v998_v32 = vpop.f32.mrf.mxu0 }
 0x23b   : > { %v999_v47 = vadd.f32 %v5446_v57, %v998_v32  ;;  %7562 = vst [vmem:[#allocation4_spill] sm:$0xff] %v5572_v7 }
 0x23c   : > { %v4306_v34 = vpop.f32.mrf.mxu0 }
 0x23d   : > { %1083 = vrot.lane.b32.xlu0 %v5482_v15, %s4903_s15  ;;  %v1010_v44 = vadd.f32 %v4306_v34, %v5446_v57 }
 0x23e   : > { %v1001_v38 = vpop.f32.mrf.mxu0 }
 0x23f   : > { %v5544_v10 = vpack.c.bf16 %v1010_v44, %v1007_v11  ;;  %v1002_v9 = vadd.f32 %v5446_v57, %v1001_v38 }
 0x240   : > { %v4309_v49 = vpop.f32.mrf.mxu0 }
 0x241   : > { %1081 = vrot.lane.b32.xlu0 %v5489_v48, %s4903_s15  ;;  %v1023_v58 = vadd.f32 %v4309_v49, %v5446_v57  ;;  %v5554_v21 = vpack.c.bf16 %v1002_v9, %v999_v47 }
 0x242   : > { %v1014_v20 = vpop.f32.mrf.mxu0 }
 0x243   : > { %v1015_v40 = vadd.f32 %v5446_v57, %v1014_v20 }
 0x244   : > { %v4310_v46 = vpop.f32.mrf.mxu0 }
 0x245   : > { %1079 = vrot.lane.b32.xlu0 %v5494_v5, %s4903_s15  ;;  %v1026_v43 = vadd.f32 %v4310_v46, %v5446_v57 }
 0x246   : > { %v1017_v29 = vpop.f32.mrf.mxu0 }
 0x247   : > { %v5528_v24 = vpack.c.bf16 %v1026_v43, %v1023_v58  ;;  %v1018_v62 = vadd.f32 %v5446_v57, %v1017_v29 }
 0x248   : > { %v4313_v39 = vpop.f32.mrf.mxu0 }
 0x249   : > { %1077 = vrot.lane.b32.xlu0 %v5450_v3, %s4903_s15  ;;  %v1039_v31 = vadd.f32 %v4313_v39, %v5446_v57  ;;  %v5537_v33 = vpack.c.bf16 %v1018_v62, %v1015_v40 }
 0x24a   : > { %v1030_v36 = vpop.f32.mrf.mxu0 }
 0x24b   : > { %v1031_v12 = vadd.f32 %v5446_v57, %v1030_v36 }
 0x24c   : > { %v4314_v8 = vpop.f32.mrf.mxu0 }
 0x24d   : > { %v1042_v55 = vadd.f32 %v4314_v8, %v5446_v57  ;;  %2183 = vrot.lane.b32.xlu0 %v5457_v60, %s4904_s16 }
 0x24e   : > { %v1033_v26 = vpop.f32.mrf.mxu0 }
 0x24f   : > { %v5508_v54 = vpack.c.bf16 %v1042_v55, %v1039_v31  ;;  %v1034_v53 = vadd.f32 %v5446_v57, %v1033_v26 }
 0x251   : > { %2181 = vrot.lane.b32.xlu0 %v5506_v51, %s4904_s16  ;;  %1107 = vrot.lane.b32.xlu1 %v5508_v54, %s4903_s15  ;;  %v5521_v52 = vpack.c.bf16 %v1034_v53, %v1031_v12 }
 0x255   : > { %2179 = vrot.lane.b32.xlu0 %v5466_v19, %s4904_s16  ;;  %1089 = vrot.lane.b32.xlu1 %v5506_v51, %s4903_s15 }
 0x259   : > { %2177 = vrot.lane.b32.xlu0 %v5477_v16, %s4904_s16  ;;  %1105 = vrot.lane.b32.xlu1 %v5521_v52, %s4903_s15 }
 0x25d   : > { %2175 = vrot.lane.b32.xlu0 %v5482_v15, %s4904_s16  ;;  %1103 = vrot.lane.b32.xlu1 %v5528_v24, %s4903_s15 }
 0x261   : > { %2173 = vrot.lane.b32.xlu0 %v5489_v48, %s4904_s16  ;;  %1101 = vrot.lane.b32.xlu1 %v5537_v33, %s4903_s15 }
 0x265   : > { %2171 = vrot.lane.b32.xlu0 %v5494_v5, %s4904_s16  ;;  %1099 = vrot.lane.b32.xlu1 %v5544_v10, %s4903_s15 }
 0x269   : > { %2169 = vrot.lane.b32.xlu0 %v5450_v3, %s4904_s16  ;;  %1097 = vrot.lane.b32.xlu1 %v5554_v21, %s4903_s15 }
 0x26d   : > { %2137 = vrot.lane.b32.xlu0 %v5450_v3, %s4905_s17  ;;  %1095 = vrot.lane.b32.xlu1 %v5562_v56, %s4903_s15 }
 0x271   : > { %2141 = vrot.lane.b32.xlu0 %v5489_v48, %s4905_s17  ;;  %1093 = vrot.lane.b32.xlu1 %v5572_v7, %s4903_s15 }
 0x275   : > { %2145 = vrot.lane.b32.xlu0 %v5477_v16, %s4905_s17  ;;  %2199 = vrot.lane.b32.xlu1 %v5508_v54, %s4904_s16 }
 0x279   : > { %2149 = vrot.lane.b32.xlu0 %v5506_v51, %s4905_s17  ;;  %2197 = vrot.lane.b32.xlu1 %v5521_v52, %s4904_s16 }
 0x27d   : > { %2153 = vrot.lane.b32.xlu0 %v5572_v7, %s4905_s17  ;;  %2195 = vrot.lane.b32.xlu1 %v5528_v24, %s4904_s16 }
 0x281   : > { %2157 = vrot.lane.b32.xlu0 %v5554_v21, %s4905_s17  ;;  %2193 = vrot.lane.b32.xlu1 %v5537_v33, %s4904_s16 }
 0x285   : > { %2161 = vrot.lane.b32.xlu0 %v5537_v33, %s4905_s17  ;;  %2191 = vrot.lane.b32.xlu1 %v5544_v10, %s4904_s16 }
 0x289   : > { %1941 = vrot.lane.b32.xlu0 %v5508_v54, %s4906_s18  ;;  %2189 = vrot.lane.b32.xlu1 %v5554_v21, %s4904_s16 }
 0x28d   : > { %1937 = vrot.lane.b32.xlu0 %v5528_v24, %s4906_s18  ;;  %2187 = vrot.lane.b32.xlu1 %v5562_v56, %s4904_s16 }
 0x291   : > { %1935 = vrot.lane.b32.xlu0 %v5537_v33, %s4906_s18  ;;  %2185 = vrot.lane.b32.xlu1 %v5572_v7, %s4904_s16 }
 0x295   : > { %1919 = vrot.lane.b32.xlu0 %v5477_v16, %s4906_s18  ;;  %2139 = vrot.lane.b32.xlu1 %v5494_v5, %s4905_s17 }
 0x299   : > { %1933 = vrot.lane.b32.xlu0 %v5544_v10, %s4906_s18  ;;  %2143 = vrot.lane.b32.xlu1 %v5482_v15, %s4905_s17 }
 0x29d   : > { %1931 = vrot.lane.b32.xlu0 %v5554_v21, %s4906_s18  ;;  %2147 = vrot.lane.b32.xlu1 %v5466_v19, %s4905_s17 }
 0x2a1   : > { %1915 = vrot.lane.b32.xlu0 %v5489_v48, %s4906_s18  ;;  %2151 = vrot.lane.b32.xlu1 %v5457_v60, %s4905_s17 }
 0x2a3   : > { %v1092_v57 = vpop.permute.xlu0 %1091 }
 0x2a4   : > { %v1180_v25 = vsel %vm1109_vm2, %v1092_v57, 0 }
 0x2a5   : > { %1929 = vrot.lane.b32.xlu0 %v5562_v56, %s4906_s18  ;;  %2155 = vrot.lane.b32.xlu1 %v5562_v56, %s4905_s17 }
 0x2a7   : > { %v1088_v28 = vpop.permute.xlu0 %1087 }
 0x2a8   : > { %v1174_v23 = vsel %vm1109_vm2, %v1088_v28, 0 }
 0x2a9   : > { %1927 = vrot.lane.b32.xlu0 %v5572_v7, %s4906_s18  ;;  %2159 = vrot.lane.b32.xlu1 %v5544_v10, %s4905_s17 }
 0x2ab   : > { %v1086_v18 = vpop.permute.xlu0 %1085 }
 0x2ac   : > { %v1171_v29 = vsel %vm1109_vm2, %v1086_v18, 0 }
 0x2ad   : > { %1911 = vrot.lane.b32.xlu0 %v5450_v3, %s4906_s18  ;;  %2163 = vrot.lane.b32.xlu1 %v5528_v24, %s4905_s17 }
 0x2af   : > { %v1084_v37 = vpop.permute.xlu0 %1083 }
 0x2b0   : > { %v1168_v17 = vsel %vm1109_vm2, %v1084_v37, 0 }
 0x2b1   : > { %3032 = vrot.lane.b32.xlu0 %v5508_v54, %s4907_s19  ;;  %2167 = vrot.lane.b32.xlu1 %v5508_v54, %s4905_s17 }
 0x2b3   : > { %v1082_v45 = vpop.permute.xlu0 %1081 }
 0x2b4   : > { %v1165_v12 = vsel %vm1109_vm2, %v1082_v45, 0 }
 0x2b5   : > { %3028 = vrot.lane.b32.xlu0 %v5528_v24, %s4907_s19  ;;  %1925 = vrot.lane.b32.xlu1 %v5457_v60, %s4906_s18 }
 0x2b7   : > { %v5646_v63 = vpop.permute.xlu0 %1079 }
 0x2b8   : > { %v1162_v44 = vsel %vm1109_vm2, %v5646_v63, 0 }
 0x2b9   : > { %3026 = vrot.lane.b32.xlu0 %v5537_v33, %s4907_s19  ;;  %1923 = vrot.lane.b32.xlu1 %v5506_v51, %s4906_s18 }
 0x2bb   : > { %v5652_v61 = vpop.permute.xlu0 %1077 }
 0x2bc   : > { %v1159_v6 = vsel %vm1109_vm2, %v5652_v61, 0 }
 0x2bd   : > { %3010 = vrot.lane.b32.xlu0 %v5477_v16, %s4907_s19  ;;  %1921 = vrot.lane.b32.xlu1 %v5466_v19, %s4906_s18 }
 0x2bf   : > { %v5658_v27 = vpop.permute.xlu0 %2183 }
 0x2c0   : > { %v2271_v18 = vsel %vm1109_vm2, %v5658_v27, 0 }
 0x2c1   : > { %3024 = vrot.lane.b32.xlu0 %v5544_v10, %s4907_s19  ;;  %1917 = vrot.lane.b32.xlu1 %v5482_v15, %s4906_s18 }
 0x2c3   : > { %v1108_v0 = vpop.permute.xlu1 %1107  ;;  %v5664_v2 = vpop.permute.xlu0 %2181 }
 0x2c4   : > { %4384 = vmatprep.subr.msk.bf16.mxu1 %vm1109_vm2, %v1108_v0  ;;  %v2268_v27 = vsel %vm1109_vm2, %v5664_v2, 0 }
 0x2c5   : > { %3022 = vrot.lane.b32.xlu0 %v5554_v21, %s4907_s19  ;;  %1913 = vrot.lane.b32.xlu1 %v5494_v5, %s4906_s18 }
 0x2c6   : > { %3928 = vmatpush3.bf16.xpose.msra.mxu1 %v1180_v25 }
 0x2c7   : > { %v1090_v41 = vpop.permute.xlu1 %1089  ;;  %v5672_v13 = vpop.permute.xlu0 %2179 }
 0x2c8   : > { %v1177_v32 = vsel %vm1109_vm2, %v1090_v41, 0  ;;  %v2265_v2 = vsel %vm1109_vm2, %v5672_v13, 0 }
 0x2c9   : > { %3006 = vrot.lane.b32.xlu0 %v5489_v48, %s4907_s19  ;;  %3016 = vrot.lane.b32.xlu1 %v5457_v60, %s4907_s19 }
 0x2cb   : > { %v1106_v30 = vpop.permute.xlu1 %1105  ;;  %v5678_v22 = vpop.permute.xlu0 %2177 }
 0x2cc   : > { %4385 = vmatprep.subr.msk.bf16.mxu1 %vm1109_vm2, %v1106_v30 }
 0x2cd   : > { %2165 = vrot.lane.b32.xlu0 %v5521_v52, %s4905_s17  ;;  %3014 = vrot.lane.b32.xlu1 %v5506_v51, %s4907_s19 }
 0x2ce   : > { %3930 = vmatpush3.bf16.xpose.msra.mxu1 %v1177_v32 }
 0x2cf   : > { %v1104_v1 = vpop.permute.xlu1 %1103  ;;  %v5686_v34 = vpop.permute.xlu0 %2175 }
 0x2d0   : > { %4386 = vmatprep.subr.msk.bf16.mxu1 %vm1109_vm2, %v1104_v1 }
 0x2d1   : > { %1939 = vrot.lane.b32.xlu0 %v5521_v52, %s4906_s18  ;;  %3012 = vrot.lane.b32.xlu1 %v5466_v19, %s4907_s19 }
 0x2d3   : > { %v1102_v35 = vpop.permute.xlu1 %1101  ;;  %v5693_v38 = vpop.permute.xlu0 %2173 }
 0x2d5   : > { %3030 = vrot.lane.b32.xlu0 %v5521_v52, %s4907_s19  ;;  %3008 = vrot.lane.b32.xlu1 %v5482_v15, %s4907_s19 }
 0x2d6   : > { %3932 = vmatpush3.bf16.xpose.msra.mxu1 %v1174_v23 }
 0x2d7   : > { %4387 = vmatprep.subr.msk.bf16.mxu1 %vm1109_vm2, %v1102_v35  ;;  %v1100_v49 = vpop.permute.xlu1 %1099  ;;  %v5701_v42 = vpop.permute.xlu0 %2171 }
 0x2db   : > { %v1098_v20 = vpop.permute.xlu1 %1097  ;;  %v5703_v46 = vpop.permute.xlu0 %2169 }
 0x2de   : > { %3934 = vmatpush3.bf16.xpose.msra.mxu1 %v1171_v29 }
 0x2df   : > { %4388 = vmatprep.subr.msk.bf16.mxu1 %vm1109_vm2, %v1100_v49  ;;  %v1096_v39 = vpop.permute.xlu1 %1095  ;;  %v5707_v36 = vpop.permute.xlu0 %2137  ;;  %v2262_v49 = vsel %vm1109_vm2, %v5678_v22, 0 }
 0x2e3   : > { %v1094_v50 = vpop.permute.xlu1 %1093  ;;  %v5709_v8 = vpop.permute.xlu0 %2141 }
 0x2e6   : > { %3936 = vmatpush3.bf16.xpose.msra.mxu1 %v1168_v17  ;;  %v2256_v17 = vsel %vm1109_vm2, %v5693_v38, 0 }
 0x2e7   : > { %4389 = vmatprep.subr.msk.bf16.mxu1 %vm1109_vm2, %v1098_v20  ;;  %v2200_v31 = vpop.permute.xlu1 %2199  ;;  %v5713_v55 = vpop.permute.xlu0 %2145 }
 0x2eb   : > { %v2198_v26 = vpop.permute.xlu1 %2197  ;;  %v5715_v53 = vpop.permute.xlu0 %2149 }
 0x2ee   : > { %3938 = vmatpush3.bf16.xpose.msra.mxu1 %v1165_v12 }
 0x2ef   : > { %4390 = vmatprep.subr.msk.bf16.mxu1 %vm1109_vm2, %v1096_v39  ;;  %v2196_v43 = vpop.permute.xlu1 %2195  ;;  %v5719_v58 = vpop.permute.xlu0 %2153  ;;  %v2259_v39 = vsel %vm1109_vm2, %v5686_v34, 0 }
 0x2f3   : > { %v2194_v62 = vpop.permute.xlu1 %2193  ;;  %v5721_v40 = vpop.permute.xlu0 %2157 }
 0x2f6   : > { %3940 = vmatpush3.bf16.xpose.msra.mxu1 %v1162_v44 }
 0x2f7   : > { %4391 = vmatprep.subr.msk.bf16.mxu1 %vm1109_vm2, %v1094_v50  ;;  %v2192_v11 = vpop.permute.xlu1 %2191  ;;  %v5726_v9 = vpop.permute.xlu0 %2161 }
 0x2fb   : > { %v2190_v47 = vpop.permute.xlu1 %2189  ;;  %v1942_v4 = vpop.permute.xlu0 %1941 }
 0x2fc   : > { %3975 = vmatprep.subr.bf16.mxu0 %v1942_v4 }
 0x2fe   : > { %3942 = vmatpush3.bf16.xpose.msra.mxu1 %v1159_v6 }
 0x2ff   : > { %4392 = vmatprep.subr.msk.bf16.mxu1 %vm1109_vm2, %v2200_v31  ;;  %v2188_v14 = vpop.permute.xlu1 %2187  ;;  %v5731_v59 = vpop.permute.xlu0 %1937  ;;  %v2253_v31 = vsel %vm1109_vm2, %v5701_v42, 0 }
 0x303   : > { %v2186_v57 = vpop.permute.xlu1 %2185  ;;  %v5733_v28 = vpop.permute.xlu0 %1935 }
 0x305   : > { %3944 = vmatmul.mubr.msk.bf16.vlgmr.msra.gmra.mxu1 %vm1109_vm2, %v5450_v3 }
 0x306   : > { %3945 = vmatprep.mubr.msk.bf16.mxu1 %vm1109_vm2, %v5494_v5  ;;  %4088 = vmatpush3.bf16.xpose.msra.mxu1 %v2271_v18 }
 0x307   : > { %4393 = vmatprep.subr.msk.bf16.mxu1 %vm1109_vm2, %v2198_v26  ;;  %v5742_v37 = vpop.permute.xlu1 %2139  ;;  %v5744_v45 = vpop.permute.xlu0 %1919  ;;  %v2250_v26 = vsel %vm1109_vm2, %v5703_v46, 0 }
 0x30b   : > { %v5746_v63 = vpop.permute.xlu1 %2143  ;;  %v5748_v61 = vpop.permute.xlu0 %1933 }
 0x30d   : > { %3946 = vmatmul.mubr.msk.bf16.gmra.mxu1 %vm1109_vm2, %v5494_v5 }
 0x30e   : > { %3947 = vmatprep.mubr.msk.bf16.mxu1 %vm1109_vm2, %v5489_v48  ;;  %4090 = vmatpush3.bf16.xpose.msra.mxu1 %v2268_v27 }
 0x30f   : > { %4394 = vmatprep.subr.msk.bf16.mxu1 %vm1109_vm2, %v2196_v43  ;;  %v5757_v0 = vpop.permute.xlu1 %2147  ;;  %v5759_v25 = vpop.permute.xlu0 %1931 }
 0x313   : > { %v5761_v41 = vpop.permute.xlu1 %2151  ;;  %v5763_v30 = vpop.permute.xlu0 %1915 }
 0x315   : > { %3948 = vmatmul.mubr.msk.bf16.gmra.mxu1 %vm1109_vm2, %v5489_v48 }
 0x316   : > { %3949 = vmatprep.mubr.msk.bf16.mxu1 %vm1109_vm2, %v5482_v15  ;;  %4092 = vmatpush3.bf16.xpose.msra.mxu1 %v2265_v2 }
 0x317   : > { %4395 = vmatprep.subr.msk.bf16.mxu1 %vm1109_vm2, %v2194_v62  ;;  %v5772_v32 = vpop.permute.xlu1 %2155  ;;  %v1930_v1 = vpop.permute.xlu0 %1929 }
 0x31b   : > { %v5774_v35 = vpop.permute.xlu1 %2159  ;;  %v1928_v23 = vpop.permute.xlu0 %1927 }
 0x31d   : > { %3950 = vmatmul.mubr.msk.bf16.gmra.mxu1 %vm1109_vm2, %v5482_v15 }
 0x31e   : > { %3951 = vmatprep.mubr.msk.bf16.mxu1 %vm1109_vm2, %v5477_v16  ;;  %4094 = vmatpush3.bf16.xpose.msra.mxu1 %v2262_v49 }
 0x31f   : > { %4396 = vmatprep.subr.msk.bf16.mxu1 %vm1109_vm2, %v2192_v11  ;;  %v5783_v48 = vpop.permute.xlu1 %2163  ;;  %v1912_v13 = vpop.permute.xlu0 %1911 }
 0x323   : > { %v5785_v20 = vpop.permute.xlu1 %2167  ;;  %v3033_v29 = vpop.permute.xlu0 %3032 }
 0x325   : > { %3952 = vmatmul.mubr.msk.bf16.gmra.mxu1 %vm1109_vm2, %v5477_v16 }
 0x326   : > { %3953 = vmatprep.mubr.msk.bf16.mxu1 %vm1109_vm2, %v5466_v19  ;;  %4096 = vmatpush3.bf16.xpose.msra.mxu1 %v2259_v39 }
 0x327   : > { %4397 = vmatprep.subr.msk.bf16.mxu1 %vm1109_vm2, %v2190_v47  ;;  %v1926_v15 = vpop.permute.xlu1 %1925  ;;  %v5794_v22 = vpop.permute.xlu0 %3028 }
 0x328   : > { %7563 = vst [vmem:[#allocation5_spill] sm:$0xff] %v5794_v22  ;;  %3976 = vmatpush3.bf16.msra.mxu0 %v1926_v15 }
 0x32b   : > { %v5796_v50 = vpop.permute.xlu0 %3026  ;;  %v1924_v42 = vpop.permute.xlu1 %1923 }
 0x32c   : > { %7564 = vst [vmem:[#allocation6_spill] sm:$0xff] %v5796_v50 }
 0x32d   : > { %3954 = vmatmul.mubr.msk.bf16.gmra.mxu1 %vm1109_vm2, %v5466_v19 }
 0x32e   : > { %3955 = vmatprep.mubr.msk.bf16.mxu1 %vm1109_vm2, %v5506_v51  ;;  %4098 = vmatpush3.bf16.xpose.msra.mxu1 %v2256_v17 }
 0x32f   : > { %4398 = vmatprep.subr.msk.bf16.mxu1 %vm1109_vm2, %v2188_v14  ;;  %v5805_v16 = vpop.permute.xlu0 %3010  ;;  %v1922_v46 = vpop.permute.xlu1 %1921 }
 0x330   : > { %7565 = vst [vmem:[#allocation7_spill] sm:$0xff] %v5805_v16 }
 0x333   : > { %v5807_v34 = vpop.permute.xlu0 %3024 }
 0x334   : > { %7566 = vst [vmem:[#allocation8_spill] sm:$0xff] %v5807_v34 }
 0x335   : > { %3956 = vmatmul.mubr.msk.bf16.gmra.mxu1 %vm1109_vm2, %v5506_v51 }
 0x336   : > { %3957 = vmatprep.mubr.msk.bf16.mxu1 %vm1109_vm2, %v5457_v60  ;;  %4100 = vmatpush3.bf16.xpose.msra.mxu1 %v2253_v31 }
 0x337   : > { %4399 = vmatprep.subr.msk.bf16.mxu1 %vm1109_vm2, %v2186_v57  ;;  %v5816_v19 = vpop.permute.xlu0 %3022 }
 0x338   : > { %7567 = vst [vmem:[#allocation9_spill] sm:$0xff] %v5816_v19 }
 0x33b   : > { %v5818_v38 = vpop.permute.xlu0 %3006 }
 0x33c   : > { %7568 = vst [vmem:[#allocation10_spill] sm:$0xff] %v5818_v38 }
 0x33d   : > { %3958 = vmatmul.mubr.msk.bf16.gmra.mxu1 %vm1109_vm2, %v5457_v60  ;;  %v1918_v60 = vpop.permute.xlu1 %1917 }
 0x33e   : > { %3959 = vmatprep.mubr.msk.bf16.mxu1 %vm1109_vm2, %v5572_v7  ;;  %4102 = vmatpush3.bf16.xpose.msra.mxu1 %v2250_v26 }
 0x33f   : > { %v5826_v51 = vpop.permute.xlu0 %2165 }
 0x341   : > { %v1914_v43 = vpop.permute.xlu1 %1913 }
 0x343   : > { %v1940_v12 = vpop.permute.xlu0 %1939 }
 0x344   : > { %3977 = vmatprep.subr.bf16.mxu0 %v1940_v12 }
 0x345   : > { %3960 = vmatmul.mubr.msk.bf16.gmra.mxu1 %vm1109_vm2, %v5572_v7  ;;  %3978 = vmatpush3.bf16.msra.mxu0 %v1924_v42 }
 0x346   : > { %3961 = vmatprep.mubr.msk.bf16.mxu1 %vm1109_vm2, %v5562_v56  ;;  %3979 = vmatprep.subr.bf16.mxu0 %v5731_v59 }
 0x349   : > { %3980 = vmatpush3.bf16.msra.mxu0 %v1922_v46 }
 0x34a   : > { %3981 = vmatprep.subr.bf16.mxu0 %v5733_v28 }
 0x34d   : > { %3962 = vmatmul.mubr.msk.bf16.gmra.mxu1 %vm1109_vm2, %v5562_v56  ;;  %3982 = vmatpush3.bf16.msra.mxu0 %v5744_v45 }
 0x34e   : > { %3963 = vmatprep.mubr.msk.bf16.mxu1 %vm1109_vm2, %v5554_v21  ;;  %3983 = vmatprep.subr.bf16.mxu0 %v5748_v61 }
 0x351   : > { %3984 = vmatpush3.bf16.msra.mxu0 %v1918_v60 }
 0x352   : > { %3985 = vmatprep.subr.bf16.mxu0 %v5759_v25 }
 0x355   : > { %3964 = vmatmul.mubr.msk.bf16.gmra.mxu1 %vm1109_vm2, %v5554_v21  ;;  %3986 = vmatpush3.bf16.msra.mxu0 %v5763_v30 }
 0x356   : > { %3965 = vmatprep.mubr.msk.bf16.mxu1 %vm1109_vm2, %v5544_v10  ;;  %3987 = vmatprep.subr.bf16.mxu0 %v1930_v1 }
 0x359   : > { %3988 = vmatpush3.bf16.msra.mxu0 %v1914_v43 }
 0x35a   : > { %3989 = vmatprep.subr.bf16.mxu0 %v1928_v23 }
 0x35d   : > { %3966 = vmatmul.mubr.msk.bf16.gmra.mxu1 %vm1109_vm2, %v5544_v10  ;;  %3990 = vmatpush3.bf16.msra.mxu0 %v1912_v13 }
 0x35e   : > { %3967 = vmatprep.mubr.msk.bf16.mxu1 %vm1109_vm2, %v5537_v33  ;;  %4135 = vmatprep.subr.bf16.mxu0 %v3033_v29 }
 0x365   : > { %3968 = vmatmul.mubr.msk.bf16.gmra.mxu1 %vm1109_vm2, %v5537_v33 }
 0x366   : > { %3969 = vmatprep.mubr.msk.bf16.mxu1 %vm1109_vm2, %v5528_v24 }
 0x36d   : > { %3970 = vmatmul.mubr.msk.bf16.gmra.mxu1 %vm1109_vm2, %v5528_v24 }
 0x36e   : > { %3971 = vmatprep.mubr.msk.bf16.mxu1 %vm1109_vm2, %v5521_v52 }
 0x375   : > { %3972 = vmatmul.mubr.msk.bf16.gmra.mxu1 %vm1109_vm2, %v5521_v52 }
 0x376   : > { %3973 = vmatprep.mubr.msk.bf16.mxu1 %vm1109_vm2, %v5508_v54 }
 0x37d   : > { %3974 = vmatmul.mubr.msk.bf16.gmra.mxu1 %vm1109_vm2, %v5508_v54 }
 0x37e   : > { %4103 = vmatprep.mubr.msk.bf16.mxu1 %vm1109_vm2, %v5707_v36 }
 0x385   : > { %4104 = vmatmul.mubr.msk.bf16.vlgmr.msra.gmra.mxu1 %vm1109_vm2, %v5707_v36 }
 0x386   : > { %4105 = vmatprep.mubr.msk.bf16.mxu1 %vm1109_vm2, %v5742_v37 }
 0x38d   : > { %4106 = vmatmul.mubr.msk.bf16.gmra.mxu1 %vm1109_vm2, %v5742_v37 }
 0x38e   : > { %4107 = vmatprep.mubr.msk.bf16.mxu1 %vm1109_vm2, %v5709_v8 }
 0x395   : > { %4108 = vmatmul.mubr.msk.bf16.gmra.mxu1 %vm1109_vm2, %v5709_v8 }
 0x396   : > { %4109 = vmatprep.mubr.msk.bf16.mxu1 %vm1109_vm2, %v5746_v63 }
 0x39d   : > { %4110 = vmatmul.mubr.msk.bf16.gmra.mxu1 %vm1109_vm2, %v5746_v63 }
 0x39e   : > { %4111 = vmatprep.mubr.msk.bf16.mxu1 %vm1109_vm2, %v5713_v55 }
 0x3a5   : > { %4112 = vmatmul.mubr.msk.bf16.gmra.mxu1 %vm1109_vm2, %v5713_v55 }
 0x3a6   : > { %4113 = vmatprep.mubr.msk.bf16.mxu1 %vm1109_vm2, %v5757_v0 }
 0x3ad   : > { %4114 = vmatmul.mubr.msk.bf16.gmra.mxu1 %vm1109_vm2, %v5757_v0 }
 0x3ae   : > { %4115 = vmatprep.mubr.msk.bf16.mxu1 %vm1109_vm2, %v5715_v53 }
 0x3b5   : > { %4116 = vmatmul.mubr.msk.bf16.gmra.mxu1 %vm1109_vm2, %v5715_v53 }
 0x3b6   : > { %4117 = vmatprep.mubr.msk.bf16.mxu1 %vm1109_vm2, %v5761_v41 }
 0x3bd   : > { %4118 = vmatmul.mubr.msk.bf16.gmra.mxu1 %vm1109_vm2, %v5761_v41 }
 0x3be   : > { %4119 = vmatprep.mubr.msk.bf16.mxu1 %vm1109_vm2, %v5719_v58 }
 0x3c5   : > { %v5898_v54 = vpop.f32.mrf.mxu1  ;;  %4120 = vmatmul.mubr.msk.bf16.gmra.mxu1 %vm1109_vm2, %v5719_v58 }
 0x3c6   : > { %4121 = vmatprep.mubr.msk.bf16.mxu1 %vm1109_vm2, %v5772_v32 }
 0x3c7   : > { %v5904_v52 = vpop.f32.mrf.mxu1 }
 0x3c8   : > { %v1399_v24 = vmax.f32 %v5898_v54, %v5904_v52 }
 0x3c9   : > { %v5908_v33 = vpop.f32.mrf.mxu1 }
 0x3ca   : > { %1400 = vmax.xlane.f32.xlu0 %v1399_v24 }
 0x3cb   : > { %v5910_v10 = vpop.f32.mrf.mxu1 }
 0x3cc   : > { %v1402_v21 = vmax.f32 %v5908_v33, %v5910_v10 }
 0x3cd   : > { %v5914_v36 = vpop.f32.mrf.mxu1  ;;  %4122 = vmatmul.mubr.msk.bf16.gmra.mxu1 %vm1109_vm2, %v5772_v32 }
 0x3ce   : > { %1403 = vmax.xlane.f32.xlu1 %v1402_v21  ;;  %4123 = vmatprep.mubr.msk.bf16.mxu1 %vm1109_vm2, %v5721_v40 }
 0x3cf   : > { %v5920_v8 = vpop.f32.mrf.mxu1 }
 0x3d0   : > { %v1405_v55 = vmax.f32 %v5914_v36, %v5920_v8 }
 0x3d1   : > { %v5924_v53 = vpop.f32.mrf.mxu1 }
 0x3d2   : > { %1406 = vmax.xlane.f32.xlu0 %v1405_v55 }
 0x3d3   : > { %v5926_v58 = vpop.f32.mrf.mxu1 }
 0x3d4   : > { %v1408_v62 = vmax.f32 %v5924_v53, %v5926_v58 }
 0x3d5   : > { %v5930_v44 = vpop.f32.mrf.mxu1  ;;  %4124 = vmatmul.mubr.msk.bf16.gmra.mxu1 %vm1109_vm2, %v5721_v40 }
 0x3d6   : > { %1409 = vmax.xlane.f32.xlu0 %v1408_v62  ;;  %4125 = vmatprep.mubr.msk.bf16.mxu1 %vm1109_vm2, %v5774_v35 }
 0x3d7   : > { %v5936_v11 = vpop.f32.mrf.mxu1 }
 0x3d8   : > { %v1411_v47 = vmax.f32 %v5930_v44, %v5936_v11 }
 0x3d9   : > { %v5940_v4 = vpop.f32.mrf.mxu1 }
 0x3da   : > { %1412 = vmax.xlane.f32.xlu0 %v1411_v47 }
 0x3db   : > { %v5942_v6 = vpop.f32.mrf.mxu1 }
 0x3dc   : > { %v1414_v14 = vmax.f32 %v5940_v4, %v5942_v6 }
 0x3dd   : > { %v5946_v59 = vpop.f32.mrf.mxu1  ;;  %4126 = vmatmul.mubr.msk.bf16.gmra.mxu1 %vm1109_vm2, %v5774_v35 }
 0x3de   : > { %1415 = vmax.xlane.f32.xlu1 %v1414_v14  ;;  %4127 = vmatprep.mubr.msk.bf16.mxu1 %vm1109_vm2, %v5726_v9 }
 0x3df   : > { %v5952_v40 = vpop.f32.mrf.mxu1 }
 0x3e0   : > { %v1417_v57 = vmax.f32 %v5946_v59, %v5952_v40 }
 0x3e1   : > { %v5956_v28 = vpop.f32.mrf.mxu1 }
 0x3e2   : > { %1418 = vmax.xlane.f32.xlu0 %v1417_v57 }
 0x3e3   : > { %v5958_v18 = vpop.f32.mrf.mxu1 }
 0x3e4   : > { %v1420_v37 = vmax.f32 %v5956_v28, %v5958_v18 }
 0x3e5   : > { %v5962_v45 = vpop.f32.mrf.mxu1  ;;  %4128 = vmatmul.mubr.msk.bf16.gmra.mxu1 %vm1109_vm2, %v5726_v9 }
 0x3e6   : > { %1421 = vmax.xlane.f32.xlu1 %v1420_v37  ;;  %4129 = vmatprep.mubr.msk.bf16.mxu1 %vm1109_vm2, %v5783_v48 }
 0x3e7   : > { %v5968_v63 = vpop.f32.mrf.mxu1 }
 0x3e8   : > { %v1423_v43 = vmax.f32 %v5962_v45, %v5968_v63 }
 0x3e9   : > { %v5970_v61 = vpop.f32.mrf.mxu1 }
 0x3eb   : > { %v5972_v27 = vpop.f32.mrf.mxu1 }
 0x3ec   : > { %v1426_v0 = vmax.f32 %v5970_v61, %v5972_v27 }
 0x3ed   : > { %v5976_v25 = vpop.f32.mrf.mxu1  ;;  %4130 = vmatmul.mubr.msk.bf16.gmra.mxu1 %vm1109_vm2, %v5783_v48 }
 0x3ee   : > { %1427 = vmax.xlane.f32.xlu1 %v1426_v0  ;;  %4131 = vmatprep.mubr.msk.bf16.mxu1 %vm1109_vm2, %v5826_v51 }
 0x3ef   : > { %v5982_v9 = vpop.f32.mrf.mxu1 }
 0x3f0   : > { %v1429_v55 = vmax.f32 %v5976_v25, %v5982_v9 }
 0x3f1   : > { %v5984_v41 = vpop.f32.mrf.mxu1 }
 0x3f3   : > { %v5986_v30 = vpop.f32.mrf.mxu1 }
 0x3f4   : > { %v1432_v2 = vmax.f32 %v5984_v41, %v5986_v30 }
 0x3f5   : > { %v5990_v32 = vpop.f32.mrf.mxu1  ;;  %4132 = vmatmul.mubr.msk.bf16.gmra.mxu1 %vm1109_vm2, %v5826_v51 }
 0x3f6   : > { %1433 = vmax.xlane.f32.xlu1 %v1432_v2  ;;  %4133 = vmatprep.mubr.msk.bf16.mxu1 %vm1109_vm2, %v5785_v20 }
 0x3f7   : > { %v5996_v1 = vpop.f32.mrf.mxu1 }
 0x3f8   : > { %3020 = vrot.lane.b32.xlu0 %v5562_v56, %s4907_s19  ;;  %v1435_v57 = vmax.f32 %v5990_v32, %v5996_v1 }
 0x3f9   : > { %v6000_v35 = vpop.f32.mrf.mxu1 }
 0x3fb   : > { %v6002_v23 = vpop.f32.mrf.mxu1 }
 0x3fc   : > { %v1438_v49 = vmax.f32 %v6000_v35, %v6002_v23 }
 0x3fd   : > { %v6006_v48 = vpop.f32.mrf.mxu1  ;;  %4134 = vmatmul.mubr.msk.bf16.gmra.mxu1 %vm1109_vm2, %v5785_v20 }
 0x3fe   : > { %1439 = vmax.xlane.f32.xlu1 %v1438_v49 }
 0x3ff   : > { %v6010_v13 = vpop.f32.mrf.mxu1 }
 0x400   : > { %v1441_v2 = vmax.f32 %v6006_v48, %v6010_v13 }
 0x401   : > { %v6012_v29 = vpop.f32.mrf.mxu1 }
 0x403   : > { %v6014_v39 = vpop.f32.mrf.mxu1 }
 0x404   : > { %v1444_v56 = vmax.f32 %v6012_v29, %v6014_v39 }
 0x405   : > { %v6018_v15 = vpop.f32.mrf.mxu1 }
 0x406   : > { %1445 = vmax.xlane.f32.xlu1 %v1444_v56 }
 0x407   : > { %v6020_v17 = vpop.f32.mrf.mxu1 }
 0x409   : > { %v6022_v31 = vpop.f32.mrf.mxu1 }
 0x40b   : > { %v6024_v26 = vpop.f32.mrf.mxu1 }
 0x40c   : > { %v1450_v20 = vmax.f32 %v6022_v31, %v6024_v26 }
 0x40d   : > { %v6028_v51 = vpop.f32.mrf.mxu1 }
 0x40e   : > { %1451 = vmax.xlane.f32.xlu1 %v1450_v20 }
 0x40f   : > { %v6030_v42 = vpop.f32.mrf.mxu1 }
 0x411   : > { %v6032_v12 = vpop.f32.mrf.mxu1 }
 0x413   : > { %v6034_v46 = vpop.f32.mrf.mxu1 }
 0x414   : > { %v1456_v60 = vmax.f32 %v6032_v12, %v6034_v46 }
 0x415   : > { %v6040_v24 = vpop.f32.mrf.mxu1 }
 0x416   : > { %1457 = vmax.xlane.f32.xlu1 %v1456_v60  ;;  %v1447_v60 = vmax.f32 %v6018_v15, %v6020_v17 }
 0x417   : > { %1424 = vmax.xlane.f32.xlu0 %v1423_v43  ;;  %v6042_v21 = vpop.f32.mrf.mxu1 }
 0x418   : > { %7569 = vst [vmem:[#allocation11_spill] sm:$0xff] %v6042_v21  ;;  %v1459_v19 = vmax.f32 %v6040_v24, %v6042_v21 }
 0x419   : > { %v6046_v62 = vpop.f32.mrf.mxu1 }
 0x41b   : > { %1430 = vmax.xlane.f32.xlu0 %v1429_v55  ;;  %v6048_v47 = vpop.f32.mrf.mxu1 }
 0x41c   : > { %v1462_v14 = vmax.f32 %v6046_v62, %v6048_v47 }
 0x41d   : > { %v6054_v37 = vpop.f32.mrf.mxu1 }
 0x41e   : > { %7570 = vst [vmem:[#allocation12_spill] sm:$0xff] %v6054_v37  ;;  %1463 = vmax.xlane.f32.xlu1 %v1462_v14  ;;  %v1453_v14 = vmax.f32 %v6028_v51, %v6030_v42 }
 0x41f   : > { %1436 = vmax.xlane.f32.xlu0 %v1435_v57  ;;  %v6056_v0 = vpop.f32.mrf.mxu1 }
 0x420   : > { %7571 = vst [vmem:[#allocation13_spill] sm:$0xff] %v6056_v0 }
 0x421   : > { %v6060_v49 = vpop.f32.mrf.mxu1 }
 0x423   : > { %1442 = vmax.xlane.f32.xlu0 %v1441_v2  ;;  %v6062_v56 = vpop.f32.mrf.mxu1 }
 0x424   : > { %v1468_v20 = vmax.f32 %v6060_v49, %v6062_v56 }
 0x425   : > { %v6068_v43 = vpop.f32.mrf.mxu1 }
 0x426   : > { %7572 = vst [vmem:[#allocation14_spill] sm:$0xff] %v6068_v43  ;;  %1469 = vmax.xlane.f32.xlu1 %v1468_v20 }
 0x427   : > { %1448 = vmax.xlane.f32.xlu0 %v1447_v60  ;;  %v6070_v55 = vpop.f32.mrf.mxu1  ;;  %v1465_v60 = vmax.f32 %v6054_v37, %v6056_v0 }
 0x428   : > { %7573 = vst [vmem:[#allocation15_spill] sm:$0xff] %v6070_v55  ;;  %v1471_v7 = vmax.f32 %v6068_v43, %v6070_v55 }
 0x429   : > { %v6074_v57 = vpop.f32.mrf.mxu1 }
 0x42b   : > { %1454 = vmax.xlane.f32.xlu0 %v1453_v14  ;;  %v6076_v2 = vpop.f32.mrf.mxu1 }
 0x42c   : > { %v1474_v38 = vmax.f32 %v6074_v57, %v6076_v2 }
 0x42d   : > { %v6082_v3 = vpop.f32.mrf.mxu1 }
 0x42e   : > { %7574 = vst [vmem:[#allocation16_spill] sm:$0xff] %v6082_v3  ;;  %1475 = vmax.xlane.f32.xlu1 %v1474_v38 }
 0x42f   : > { %1460 = vmax.xlane.f32.xlu0 %v1459_v19  ;;  %v6084_v20 = vpop.f32.mrf.mxu1 }
 0x430   : > { %7575 = vst [vmem:[#allocation17_spill] sm:$0xff] %v6084_v20  ;;  %v1477_v38 = vmax.f32 %v6082_v3, %v6084_v20 }
 0x431   : > { %v6088_v34 = vpop.f32.mrf.mxu1 }
 0x433   : > { %1466 = vmax.xlane.f32.xlu0 %v1465_v60  ;;  %v6090_v14 = vpop.f32.mrf.mxu1 }
 0x434   : > { %v1480_v16 = vmax.f32 %v6088_v34, %v6090_v14 }
 0x435   : > { %v6096_v50 = vpop.f32.mrf.mxu1 }
 0x436   : > { %7576 = vst [vmem:[#allocation18_spill] sm:$0xff] %v6096_v50  ;;  %1481 = vmax.xlane.f32.xlu1 %v1480_v16 }
 0x437   : > { %v6098_v19 = vpop.f32.mrf.mxu1  ;;  %1472 = vmax.xlane.f32.xlu0 %v1471_v7  ;;  %v6114_v7 = vpop.permute.xlu1 %3016 }
 0x438   : > { %7577 = vst [vmem:[#allocation19_spill] sm:$0xff] %v6098_v19  ;;  %v1483_v55 = vmax.f32 %v6096_v50, %v6098_v19  ;;  %7580 = vst [vmem:[#allocation22_spill] sm:$0xff] %v6114_v7 }
 0x439   : > { %v6102_v5 = vpop.f32.mrf.mxu1 }
 0x43b   : > { %v6104_v60 = vpop.f32.mrf.mxu1  ;;  %1478 = vmax.xlane.f32.xlu0 %v1477_v38  ;;  %v6126_v50 = vpop.permute.xlu1 %3014 }
 0x43c   : > { %v1486_v22 = vmax.f32 %v6102_v5, %v6104_v60  ;;  %7584 = vst [vmem:[#allocation26_spill] sm:$0xff] %v6126_v50  ;;  %v6142_v50 = vpop.permute.xlu0 %3030 }
 0x43d   : > { %v6110_v43 = vpop.f32.mrf.mxu1  ;;  %7590 = vst [vmem:[#allocation32_spill] sm:$0xff] %v6142_v50 }
 0x43e   : > { %7578 = vst [vmem:[#allocation20_spill] sm:$0xff] %v6110_v43  ;;  %1487 = vmax.xlane.f32.xlu1 %v1486_v22 }
 0x43f   : > { %v6112_v16 = vpop.f32.mrf.mxu1  ;;  %1484 = vmax.xlane.f32.xlu0 %v1483_v55 }
 0x440   : > { %7579 = vst [vmem:[#allocation21_spill] sm:$0xff] %v6112_v16  ;;  %v1489_v20 = vmax.f32 %v6110_v43, %v6112_v16  ;;  %v6136_v43 = vpop.permute.xlu1 %3012 }
 0x441   : > { %v6118_v3 = vpop.f32.mrf.mxu1  ;;  %7588 = vst [vmem:[#allocation30_spill] sm:$0xff] %v6136_v43 }
 0x442   : > { %7581 = vst [vmem:[#allocation23_spill] sm:$0xff] %v6118_v3 }
 0x443   : > { %v6120_v38 = vpop.f32.mrf.mxu1  ;;  %1490 = vmax.xlane.f32.xlu0 %v1489_v20 }
 0x444   : > { %7582 = vst [vmem:[#allocation24_spill] sm:$0xff] %v6120_v38  ;;  %v1492_v0 = vmax.f32 %v6118_v3, %v6120_v38 }
 0x445   : > { %v6124_v19 = vpop.f32.mrf.mxu1 }
 0x446   : > { %7583 = vst [vmem:[#allocation25_spill] sm:$0xff] %v6124_v19  ;;  %1493 = vmax.xlane.f32.xlu1 %v1492_v0 }
 0x447   : > { %v6128_v22 = vpop.f32.mrf.mxu1 }
 0x448   : > { %7585 = vst [vmem:[#allocation27_spill] sm:$0xff] %v6128_v22  ;;  %v2490_v55 = vmax.f32 %v6124_v19, %v6128_v22 }
 0x449   : > { %v6132_v7 = vpop.f32.mrf.mxu1 }
 0x44a   : > { %7586 = vst [vmem:[#allocation28_spill] sm:$0xff] %v6132_v7  ;;  %2491 = vmax.xlane.f32.xlu0 %v2490_v55  ;;  %v6150_v55 = vpop.permute.xlu1 %3008 }
 0x44b   : > { %v6134_v16 = vpop.f32.mrf.mxu1  ;;  %7592 = vst [vmem:[#allocation34_spill] sm:$0xff] %v6150_v55 }
 0x44c   : > { %7587 = vst [vmem:[#allocation29_spill] sm:$0xff] %v6134_v16  ;;  %v2493_v20 = vmax.f32 %v6132_v7, %v6134_v16 }
 0x44d   : > { %v6140_v37 = vpop.f32.mrf.mxu1 }
 0x44e   : > { %7589 = vst [vmem:[#allocation31_spill] sm:$0xff] %v6140_v37  ;;  %2494 = vmax.xlane.f32.xlu1 %v2493_v20 }
 0x44f   : > { %v6144_v0 = vpop.f32.mrf.mxu1 }
 0x450   : > { %7591 = vst [vmem:[#allocation33_spill] sm:$0xff] %v6144_v0  ;;  %v2496_v22 = vmax.f32 %v6140_v37, %v6144_v0 }
 0x451   : > { %v6148_v19 = vpop.f32.mrf.mxu1 }
 0x452   : > { %2497 = vmax.xlane.f32.xlu0 %v2496_v22 }
 0x453   : > { %v6152_v38 = vpop.f32.mrf.mxu1  ;;  %v1401_v43 = vpop.xlane.xlu0 %1400 }
 0x454   : > { %7593 = vst [vmem:[#allocation35_spill] sm:$0xff] %v6152_v38  ;;  %v2499_v16 = vmax.f32 %v6148_v19, %v6152_v38  ;;  %v1495_v20 = vsub.f32 %v5898_v54, %v1401_v43  ;;  %v1496_v50 = vsub.f32 %v5904_v52, %v1401_v43 }
 0x455   : > { %v6158_v7 = vpop.f32.mrf.mxu1 }
 0x456   : > { %v1559_v3 = vmul.f32 1.442695, %v1495_v20  ;;  %v1561_v21 = vmul.f32 1.442695, %v1496_v50  ;;  %2500 = vmax.xlane.f32.xlu1 %v2499_v16 }
 0x457   : > { %v1404_v0 = vpop.xlane.xlu1 %1403  ;;  %v6160_v37 = vpop.f32.mrf.mxu1 }
 0x458   : > { %4479 = vpow2.f32 %v1559_v3  ;;  %v1497_v22 = vsub.f32 %v5908_v33, %v1404_v0  ;;  %v1498_v55 = vsub.f32 %v5910_v10, %v1404_v0  ;;  %v2502_v38 = vmax.f32 %v6158_v7, %v6160_v37 }
 0x459   : > { %4481 = vpow2.f32 %v1561_v21  ;;  %v6166_v54 = vpop.f32.mrf.mxu1 }
 0x45a   : > { %7594 = vst [vmem:[#allocation36_spill] sm:$0xff] %v6166_v54  ;;  %v1563_v52 = vmul.f32 1.442695, %v1497_v22  ;;  %v1565_v43 = vmul.f32 1.442695, %v1498_v55  ;;  %2503 = vmax.xlane.f32.xlu0 %v2502_v38 }
 0x45b   : > { %v6168_v20 = vpop.f32.mrf.mxu1  ;;  %v1407_v50 = vpop.xlane.xlu0 %1406 }
 0x45c   : > { %7595 = vst [vmem:[#allocation37_spill] sm:$0xff] %v6168_v20  ;;  %4483 = vpow2.f32 %v1563_v52  ;;  %v2505_v3 = vmax.f32 %v6166_v54, %v6168_v20  ;;  %v1499_v33 = vsub.f32 %v5914_v36, %v1407_v50  ;;  %v1500_v10 = vsub.f32 %v5920_v8, %v1407_v50 }
 0x45d   : > { %4485 = vpow2.f32 %v1565_v43  ;;  %v6174_v16 = vpop.f32.mrf.mxu1 }
 0x45e   : > { %2506 = vmax.xlane.f32.xlu1 %v2505_v3  ;;  %v1567_v21 = vmul.f32 1.442695, %v1499_v33  ;;  %v1569_v38 = vmul.f32 1.442695, %v1500_v10 }
 0x45f   : > { %v6176_v0 = vpop.f32.mrf.mxu1  ;;  %v1410_v55 = vpop.xlane.xlu0 %1409 }
 0x460   : > { %v2508_v22 = vmax.f32 %v6174_v16, %v6176_v0  ;;  %v1501_v52 = vsub.f32 %v5924_v53, %v1410_v55  ;;  %v1502_v20 = vsub.f32 %v5926_v58, %v1410_v55  ;;  %4487 = vpow2.f32 %v1567_v21 }
 0x461   : > { %v6182_v54 = vpop.f32.mrf.mxu1  ;;  %4489 = vpow2.f32 %v1569_v38 }
 0x462   : > { %2509 = vmax.xlane.f32.xlu0 %v2508_v22  ;;  %v1571_v36 = vmul.f32 1.442695, %v1501_v52  ;;  %v1573_v43 = vmul.f32 1.442695, %v1502_v20 }
 0x463   : > { %v6184_v8 = vpop.f32.mrf.mxu1  ;;  %v1413_v3 = vpop.xlane.xlu0 %1412 }
 0x464   : > { %7596 = vst [vmem:[#allocation38_spill] sm:$0xff] %v6184_v8  ;;  %v2511_v50 = vmax.f32 %v6182_v54, %v6184_v8  ;;  %4491 = vpow2.f32 %v1571_v36  ;;  %v1503_v58 = vsub.f32 %v5930_v44, %v1413_v3  ;;  %v1504_v55 = vsub.f32 %v5936_v11, %v1413_v3 }
 0x465   : > { %v6188_v33 = vpop.eup %4479  ;;  %v6190_v10 = vpop.f32.mrf.mxu1  ;;  %4493 = vpow2.f32 %v1573_v43 }
 0x466   : > { %7597 = vst [vmem:[#allocation39_spill] sm:$0xff] %v6188_v33  ;;  %7598 = vst [vmem:[#allocation40_spill] sm:$0xff] %v6190_v10  ;;  %v6192_v53 = vpop.eup %4481  ;;  %2512 = vmax.xlane.f32.xlu1 %v2511_v50  ;;  %v1575_v44 = vmul.f32 1.442695, %v1503_v58  ;;  %v1577_v11 = vmul.f32 1.442695, %v1504_v55 }
 0x467   : > { %7599 = vst [vmem:[#allocation41_spill] sm:$0xff] %v6192_v53  ;;  %v6195_v21 = vpop.f32.mrf.mxu1  ;;  %v1416_v20 = vpop.xlane.xlu1 %1415  ;;  %v1687_v22 = vadd.f32 %v6192_v53, %v6188_v33 }
 0x468   : > { %7600 = vst [vmem:[#allocation42_spill] sm:$0xff] %v6195_v21  ;;  %v2514_v38 = vmax.f32 %v6190_v10, %v6195_v21  ;;  %v1505_v36 = vsub.f32 %v5940_v4, %v1416_v20  ;;  %v1506_v3 = vsub.f32 %v5942_v6, %v1416_v20  ;;  %4495 = vpow2.f32 %v1575_v44 }
 0x469   : > { %v6202_v52 = vpop.eup %4483  ;;  %v6204_v8 = vpop.f32.mrf.mxu1  ;;  %4497 = vpow2.f32 %v1577_v11 }
 0x46a   : > { %7601 = vst [vmem:[#allocation43_spill] sm:$0xff] %v6204_v8  ;;  %v6206_v50 = vpop.eup %4485  ;;  %2515 = vmax.xlane.f32.xlu0 %v2514_v38  ;;  %1688 = vadd.xlane.f32.xlu1 %v1687_v22  ;;  %v1579_v33 = vmul.f32 1.442695, %v1505_v36  ;;  %v1581_v58 = vmul.f32 1.442695, %v1506_v3 }
 0x46b   : > { %v6209_v43 = vpop.f32.mrf.mxu1  ;;  %v1690_v21 = vadd.f32 %v6206_v50, %v6202_v52  ;;  %v1419_v55 = vpop.xlane.xlu0 %1418 }
 0x46c   : > { %7602 = vst [vmem:[#allocation44_spill] sm:$0xff] %v6209_v43  ;;  %v2517_v4 = vmax.f32 %v6204_v8, %v6209_v43  ;;  %4499 = vpow2.f32 %v1579_v33  ;;  %v1508_v11 = vsub.f32 %v5952_v40, %v1419_v55 }
 0x46d   : > { %v6214_v10 = vpop.f32.mrf.mxu1  ;;  %v6218_v38 = vpop.eup %4487  ;;  %4501 = vpow2.f32 %v1581_v58 }
 0x46e   : > { %7603 = vst [vmem:[#allocation45_spill] sm:$0xff] %v6214_v10  ;;  %1691 = vadd.xlane.f32.xlu1 %v1690_v21  ;;  %7605 = vst [vmem:[#allocation47_spill] sm:$0xff] %v6218_v38  ;;  %v6224_v20 = vpop.eup %4489  ;;  %v1507_v21 = vsub.f32 %v5946_v59, %v1419_v55 }
 0x46f   : > { %v6216_v53 = vpop.f32.mrf.mxu1  ;;  %v1422_v3 = vpop.xlane.xlu1 %1421 }
 0x470   : > { %7604 = vst [vmem:[#allocation46_spill] sm:$0xff] %v6216_v53  ;;  %v2520_v6 = vmax.f32 %v6214_v10, %v6216_v53  ;;  %v1693_v53 = vadd.f32 %v6224_v20, %v6218_v38  ;;  %v1509_v33 = vsub.f32 %v5956_v28, %v1422_v3  ;;  %v1510_v8 = vsub.f32 %v5958_v18, %v1422_v3 }
 0x471   : > { %v6226_v22 = vpop.f32.mrf.mxu1  ;;  %v6231_v36 = vpop.eup %4491 }
 0x472   : > { %7606 = vst [vmem:[#allocation48_spill] sm:$0xff] %v6226_v22  ;;  %2521 = vmax.xlane.f32.xlu0 %v2520_v6  ;;  %2518 = vmax.xlane.f32.xlu1 %v2517_v4  ;;  %7608 = vst [vmem:[#allocation50_spill] sm:$0xff] %v6231_v36  ;;  %v6236_v10 = vpop.eup %4493  ;;  %v1583_v4 = vmul.f32 1.442695, %v1507_v21  ;;  %v1585_v6 = vmul.f32 1.442695, %v1508_v11 }
 0x473   : > { %v6229_v44 = vpop.f32.mrf.mxu1  ;;  %7609 = vst [vmem:[#allocation51_spill] sm:$0xff] %v6236_v10  ;;  %v1696_v58 = vadd.f32 %v6236_v10, %v6231_v36  ;;  %v1589_v11 = vmul.f32 1.442695, %v1510_v8 }
 0x474   : > { %7607 = vst [vmem:[#allocation49_spill] sm:$0xff] %v6229_v44  ;;  %4503 = vpow2.f32 %v1583_v4  ;;  %v2523_v18 = vmax.f32 %v6226_v22, %v6229_v44 }
 0x475   : > { %v6238_v43 = vpop.f32.mrf.mxu1  ;;  %v6252_v28 = vpop.eup %4495  ;;  %4505 = vpow2.f32 %v1585_v6 }
 0x476   : > { %7610 = vst [vmem:[#allocation52_spill] sm:$0xff] %v6238_v43  ;;  %1694 = vadd.xlane.f32.xlu1 %v1693_v53  ;;  %v1587_v53 = vmul.f32 1.442695, %v1509_v33  ;;  %7614 = vst [vmem:[#allocation56_spill] sm:$0xff] %v6252_v28 }
 0x477   : > { %v6241_v59 = vpop.f32.mrf.mxu1  ;;  %v6256_v3 = vpop.xlane.xlu1 %1427 }
 0x478   : > { %7611 = vst [vmem:[#allocation53_spill] sm:$0xff] %v6241_v59  ;;  %v2526_v40 = vmax.f32 %v6238_v43, %v6241_v59  ;;  %v6258_v59 = vpop.eup %4497  ;;  %4507 = vpow2.f32 %v1587_v53 }
 0x479   : > { %v6248_v55 = vpop.f32.mrf.mxu1  ;;  %7615 = vst [vmem:[#allocation57_spill] sm:$0xff] %v6258_v59  ;;  %v6264_v4 = vpop.eup %4499  ;;  %4509 = vpow2.f32 %v1589_v11  ;;  %v1699_v6 = vadd.f32 %v6258_v59, %v6252_v28 }
 0x47a   : > { %7612 = vst [vmem:[#allocation54_spill] sm:$0xff] %v6248_v55  ;;  %2527 = vmax.xlane.f32.xlu0 %v2526_v40  ;;  %1697 = vadd.xlane.f32.xlu1 %v1696_v58  ;;  %7618 = vst [vmem:[#allocation60_spill] sm:$0xff] %v6264_v4  ;;  %v6270_v58 = vpop.eup %4501 }
 0x47b   : > { %v6250_v21 = vpop.f32.mrf.mxu1  ;;  %7619 = vst [vmem:[#allocation61_spill] sm:$0xff] %v6270_v58  ;;  %v1702_v11 = vadd.f32 %v6270_v58, %v6264_v4 }
 0x47c   : > { %7613 = vst [vmem:[#allocation55_spill] sm:$0xff] %v6250_v21 }
 0x47d   : > { %v6260_v43 = vpop.f32.mrf.mxu1 }
 0x47e   : > { %7616 = vst [vmem:[#allocation58_spill] sm:$0xff] %v6260_v43  ;;  %2524 = vmax.xlane.f32.xlu1 %v2523_v18 }
 0x47f   : > { %v6262_v40 = vpop.f32.mrf.mxu1  ;;  %v1434_v33 = vpop.xlane.xlu1 %1433 }
 0x480   : > { %7617 = vst [vmem:[#allocation59_spill] sm:$0xff] %v6262_v40  ;;  %v2532_v8 = vmax.f32 %v6260_v43, %v6262_v40  ;;  %v1517_v53 = vsub.f32 %v5984_v41, %v1434_v33  ;;  %v1518_v22 = vsub.f32 %v5986_v30, %v1434_v33 }
 0x481   : > { %v6272_v44 = vpop.f32.mrf.mxu1  ;;  %v6284_v28 = vpop.eup %4503 }
 0x482   : > { %7620 = vst [vmem:[#allocation62_spill] sm:$0xff] %v6272_v44  ;;  %2533 = vmax.xlane.f32.xlu0 %v2532_v8  ;;  %1700 = vadd.xlane.f32.xlu1 %v1699_v6  ;;  %v1603_v40 = vmul.f32 1.442695, %v1517_v53  ;;  %7622 = vst [vmem:[#allocation64_spill] sm:$0xff] %v6284_v28  ;;  %v2529_v8 = vmax.f32 %v6248_v55, %v6250_v21  ;;  %v1605_v6 = vmul.f32 1.442695, %v1518_v22  ;;  %v6288_v59 = vpop.eup %4505 }
 0x483   : > { %v6275_v18 = vpop.f32.mrf.mxu1  ;;  %7623 = vst [vmem:[#allocation65_spill] sm:$0xff] %v6288_v59  ;;  %v1705_v21 = vadd.f32 %v6288_v59, %v6284_v28 }
 0x484   : > { %7621 = vst [vmem:[#allocation63_spill] sm:$0xff] %v6275_v18  ;;  %4511 = vpow2.f32 %v1603_v40 }
 0x485   : > { %v6280_v36 = vpop.f32.mrf.mxu1  ;;  %v6295_v53 = vpop.eup %4507  ;;  %4513 = vpow2.f32 %v1605_v6 }
 0x486   : > { %1703 = vadd.xlane.f32.xlu1 %v1702_v11  ;;  %7626 = vst [vmem:[#allocation68_spill] sm:$0xff] %v6295_v53  ;;  %v6300_v22 = vpop.eup %4509 }
 0x487   : > { %v6282_v43 = vpop.f32.mrf.mxu1  ;;  %v1440_v41 = vpop.xlane.xlu1 %1439  ;;  %7627 = vst [vmem:[#allocation69_spill] sm:$0xff] %v6300_v22  ;;  %v1708_v58 = vadd.f32 %v6300_v22, %v6295_v53 }
 0x488   : > { %v1521_v30 = vsub.f32 %v6000_v35, %v1440_v41  ;;  %v1522_v11 = vsub.f32 %v6002_v23, %v1440_v41  ;;  %v2535_v41 = vmax.f32 %v6272_v44, %v6275_v18 }
 0x489   : > { %v6290_v38 = vpop.f32.mrf.mxu1 }
 0x48a   : > { %7624 = vst [vmem:[#allocation66_spill] sm:$0xff] %v6290_v38  ;;  %2530 = vmax.xlane.f32.xlu1 %v2529_v8  ;;  %v1611_v4 = vmul.f32 1.442695, %v1521_v30  ;;  %v1613_v40 = vmul.f32 1.442695, %v1522_v11 }
 0x48b   : > { %v6293_v33 = vpop.f32.mrf.mxu1 }
 0x48c   : > { %7625 = vst [vmem:[#allocation67_spill] sm:$0xff] %v6293_v33  ;;  %4515 = vpow2.f32 %v1611_v4  ;;  %v2541_v4 = vmax.f32 %v6290_v38, %v6293_v33 }
 0x48d   : > { %v6302_v55 = vpop.f32.mrf.mxu1  ;;  %4517 = vpow2.f32 %v1613_v40 }
 0x48e   : > { %1706 = vadd.xlane.f32.xlu1 %v1705_v21 }
 0x48f   : > { %v6304_v8 = vpop.f32.mrf.mxu1  ;;  %v1446_v35 = vpop.xlane.xlu1 %1445 }
 0x490   : > { %v1525_v23 = vsub.f32 %v6012_v29, %v1446_v35  ;;  %v1526_v21 = vsub.f32 %v6014_v39, %v1446_v35  ;;  %v6331_v35 = vpop.permute.xlu0 %3020 }
 0x491   : > { %v6308_v10 = vpop.f32.mrf.mxu1  ;;  %v6320_v53 = vpop.eup %4511  ;;  %7632 = vst [vmem:[#allocation74_spill] sm:$0xff] %v6331_v35 }
 0x492   : > { %7628 = vst [vmem:[#allocation70_spill] sm:$0xff] %v6308_v10  ;;  %1709 = vadd.xlane.f32.xlu1 %v1708_v58  ;;  %v1619_v11 = vmul.f32 1.442695, %v1525_v23  ;;  %7630 = vst [vmem:[#allocation72_spill] sm:$0xff] %v6320_v53  ;;  %v1621_v29 = vmul.f32 1.442695, %v1526_v21  ;;  %v6324_v22 = vpop.eup %4513 }
 0x493   : > { %v6311_v6 = vpop.f32.mrf.mxu1  ;;  %7631 = vst [vmem:[#allocation73_spill] sm:$0xff] %v6324_v22 }
 0x494   : > { %7629 = vst [vmem:[#allocation71_spill] sm:$0xff] %v6311_v6  ;;  %4519 = vpow2.f32 %v1619_v11 }
 0x495   : > { %v6316_v30 = vpop.f32.mrf.mxu1  ;;  %4521 = vpow2.f32 %v1621_v29 }
 0x496   : > { %2536 = vmax.xlane.f32.xlu1 %v2535_v41  ;;  %v1720_v41 = vadd.f32 %v6324_v22, %v6320_v53 }
 0x497   : > { %v6318_v28 = vpop.f32.mrf.mxu1  ;;  %v1452_v58 = vpop.xlane.xlu1 %1451 }
 0x498   : > { %v1529_v39 = vsub.f32 %v6022_v31, %v1452_v58  ;;  %v1530_v23 = vsub.f32 %v6024_v26, %v1452_v58  ;;  %v2547_v31 = vmax.f32 %v6308_v10, %v6311_v6 }
 0x499   : > { %v6326_v59 = vpop.f32.mrf.mxu1 }
 0x49a   : > { %2542 = vmax.xlane.f32.xlu1 %v2541_v4  ;;  %v1627_v33 = vmul.f32 1.442695, %v1529_v39  ;;  %v6340_v4 = vpop.eup %4515  ;;  %v1629_v11 = vmul.f32 1.442695, %v1530_v23  ;;  %v1513_v39 = vsub.f32 %v5970_v61, %v6256_v3 }
 0x49b   : > { %v6329_v40 = vpop.f32.mrf.mxu1  ;;  %7633 = vst [vmem:[#allocation75_spill] sm:$0xff] %v6340_v4  ;;  %v6344_v29 = vpop.eup %4517 }
 0x49c   : > { %7634 = vst [vmem:[#allocation76_spill] sm:$0xff] %v6344_v29  ;;  %4523 = vpow2.f32 %v1627_v33  ;;  %v1595_v61 = vmul.f32 1.442695, %v1513_v39 }
 0x49d   : > { %v6336_v21 = vpop.f32.mrf.mxu1  ;;  %4525 = vpow2.f32 %v1629_v11 }
 0x49e   : > { %1721 = vadd.xlane.f32.xlu1 %v1720_v41 }
 0x49f   : > { %v6338_v38 = vpop.f32.mrf.mxu1  ;;  %v1458_v18 = vpop.xlane.xlu1 %1457 }
 0x4a0   : > { %v1425_v44 = vpop.xlane.xlu0 %1424  ;;  %v1533_v41 = vsub.f32 %v6032_v12, %v1458_v18  ;;  %v1534_v10 = vsub.f32 %v6034_v46, %v1458_v18  ;;  %v2553_v46 = vmax.f32 %v6326_v59, %v6329_v40 }
 0x4a1   : > { %v1511_v26 = vsub.f32 %v5962_v45, %v1425_v44  ;;  %v1512_v58 = vsub.f32 %v5968_v63, %v1425_v44  ;;  %v6348_v53 = vpop.f32.mrf.mxu1  ;;  %v1726_v45 = vadd.f32 %v6344_v29, %v6340_v4  ;;  %v1514_v63 = vsub.f32 %v5972_v27, %v6256_v3 }
 0x4a2   : > { %2548 = vmax.xlane.f32.xlu1 %v2547_v31  ;;  %v1635_v12 = vmul.f32 1.442695, %v1533_v41  ;;  %v6364_v31 = vpop.eup %4519  ;;  %v1637_v18 = vmul.f32 1.442695, %v1534_v10 }
 0x4a3   : > { %v1591_v22 = vmul.f32 1.442695, %v1511_v26  ;;  %v1593_v6 = vmul.f32 1.442695, %v1512_v58  ;;  %v6353_v23 = vpop.f32.mrf.mxu1  ;;  %7635 = vst [vmem:[#allocation77_spill] sm:$0xff] %v6364_v31  ;;  %v6369_v27 = vpop.eup %4521 }
 0x4a4   : > { %v1431_v35 = vpop.xlane.xlu0 %1430  ;;  %7636 = vst [vmem:[#allocation78_spill] sm:$0xff] %v6369_v27  ;;  %v1597_v3 = vmul.f32 1.442695, %v1514_v63  ;;  %v1732_v4 = vadd.f32 %v6369_v27, %v6364_v31 }
 0x4a5   : > { %v6360_v44 = vpop.f32.mrf.mxu1  ;;  %4527 = vpow2.f32 %v1591_v22  ;;  %v1515_v11 = vsub.f32 %v5976_v25, %v1431_v35  ;;  %v1516_v22 = vsub.f32 %v5982_v9, %v1431_v35 }
 0x4a6   : > { %1727 = vadd.xlane.f32.xlu1 %v1726_v45  ;;  %4529 = vpow2.f32 %v1593_v6 }
 0x4a7   : > { %v6362_v33 = vpop.f32.mrf.mxu1  ;;  %v1464_v26 = vpop.xlane.xlu1 %1463  ;;  %4531 = vpow2.f32 %v1595_v61  ;;  %v1599_v10 = vmul.f32 1.442695, %v1515_v11  ;;  %v1601_v63 = vmul.f32 1.442695, %v1516_v22 }
 0x4a8   : > { %v1437_v58 = vpop.xlane.xlu0 %1436  ;;  %4533 = vpow2.f32 %v1635_v12  ;;  %v1537_v6 = vsub.f32 %v6046_v62, %v1464_v26  ;;  %v1538_v25 = vsub.f32 %v6048_v47, %v1464_v26  ;;  %v2559_v62 = vmax.f32 %v6348_v53, %v6353_v23 }
 0x4a9   : > { %v6372_v39 = vpop.f32.mrf.mxu1  ;;  %4535 = vpow2.f32 %v1637_v18  ;;  %v6384_v12 = vpop.eup %4523  ;;  %v1519_v47 = vsub.f32 %v5990_v32, %v1437_v58 }
 0x4aa   : > { %2554 = vmax.xlane.f32.xlu1 %v2553_v46  ;;  %4537 = vpow2.f32 %v1597_v3  ;;  %v1643_v35 = vmul.f32 1.442695, %v1537_v6  ;;  %7637 = vst [vmem:[#allocation79_spill] sm:$0xff] %v6384_v12  ;;  %v1645_v46 = vmul.f32 1.442695, %v1538_v25  ;;  %v6391_v26 = vpop.eup %4525 }
 0x4ab   : > { %v6375_v41 = vpop.f32.mrf.mxu1  ;;  %4539 = vpow2.f32 %v1599_v10  ;;  %7638 = vst [vmem:[#allocation80_spill] sm:$0xff] %v6391_v26  ;;  %v1607_v32 = vmul.f32 1.442695, %v1519_v47 }
 0x4ac   : > { %v1443_v45 = vpop.xlane.xlu0 %1442  ;;  %4541 = vpow2.f32 %v1601_v63  ;;  %v1738_v63 = vadd.f32 %v6391_v26, %v6384_v12 }
 0x4ad   : > { %v6380_v9 = vpop.f32.mrf.mxu1  ;;  %4543 = vpow2.f32 %v1643_v35  ;;  %v1523_v35 = vsub.f32 %v6006_v48, %v1443_v45 }
 0x4ae   : > { %1733 = vadd.xlane.f32.xlu1 %v1732_v4  ;;  %v1520_v4 = vsub.f32 %v5996_v1, %v1437_v58  ;;  %4545 = vpow2.f32 %v1645_v46  ;;  %v2565_v46 = vmax.f32 %v6372_v39, %v6375_v41 }
 0x4af   : > { %v6382_v61 = vpop.f32.mrf.mxu1  ;;  %v1470_v18 = vpop.xlane.xlu1 %1469  ;;  %4547 = vpow2.f32 %v1607_v32  ;;  %v1615_v32 = vmul.f32 1.442695, %v1523_v35 }
 0x4b0   : > { %v6389_v11 = vpop.xlane.xlu0 %1448  ;;  %v1541_v6 = vsub.f32 %v6060_v49, %v1470_v18  ;;  %v1542_v25 = vsub.f32 %v6062_v56, %v1470_v18  ;;  %v1609_v1 = vmul.f32 1.442695, %v1520_v4 }
 0x4b1   : > { %v6394_v3 = vpop.f32.mrf.mxu1 }
 0x4b2   : > { %2560 = vmax.xlane.f32.xlu1 %v2559_v62  ;;  %v6396_v22 = vpop.eup %4527  ;;  %v1651_v56 = vmul.f32 1.442695, %v1541_v6  ;;  %v1653_v4 = vmul.f32 1.442695, %v1542_v25  ;;  %4549 = vpow2.f32 %v1609_v1  ;;  %v1524_v6 = vsub.f32 %v6010_v13, %v1443_v45 }
 0x4b3   : > { %7639 = vst [vmem:[#allocation81_spill] sm:$0xff] %v6396_v22  ;;  %v6399_v10 = vpop.eup %4529  ;;  %v6406_v58 = vpop.f32.mrf.mxu1 }
 0x4b4   : > { %v6402_v31 = vpop.xlane.xlu0 %1454  ;;  %v1711_v62 = vadd.f32 %v6399_v10, %v6396_v22  ;;  %v6411_v49 = vpop.eup %4531  ;;  %4551 = vpow2.f32 %v1651_v56  ;;  %v1617_v1 = vmul.f32 1.442695, %v1524_v6  ;;  %v2571_v56 = vmax.f32 %v6394_v3, %v6406_v58 }
 0x4b5   : > { %v6415_v18 = vpop.eup %4533  ;;  %4553 = vpow2.f32 %v1653_v4 }
 0x4b6   : > { %1739 = vadd.xlane.f32.xlu1 %v1738_v63  ;;  %1712 = vadd.xlane.f32.xlu0 %v1711_v62  ;;  %7640 = vst [vmem:[#allocation82_spill] sm:$0xff] %v6415_v18  ;;  %v6421_v48 = vpop.eup %4535  ;;  %v2538_v63 = vmax.f32 %v6280_v36, %v6282_v43  ;;  %v6426_v62 = vpop.f32.mrf.mxu1  ;;  %4555 = vpow2.f32 %v1615_v32 }
 0x4b7   : > { %v1476_v47 = vpop.xlane.xlu1 %1475  ;;  %7641 = vst [vmem:[#allocation83_spill] sm:$0xff] %v6421_v48  ;;  %v6428_v29 = vpop.eup %4537 }
 0x4b8   : > { %v1545_v12 = vsub.f32 %v6074_v57, %v1476_v47  ;;  %v1546_v26 = vsub.f32 %v6076_v2, %v1476_v47  ;;  %v6419_v27 = vpop.xlane.xlu0 %1460  ;;  %v1744_v47 = vadd.f32 %v6421_v48, %v6415_v18  ;;  %v6434_v22 = vpop.eup %4539  ;;  %v1714_v45 = vadd.f32 %v6428_v29, %v6411_v49  ;;  %v7655_v48 = vld [vmem:[#allocation24_spill] sm:$0xff] }
 0x4b9   : > { %7642 = vst [vmem:[#allocation84_spill] sm:$0xff] %v6434_v22  ;;  %v6436_v13 = vpop.f32.mrf.mxu1  ;;  %v6440_v35 = vpop.eup %4541 }
 0x4ba   : > { %2566 = vmax.xlane.f32.xlu1 %v2565_v46  ;;  %v1659_v57 = vmul.f32 1.442695, %v1545_v12  ;;  %2539 = vmax.xlane.f32.xlu0 %v2538_v63  ;;  %v1661_v2 = vmul.f32 1.442695, %v1546_v26  ;;  %v1527_v12 = vsub.f32 %v6018_v15, %v6389_v11  ;;  %v6444_v46 = vpop.eup %4543  ;;  %v1528_v15 = vsub.f32 %v6020_v17, %v6389_v11 }
 0x4bb   : > { %7643 = vst [vmem:[#allocation85_spill] sm:$0xff] %v6444_v46  ;;  %v6452_v32 = vpop.eup %4545  ;;  %v2544_v17 = vmax.f32 %v6302_v55, %v6304_v8 }
 0x4bc   : > { %v6430_v25 = vpop.xlane.xlu0 %1466  ;;  %4557 = vpow2.f32 %v1659_v57  ;;  %7644 = vst [vmem:[#allocation86_spill] sm:$0xff] %v6452_v32  ;;  %v6456_v57 = vpop.f32.mrf.mxu1  ;;  %v1625_v11 = vmul.f32 1.442695, %v1528_v15 }
 0x4bd   : > { %4559 = vpow2.f32 %v1661_v2  ;;  %v1750_v2 = vadd.f32 %v6452_v32, %v6444_v46 }
 0x4be   : > { %1745 = vadd.xlane.f32.xlu1 %v1744_v47  ;;  %1715 = vadd.xlane.f32.xlu0 %v1714_v45  ;;  %4561 = vpow2.f32 %v1617_v1  ;;  %v1717_v47 = vadd.f32 %v6440_v35, %v6434_v22  ;;  %v6464_v1 = vpop.eup %4547 }
 0x4bf   : > { %v1482_v26 = vpop.xlane.xlu1 %1481  ;;  %7645 = vst [vmem:[#allocation87_spill] sm:$0xff] %v6464_v1 }
 0x4c0   : > { %v1549_v4 = vsub.f32 %v6088_v34, %v1482_v26  ;;  %v1550_v63 = vsub.f32 %v6090_v14, %v1482_v26  ;;  %v6450_v6 = vpop.xlane.xlu0 %1472  ;;  %v1623_v34 = vmul.f32 1.442695, %v1527_v12  ;;  %v6468_v26 = vpop.f32.mrf.mxu1  ;;  %v1531_v12 = vsub.f32 %v6028_v51, %v6402_v31 }
 0x4c2   : > { %v1667_v45 = vmul.f32 1.442695, %v1549_v4  ;;  %v1669_v18 = vmul.f32 1.442695, %v1550_v63  ;;  %2572 = vmax.xlane.f32.xlu1 %v2571_v56  ;;  %1718 = vadd.xlane.f32.xlu0 %v1717_v47  ;;  %v6470_v4 = vpop.eup %4549  ;;  %v2577_v47 = vmax.f32 %v6456_v57, %v6468_v26 }
 0x4c3   : > { %7646 = vst [vmem:[#allocation88_spill] sm:$0xff] %v6470_v4  ;;  %v6474_v63 = vpop.eup %4551  ;;  %v1723_v51 = vadd.f32 %v6470_v4, %v6464_v1 }
 0x4c4   : > { %4563 = vpow2.f32 %v1667_v45  ;;  %v6460_v14 = vpop.xlane.xlu0 %1478  ;;  %7647 = vst [vmem:[#allocation89_spill] sm:$0xff] %v6474_v63  ;;  %v6480_v46 = vpop.eup %4553 }
 0x4c5   : > { %4565 = vpow2.f32 %v1669_v18  ;;  %7648 = vst [vmem:[#allocation90_spill] sm:$0xff] %v6480_v46  ;;  %v1532_v18 = vsub.f32 %v6030_v42, %v6402_v31  ;;  %v6488_v32 = vpop.eup %4555  ;;  %v2550_v42 = vmax.f32 %v6316_v30, %v6318_v28 }
 0x4c6   : > { %1751 = vadd.xlane.f32.xlu1 %v1750_v2  ;;  %2545 = vmax.xlane.f32.xlu0 %v2544_v17  ;;  %4567 = vpow2.f32 %v1623_v34  ;;  %7649 = vst [vmem:[#allocation91_spill] sm:$0xff] %v6488_v32 }
 0x4c7   : > { %v1488_v56 = vpop.xlane.xlu1 %1487  ;;  %4569 = vpow2.f32 %v1625_v11  ;;  %v1756_v11 = vadd.f32 %v6480_v46, %v6474_v63  ;;  %v1633_v31 = vmul.f32 1.442695, %v1532_v18  ;;  %v7654_v63 = vld [vmem:[#allocation23_spill] sm:$0xff] }
 0x4c8   : > { %v1553_v45 = vsub.f32 %v6102_v5, %v1488_v56  ;;  %v1554_v15 = vsub.f32 %v6104_v60, %v1488_v56  ;;  %v6484_v2 = vpop.xlane.xlu0 %1484  ;;  %v1631_v60 = vmul.f32 1.442695, %v1531_v12 }
 0x4c9   : > { %v6490_v5 = vpop.eup %4557 }
 0x4ca   : > { %v1675_v17 = vmul.f32 1.442695, %v1553_v45  ;;  %v1677_v34 = vmul.f32 1.442695, %v1554_v15  ;;  %2578 = vmax.xlane.f32.xlu1 %v2577_v47  ;;  %1724 = vadd.xlane.f32.xlu0 %v1723_v51  ;;  %7650 = vst [vmem:[#allocation92_spill] sm:$0xff] %v6490_v5  ;;  %v6494_v56 = vpop.eup %4559  ;;  %v1535_v47 = vsub.f32 %v6040_v24, %v6419_v27  ;;  %v7653_v15 = vld [vmem:[#allocation11_spill] sm:$0xff] }
 0x4cb   : > { %7651 = vst [vmem:[#allocation93_spill] sm:$0xff] %v6494_v56  ;;  %v6498_v45 = vpop.eup %4561  ;;  %v1536_v12 = vsub.f32 %v7653_v15, %v6419_v27  ;;  %v1762_v18 = vadd.f32 %v6494_v56, %v6490_v5  ;;  %v7660_v56 = vld [vmem:[#allocation27_spill] sm:$0xff] }
 0x4cc   : > { %4571 = vpow2.f32 %v1675_v17  ;;  %7652 = vst [vmem:[#allocation94_spill] sm:$0xff] %v6498_v45  ;;  %v6504_v51 = vpop.xlane.xlu0 %1490  ;;  %v1729_v24 = vadd.f32 %v6498_v45, %v6488_v32  ;;  %v1639_v27 = vmul.f32 1.442695, %v1535_v47  ;;  %v7662_v47 = vld [vmem:[#allocation13_spill] sm:$0xff] }
 0x4cd   : > { %4573 = vpow2.f32 %v1677_v34 }
 0x4ce   : > { %1757 = vadd.xlane.f32.xlu1 %v1756_v11  ;;  %2551 = vmax.xlane.f32.xlu0 %v2550_v42  ;;  %4575 = vpow2.f32 %v1631_v60  ;;  %v1641_v60 = vmul.f32 1.442695, %v1536_v12  ;;  %v1540_v12 = vsub.f32 %v7662_v47, %v6430_v25  ;;  %v7669_v47 = vld [vmem:[#allocation16_spill] sm:$0xff] }
 0x4cf   : > { %v1494_v17 = vpop.xlane.xlu1 %1493  ;;  %4577 = vpow2.f32 %v1633_v31 }
 0x4d0   : > { %v1557_v46 = vsub.f32 %v7654_v63, %v1494_v17  ;;  %v1558_v1 = vsub.f32 %v7655_v48, %v1494_v17  ;;  %v7658_v63 = vld [vmem:[#allocation12_spill] sm:$0xff]  ;;  %v7659_v17 = vld [vmem:[#allocation25_spill] sm:$0xff] }
 0x4d1   : > { %v6510_v34 = vpop.eup %4563  ;;  %v1539_v4 = vsub.f32 %v7658_v63, %v6430_v25 }
 0x4d2   : > { %7656 = vst [vmem:[#allocation11_spill] sm:$0xff] %v6510_v34  ;;  %v6514_v11 = vpop.eup %4565  ;;  %v1683_v15 = vmul.f32 1.442695, %v1557_v46  ;;  %v1685_v42 = vmul.f32 1.442695, %v1558_v1  ;;  %1763 = vadd.xlane.f32.xlu1 %v1762_v18  ;;  %1730 = vadd.xlane.f32.xlu0 %v1729_v24  ;;  %v2556_v46 = vmax.f32 %v6336_v21, %v6338_v38 }
 0x4d3   : > { %7657 = vst [vmem:[#allocation23_spill] sm:$0xff] %v6514_v11  ;;  %v2492_v48 = vpop.xlane.xlu0 %2491  ;;  %v1768_v32 = vadd.f32 %v6514_v11, %v6510_v34  ;;  %v6522_v45 = vpop.eup %4567 }
 0x4d4   : > { %4579 = vpow2.f32 %v1683_v15  ;;  %v2586_v5 = vsub.f32 %v7659_v17, %v2492_v48  ;;  %v2587_v31 = vsub.f32 %v7660_v56, %v2492_v48  ;;  %7661 = vst [vmem:[#allocation24_spill] sm:$0xff] %v6522_v45  ;;  %v6526_v1 = vpop.eup %4569  ;;  %v1647_v56 = vmul.f32 1.442695, %v1539_v4  ;;  %v7663_v15 = vld [vmem:[#allocation14_spill] sm:$0xff]  ;;  %v7664_v17 = vld [vmem:[#allocation28_spill] sm:$0xff]  ;;  %v7668_v4 = vld [vmem:[#allocation15_spill] sm:$0xff] }
 0x4d5   : > { %4581 = vpow2.f32 %v1685_v42  ;;  %v1543_v63 = vsub.f32 %v7663_v15, %v6450_v6  ;;  %v7665_v42 = vld [vmem:[#allocation29_spill] sm:$0xff]  ;;  %v1735_v25 = vadd.f32 %v6526_v1, %v6522_v45 }
 0x4d6   : > { %4583 = vpow2.f32 %v1639_v27  ;;  %v2650_v18 = vmul.f32 1.442695, %v2586_v5  ;;  %v2652_v24 = vmul.f32 1.442695, %v2587_v31  ;;  %1769 = vadd.xlane.f32.xlu1 %v1768_v32  ;;  %2557 = vmax.xlane.f32.xlu0 %v2556_v46  ;;  %v1649_v32 = vmul.f32 1.442695, %v1540_v12 }
 0x4d7   : > { %4585 = vpow2.f32 %v1641_v60  ;;  %v2495_v48 = vpop.xlane.xlu1 %2494  ;;  %v1544_v27 = vsub.f32 %v7668_v4, %v6450_v6  ;;  %v1655_v46 = vmul.f32 1.442695, %v1543_v63  ;;  %v2562_v6 = vmax.f32 %v6360_v44, %v6362_v33 }
 0x4d8   : > { %4587 = vpow2.f32 %v2650_v18  ;;  %v2588_v34 = vsub.f32 %v7664_v17, %v2495_v48  ;;  %v2589_v11 = vsub.f32 %v7665_v42, %v2495_v48  ;;  %v1547_v18 = vsub.f32 %v7669_v47, %v6460_v14  ;;  %v7670_v48 = vld [vmem:[#allocation31_spill] sm:$0xff]  ;;  %v7671_v42 = vld [vmem:[#allocation33_spill] sm:$0xff] }
 0x4d9   : > { %v6534_v22 = vpop.eup %4571  ;;  %4589 = vpow2.f32 %v2652_v24 }
 0x4da   : > { %7666 = vst [vmem:[#allocation12_spill] sm:$0xff] %v6534_v22  ;;  %v6538_v5 = vpop.eup %4573  ;;  %v2654_v60 = vmul.f32 1.442695, %v2588_v34  ;;  %v2656_v31 = vmul.f32 1.442695, %v2589_v11  ;;  %4591 = vpow2.f32 %v1647_v56  ;;  %1736 = vadd.xlane.f32.xlu0 %v1735_v25  ;;  %v7672_v25 = vld [vmem:[#allocation17_spill] sm:$0xff] }
 0x4db   : > { %7667 = vst [vmem:[#allocation25_spill] sm:$0xff] %v6538_v5  ;;  %v2498_v15 = vpop.xlane.xlu0 %2497  ;;  %v1774_v24 = vadd.f32 %v6538_v5, %v6534_v22  ;;  %v6548_v45 = vpop.eup %4575  ;;  %v1657_v11 = vmul.f32 1.442695, %v1544_v27  ;;  %v1548_v4 = vsub.f32 %v7672_v25, %v6460_v14  ;;  %v7736_v5 = vld [vmem:[#allocation74_spill] sm:$0xff] }
 0x4dc   : > { %4593 = vpow2.f32 %v2654_v60  ;;  %v2590_v17 = vsub.f32 %v7670_v48, %v2498_v15  ;;  %v2591_v12 = vsub.f32 %v7671_v42, %v2498_v15  ;;  %v6552_v34 = vpop.eup %4577  ;;  %v1663_v60 = vmul.f32 1.442695, %v1547_v18  ;;  %v7673_v48 = vld [vmem:[#allocation35_spill] sm:$0xff] }
 0x4dd   : > { %4595 = vpow2.f32 %v2656_v31  ;;  %1775 = vadd.xlane.f32.xlu1 %v1774_v24 }
 0x4de   : > { %4597 = vpow2.f32 %v1649_v32  ;;  %v2658_v56 = vmul.f32 1.442695, %v2590_v17  ;;  %v2660_v63 = vmul.f32 1.442695, %v2591_v12  ;;  %2563 = vmax.xlane.f32.xlu0 %v2562_v6  ;;  %v1741_v32 = vadd.f32 %v6552_v34, %v6548_v45  ;;  %v7678_v12 = vld [vmem:[#allocation19_spill] sm:$0xff] }
 0x4df   : > { %4599 = vpow2.f32 %v1655_v46  ;;  %v2501_v47 = vpop.xlane.xlu1 %2500  ;;  %v7676_v46 = vld [vmem:[#allocation18_spill] sm:$0xff]  ;;  %v1552_v6 = vsub.f32 %v7678_v12, %v6484_v2 }
 0x4e0   : > { %4601 = vpow2.f32 %v2658_v56  ;;  %v2592_v15 = vsub.f32 %v6148_v19, %v2501_v47  ;;  %v2593_v42 = vsub.f32 %v7673_v48, %v2501_v47  ;;  %v1551_v14 = vsub.f32 %v7676_v46, %v6484_v2  ;;  %v7682_v48 = vld [vmem:[#allocation20_spill] sm:$0xff] }
 0x4e1   : > { %v6558_v31 = vpop.eup %4579  ;;  %4603 = vpow2.f32 %v2660_v63  ;;  %v1665_v19 = vmul.f32 1.442695, %v1548_v4  ;;  %v2568_v4 = vmax.f32 %v6380_v9, %v6382_v61 }
 0x4e2   : > { %7674 = vst [vmem:[#allocation27_spill] sm:$0xff] %v6558_v31  ;;  %v6562_v27 = vpop.eup %4581  ;;  %4605 = vpow2.f32 %v1657_v11  ;;  %v2662_v18 = vmul.f32 1.442695, %v2592_v15  ;;  %v2664_v24 = vmul.f32 1.442695, %v2593_v42  ;;  %1742 = vadd.xlane.f32.xlu0 %v1741_v32  ;;  %v1555_v42 = vsub.f32 %v7682_v48, %v6504_v51 }
 0x4e3   : > { %7675 = vst [vmem:[#allocation13_spill] sm:$0xff] %v6562_v27  ;;  %v6566_v17 = vpop.eup %4583  ;;  %4607 = vpow2.f32 %v1663_v60  ;;  %v2504_v56 = vpop.xlane.xlu0 %2503  ;;  %v1780_v63 = vadd.f32 %v6562_v27, %v6558_v31  ;;  %v1671_v60 = vmul.f32 1.442695, %v1551_v14  ;;  %v7686_v31 = vld [vmem:[#allocation37_spill] sm:$0xff] }
 0x4e4   : > { %7677 = vst [vmem:[#allocation14_spill] sm:$0xff] %v6566_v17  ;;  %v6572_v25 = vpop.eup %4585  ;;  %4609 = vpow2.f32 %v2662_v18  ;;  %v2594_v11 = vsub.f32 %v6158_v7, %v2504_v56  ;;  %v2595_v47 = vsub.f32 %v6160_v37, %v2504_v56  ;;  %v1673_v18 = vmul.f32 1.442695, %v1552_v6  ;;  %v7683_v7 = vld [vmem:[#allocation21_spill] sm:$0xff] }
 0x4e5   : > { %7679 = vst [vmem:[#allocation28_spill] sm:$0xff] %v6572_v25  ;;  %v6576_v15 = vpop.eup %4587  ;;  %4611 = vpow2.f32 %v2664_v24  ;;  %1781 = vadd.xlane.f32.xlu1 %v1780_v63  ;;  %v1556_v37 = vsub.f32 %v7683_v7, %v6504_v51  ;;  %v7685_v63 = vld [vmem:[#allocation36_spill] sm:$0xff]  ;;  %v1679_v6 = vmul.f32 1.442695, %v1555_v42 }
 0x4e6   : > { %7680 = vst [vmem:[#allocation29_spill] sm:$0xff] %v6576_v15  ;;  %v6580_v2 = vpop.eup %4589  ;;  %v2666_v32 = vmul.f32 1.442695, %v2594_v11  ;;  %v2668_v46 = vmul.f32 1.442695, %v2595_v47  ;;  %4613 = vpow2.f32 %v1665_v19  ;;  %2569 = vmax.xlane.f32.xlu0 %v2568_v4  ;;  %v1747_v19 = vadd.f32 %v6572_v25, %v6566_v17 }
 0x4e7   : > { %7681 = vst [vmem:[#allocation15_spill] sm:$0xff] %v6580_v2  ;;  %v2507_v12 = vpop.xlane.xlu1 %2506  ;;  %v2778_v56 = vadd.f32 %v6580_v2, %v6576_v15  ;;  %v6588_v24 = vpop.eup %4591 }
 0x4e8   : > { %7684 = vst [vmem:[#allocation16_spill] sm:$0xff] %v6588_v24  ;;  %4615 = vpow2.f32 %v2666_v32  ;;  %v2596_v14 = vsub.f32 %v7685_v63, %v2507_v12  ;;  %v2597_v27 = vsub.f32 %v7686_v31, %v2507_v12  ;;  %v1681_v32 = vmul.f32 1.442695, %v1556_v37 }
 0x4e9   : > { %v6592_v48 = vpop.eup %4593  ;;  %4617 = vpow2.f32 %v2668_v46  ;;  %2779 = vadd.xlane.f32.xlu1 %v2778_v56 }
 0x4ea   : > { %7687 = vst [vmem:[#allocation31_spill] sm:$0xff] %v6592_v48  ;;  %v6596_v51 = vpop.eup %4595  ;;  %4619 = vpow2.f32 %v1671_v60  ;;  %v2670_v11 = vmul.f32 1.442695, %v2596_v14  ;;  %v2672_v47 = vmul.f32 1.442695, %v2597_v27  ;;  %1748 = vadd.xlane.f32.xlu0 %v1747_v19  ;;  %v2574_v27 = vmax.f32 %v6426_v62, %v6436_v13 }
 0x4eb   : > { %7688 = vst [vmem:[#allocation33_spill] sm:$0xff] %v6596_v51  ;;  %v6598_v4 = vpop.eup %4597  ;;  %4621 = vpow2.f32 %v1673_v18  ;;  %v2510_v7 = vpop.xlane.xlu0 %2509  ;;  %v2781_v31 = vadd.f32 %v6596_v51, %v6592_v48  ;;  %v7712_v48 = vld [vmem:[#allocation39_spill] sm:$0xff] }
 0x4ec   : > { %7689 = vst [vmem:[#allocation17_spill] sm:$0xff] %v6598_v4  ;;  %v6602_v46 = vpop.eup %4599  ;;  %4623 = vpow2.f32 %v2670_v11  ;;  %v2598_v12 = vsub.f32 %v6174_v16, %v2510_v7  ;;  %v2599_v56 = vsub.f32 %v6176_v0, %v2510_v7  ;;  %v7695_v11 = vld [vmem:[#allocation38_spill] sm:$0xff] }
 0x4ed   : > { %7690 = vst [vmem:[#allocation35_spill] sm:$0xff] %v6602_v46  ;;  %v6606_v60 = vpop.eup %4601  ;;  %4625 = vpow2.f32 %v2672_v47  ;;  %2782 = vadd.xlane.f32.xlu1 %v2781_v31 }
 0x4ee   : > { %7691 = vst [vmem:[#allocation18_spill] sm:$0xff] %v6606_v60  ;;  %v6610_v42 = vpop.eup %4603  ;;  %4627 = vpow2.f32 %v1679_v6  ;;  %v2674_v18 = vmul.f32 1.442695, %v2598_v12  ;;  %v2676_v37 = vmul.f32 1.442695, %v2599_v56  ;;  %2575 = vmax.xlane.f32.xlu0 %v2574_v27  ;;  %v1753_v6 = vadd.f32 %v6598_v4, %v6588_v24 }
 0x4ef   : > { %7692 = vst [vmem:[#allocation19_spill] sm:$0xff] %v6610_v42  ;;  %v6612_v63 = vpop.eup %4605  ;;  %4629 = vpow2.f32 %v1681_v32  ;;  %v2513_v14 = vpop.xlane.xlu1 %2512  ;;  %v2784_v16 = vadd.f32 %v6610_v42, %v6606_v60 }
 0x4f0   : > { %7693 = vst [vmem:[#allocation20_spill] sm:$0xff] %v6612_v63  ;;  %v6616_v0 = vpop.eup %4607  ;;  %4631 = vpow2.f32 %v2674_v18  ;;  %v2600_v19 = vsub.f32 %v6182_v54, %v2513_v14  ;;  %v2601_v47 = vsub.f32 %v7695_v11, %v2513_v14 }
 0x4f1   : > { %7694 = vst [vmem:[#allocation21_spill] sm:$0xff] %v6616_v0  ;;  %v6620_v7 = vpop.eup %4609  ;;  %4633 = vpow2.f32 %v2676_v37  ;;  %2785 = vadd.xlane.f32.xlu1 %v2784_v16  ;;  %v1759_v37 = vadd.f32 %v6612_v63, %v6602_v46  ;;  %v7746_v46 = vld [vmem:[#allocation68_spill] sm:$0xff]  ;;  %v7747_v63 = vld [vmem:[#allocation62_spill] sm:$0xff] }
 0x4f2   : > { %7696 = vst [vmem:[#allocation36_spill] sm:$0xff] %v6620_v7  ;;  %v6624_v32 = vpop.eup %4611  ;;  %v2678_v31 = vmul.f32 1.442695, %v2600_v19  ;;  %v2680_v12 = vmul.f32 1.442695, %v2601_v47  ;;  %1754 = vadd.xlane.f32.xlu0 %v1753_v6 }
 0x4f3   : > { %7697 = vst [vmem:[#allocation37_spill] sm:$0xff] %v6624_v32  ;;  %v1689_v56 = vpop.xlane.xlu1 %1688  ;;  %v2787_v27 = vadd.f32 %v6624_v32, %v6620_v7  ;;  %v6628_v18 = vpop.eup %4613 }
 0x4f4   : > { %7698 = vst [vmem:[#allocation38_spill] sm:$0xff] %v6628_v18  ;;  %4635 = vpow2.f32 %v2678_v31  ;;  %v1765_v31 = vadd.f32 %v6628_v18, %v6616_v0 }
 0x4f5   : > { %v6630_v54 = vpop.eup %4615  ;;  %4637 = vpow2.f32 %v2680_v12  ;;  %2788 = vadd.xlane.f32.xlu1 %v2787_v27 }
 0x4f6   : > { %7699 = vst [vmem:[#allocation95_spill] sm:$0xff] %v6630_v54  ;;  %v6634_v14 = vpop.eup %4617  ;;  %1760 = vadd.xlane.f32.xlu0 %v1759_v37  ;;  %4639 = vrcp.f32 %v1689_v56 }
 0x4f7   : > { %7700 = vst [vmem:[#allocation96_spill] sm:$0xff] %v6634_v14  ;;  %v6636_v16 = vpop.eup %4619  ;;  %v1692_v19 = vpop.xlane.xlu1 %1691  ;;  %v2790_v11 = vadd.f32 %v6634_v14, %v6630_v54 }
 0x4f8   : > { %7701 = vst [vmem:[#allocation97_spill] sm:$0xff] %v6636_v16  ;;  %v6640_v47 = vpop.eup %4621  ;;  %4641 = vrcp.f32 %v1692_v19 }
 0x4f9   : > { %7702 = vst [vmem:[#allocation98_spill] sm:$0xff] %v6640_v47  ;;  %v6642_v6 = vpop.eup %4623  ;;  %2791 = vadd.xlane.f32.xlu1 %v2790_v11  ;;  %v1771_v11 = vadd.f32 %v6640_v47, %v6636_v16  ;;  %v7737_v47 = vld [vmem:[#allocation40_spill] sm:$0xff] }
 0x4fa   : > { %7703 = vst [vmem:[#allocation99_spill] sm:$0xff] %v6642_v6  ;;  %v6646_v12 = vpop.eup %4625  ;;  %1766 = vadd.xlane.f32.xlu0 %v1765_v31 }
 0x4fb   : > { %7704 = vst [vmem:[#allocation100_spill] sm:$0xff] %v6646_v12  ;;  %v6648_v27 = vpop.eup %4627  ;;  %v6650_v37 = vpop.xlane.xlu1 %2518  ;;  %v2793_v54 = vadd.f32 %v6646_v12, %v6642_v6 }
 0x4fc   : > { %7705 = vst [vmem:[#allocation101_spill] sm:$0xff] %v6648_v27  ;;  %v6654_v14 = vpop.eup %4629 }
 0x4fd   : > { %7706 = vst [vmem:[#allocation102_spill] sm:$0xff] %v6654_v14  ;;  %v6656_v56 = vpop.eup %4631  ;;  %2794 = vadd.xlane.f32.xlu1 %v2793_v54  ;;  %v1777_v6 = vadd.f32 %v6654_v14, %v6648_v27 }
 0x4fe   : > { %7707 = vst [vmem:[#allocation103_spill] sm:$0xff] %v6656_v56  ;;  %v6660_v60 = vpop.eup %4633  ;;  %1772 = vadd.xlane.f32.xlu0 %v1771_v11 }
 0x4ff   : > { %7708 = vst [vmem:[#allocation104_spill] sm:$0xff] %v6660_v60  ;;  %v1695_v19 = vpop.xlane.xlu1 %1694  ;;  %v2796_v31 = vadd.f32 %v6660_v60, %v6656_v56  ;;  %v7711_v56 = vld [vmem:[#allocation41_spill] sm:$0xff] }
 0x500   : > { %4643 = vrcp.f32 %v1695_v19  ;;  %v7714_v19 = vld [vmem:[#allocation32_spill] sm:$0xff] }
 0x501   : > { %v6664_v7 = vpop.eup %4635  ;;  %2797 = vadd.xlane.f32.xlu1 %v2796_v31 }
 0x502   : > { %7709 = vst [vmem:[#allocation105_spill] sm:$0xff] %v6664_v7  ;;  %v6668_v12 = vpop.eup %4637  ;;  %1778 = vadd.xlane.f32.xlu0 %v1777_v6 }
 0x503   : > { %7710 = vst [vmem:[#allocation106_spill] sm:$0xff] %v6668_v12  ;;  %v1698_v54 = vpop.xlane.xlu1 %1697  ;;  %v2799_v42 = vadd.f32 %v6668_v12, %v6664_v7  ;;  %v4640_v15 = vpop.eup %4639  ;;  %v7713_v7 = vld [vmem:[#allocation22_spill] sm:$0xff] }
 0x504   : > { %4645 = vrcp.f32 %v1698_v54  ;;  %v1816_v60 = vmul.f32 %v4640_v15, %v7711_v56  ;;  %v1815_v2 = vmul.f32 %v4640_v15, %v7712_v48  ;;  %v7715_v56 = vld [vmem:[#allocation26_spill] sm:$0xff] }
 0x505   : > { %2800 = vadd.xlane.f32.xlu1 %v2799_v42  ;;  %v4642_v11 = vpop.eup %4641 }
 0x506   : > { %v1818_v31 = vmul.f32 %v4642_v11, %v6206_v50  ;;  %v1817_v51 = vmul.f32 %v4642_v11, %v6202_v52  ;;  %v7716_v50 = vld [vmem:[#allocation5_spill] sm:$0xff] }
 0x507   : > { %v2525_v32 = vpop.xlane.xlu1 %2524 }
 0x508   : > { %v1880_v27 = vpack.c.bf16 %v1818_v31, %v1816_v60  ;;  %v1879_v6 = vpack.c.bf16 %v1817_v51, %v1815_v2  ;;  %v7717_v2 = vld [vmem:[#allocation51_spill] sm:$0xff] }
 0x509   : > { %v7718_v51 = vld [vmem:[#allocation47_spill] sm:$0xff] }
 0x50a   : > { %1991 = vmatprep.mubr.bf16.mxu0 %v1880_v27 }
 0x50b   : > { %v1701_v22 = vpop.xlane.xlu1 %1700  ;;  %1992 = vmatmul.mubr.bf16.vlgmr.msra.gmra.mxu0 %v1879_v6  ;;  %v7721_v6 = vld [vmem:[#allocation3_spill] sm:$0xff] }
 0x50c   : > { %4136 = vmatpush3.bf16.msra.mxu0 %v7713_v7  ;;  %4647 = vrcp.f32 %v1701_v22  ;;  %v7719_v7 = vld [vmem:[#allocation50_spill] sm:$0xff] }
 0x50d   : > { %4137 = vmatprep.subr.bf16.mxu0 %v7714_v19  ;;  %v4644_v54 = vpop.eup %4643  ;;  %v7720_v22 = vld [vmem:[#allocation30_spill] sm:$0xff] }
 0x50e   : > { %v1820_v52 = vmul.f32 %v4644_v54, %v6224_v20  ;;  %v1819_v60 = vmul.f32 %v4644_v54, %v7718_v51  ;;  %v7722_v19 = vld [vmem:[#allocation6_spill] sm:$0xff]  ;;  %v7723_v20 = vld [vmem:[#allocation4_spill] sm:$0xff]  ;;  %v7728_v51 = vld [vmem:[#allocation9_spill] sm:$0xff] }
 0x50f   : > { %v1704_v42 = vpop.xlane.xlu1 %1703  ;;  %v7725_v54 = vld [vmem:[#allocation8_spill] sm:$0xff] }
 0x510   : > { %4138 = vmatpush3.bf16.msra.mxu0 %v7715_v56  ;;  %4649 = vrcp.f32 %v1704_v42  ;;  %v7724_v56 = vld [vmem:[#allocation7_spill] sm:$0xff] }
 0x511   : > { %v4646_v12 = vpop.eup %4645  ;;  %4139 = vmatprep.subr.bf16.mxu0 %v7716_v50 }
 0x512   : > { %v1822_v48 = vmul.f32 %v4646_v12, %v7717_v2  ;;  %v1821_v27 = vmul.f32 %v4646_v12, %v7719_v7  ;;  %v7727_v2 = vld [vmem:[#allocation34_spill] sm:$0xff]  ;;  %v7729_v7 = vld [vmem:[#allocation57_spill] sm:$0xff] }
 0x513   : > { %v6680_v15 = vpop.xlane.xlu1 %2530 }
 0x514   : > { %v1882_v11 = vpack.c.bf16 %v1822_v48, %v1820_v52  ;;  %v1881_v31 = vpack.c.bf16 %v1821_v27, %v1819_v60  ;;  %4140 = vmatpush3.bf16.msra.mxu0 %v7720_v22  ;;  %v7726_v52 = vld [vmem:[#allocation2_spill] sm:$0xff]  ;;  %v7731_v22 = vld [vmem:[#allocation56_spill] sm:$0xff] }
 0x515   : > { %4141 = vmatprep.subr.bf16.mxu0 %v7722_v19  ;;  %v7732_v19 = vld [vmem:[#allocation60_spill] sm:$0xff] }
 0x516   : > { %3004 = vrot.lane.b32.xlu1 %v7721_v6, %s4907_s19  ;;  %1999 = vmatprep.mubr.bf16.mxu0 %v1882_v11  ;;  %v7730_v11 = vld [vmem:[#allocation61_spill] sm:$0xff] }
 0x517   : > { %v1707_v42 = vpop.xlane.xlu1 %1706  ;;  %2000 = vmatmul.mubr.bf16.gmra.mxu0 %v1881_v31 }
 0x518   : > { %3018 = vrot.lane.b32.xlu0 %v7723_v20, %s4907_s19  ;;  %4142 = vmatpush3.bf16.msra.mxu0 %v7724_v56  ;;  %4651 = vrcp.f32 %v1707_v42  ;;  %v2516_v20 = vpop.xlane.xlu0 %2515  ;;  %v7733_v56 = vld [vmem:[#allocation48_spill] sm:$0xff] }
 0x519   : > { %4143 = vmatprep.subr.bf16.mxu0 %v7725_v54  ;;  %v4648_v50 = vpop.eup %4647  ;;  %v2608_v54 = vsub.f32 %v7733_v56, %v2525_v32 }
 0x51a   : > { %v1824_v27 = vmul.f32 %v4648_v50, %v7729_v7  ;;  %v1823_v6 = vmul.f32 %v4648_v50, %v7731_v22  ;;  %v2602_v7 = vsub.f32 %v7737_v47, %v2516_v20 }
 0x51b   : > { %v1710_v12 = vpop.xlane.xlu1 %1709  ;;  %v2694_v50 = vmul.f32 1.442695, %v2608_v54 }
 0x51c   : > { %4653 = vrcp.f32 %v1710_v12  ;;  %3002 = vrot.lane.b32.xlu0 %v7726_v52, %s4907_s19  ;;  %4144 = vmatpush3.bf16.msra.mxu0 %v7727_v2  ;;  %v7734_v12 = vld [vmem:[#allocation10_spill] sm:$0xff]  ;;  %v7735_v2 = vld [vmem:[#allocation49_spill] sm:$0xff] }
 0x51d   : > { %v4650_v48 = vpop.eup %4649  ;;  %4145 = vmatprep.subr.bf16.mxu0 %v7728_v51  ;;  %v2609_v16 = vsub.f32 %v7735_v2, %v2525_v32  ;;  %v7740_v32 = vld [vmem:[#allocation55_spill] sm:$0xff]  ;;  %4655 = vpow2.f32 %v2694_v50 }
 0x51e   : > { %v1826_v31 = vmul.f32 %v4650_v48, %v7730_v11  ;;  %v1825_v42 = vmul.f32 %v4650_v48, %v7732_v19  ;;  %v7738_v11 = vld [vmem:[#allocation42_spill] sm:$0xff] }
 0x51f   : > { %v2537_v60 = vpop.xlane.xlu1 %2536  ;;  %v2603_v0 = vsub.f32 %v7738_v11, %v2516_v20  ;;  %v2696_v22 = vmul.f32 1.442695, %v2609_v16  ;;  %v7739_v19 = vld [vmem:[#allocation54_spill] sm:$0xff]  ;;  %v2522_v16 = vpop.xlane.xlu0 %2521  ;;  %v7744_v11 = vld [vmem:[#allocation69_spill] sm:$0xff] }
 0x520   : > { %4146 = vmatpush3.bf16.msra.mxu0 %v7734_v12  ;;  %v1884_v52 = vpack.c.bf16 %v1826_v31, %v1824_v27  ;;  %v1883_v14 = vpack.c.bf16 %v1825_v42, %v1823_v6  ;;  %v2612_v56 = vsub.f32 %v7739_v19, %v6680_v15  ;;  %v2682_v27 = vmul.f32 1.442695, %v2602_v7  ;;  %v6714_v6 = vpop.f32.mrf.mxu1  ;;  %v7741_v42 = vld [vmem:[#allocation43_spill] sm:$0xff]  ;;  %v7745_v7 = vld [vmem:[#allocation64_spill] sm:$0xff] }
 0x521   : > { %4147 = vmatprep.subr.bf16.mxu0 %v7736_v5  ;;  %v2613_v31 = vsub.f32 %v7740_v32, %v6680_v15  ;;  %v2684_v47 = vmul.f32 1.442695, %v2603_v0  ;;  %v2604_v20 = vsub.f32 %v7741_v42, %v6650_v37  ;;  %4657 = vpow2.f32 %v2696_v22  ;;  %v7748_v42 = vld [vmem:[#allocation63_spill] sm:$0xff] }
 0x522   : > { %2007 = vmatprep.mubr.bf16.mxu0 %v1884_v52  ;;  %v7743_v52 = vld [vmem:[#allocation65_spill] sm:$0xff]  ;;  %v2702_v32 = vmul.f32 1.442695, %v2612_v56  ;;  %v2616_v0 = vsub.f32 %v7747_v63, %v2537_v60  ;;  %v2617_v17 = vsub.f32 %v7748_v42, %v2537_v60  ;;  %v6726_v50 = vpop.f32.mrf.mxu1  ;;  %4659 = vpow2.f32 %v2682_v27  ;;  %v7751_v56 = vld [vmem:[#allocation66_spill] sm:$0xff] }
 0x523   : > { %v2543_v51 = vpop.xlane.xlu1 %2542  ;;  %2008 = vmatmul.mubr.bf16.gmra.mxu0 %v1883_v14  ;;  %v7742_v14 = vld [vmem:[#allocation44_spill] sm:$0xff]  ;;  %v2704_v4 = vmul.f32 1.442695, %v2613_v31  ;;  %4661 = vpow2.f32 %v2684_v47  ;;  %v2528_v22 = vpop.xlane.xlu0 %2527 }
 0x524   : > { %v2605_v54 = vsub.f32 %v7742_v14, %v6650_v37  ;;  %v2686_v14 = vmul.f32 1.442695, %v2604_v20  ;;  %4663 = vpow2.f32 %v2702_v32  ;;  %v2710_v63 = vmul.f32 1.442695, %v2616_v0  ;;  %v6734_v20 = vpop.f32.mrf.mxu1  ;;  %v7755_v0 = vld [vmem:[#allocation70_spill] sm:$0xff] }
 0x525   : > { %v4652_v48 = vpop.eup %4651  ;;  %v2620_v31 = vsub.f32 %v7751_v56, %v2543_v51  ;;  %4665 = vpow2.f32 %v2704_v4  ;;  %v7756_v4 = vld [vmem:[#allocation71_spill] sm:$0xff] }
 0x526   : > { %v1828_v2 = vmul.f32 %v4652_v48, %v7743_v52  ;;  %v1827_v18 = vmul.f32 %v4652_v48, %v7745_v7  ;;  %v7749_v52 = vld [vmem:[#allocation45_spill] sm:$0xff]  ;;  %v2688_v48 = vmul.f32 1.442695, %v2605_v54  ;;  %v7750_v7 = vld [vmem:[#allocation46_spill] sm:$0xff]  ;;  %4667 = vpow2.f32 %v2686_v14  ;;  %v7753_v54 = vld [vmem:[#allocation52_spill] sm:$0xff] }
 0x527   : > { %v6710_v12 = vpop.xlane.xlu1 %1721  ;;  %v2718_v32 = vmul.f32 1.442695, %v2620_v31 }
 0x528   : > { %4669 = vpow2.f32 %v2688_v48 }
 0x529   : > { %v4654_v5 = vpop.eup %4653  ;;  %4671 = vpow2.f32 %v2710_v63 }
 0x52a   : > { %v1830_v19 = vmul.f32 %v4654_v5, %v7744_v11  ;;  %v1829_v15 = vmul.f32 %v4654_v5, %v7746_v46  ;;  %v2606_v11 = vsub.f32 %v7749_v52, %v2522_v16  ;;  %v2607_v46 = vsub.f32 %v7750_v7, %v2522_v16  ;;  %v7752_v5 = vld [vmem:[#allocation67_spill] sm:$0xff]  ;;  %v6740_v52 = vpop.f32.mrf.mxu1  ;;  %v6743_v48 = vpop.eup %4655 }
 0x52b   : > { %v2549_v24 = vpop.xlane.xlu1 %2548  ;;  %v2621_v27 = vsub.f32 %v7752_v5, %v2543_v51 }
 0x52c   : > { %v1886_v25 = vpack.c.bf16 %v1830_v19, %v1828_v2  ;;  %v1885_v37 = vpack.c.bf16 %v1829_v15, %v1827_v18  ;;  %v2712_v18 = vmul.f32 1.442695, %v2617_v17  ;;  %v2690_v47 = vmul.f32 1.442695, %v2606_v11  ;;  %v2534_v15 = vpop.xlane.xlu0 %2533  ;;  %v7757_v11 = vld [vmem:[#allocation58_spill] sm:$0xff] }
 0x52d   : > { %v2610_v2 = vsub.f32 %v7753_v54, %v2528_v22  ;;  %v2692_v16 = vmul.f32 1.442695, %v2607_v46  ;;  %v2624_v42 = vsub.f32 %v7755_v0, %v2549_v24  ;;  %v2720_v17 = vmul.f32 1.442695, %v2621_v27 }
 0x52e   : > { %2015 = vmatprep.mubr.bf16.mxu0 %v1886_v25  ;;  %v7754_v25 = vld [vmem:[#allocation53_spill] sm:$0xff]  ;;  %4673 = vpow2.f32 %v2712_v18  ;;  %v2625_v51 = vsub.f32 %v7756_v4, %v2549_v24  ;;  %v2614_v7 = vsub.f32 %v7757_v11, %v2534_v15  ;;  %v6749_v5 = vpop.eup %4657  ;;  %v2583_v24 = vmax.f32 %v6734_v20, %v6740_v52 }
 0x52f   : > { %2016 = vmatmul.mubr.bf16.gmra.mxu0 %v1885_v37  ;;  %v6731_v60 = vpop.xlane.xlu1 %1727  ;;  %v2611_v19 = vsub.f32 %v7754_v25, %v2528_v22  ;;  %4675 = vpow2.f32 %v2690_v47  ;;  %v2698_v14 = vmul.f32 1.442695, %v2610_v2  ;;  %v7758_v22 = vld [vmem:[#allocation59_spill] sm:$0xff]  ;;  %v2726_v56 = vmul.f32 1.442695, %v2624_v42  ;;  %v6754_v2 = vpop.eup %4659 }
 0x530   : > { %4677 = vpow2.f32 %v2692_v16  ;;  %v2615_v63 = vsub.f32 %v7758_v22, %v2534_v15  ;;  %v2728_v27 = vmul.f32 1.442695, %v2625_v51  ;;  %v2706_v54 = vmul.f32 1.442695, %v2614_v7  ;;  %v6758_v25 = vpop.eup %4661 }
 0x531   : > { %v2700_v46 = vmul.f32 1.442695, %v2611_v19  ;;  %4679 = vpow2.f32 %v2718_v32  ;;  %v2580_v16 = vmax.f32 %v6714_v6, %v6726_v50  ;;  %v2811_v32 = vadd.f32 %v6749_v5, %v6743_v48  ;;  %v6762_v0 = vpop.eup %4663 }
 0x532   : > { %4681 = vpow2.f32 %v2720_v17  ;;  %v6766_v17 = vpop.eup %4665  ;;  %v2802_v51 = vadd.f32 %v6758_v25, %v6754_v2 }
 0x533   : > { %v2555_v37 = vpop.xlane.xlu1 %2554  ;;  %4683 = vpow2.f32 %v2698_v14  ;;  %v6768_v4 = vpop.eup %4667  ;;  %v2817_v22 = vadd.f32 %v6766_v17, %v6762_v0 }
 0x534   : > { %v2628_v31 = vsub.f32 %v6326_v59, %v2555_v37  ;;  %v2629_v47 = vsub.f32 %v6329_v40, %v2555_v37  ;;  %4685 = vpow2.f32 %v2700_v46  ;;  %v2708_v59 = vmul.f32 1.442695, %v2615_v63 }
 0x535   : > { %4687 = vpow2.f32 %v2726_v56  ;;  %v6772_v14 = vpop.eup %4669 }
 0x536   : > { %v2734_v19 = vmul.f32 1.442695, %v2628_v31  ;;  %4689 = vpow2.f32 %v2728_v27  ;;  %v2736_v40 = vmul.f32 1.442695, %v2629_v47  ;;  %v6776_v46 = vpop.eup %4671  ;;  %v2805_v31 = vadd.f32 %v6772_v14, %v6768_v4 }
 0x537   : > { %v6747_v18 = vpop.xlane.xlu1 %1733  ;;  %4691 = vpow2.f32 %v2706_v54 }
 0x538   : > { %4693 = vpow2.f32 %v2708_v59 }
 0x539   : > { %4695 = vpow2.f32 %v2734_v19 }
 0x53a   : > { %2584 = vmax.xlane.f32.xlu1 %v2583_v24  ;;  %4697 = vpow2.f32 %v2736_v40 }
 0x53b   : > { %v2561_v15 = vpop.xlane.xlu1 %2560  ;;  %2581 = vmax.xlane.f32.xlu0 %v2580_v16  ;;  %v6780_v63 = vpop.eup %4673 }
 0x53c   : > { %v2632_v42 = vsub.f32 %v6348_v53, %v2561_v15  ;;  %v2633_v37 = vsub.f32 %v6353_v23, %v2561_v15  ;;  %v6782_v56 = vpop.eup %4675  ;;  %v2823_v19 = vadd.f32 %v6780_v63, %v6776_v46 }
 0x53d   : > { %v6786_v24 = vpop.eup %4677 }
 0x53e   : > { %2812 = vadd.xlane.f32.xlu1 %v2811_v32  ;;  %v2742_v11 = vmul.f32 1.442695, %v2632_v42  ;;  %v2744_v53 = vmul.f32 1.442695, %v2633_v37  ;;  %v6788_v47 = vpop.eup %4679 }
 0x53f   : > { %v6774_v7 = vpop.xlane.xlu1 %1739  ;;  %2803 = vadd.xlane.f32.xlu0 %v2802_v51  ;;  %v1713_v23 = vpop.xlane.xlu0 %1712 }
 0x540   : > { %4699 = vpow2.f32 %v2742_v11  ;;  %v6794_v15 = vpop.eup %4681 }
 0x541   : > { %4701 = vpow2.f32 %v2744_v53  ;;  %v6798_v42 = vpop.eup %4683 }
 0x542   : > { %2818 = vadd.xlane.f32.xlu1 %v2817_v22  ;;  %4703 = vrcp.f32 %v6710_v12  ;;  %v6803_v51 = vpop.eup %4685  ;;  %v2829_v12 = vadd.f32 %v6794_v15, %v6788_v47 }
 0x543   : > { %v2567_v27 = vpop.xlane.xlu1 %2566  ;;  %2806 = vadd.xlane.f32.xlu0 %v2805_v31  ;;  %v2540_v54 = vpop.xlane.xlu0 %2539  ;;  %4705 = vrcp.f32 %v1713_v23  ;;  %v2814_v23 = vadd.f32 %v6803_v51, %v6798_v42 }
 0x544   : > { %v2636_v16 = vsub.f32 %v6372_v39, %v2567_v27  ;;  %v2637_v59 = vsub.f32 %v6375_v41, %v2567_v27  ;;  %v2618_v32 = vsub.f32 %v6280_v36, %v2540_v54  ;;  %v2619_v40 = vsub.f32 %v6282_v43, %v2540_v54  ;;  %v6807_v36 = vpop.eup %4687 }
 0x545   : > { %v2808_v39 = vadd.f32 %v6786_v24, %v6782_v56  ;;  %7759 = vst [vmem:[#allocation41_spill] sm:$0xff] %v6807_v36  ;;  %v6811_v31 = vpop.eup %4689 }
 0x546   : > { %v2750_v37 = vmul.f32 1.442695, %v2636_v16  ;;  %2824 = vadd.xlane.f32.xlu1 %v2823_v19  ;;  %v2714_v41 = vmul.f32 1.442695, %v2618_v32  ;;  %v2716_v11 = vmul.f32 1.442695, %v2619_v40  ;;  %v6813_v27 = vpop.eup %4691 }
 0x547   : > { %v2752_v53 = vmul.f32 1.442695, %v2637_v59  ;;  %v6805_v22 = vpop.xlane.xlu1 %1745  ;;  %2809 = vadd.xlane.f32.xlu0 %v2808_v39  ;;  %v1716_v43 = vpop.xlane.xlu0 %1715  ;;  %7760 = vst [vmem:[#allocation39_spill] sm:$0xff] %v6811_v31 }
 0x548   : > { %4707 = vpow2.f32 %v2750_v37  ;;  %v6817_v54 = vpop.eup %4693  ;;  %v2835_v37 = vadd.f32 %v6811_v31, %v6807_v36 }
 0x549   : > { %4709 = vpow2.f32 %v2714_v41  ;;  %v6819_v59 = vpop.eup %4695 }
 0x54a   : > { %4711 = vpow2.f32 %v2716_v11  ;;  %2830 = vadd.xlane.f32.xlu1 %v2829_v12  ;;  %7761 = vst [vmem:[#allocation22_spill] sm:$0xff] %v6819_v59  ;;  %v6825_v39 = vpop.eup %4697 }
 0x54b   : > { %4713 = vpow2.f32 %v2752_v53  ;;  %v2573_v16 = vpop.xlane.xlu1 %2572  ;;  %2815 = vadd.xlane.f32.xlu0 %v2814_v23  ;;  %v1719_v19 = vpop.xlane.xlu0 %1718  ;;  %7762 = vst [vmem:[#allocation32_spill] sm:$0xff] %v6825_v39  ;;  %v2820_v53 = vadd.f32 %v6817_v54, %v6813_v27 }
 0x54c   : > { %4715 = vrcp.f32 %v1716_v43  ;;  %v2640_v32 = vsub.f32 %v6394_v3, %v2573_v16  ;;  %v2641_v40 = vsub.f32 %v6406_v58, %v2573_v16  ;;  %v2841_v58 = vadd.f32 %v6825_v39, %v6819_v59 }
 0x54d   : > { %4717 = vrcp.f32 %v1719_v19  ;;  %v6831_v43 = vpop.eup %4699 }
 0x54e   : > { %v2758_v41 = vmul.f32 1.442695, %v2640_v32  ;;  %v2760_v11 = vmul.f32 1.442695, %v2641_v40  ;;  %2836 = vadd.xlane.f32.xlu1 %v2835_v37  ;;  %7763 = vst [vmem:[#allocation26_spill] sm:$0xff] %v6831_v43  ;;  %v6835_v23 = vpop.eup %4701 }
 0x54f   : > { %v6829_v12 = vpop.xlane.xlu1 %1751  ;;  %2821 = vadd.xlane.f32.xlu0 %v2820_v53  ;;  %v2546_v3 = vpop.xlane.xlu0 %2545  ;;  %7764 = vst [vmem:[#allocation5_spill] sm:$0xff] %v6835_v23 }
 0x550   : > { %4719 = vpow2.f32 %v2758_v41  ;;  %v2622_v16 = vsub.f32 %v6302_v55, %v2546_v3  ;;  %v2623_v19 = vsub.f32 %v6304_v8, %v2546_v3  ;;  %v6839_v32 = vpop.eup %4703 }
 0x551   : > { %4721 = vpow2.f32 %v2760_v11  ;;  %v4706_v31 = vpop.eup %4705  ;;  %v2847_v11 = vadd.f32 %v6835_v23, %v6831_v43 }
 0x552   : > { %2842 = vadd.xlane.f32.xlu1 %v2841_v58  ;;  %v2722_v40 = vmul.f32 1.442695, %v2622_v16  ;;  %v2724_v37 = vmul.f32 1.442695, %v2623_v19  ;;  %4723 = vrcp.f32 %v6731_v60 }
 0x553   : > { %v2579_v36 = vpop.xlane.xlu1 %2578  ;;  %v1725_v41 = vpop.xlane.xlu0 %1724 }
 0x554   : > { %v2644_v53 = vsub.f32 %v6456_v57, %v2579_v36  ;;  %v2645_v59 = vsub.f32 %v6468_v26, %v2579_v36  ;;  %4725 = vpow2.f32 %v2722_v40 }
 0x555   : > { %v6846_v55 = vpop.eup %4707  ;;  %4727 = vpow2.f32 %v2724_v37 }
 0x556   : > { %7765 = vst [vmem:[#allocation51_spill] sm:$0xff] %v6846_v55  ;;  %v6848_v8 = vpop.eup %4709  ;;  %v2766_v3 = vmul.f32 1.442695, %v2644_v53  ;;  %v2768_v58 = vmul.f32 1.442695, %v2645_v59  ;;  %2848 = vadd.xlane.f32.xlu1 %v2847_v11  ;;  %4729 = vrcp.f32 %v1725_v41  ;;  %v1832_v41 = vmul.f32 %v4706_v31, %v6399_v10  ;;  %v7767_v11 = vld [vmem:[#allocation81_spill] sm:$0xff] }
 0x557   : > { %v6850_v16 = vpop.eup %4711  ;;  %v2552_v57 = vpop.xlane.xlu0 %2551 }
 0x558   : > { %v6852_v60 = vpop.eup %4713  ;;  %4731 = vpow2.f32 %v2766_v3  ;;  %v2826_v26 = vadd.f32 %v6850_v16, %v6848_v8  ;;  %v2626_v19 = vsub.f32 %v6316_v30, %v2552_v57  ;;  %v2627_v40 = vsub.f32 %v6318_v28, %v2552_v57  ;;  %v6860_v37 = vpop.xlane.xlu1 %1757  ;;  %v7768_v30 = vld [vmem:[#allocation73_spill] sm:$0xff] }
 0x559   : > { %7766 = vst [vmem:[#allocation47_spill] sm:$0xff] %v6852_v60  ;;  %v4716_v36 = vpop.eup %4715  ;;  %4733 = vpow2.f32 %v2768_v58  ;;  %v2853_v59 = vadd.f32 %v6852_v60, %v6846_v55  ;;  %v1831_v3 = vmul.f32 %v4706_v31, %v7767_v11  ;;  %v1838_v28 = vmul.f32 %v6839_v32, %v7768_v30  ;;  %v7772_v11 = vld [vmem:[#allocation72_spill] sm:$0xff] }
 0x55a   : > { %2827 = vadd.xlane.f32.xlu0 %v2826_v26  ;;  %v1834_v53 = vmul.f32 %v4716_v36, %v6428_v29  ;;  %v1833_v43 = vmul.f32 %v4716_v36, %v6411_v49  ;;  %v4718_v23 = vpop.eup %4717  ;;  %v2730_v58 = vmul.f32 1.442695, %v2626_v19  ;;  %v2732_v39 = vmul.f32 1.442695, %v2627_v40  ;;  %v7771_v40 = vld [vmem:[#allocation84_spill] sm:$0xff] }
 0x55b   : > { %2854 = vadd.xlane.f32.xlu1 %v2853_v59  ;;  %4735 = vrcp.f32 %v6747_v18  ;;  %v1731_v26 = vpop.xlane.xlu0 %1730  ;;  %v1836_v10 = vmul.f32 %v4718_v23, %v6440_v35  ;;  %v1835_v59 = vmul.f32 %v4718_v23, %v7771_v40 }
 0x55c   : > { %v1888_v57 = vpack.c.bf16 %v1834_v53, %v1832_v41  ;;  %v1887_v55 = vpack.c.bf16 %v1833_v43, %v1831_v3  ;;  %4737 = vpow2.f32 %v2730_v58  ;;  %v6876_v36 = vpop.xlane.xlu1 %1763  ;;  %v1837_v3 = vmul.f32 %v6839_v32, %v7772_v11 }
 0x55d   : > { %v6870_v60 = vpop.eup %4719  ;;  %4739 = vpow2.f32 %v2732_v39  ;;  %v1890_v49 = vpack.c.bf16 %v1838_v28, %v1836_v10  ;;  %v7774_v28 = vld [vmem:[#allocation88_spill] sm:$0xff] }
 0x55e   : > { %7769 = vst [vmem:[#allocation50_spill] sm:$0xff] %v6870_v60  ;;  %v6872_v29 = vpop.eup %4721  ;;  %2023 = vmatprep.mubr.bf16.mxu0 %v1888_v57  ;;  %4741 = vrcp.f32 %v1731_v26  ;;  %v1889_v23 = vpack.c.bf16 %v1837_v3, %v1835_v59  ;;  %v7775_v26 = vld [vmem:[#allocation76_spill] sm:$0xff]  ;;  %v7777_v59 = vld [vmem:[#allocation87_spill] sm:$0xff] }
 0x55f   : > { %7770 = vst [vmem:[#allocation30_spill] sm:$0xff] %v6872_v29  ;;  %2024 = vmatmul.mubr.bf16.gmra.mxu0 %v1887_v55  ;;  %v2859_v31 = vadd.f32 %v6872_v29, %v6870_v60  ;;  %v2558_v18 = vpop.xlane.xlu0 %2557  ;;  %v4724_v43 = vpop.eup %4723  ;;  %4743 = vrcp.f32 %v6774_v7 }
 0x560   : > { %2031 = vmatprep.mubr.bf16.mxu0 %v1890_v49  ;;  %v2630_v35 = vsub.f32 %v6336_v21, %v2558_v18  ;;  %v2631_v19 = vsub.f32 %v6338_v38, %v2558_v18  ;;  %v1842_v10 = vmul.f32 %v4724_v43, %v7775_v26 }
 0x561   : > { %2860 = vadd.xlane.f32.xlu1 %v2859_v31  ;;  %v6881_v39 = vpop.eup %4725  ;;  %v6896_v31 = vpop.xlane.xlu1 %1769 }
 0x562   : > { %v6883_v41 = vpop.eup %4727  ;;  %v2738_v55 = vmul.f32 1.442695, %v2630_v35  ;;  %v2740_v53 = vmul.f32 1.442695, %v2631_v19 }
 0x563   : > { %v4730_v58 = vpop.eup %4729  ;;  %v1737_v30 = vpop.xlane.xlu0 %1736  ;;  %v2832_v21 = vadd.f32 %v6883_v41, %v6881_v39 }
 0x564   : > { %4745 = vpow2.f32 %v2738_v55  ;;  %v1840_v57 = vmul.f32 %v4730_v58, %v7774_v28  ;;  %v1839_v55 = vmul.f32 %v4730_v58, %v7777_v59  ;;  %v7779_v58 = vld [vmem:[#allocation94_spill] sm:$0xff] }
 0x565   : > { %v6890_v38 = vpop.eup %4731  ;;  %4747 = vpow2.f32 %v2740_v53  ;;  %2833 = vadd.xlane.f32.xlu0 %v2832_v21 }
 0x566   : > { %7773 = vst [vmem:[#allocation3_spill] sm:$0xff] %v6890_v38  ;;  %v6894_v49 = vpop.eup %4733  ;;  %4749 = vrcp.f32 %v1737_v30  ;;  %v1892_v7 = vpack.c.bf16 %v1842_v10, %v1840_v57  ;;  %v6905_v11 = vpop.xlane.xlu1 %1775 }
 0x567   : > { %7776 = vst [vmem:[#allocation6_spill] sm:$0xff] %v6894_v49  ;;  %2032 = vmatmul.mubr.bf16.gmra.mxu0 %v1889_v23  ;;  %v2865_v32 = vadd.f32 %v6894_v49, %v6890_v38  ;;  %v2564_v18 = vpop.xlane.xlu0 %2563  ;;  %v7778_v23 = vld [vmem:[#allocation75_spill] sm:$0xff]  ;;  %4751 = vrcp.f32 %v6805_v22 }
 0x568   : > { %v4736_v35 = vpop.eup %4735  ;;  %2039 = vmatprep.mubr.bf16.mxu0 %v1892_v7  ;;  %v2634_v19 = vsub.f32 %v6360_v44, %v2564_v18  ;;  %v2635_v40 = vsub.f32 %v6362_v33, %v2564_v18  ;;  %v1841_v28 = vmul.f32 %v4724_v43, %v7778_v23  ;;  %v7780_v7 = vld [vmem:[#allocation78_spill] sm:$0xff] }
 0x569   : > { %2866 = vadd.xlane.f32.xlu1 %v2865_v32  ;;  %v6903_v53 = vpop.eup %4737  ;;  %v1846_v32 = vmul.f32 %v4736_v35, %v7780_v7 }
 0x56a   : > { %v6907_v3 = vpop.eup %4739  ;;  %v2746_v30 = vmul.f32 1.442695, %v2634_v19  ;;  %v2748_v21 = vmul.f32 1.442695, %v2635_v40  ;;  %v1891_v33 = vpack.c.bf16 %v1841_v28, %v1839_v55 }
 0x56b   : > { %v4742_v57 = vpop.eup %4741  ;;  %v1743_v26 = vpop.xlane.xlu0 %1742  ;;  %v2838_v44 = vadd.f32 %v6907_v3, %v6903_v53 }
 0x56c   : > { %4753 = vpow2.f32 %v2746_v30  ;;  %v1844_v10 = vmul.f32 %v4742_v57, %v7779_v58  ;;  %v4744_v40 = vpop.eup %4743  ;;  %v7781_v30 = vld [vmem:[#allocation91_spill] sm:$0xff] }
 0x56d   : > { %4755 = vpow2.f32 %v2748_v21  ;;  %2839 = vadd.xlane.f32.xlu0 %v2838_v44  ;;  %v1843_v55 = vmul.f32 %v4742_v57, %v7781_v30 }
 0x56e   : > { %v6915_v18 = vpop.xlane.xlu1 %1781  ;;  %4757 = vrcp.f32 %v1743_v26  ;;  %v1894_v43 = vpack.c.bf16 %v1846_v32, %v1844_v10  ;;  %v7783_v32 = vld [vmem:[#allocation80_spill] sm:$0xff] }
 0x56f   : > { %2040 = vmatmul.mubr.bf16.gmra.mxu0 %v1891_v33  ;;  %v2570_v19 = vpop.xlane.xlu0 %2569  ;;  %v7782_v33 = vld [vmem:[#allocation77_spill] sm:$0xff]  ;;  %4759 = vrcp.f32 %v6829_v12 }
 0x570   : > { %2047 = vmatprep.mubr.bf16.mxu0 %v1894_v43  ;;  %v2638_v22 = vsub.f32 %v6380_v9, %v2570_v19  ;;  %v2639_v59 = vsub.f32 %v6382_v61, %v2570_v19  ;;  %v1845_v26 = vmul.f32 %v4736_v35, %v7782_v33  ;;  %v1850_v43 = vmul.f32 %v4744_v40, %v7783_v32 }
 0x571   : > { %v6920_v23 = vpop.eup %4745 }
 0x572   : > { %v6922_v28 = vpop.xlane.xlu1 %2779  ;;  %v6924_v21 = vpop.eup %4747  ;;  %v2754_v44 = vmul.f32 1.442695, %v2638_v22  ;;  %v2756_v58 = vmul.f32 1.442695, %v2639_v59  ;;  %v1893_v61 = vpack.c.bf16 %v1845_v26, %v1843_v55 }
 0x573   : > { %v4750_v10 = vpop.eup %4749  ;;  %v1749_v7 = vpop.xlane.xlu0 %1748  ;;  %v2844_v9 = vadd.f32 %v6924_v21, %v6920_v23 }
 0x574   : > { %4761 = vpow2.f32 %v2754_v44  ;;  %v1848_v57 = vmul.f32 %v4750_v10, %v6526_v1  ;;  %v4752_v59 = vpop.eup %4751  ;;  %v7784_v44 = vld [vmem:[#allocation24_spill] sm:$0xff] }
 0x575   : > { %4763 = vpow2.f32 %v2756_v58  ;;  %2845 = vadd.xlane.f32.xlu0 %v2844_v9  ;;  %v1847_v55 = vmul.f32 %v4750_v10, %v7784_v44 }
 0x576   : > { %v6932_v19 = vpop.xlane.xlu1 %2782  ;;  %4765 = vrcp.f32 %v1749_v7  ;;  %v1896_v35 = vpack.c.bf16 %v1850_v43, %v1848_v57  ;;  %v7786_v43 = vld [vmem:[#allocation83_spill] sm:$0xff] }
 0x577   : > { %2048 = vmatmul.mubr.bf16.gmra.mxu0 %v1893_v61  ;;  %v2576_v22 = vpop.xlane.xlu0 %2575  ;;  %v7785_v61 = vld [vmem:[#allocation79_spill] sm:$0xff]  ;;  %4767 = vrcp.f32 %v6860_v37 }
 0x578   : > { %2055 = vmatprep.mubr.bf16.mxu0 %v1896_v35  ;;  %v2642_v12 = vsub.f32 %v6426_v62, %v2576_v22  ;;  %v2643_v30 = vsub.f32 %v6436_v13, %v2576_v22  ;;  %v1849_v7 = vmul.f32 %v4744_v40, %v7785_v61  ;;  %v1854_v35 = vmul.f32 %v4752_v59, %v7786_v43 }
 0x579   : > { %v6937_v33 = vpop.eup %4753 }
 0x57a   : > { %v6939_v1 = vpop.xlane.xlu1 %2785  ;;  %v6941_v58 = vpop.eup %4755  ;;  %v2762_v26 = vmul.f32 1.442695, %v2642_v12  ;;  %v2764_v9 = vmul.f32 1.442695, %v2643_v30  ;;  %v1895_v13 = vpack.c.bf16 %v1849_v7, %v1847_v55 }
 0x57b   : > { %v4758_v57 = vpop.eup %4757  ;;  %v1755_v32 = vpop.xlane.xlu0 %1754  ;;  %v2850_v62 = vadd.f32 %v6941_v58, %v6937_v33 }
 0x57c   : > { %4769 = vpow2.f32 %v2762_v26  ;;  %v1852_v10 = vmul.f32 %v4758_v57, %v6552_v34  ;;  %v4760_v30 = vpop.eup %4759  ;;  %v1851_v37 = vmul.f32 %v4758_v57, %v6548_v45  ;;  %v7789_v26 = vld [vmem:[#allocation82_spill] sm:$0xff] }
 0x57d   : > { %4771 = vpow2.f32 %v2764_v9  ;;  %2851 = vadd.xlane.f32.xlu0 %v2850_v62  ;;  %v1853_v9 = vmul.f32 %v4752_v59, %v7789_v26  ;;  %v7791_v45 = vld [vmem:[#allocation86_spill] sm:$0xff] }
 0x57e   : > { %v6949_v22 = vpop.xlane.xlu1 %2788  ;;  %4773 = vrcp.f32 %v1755_v32  ;;  %v1898_v40 = vpack.c.bf16 %v1854_v35, %v1852_v10  ;;  %v1858_v57 = vmul.f32 %v4760_v30, %v7791_v45  ;;  %v7792_v59 = vld [vmem:[#allocation14_spill] sm:$0xff] }
 0x57f   : > { %2056 = vmatmul.mubr.bf16.gmra.mxu0 %v1895_v13  ;;  %v1761_v12 = vpop.xlane.xlu0 %1760  ;;  %v1897_v62 = vpack.c.bf16 %v1853_v9, %v1851_v37  ;;  %v7790_v13 = vld [vmem:[#allocation28_spill] sm:$0xff]  ;;  %v7794_v9 = vld [vmem:[#allocation85_spill] sm:$0xff] }
 0x580   : > { %2063 = vmatprep.mubr.bf16.mxu0 %v1898_v40  ;;  %4775 = vrcp.f32 %v1761_v12 }
 0x581   : > { %v6952_v44 = vpop.eup %4761  ;;  %4777 = vrcp.f32 %v6876_v36 }
 0x582   : > { %7787 = vst [vmem:[#allocation4_spill] sm:$0xff] %v6952_v44  ;;  %v6954_v55 = vpop.xlane.xlu1 %2791  ;;  %v6956_v34 = vpop.eup %4763 }
 0x583   : > { %7788 = vst [vmem:[#allocation7_spill] sm:$0xff] %v6956_v34  ;;  %v4766_v61 = vpop.eup %4765  ;;  %v1767_v7 = vpop.xlane.xlu0 %1766  ;;  %v2856_v32 = vadd.f32 %v6956_v34, %v6952_v44  ;;  %v7798_v34 = vld [vmem:[#allocation20_spill] sm:$0xff] }
 0x584   : > { %v1856_v10 = vmul.f32 %v4766_v61, %v7790_v13  ;;  %v4768_v12 = vpop.eup %4767  ;;  %v1855_v26 = vmul.f32 %v4766_v61, %v7792_v59  ;;  %4779 = vrcp.f32 %v1767_v7  ;;  %v1857_v13 = vmul.f32 %v4760_v30, %v7794_v9  ;;  %v7796_v61 = vld [vmem:[#allocation90_spill] sm:$0xff]  ;;  %v7797_v9 = vld [vmem:[#allocation16_spill] sm:$0xff] }
 0x585   : > { %2857 = vadd.xlane.f32.xlu0 %v2856_v32  ;;  %4781 = vrcp.f32 %v6896_v31  ;;  %v1862_v59 = vmul.f32 %v4768_v12, %v7796_v61 }
 0x586   : > { %v6964_v43 = vpop.xlane.xlu1 %2794  ;;  %v1900_v35 = vpack.c.bf16 %v1858_v57, %v1856_v10  ;;  %v1899_v10 = vpack.c.bf16 %v1857_v13, %v1855_v26  ;;  %v7795_v57 = vld [vmem:[#allocation17_spill] sm:$0xff] }
 0x587   : > { %2064 = vmatmul.mubr.bf16.gmra.mxu0 %v1897_v62  ;;  %v1773_v40 = vpop.xlane.xlu0 %1772  ;;  %v7799_v26 = vld [vmem:[#allocation89_spill] sm:$0xff] }
 0x588   : > { %2071 = vmatprep.mubr.bf16.mxu0 %v1900_v35  ;;  %4783 = vrcp.f32 %v1773_v40  ;;  %v1861_v13 = vmul.f32 %v4768_v12, %v7799_v26  ;;  %v7801_v40 = vld [vmem:[#allocation35_spill] sm:$0xff]  ;;  %v7803_v12 = vld [vmem:[#allocation92_spill] sm:$0xff] }
 0x589   : > { %v6967_v36 = vpop.eup %4769  ;;  %4785 = vrcp.f32 %v6905_v11  ;;  %v7804_v11 = vld [vmem:[#allocation23_spill] sm:$0xff] }
 0x58a   : > { %7793 = vst [vmem:[#allocation8_spill] sm:$0xff] %v6967_v36  ;;  %v6969_v38 = vpop.xlane.xlu1 %2797  ;;  %v6971_v37 = vpop.eup %4771 }
 0x58b   : > { %v4774_v45 = vpop.eup %4773  ;;  %v1779_v32 = vpop.xlane.xlu0 %1778  ;;  %v2862_v62 = vadd.f32 %v6971_v37, %v6967_v36 }
 0x58c   : > { %v1860_v35 = vmul.f32 %v4774_v45, %v7795_v57  ;;  %v1859_v31 = vmul.f32 %v4774_v45, %v7797_v9  ;;  %4787 = vrcp.f32 %v1779_v32 }
 0x58d   : > { %2863 = vadd.xlane.f32.xlu0 %v2862_v62  ;;  %v4776_v49 = vpop.eup %4775  ;;  %v7800_v62 = vld [vmem:[#allocation93_spill] sm:$0xff]  ;;  %4789 = vrcp.f32 %v6915_v18 }
 0x58e   : > { %v6979_v7 = vpop.xlane.xlu1 %2800  ;;  %v1902_v60 = vpack.c.bf16 %v1862_v59, %v1860_v35  ;;  %v4778_v44 = vpop.eup %4777  ;;  %v1864_v36 = vmul.f32 %v4776_v49, %v7798_v34  ;;  %v1901_v61 = vpack.c.bf16 %v1861_v13, %v1859_v31  ;;  %v1863_v59 = vmul.f32 %v4776_v49, %v7801_v40  ;;  %v7802_v34 = vld [vmem:[#allocation38_spill] sm:$0xff] }
 0x58f   : > { %2072 = vmatmul.mubr.bf16.gmra.mxu0 %v1899_v10  ;;  %v3019_v30 = vpop.permute.xlu0 %3018  ;;  %v1866_v57 = vmul.f32 %v4778_v44, %v7800_v62  ;;  %v7805_v62 = vld [vmem:[#allocation21_spill] sm:$0xff]  ;;  %4791 = vrcp.f32 %v6932_v19  ;;  %v7806_v49 = vld [vmem:[#allocation98_spill] sm:$0xff] }
 0x590   : > { %2079 = vmatprep.mubr.bf16.mxu0 %v1902_v60  ;;  %4793 = vrcp.f32 %v6922_v28 }
 0x591   : > { %v1904_v10 = vpack.c.bf16 %v1866_v57, %v1864_v36  ;;  %v4780_v35 = vpop.eup %4779  ;;  %4795 = vrcp.f32 %v6949_v22 }
 0x592   : > { %v3005_v29 = vpop.permute.xlu1 %3004  ;;  %v4782_v45 = vpop.eup %4781  ;;  %v1868_v9 = vmul.f32 %v4780_v35, %v7802_v34  ;;  %v1867_v57 = vmul.f32 %v4780_v35, %v7805_v62  ;;  %v7810_v35 = vld [vmem:[#allocation102_spill] sm:$0xff]  ;;  %4797 = vrcp.f32 %v6939_v1 }
 0x593   : > { %4148 = vmatpush3.bf16.msra.mxu0 %v3005_v29  ;;  %v3003_v60 = vpop.permute.xlu0 %3002  ;;  %v1865_v29 = vmul.f32 %v4778_v44, %v7803_v12  ;;  %v1870_v26 = vmul.f32 %v4782_v45, %v7804_v11  ;;  %v7808_v44 = vld [vmem:[#allocation25_spill] sm:$0xff]  ;;  %4799 = vrcp.f32 %v6964_v43 }
 0x594   : > { %4149 = vmatprep.subr.bf16.mxu0 %v3019_v30  ;;  %4801 = vrcp.f32 %v6954_v55  ;;  %v7818_v43 = vld [vmem:[#allocation37_spill] sm:$0xff]  ;;  %v7820_v55 = vld [vmem:[#allocation19_spill] sm:$0xff] }
 0x595   : > { %v1903_v30 = vpack.c.bf16 %v1865_v29, %v1863_v59  ;;  %v1906_v31 = vpack.c.bf16 %v1870_v26, %v1868_v9  ;;  %v4784_v36 = vpop.eup %4783  ;;  %v7809_v9 = vld [vmem:[#allocation97_spill] sm:$0xff]  ;;  %v7811_v29 = vld [vmem:[#allocation12_spill] sm:$0xff]  ;;  %4803 = vrcp.f32 %v6979_v7  ;;  %v7823_v7 = vld [vmem:[#allocation18_spill] sm:$0xff] }
 0x596   : > { %v4786_v13 = vpop.eup %4785  ;;  %v1872_v32 = vmul.f32 %v4784_v36, %v7806_v49  ;;  %v1871_v12 = vmul.f32 %v4784_v36, %v7809_v9  ;;  %v7814_v49 = vld [vmem:[#allocation33_spill] sm:$0xff]  ;;  %4805 = vrcp.f32 %v6969_v38 }
 0x597   : > { %2080 = vmatmul.mubr.bf16.gmra.mxu0 %v1901_v61  ;;  %v7807_v61 = vld [vmem:[#allocation11_spill] sm:$0xff]  ;;  %v1874_v18 = vmul.f32 %v4786_v13, %v7808_v44  ;;  %v1873_v11 = vmul.f32 %v4786_v13, %v7811_v29 }
 0x598   : > { %2087 = vmatprep.mubr.bf16.mxu0 %v1904_v10  ;;  %4150 = vmatpush3.bf16.msra.mxu0 %v3003_v60  ;;  %v1869_v10 = vmul.f32 %v4782_v45, %v7807_v61  ;;  %v7812_v45 = vld [vmem:[#allocation13_spill] sm:$0xff]  ;;  %v7816_v61 = vld [vmem:[#allocation15_spill] sm:$0xff] }
 0x599   : > { %v1908_v40 = vpack.c.bf16 %v1874_v18, %v1872_v32  ;;  %v4788_v59 = vpop.eup %4787  ;;  %v1907_v26 = vpack.c.bf16 %v1873_v11, %v1871_v12  ;;  %v7815_v32 = vld [vmem:[#allocation27_spill] sm:$0xff]  ;;  %v7819_v12 = vld [vmem:[#allocation29_spill] sm:$0xff] }
 0x59a   : > { %v1905_v60 = vpack.c.bf16 %v1869_v10, %v1867_v57  ;;  %v4790_v34 = vpop.eup %4789  ;;  %v1876_v19 = vmul.f32 %v4788_v59, %v7810_v35  ;;  %v7813_v57 = vld [vmem:[#allocation101_spill] sm:$0xff] }
 0x59b   : > { %v1878_v28 = vmul.f32 %v4790_v34, %v7812_v45  ;;  %v1875_v36 = vmul.f32 %v4788_v59, %v7813_v57  ;;  %v1877_v13 = vmul.f32 %v4790_v34, %v7815_v32 }
 0x59d   : > { %v1909_v10 = vpack.c.bf16 %v1877_v13, %v1875_v36 }
 0x59f   : > { %2088 = vmatmul.mubr.bf16.gmra.mxu0 %v1903_v30  ;;  %v1910_v30 = vpack.c.bf16 %v1878_v28, %v1876_v19  ;;  %v7821_v28 = vld [vmem:[#allocation36_spill] sm:$0xff] }
 0x5a0   : > { %2095 = vmatprep.mubr.bf16.mxu0 %v1906_v31  ;;  %v4792_v31 = vpop.eup %4791 }
 0x5a1   : > { %v4794_v62 = vpop.eup %4793  ;;  %v2909_v22 = vmul.f32 %v4792_v31, %v7814_v49  ;;  %v7824_v49 = vld [vmem:[#allocation96_spill] sm:$0xff] }
 0x5a2   : > { %v2907_v1 = vmul.f32 %v4794_v62, %v7816_v61  ;;  %v4796_v18 = vpop.eup %4795  ;;  %v2906_v35 = vmul.f32 %v4794_v62, %v7819_v12  ;;  %v7826_v12 = vld [vmem:[#allocation106_spill] sm:$0xff] }
 0x5a3   : > { %v2913_v59 = vmul.f32 %v4796_v18, %v7818_v43 }
 0x5a4   : > { %v2971_v44 = vpack.c.bf16 %v2909_v22, %v2907_v1 }
 0x5a7   : > { %2096 = vmatmul.mubr.bf16.gmra.mxu0 %v1905_v60  ;;  %v4798_v60 = vpop.eup %4797 }
 0x5a8   : > { %2103 = vmatprep.mubr.bf16.mxu0 %v1908_v40  ;;  %v7817_v40 = vld [vmem:[#allocation31_spill] sm:$0xff]  ;;  %v2911_v34 = vmul.f32 %v4798_v60, %v7820_v55  ;;  %v4800_v29 = vpop.eup %4799  ;;  %v2910_v36 = vmul.f32 %v4798_v60, %v7823_v7 }
 0x5a9   : > { %v2908_v9 = vmul.f32 %v4792_v31, %v7817_v40  ;;  %v4802_v45 = vpop.eup %4801  ;;  %v7827_v55 = vld [vmem:[#allocation95_spill] sm:$0xff] }
 0x5aa   : > { %v2973_v11 = vpack.c.bf16 %v2913_v59, %v2911_v34  ;;  %v2915_v22 = vmul.f32 %v4802_v45, %v7824_v49  ;;  %v4804_v40 = vpop.eup %4803  ;;  %v7825_v59 = vld [vmem:[#allocation99_spill] sm:$0xff]  ;;  %v2914_v34 = vmul.f32 %v4802_v45, %v7827_v55 }
 0x5ab   : > { %v2970_v19 = vpack.c.bf16 %v2908_v9, %v2906_v35  ;;  %v4806_v43 = vpop.eup %4805  ;;  %v2921_v35 = vmul.f32 %v4804_v40, %v7826_v12 }
 0x5af   : > { %2104 = vmatmul.mubr.bf16.gmra.mxu0 %v1907_v26  ;;  %v2912_v26 = vmul.f32 %v4796_v18, %v7821_v28 }
 0x5b0   : > { %2111 = vmatprep.mubr.bf16.mxu0 %v1910_v30  ;;  %v7822_v30 = vld [vmem:[#allocation100_spill] sm:$0xff] }
 0x5b1   : > { %v2917_v31 = vmul.f32 %v4800_v29, %v7822_v30  ;;  %v2972_v32 = vpack.c.bf16 %v2912_v26, %v2910_v36  ;;  %v7829_v36 = vld [vmem:[#allocation105_spill] sm:$0xff] }
 0x5b2   : > { %v2920_v49 = vmul.f32 %v4804_v40, %v7829_v36 }
 0x5b3   : > { %v2975_v13 = vpack.c.bf16 %v2917_v31, %v2915_v22  ;;  %v7830_v22 = vld [vmem:[#allocation103_spill] sm:$0xff] }
 0x5b7   : > { %2112 = vmatmul.mubr.bf16.gmra.mxu0 %v1909_v10 }
 0x5b8   : > { %3082 = vmatprep.mubr.bf16.mxu0 %v2971_v44 }
 0x5bf   : > { %3083 = vmatmul.mubr.bf16.vlgmr.msra.gmra.mxu0 %v2970_v19  ;;  %v7828_v19 = vld [vmem:[#allocation104_spill] sm:$0xff] }
 0x5c0   : > { %3090 = vmatprep.mubr.bf16.mxu0 %v2973_v11 }
 0x5c3   : > { %v2585_v57 = vpop.xlane.xlu1 %2584 }
 0x5c4   : > { %v2648_v62 = vsub.f32 %v6734_v20, %v2585_v57  ;;  %v2649_v38 = vsub.f32 %v6740_v52, %v2585_v57  ;;  %v2582_v61 = vpop.xlane.xlu0 %2581  ;;  %v2916_v52 = vmul.f32 %v4800_v29, %v7825_v59 }
 0x5c5   : > { %v2646_v44 = vsub.f32 %v6714_v6, %v2582_v61  ;;  %v2647_v18 = vsub.f32 %v6726_v50, %v2582_v61  ;;  %v2919_v50 = vmul.f32 %v4806_v43, %v7828_v19 }
 0x5c6   : > { %v2774_v1 = vmul.f32 1.442695, %v2648_v62  ;;  %v2776_v10 = vmul.f32 1.442695, %v2649_v38  ;;  %v2974_v11 = vpack.c.bf16 %v2916_v52, %v2914_v34  ;;  %v2918_v62 = vmul.f32 %v4806_v43, %v7830_v22 }
 0x5c7   : > { %3091 = vmatmul.mubr.bf16.gmra.mxu0 %v2972_v32  ;;  %v2770_v60 = vmul.f32 1.442695, %v2646_v44  ;;  %v2772_v9 = vmul.f32 1.442695, %v2647_v18  ;;  %v2813_v6 = vpop.xlane.xlu1 %2812  ;;  %v2977_v30 = vpack.c.bf16 %v2921_v35, %v2919_v50 }
 0x5c8   : > { %4807 = vpow2.f32 %v2774_v1  ;;  %3098 = vmatprep.mubr.bf16.mxu0 %v2975_v13  ;;  %v2804_v20 = vpop.xlane.xlu0 %2803  ;;  %v2976_v61 = vpack.c.bf16 %v2920_v49, %v2918_v62 }
 0x5c9   : > { %4809 = vpow2.f32 %v2776_v10 }
 0x5ca   : > { %4811 = vpow2.f32 %v2770_v60 }
 0x5cb   : > { %4813 = vpow2.f32 %v2772_v9  ;;  %v3991_v28 = vpop.f32.mrf.mxu0  ;;  %v2819_v38 = vpop.xlane.xlu1 %2818 }
 0x5cc   : > { %4815 = vrcp.f32 %v2804_v20  ;;  %v2807_v26 = vpop.xlane.xlu0 %2806 }
 0x5cd   : > { %4817 = vrcp.f32 %v2807_v26  ;;  %v3992_v31 = vpop.f32.mrf.mxu0 }
 0x5ce   : > { %4819 = vrcp.f32 %v2813_v6  ;;  %v7027_v29 = vadd.f32 %v3992_v31, %v3991_v28 }
 0x5cf   : > { %3099 = vmatmul.mubr.bf16.gmra.mxu0 %v2974_v11  ;;  %v3994_v57 = vpop.f32.mrf.mxu0  ;;  %v2825_v55 = vpop.xlane.xlu1 %2824 }
 0x5d0   : > { %3106 = vmatprep.mubr.bf16.mxu0 %v2977_v30  ;;  %v2810_v7 = vpop.xlane.xlu0 %2809 }
 0x5d1   : > { %4821 = vrcp.f32 %v2810_v7  ;;  %v3995_v45 = vpop.f32.mrf.mxu0 }
 0x5d2   : > { %v7031_v32 = vadd.f32 %v3995_v45, %v3994_v57 }
 0x5d3   : > { %v2831_v22 = vpop.xlane.xlu1 %2830 }
 0x5d4   : > { %v2816_v1 = vpop.xlane.xlu0 %2815  ;;  %v2120_v44 = vpack.c.bf16 %v7031_v32, %v7027_v29 }
 0x5d5   : > { %v7033_v13 = vpop.eup %4807  ;;  %4823 = vrcp.f32 %v2816_v1 }
 0x5d6   : > { %v7035_v10 = vpop.eup %4809  ;;  %4825 = vrcp.f32 %v2819_v38 }
 0x5d7   : > { %v7039_v18 = vpop.eup %4811  ;;  %3107 = vmatmul.mubr.bf16.gmra.mxu0 %v2976_v61  ;;  %v2871_v40 = vadd.f32 %v7035_v10, %v7033_v13  ;;  %v3997_v9 = vpop.f32.mrf.mxu0 }
 0x5d8   : > { %v7043_v60 = vpop.eup %4813  ;;  %v2822_v43 = vpop.xlane.xlu0 %2821 }
 0x5d9   : > { %2872 = vadd.xlane.f32.xlu1 %v2871_v40  ;;  %v2868_v20 = vadd.f32 %v7043_v60, %v7039_v18  ;;  %v4816_v59 = vpop.eup %4815  ;;  %v3998_v52 = vpop.f32.mrf.mxu0  ;;  %4827 = vrcp.f32 %v2822_v43 }
 0x5da   : > { %v7047_v12 = vadd.f32 %v3998_v52, %v3997_v9  ;;  %v4818_v35 = vpop.eup %4817  ;;  %v2923_v19 = vmul.f32 %v4816_v59, %v6758_v25  ;;  %v2922_v11 = vmul.f32 %v4816_v59, %v6754_v2  ;;  %4829 = vrcp.f32 %v2825_v55  ;;  %v2837_v52 = vpop.xlane.xlu1 %2836 }
 0x5db   : > { %2869 = vadd.xlane.f32.xlu0 %v2868_v20  ;;  %v4000_v34 = vpop.f32.mrf.mxu0  ;;  %v4820_v6 = vpop.eup %4819  ;;  %v2925_v50 = vmul.f32 %v4818_v35, %v6772_v14  ;;  %v2924_v28 = vmul.f32 %v4818_v35, %v6768_v4 }
 0x5dc   : > { %v2929_v49 = vmul.f32 %v4820_v6, %v6749_v5 }
 0x5dd   : > { %v4001_v26 = vpop.f32.mrf.mxu0  ;;  %v2979_v57 = vpack.c.bf16 %v2925_v50, %v2923_v19  ;;  %v2978_v7 = vpack.c.bf16 %v2924_v28, %v2922_v11 }
 0x5de   : > { %v4822_v30 = vpop.eup %4821  ;;  %v7053_v31 = vadd.f32 %v4001_v26, %v4000_v34 }
 0x5df   : > { %v2927_v36 = vmul.f32 %v4822_v30, %v6786_v24  ;;  %3114 = vmatprep.mubr.bf16.mxu0 %v2979_v57  ;;  %v2926_v62 = vmul.f32 %v4822_v30, %v6782_v56  ;;  %v2928_v24 = vmul.f32 %v4820_v6, %v6743_v48 }
 0x5e0   : > { %v2121_v25 = vpack.c.bf16 %v7053_v31, %v7047_v12  ;;  %3115 = vmatmul.mubr.bf16.gmra.mxu0 %v2978_v7 }
 0x5e1   : > { %v2981_v14 = vpack.c.bf16 %v2929_v49, %v2927_v36  ;;  %v2980_v9 = vpack.c.bf16 %v2928_v24, %v2926_v62 }
 0x5e2   : > { %v4824_v2 = vpop.eup %4823 }
 0x5e3   : > { %v2828_v45 = vpop.xlane.xlu0 %2827  ;;  %v4826_v4 = vpop.eup %4825  ;;  %3122 = vmatprep.mubr.bf16.mxu0 %v2981_v14  ;;  %v2931_v61 = vmul.f32 %v4824_v2, %v6803_v51  ;;  %v2930_v51 = vmul.f32 %v4824_v2, %v6798_v42 }
 0x5e4   : > { %4831 = vrcp.f32 %v2828_v45  ;;  %v4003_v38 = vpop.f32.mrf.mxu0  ;;  %v2933_v1 = vmul.f32 %v4826_v4, %v6766_v17  ;;  %v2932_v34 = vmul.f32 %v4826_v4, %v6762_v0  ;;  %v2843_v42 = vpop.xlane.xlu1 %2842 }
 0x5e5   : > { %4833 = vrcp.f32 %v2831_v22 }
 0x5e6   : > { %v4004_v5 = vpop.f32.mrf.mxu0  ;;  %v4828_v43 = vpop.eup %4827  ;;  %v2983_v59 = vpack.c.bf16 %v2933_v1, %v2931_v61  ;;  %4835 = vrcp.f32 %v2837_v52  ;;  %v2982_v11 = vpack.c.bf16 %v2932_v34, %v2930_v51 }
 0x5e7   : > { %v7063_v40 = vadd.f32 %v4004_v5, %v4003_v38  ;;  %v4830_v35 = vpop.eup %4829  ;;  %v2935_v48 = vmul.f32 %v4828_v43, %v6817_v54  ;;  %v2934_v36 = vmul.f32 %v4828_v43, %v6813_v27  ;;  %v7831_v5 = vld [vmem:[#allocation39_spill] sm:$0xff] }
 0x5e8   : > { %v4006_v20 = vpop.f32.mrf.mxu0  ;;  %3123 = vmatmul.mubr.bf16.gmra.mxu0 %v2980_v9  ;;  %v2937_v50 = vmul.f32 %v4830_v35, %v6780_v63  ;;  %v2936_v63 = vmul.f32 %v4830_v35, %v6776_v46  ;;  %v2849_v38 = vpop.xlane.xlu1 %2848  ;;  %v2136_v46 = vld [vmem:[%s7426_s5] sm:$0x3] }
 0x5e9   : > { %3130 = vmatprep.mubr.bf16.mxu0 %v2983_v59  ;;  %4401 = vmatprep.subr.msk.bf16.mxu0 %vm3277_vm3, %v2136_v46  ;;  %v3491_v9 = vsel %vm3277_vm3, %v2136_v46, 0 }
 0x5ea   : > { %v4007_v56 = vpop.f32.mrf.mxu0  ;;  %v2985_v28 = vpack.c.bf16 %v2937_v50, %v2935_v48  ;;  %v2984_v22 = vpack.c.bf16 %v2936_v63, %v2934_v36  ;;  %4350 = vmatpush3.bf16.msra.mxu0 %v3491_v9  ;;  %v7833_v48 = vld [vmem:[#allocation32_spill] sm:$0xff] }
 0x5eb   : > { %v7065_v55 = vadd.f32 %v4007_v56, %v4006_v20 }
 0x5ec   : > { %v2855_v52 = vpop.xlane.xlu1 %2854 }
 0x5ed   : > { %v2122_v17 = vpack.c.bf16 %v7065_v55, %v7063_v40 }
 0x5ee   : > { %v2834_v6 = vpop.xlane.xlu0 %2833 }
 0x5ef   : > { %v4009_v19 = vpop.f32.mrf.mxu0  ;;  %4837 = vrcp.f32 %v2834_v6 }
 0x5f0   : > { %3131 = vmatmul.mubr.bf16.gmra.mxu0 %v2982_v11  ;;  %4839 = vrcp.f32 %v2843_v42 }
 0x5f1   : > { %v4010_v26 = vpop.f32.mrf.mxu0  ;;  %v4832_v30 = vpop.eup %4831  ;;  %3138 = vmatprep.mubr.bf16.mxu0 %v2985_v28 }
 0x5f2   : > { %v7073_v57 = vadd.f32 %v4010_v26, %v4009_v19  ;;  %v4834_v7 = vpop.eup %4833  ;;  %v2939_v0 = vmul.f32 %v4832_v30, %v6850_v16  ;;  %v2938_v16 = vmul.f32 %v4832_v30, %v6848_v8  ;;  %v2861_v28 = vpop.xlane.xlu1 %2860 }
 0x5f3   : > { %v4012_v54 = vpop.f32.mrf.mxu0  ;;  %v2941_v45 = vmul.f32 %v4834_v7, %v6794_v15  ;;  %v4836_v27 = vpop.eup %4835  ;;  %v2940_v15 = vmul.f32 %v4834_v7, %v6788_v47  ;;  %v7835_v7 = vld [vmem:[#allocation5_spill] sm:$0xff] }
 0x5f4   : > { %v2945_v1 = vmul.f32 %v4836_v27, %v7831_v5 }
 0x5f5   : > { %v4013_v49 = vpop.f32.mrf.mxu0  ;;  %v2987_v62 = vpack.c.bf16 %v2941_v45, %v2939_v0  ;;  %v2986_v8 = vpack.c.bf16 %v2940_v15, %v2938_v16  ;;  %v7837_v16 = vld [vmem:[#allocation47_spill] sm:$0xff] }
 0x5f6   : > { %v7077_v14 = vadd.f32 %v4013_v49, %v4012_v54  ;;  %v2840_v2 = vpop.xlane.xlu0 %2839 }
 0x5f7   : > { %4841 = vrcp.f32 %v2840_v2 }
 0x5f8   : > { %v2123_v4 = vpack.c.bf16 %v7077_v14, %v7073_v57  ;;  %3139 = vmatmul.mubr.bf16.gmra.mxu0 %v2984_v22  ;;  %4843 = vrcp.f32 %v2849_v38  ;;  %v7836_v38 = vld [vmem:[#allocation26_spill] sm:$0xff] }
 0x5f9   : > { %3146 = vmatprep.mubr.bf16.mxu0 %v2987_v62 }
 0x5fc   : > { %v4838_v61 = vpop.eup %4837 }
 0x5fd   : > { %v2943_v24 = vmul.f32 %v4838_v61, %v6883_v41  ;;  %v4840_v59 = vpop.eup %4839  ;;  %v2942_v56 = vmul.f32 %v4838_v61, %v6881_v39  ;;  %v7832_v41 = vld [vmem:[#allocation41_spill] sm:$0xff]  ;;  %v3872_v39 = vld [vmem:[%s7426_s5 + $0x2] sm:$0x3] }
 0x5fe   : > { %v2846_v43 = vpop.xlane.xlu0 %2845  ;;  %v2944_v35 = vmul.f32 %v4836_v27, %v7832_v41  ;;  %v2949_v34 = vmul.f32 %v4840_v59, %v7833_v48  ;;  %4400 = vmatprep.subr.msk.bf16.mxu1 %vm3277_vm3, %v3872_v39  ;;  %v3279_v49 = vsel %vm3277_vm3, %v3872_v39, 0 }
 0x5ff   : > { %4845 = vrcp.f32 %v2846_v43  ;;  %v2989_v20 = vpack.c.bf16 %v2945_v1, %v2943_v24  ;;  %4316 = vmatpush3.bf16.msra.mxu1 %v3279_v49  ;;  %v7838_v43 = vld [vmem:[#allocation51_spill] sm:$0xff] }
 0x600   : > { %3147 = vmatmul.mubr.bf16.gmra.mxu0 %v2986_v8  ;;  %4847 = vrcp.f32 %v2855_v52  ;;  %v2988_v19 = vpack.c.bf16 %v2944_v35, %v2942_v56  ;;  %v7839_v8 = vld [vmem:[#allocation7_spill] sm:$0xff] }
 0x601   : > { %3154 = vmatprep.mubr.bf16.mxu0 %v2989_v20 }
 0x604   : > { %v4842_v47 = vpop.eup %4841 }
 0x605   : > { %v2947_v51 = vmul.f32 %v4842_v47, %v6907_v3  ;;  %v4844_v11 = vpop.eup %4843  ;;  %v2946_v26 = vmul.f32 %v4842_v47, %v6903_v53  ;;  %v7834_v3 = vld [vmem:[#allocation22_spill] sm:$0xff]  ;;  %v2867_v53 = vpop.xlane.xlu1 %2866 }
 0x606   : > { %v2852_v6 = vpop.xlane.xlu0 %2851  ;;  %v2948_v42 = vmul.f32 %v4840_v59, %v7834_v3  ;;  %v2953_v36 = vmul.f32 %v4844_v11, %v7835_v7  ;;  %v2952_v27 = vmul.f32 %v4844_v11, %v7836_v38  ;;  %v7840_v59 = vld [vmem:[#allocation30_spill] sm:$0xff] }
 0x607   : > { %4849 = vrcp.f32 %v2852_v6  ;;  %v2991_v50 = vpack.c.bf16 %v2949_v34, %v2947_v51  ;;  %v7841_v34 = vld [vmem:[#allocation4_spill] sm:$0xff]  ;;  %v7842_v11 = vld [vmem:[#allocation50_spill] sm:$0xff] }
 0x608   : > { %3155 = vmatmul.mubr.bf16.gmra.mxu0 %v2988_v19  ;;  %4851 = vrcp.f32 %v2861_v28  ;;  %v2990_v63 = vpack.c.bf16 %v2948_v42, %v2946_v26  ;;  %v7843_v26 = vld [vmem:[#allocation6_spill] sm:$0xff] }
 0x609   : > { %3162 = vmatprep.mubr.bf16.mxu0 %v2991_v50 }
 0x60c   : > { %v4846_v30 = vpop.eup %4845 }
 0x60d   : > { %v2951_v54 = vmul.f32 %v4846_v30, %v6924_v21  ;;  %v4848_v45 = vpop.eup %4847  ;;  %v2950_v22 = vmul.f32 %v4846_v30, %v6920_v23 }
 0x60e   : > { %v2858_v0 = vpop.xlane.xlu0 %2857  ;;  %v2957_v61 = vmul.f32 %v4848_v45, %v7837_v16  ;;  %v2956_v23 = vmul.f32 %v4848_v45, %v7838_v43 }
 0x60f   : > { %4853 = vrcp.f32 %v2858_v0  ;;  %v2993_v2 = vpack.c.bf16 %v2953_v36, %v2951_v54  ;;  %v2992_v15 = vpack.c.bf16 %v2952_v27, %v2950_v22 }
 0x610   : > { %3163 = vmatmul.mubr.bf16.gmra.mxu0 %v2990_v63  ;;  %4855 = vrcp.f32 %v2867_v53  ;;  %v7844_v63 = vld [vmem:[#allocation8_spill] sm:$0xff] }
 0x611   : > { %3170 = vmatprep.mubr.bf16.mxu0 %v2993_v2 }
 0x614   : > { %v4850_v62 = vpop.eup %4849 }
 0x615   : > { %v2955_v21 = vmul.f32 %v4850_v62, %v6941_v58  ;;  %v4852_v5 = vpop.eup %4851  ;;  %v2954_v1 = vmul.f32 %v4850_v62, %v6937_v33 }
 0x616   : > { %v2864_v46 = vpop.xlane.xlu0 %2863  ;;  %v2961_v52 = vmul.f32 %v4852_v5, %v7840_v59  ;;  %v2960_v28 = vmul.f32 %v4852_v5, %v7842_v11 }
 0x617   : > { %4857 = vrcp.f32 %v2864_v46  ;;  %v2995_v24 = vpack.c.bf16 %v2957_v61, %v2955_v21  ;;  %v2994_v58 = vpack.c.bf16 %v2956_v23, %v2954_v1 }
 0x618   : > { %3171 = vmatmul.mubr.bf16.gmra.mxu0 %v2992_v15 }
 0x619   : > { %3178 = vmatprep.mubr.bf16.mxu0 %v2995_v24 }
 0x61c   : > { %v4854_v9 = vpop.eup %4853 }
 0x61d   : > { %v2959_v20 = vmul.f32 %v4854_v9, %v7839_v8  ;;  %v4856_v51 = vpop.eup %4855  ;;  %v2958_v6 = vmul.f32 %v4854_v9, %v7841_v34 }
 0x61e   : > { %v2965_v30 = vmul.f32 %v4856_v51, %v7843_v26 }
 0x61f   : > { %v4015_v56 = vpop.f32.mrf.mxu0  ;;  %v2997_v47 = vpack.c.bf16 %v2961_v52, %v2959_v20  ;;  %v2996_v54 = vpack.c.bf16 %v2960_v28, %v2958_v6 }
 0x620   : > { %3179 = vmatmul.mubr.bf16.gmra.mxu0 %v2994_v58 }
 0x621   : > { %v4016_v41 = vpop.f32.mrf.mxu0  ;;  %3186 = vmatprep.mubr.bf16.mxu0 %v2997_v47 }
 0x622   : > { %v7113_v35 = vadd.f32 %v4016_v41, %v4015_v56 }
 0x623   : > { %v4018_v48 = vpop.f32.mrf.mxu0 }
 0x624   : > { %v4858_v33 = vpop.eup %4857 }
 0x625   : > { %v4019_v19 = vpop.f32.mrf.mxu0  ;;  %v2963_v39 = vmul.f32 %v4858_v33, %v6971_v37  ;;  %v2962_v2 = vmul.f32 %v4858_v33, %v7844_v63  ;;  %v7845_v37 = vld [vmem:[#allocation3_spill] sm:$0xff] }
 0x626   : > { %v7116_v50 = vadd.f32 %v4019_v19, %v4018_v48  ;;  %v2964_v22 = vmul.f32 %v4856_v51, %v7845_v37 }
 0x627   : > { %v4021_v3 = vpop.f32.mrf.mxu0  ;;  %v2999_v7 = vpack.c.bf16 %v2965_v30, %v2963_v39 }
 0x628   : > { %v2124_v42 = vpack.c.bf16 %v7116_v50, %v7113_v35  ;;  %3187 = vmatmul.mubr.bf16.gmra.mxu0 %v2996_v54  ;;  %v2998_v27 = vpack.c.bf16 %v2964_v22, %v2962_v2 }
 0x629   : > { %v4022_v36 = vpop.f32.mrf.mxu0  ;;  %3194 = vmatprep.mubr.bf16.mxu0 %v2999_v7 }
 0x62a   : > { %v7123_v49 = vadd.f32 %v4022_v36, %v4021_v3 }
 0x62b   : > { %v4024_v0 = vpop.f32.mrf.mxu0 }
 0x62d   : > { %v4025_v45 = vpop.f32.mrf.mxu0 }
 0x62e   : > { %v7126_v53 = vadd.f32 %v4025_v45, %v4024_v0 }
 0x62f   : > { %v4027_v62 = vpop.f32.mrf.mxu0 }
 0x630   : > { %v2125_v38 = vpack.c.bf16 %v7126_v53, %v7123_v49  ;;  %3195 = vmatmul.mubr.bf16.gmra.mxu0 %v2998_v27 }
 0x631   : > { %v4028_v21 = vpop.f32.mrf.mxu0 }
 0x632   : > { %v7131_v16 = vadd.f32 %v4028_v21, %v4027_v62 }
 0x633   : > { %v4030_v61 = vpop.f32.mrf.mxu0 }
 0x635   : > { %v4031_v46 = vpop.f32.mrf.mxu0 }
 0x636   : > { %v7133_v15 = vadd.f32 %v4031_v46, %v4030_v61 }
 0x637   : > { %v4033_v24 = vpop.f32.mrf.mxu0 }
 0x638   : > { %v2126_v5 = vpack.c.bf16 %v7133_v15, %v7131_v16 }
 0x639   : > { %v4034_v1 = vpop.f32.mrf.mxu0 }
 0x63a   : > { %v7137_v9 = vadd.f32 %v4034_v1, %v4033_v24 }
 0x63b   : > { %v4036_v43 = vpop.f32.mrf.mxu0 }
 0x63d   : > { %v4037_v23 = vpop.f32.mrf.mxu0 }
 0x63e   : > { %v7139_v8 = vadd.f32 %v4037_v23, %v4036_v43 }
 0x63f   : > { %v4039_v20 = vpop.f32.mrf.mxu0 }
 0x640   : > { %v2127_v59 = vpack.c.bf16 %v7139_v8, %v7137_v9 }
 0x641   : > { %v4040_v52 = vpop.f32.mrf.mxu0 }
 0x642   : > { %v7143_v56 = vadd.f32 %v4040_v52, %v4039_v20 }
 0x643   : > { %v4042_v58 = vpop.f32.mrf.mxu0 }
 0x645   : > { %v4043_v47 = vpop.f32.mrf.mxu0 }
 0x646   : > { %v7145_v41 = vadd.f32 %v4043_v47, %v4042_v58 }
 0x647   : > { %v4045_v51 = vpop.f32.mrf.mxu0 }
 0x648   : > { %v2128_v48 = vpack.c.bf16 %v7145_v41, %v7143_v56 }
 0x649   : > { %v4046_v34 = vpop.f32.mrf.mxu0 }
 0x64a   : > { %v7149_v6 = vadd.f32 %v4046_v34, %v4045_v51 }
 0x64b   : > { %v4048_v33 = vpop.f32.mrf.mxu0 }
 0x64d   : > { %v4049_v19 = vpop.f32.mrf.mxu0 }
 0x64e   : > { %v7151_v11 = vadd.f32 %v4049_v19, %v4048_v33 }
 0x64f   : > { %v4051_v28 = vpop.f32.mrf.mxu0 }
 0x650   : > { %v2129_v39 = vpack.c.bf16 %v7151_v11, %v7149_v6 }
 0x651   : > { %v4052_v26 = vpop.f32.mrf.mxu0 }
 0x652   : > { %v7155_v30 = vadd.f32 %v4052_v26, %v4051_v28 }
 0x653   : > { %v4054_v3 = vpop.f32.mrf.mxu0 }
 0x655   : > { %v4055_v54 = vpop.f32.mrf.mxu0 }
 0x656   : > { %v7157_v7 = vadd.f32 %v4055_v54, %v4054_v3 }
 0x657   : > { %v4057_v36 = vpop.f32.mrf.mxu0 }
 0x658   : > { %v2130_v0 = vpack.c.bf16 %v7157_v7, %v7155_v30 }
 0x659   : > { %v4058_v63 = vpop.f32.mrf.mxu0 }
 0x65a   : > { %v7161_v2 = vadd.f32 %v4058_v63, %v4057_v36 }
 0x65b   : > { %v4060_v45 = vpop.f32.mrf.mxu0 }
 0x65d   : > { %v4061_v37 = vpop.f32.mrf.mxu0 }
 0x65e   : > { %v7163_v22 = vadd.f32 %v4061_v37, %v4060_v45 }
 0x65f   : > { %v4063_v62 = vpop.f32.mrf.mxu0 }
 0x660   : > { %v2131_v27 = vpack.c.bf16 %v7163_v22, %v7161_v2 }
 0x661   : > { %v4064_v21 = vpop.f32.mrf.mxu0 }
 0x662   : > { %v7167_v61 = vadd.f32 %v4064_v21, %v4063_v62  ;;  %v2873_v46 = vpop.xlane.xlu1 %2872 }
 0x663   : > { %v4066_v24 = vpop.f32.mrf.mxu0  ;;  %4859 = vrcp.f32 %v2873_v46 }
 0x664   : > { %v2870_v1 = vpop.xlane.xlu0 %2869 }
 0x665   : > { %v4067_v43 = vpop.f32.mrf.mxu0  ;;  %4861 = vrcp.f32 %v2870_v1 }
 0x666   : > { %v7169_v23 = vadd.f32 %v4067_v43, %v4066_v24 }
 0x667   : > { %v4069_v20 = vpop.f32.mrf.mxu0 }
 0x668   : > { %v2132_v52 = vpack.c.bf16 %v7169_v23, %v7167_v61 }
 0x669   : > { %v4070_v58 = vpop.f32.mrf.mxu0 }
 0x66a   : > { %v7173_v47 = vadd.f32 %v4070_v58, %v4069_v20 }
 0x66b   : > { %v4072_v51 = vpop.f32.mrf.mxu0 }
 0x66d   : > { %v4073_v34 = vpop.f32.mrf.mxu0 }
 0x66e   : > { %v7175_v33 = vadd.f32 %v4073_v34, %v4072_v51 }
 0x66f   : > { %v7177_v19 = vpop.f32.mrf.mxu0 }
 0x670   : > { %v4860_v28 = vpop.eup %4859  ;;  %v2133_v26 = vpack.c.bf16 %v7175_v33, %v7173_v47 }
 0x671   : > { %v7181_v3 = vpop.f32.mrf.mxu0  ;;  %v2969_v54 = vmul.f32 %v4860_v28, %v7035_v10  ;;  %v2968_v36 = vmul.f32 %v4860_v28, %v7033_v13 }
 0x672   : > { %v4862_v63 = vpop.eup %4861  ;;  %v4077_v7 = vadd.f32 %v7181_v3, %v7177_v19 }
 0x673   : > { %v7185_v45 = vpop.f32.mrf.mxu0  ;;  %v2967_v37 = vmul.f32 %v4862_v63, %v7043_v60  ;;  %v2966_v62 = vmul.f32 %v4862_v63, %v7039_v18 }
 0x675   : > { %v4079_v21 = vpop.f32.mrf.mxu0  ;;  %v3001_v46 = vpack.c.bf16 %v2969_v54, %v2967_v37  ;;  %v3000_v24 = vpack.c.bf16 %v2968_v36, %v2966_v62 }
 0x676   : > { %v4080_v11 = vadd.f32 %v4079_v21, %v7185_v45 }
 0x677   : > { %v7189_v1 = vpop.f32.mrf.mxu0  ;;  %3202 = vmatprep.mubr.bf16.mxu0 %v3001_v46 }
 0x678   : > { %3203 = vmatmul.mubr.bf16.gmra.mxu0 %v3000_v24  ;;  %v2134_v2 = vpack.c.bf16 %v4080_v11, %v4077_v7 }
 0x679   : > { %v7191_v43 = vpop.f32.mrf.mxu0  ;;  %4351 = vmatprep.mubr.msk.bf16.mxu0 %vm1109_vm2, %v2120_v44 }
 0x67a   : > { %v4083_v19 = vadd.f32 %v7191_v43, %v7189_v1 }
 0x67b   : > { %v7197_v13 = vpop.f32.mrf.mxu0 }
 0x67d   : > { %v7199_v10 = vpop.f32.mrf.mxu0 }
 0x67e   : > { %v4086_v23 = vadd.f32 %v7199_v10, %v7197_v13 }
 0x67f   : > { %v4151_v60 = vpop.f32.mrf.mxu0 }
 0x680   : > { %4352 = vmatmul.mubr.msk.bf16.vlgmr.msra.gmra.mxu0 %vm1109_vm2, %v2121_v25  ;;  %v2135_v36 = vpack.c.bf16 %v4086_v23, %v4083_v19 }
 0x681   : > { %v4152_v18 = vpop.f32.mrf.mxu0  ;;  %4355 = vmatprep.mubr.msk.bf16.mxu0 %vm1109_vm2, %v2122_v17 }
 0x682   : > { %v4153_v32 = vadd.f32 %v4152_v18, %v4151_v60 }
 0x683   : > { %v4154_v20 = vpop.f32.mrf.mxu0 }
 0x685   : > { %v4155_v29 = vpop.f32.mrf.mxu0 }
 0x686   : > { %v4156_v44 = vadd.f32 %v4155_v29, %v4154_v20 }
 0x687   : > { %v4157_v58 = vpop.f32.mrf.mxu0 }
 0x688   : > { %v3211_v51 = vpack.c.bf16 %v4156_v44, %v4153_v32  ;;  %4356 = vmatmul.mubr.msk.bf16.gmra.mxu0 %vm1109_vm2, %v2123_v4 }
 0x689   : > { %v4158_v12 = vpop.f32.mrf.mxu0  ;;  %4359 = vmatprep.mubr.msk.bf16.mxu0 %vm1109_vm2, %v2124_v42 }
 0x68a   : > { %4317 = vmatprep.mubr.msk.bf16.mxu1 %vm1109_vm2, %v3211_v51  ;;  %v4159_v40 = vadd.f32 %v4158_v12, %v4157_v58 }
 0x68b   : > { %v4160_v31 = vpop.f32.mrf.mxu0 }
 0x68d   : > { %v4161_v25 = vpop.f32.mrf.mxu0 }
 0x68e   : > { %v4162_v55 = vadd.f32 %v4161_v25, %v4160_v31 }
 0x68f   : > { %v4163_v17 = vpop.f32.mrf.mxu0 }
 0x690   : > { %v3212_v34 = vpack.c.bf16 %v4162_v55, %v4159_v40  ;;  %4360 = vmatmul.mubr.msk.bf16.gmra.mxu0 %vm1109_vm2, %v2125_v38 }
 0x691   : > { %v4164_v57 = vpop.f32.mrf.mxu0  ;;  %4363 = vmatprep.mubr.msk.bf16.mxu0 %vm1109_vm2, %v2126_v5 }
 0x692   : > { %4318 = vmatmul.mubr.msk.bf16.vlgmr.msra.gmra.mxu1 %vm1109_vm2, %v3212_v34  ;;  %v4165_v35 = vadd.f32 %v4164_v57, %v4163_v17 }
 0x693   : > { %v4166_v14 = vpop.f32.mrf.mxu0 }
 0x695   : > { %v4167_v4 = vpop.f32.mrf.mxu0 }
 0x696   : > { %v4168_v50 = vadd.f32 %v4167_v4, %v4166_v14 }
 0x697   : > { %v4169_v42 = vpop.f32.mrf.mxu0 }
 0x698   : > { %v3213_v28 = vpack.c.bf16 %v4168_v50, %v4165_v35  ;;  %4364 = vmatmul.mubr.msk.bf16.gmra.mxu0 %vm1109_vm2, %v2127_v59 }
 0x699   : > { %v4170_v49 = vpop.f32.mrf.mxu0  ;;  %4367 = vmatprep.mubr.msk.bf16.mxu0 %vm1109_vm2, %v2128_v48 }
 0x69a   : > { %4321 = vmatprep.mubr.msk.bf16.mxu1 %vm1109_vm2, %v3213_v28  ;;  %v4171_v16 = vadd.f32 %v4170_v49, %v4169_v42 }
 0x69b   : > { %v4172_v53 = vpop.f32.mrf.mxu0 }
 0x69d   : > { %v4173_v38 = vpop.f32.mrf.mxu0 }
 0x69e   : > { %v4174_v15 = vadd.f32 %v4173_v38, %v4172_v53 }
 0x6a0   : > { %v3214_v5 = vpack.c.bf16 %v4174_v15, %v4171_v16  ;;  %4368 = vmatmul.mubr.msk.bf16.gmra.mxu0 %vm1109_vm2, %v2129_v39  ;;  %v4175_v9 = vpop.f32.mrf.mxu0 }
 0x6a1   : > { %4371 = vmatprep.mubr.msk.bf16.mxu0 %vm1109_vm2, %v2130_v0 }
 0x6a2   : > { %4322 = vmatmul.mubr.msk.bf16.gmra.mxu1 %vm1109_vm2, %v3214_v5  ;;  %v4176_v8 = vpop.f32.mrf.mxu0 }
 0x6a3   : > { %v4177_v41 = vadd.f32 %v4176_v8, %v4175_v9 }
 0x6a4   : > { %v4178_v59 = vpop.f32.mrf.mxu0 }
 0x6a6   : > { %v4179_v56 = vpop.f32.mrf.mxu0 }
 0x6a7   : > { %v4180_v48 = vadd.f32 %v4179_v56, %v4178_v59 }
 0x6a8   : > { %4372 = vmatmul.mubr.msk.bf16.gmra.mxu0 %vm1109_vm2, %v2131_v27  ;;  %v4181_v6 = vpop.f32.mrf.mxu0 }
 0x6a9   : > { %4375 = vmatprep.mubr.msk.bf16.mxu0 %vm1109_vm2, %v2132_v52  ;;  %v3215_v39 = vpack.c.bf16 %v4180_v48, %v4177_v41 }
 0x6aa   : > { %v4182_v30 = vpop.f32.mrf.mxu0 }
 0x6ab   : > { %4325 = vmatprep.mubr.msk.bf16.mxu1 %vm1109_vm2, %v3215_v39  ;;  %v4183_v27 = vadd.f32 %v4182_v30, %v4181_v6 }
 0x6ac   : > { %v4184_v0 = vpop.f32.mrf.mxu0 }
 0x6ae   : > { %v4185_v22 = vpop.f32.mrf.mxu0 }
 0x6af   : > { %v4186_v61 = vadd.f32 %v4185_v22, %v4184_v0 }
 0x6b0   : > { %4376 = vmatmul.mubr.msk.bf16.gmra.mxu0 %vm1109_vm2, %v2133_v26  ;;  %v4187_v52 = vpop.f32.mrf.mxu0 }
 0x6b1   : > { %4379 = vmatprep.mubr.msk.bf16.mxu0 %vm1109_vm2, %v2134_v2  ;;  %v3216_v54 = vpack.c.bf16 %v4186_v61, %v4183_v27 }
 0x6b2   : > { %v4188_v3 = vpop.f32.mrf.mxu0 }
 0x6b3   : > { %4326 = vmatmul.mubr.msk.bf16.gmra.mxu1 %vm1109_vm2, %v3216_v54  ;;  %v4189_v33 = vadd.f32 %v4188_v3, %v4187_v52 }
 0x6b4   : > { %v4190_v63 = vpop.f32.mrf.mxu0 }
 0x6b6   : > { %v4191_v47 = vpop.f32.mrf.mxu0 }
 0x6b7   : > { %v4192_v26 = vadd.f32 %v4191_v47, %v4190_v63 }
 0x6b8   : > { %4380 = vmatmul.mubr.msk.bf16.gmra.mxu0 %vm1109_vm2, %v2135_v36  ;;  %v4193_v45 = vpop.f32.mrf.mxu0 }
 0x6b9   : > { %v3217_v37 = vpack.c.bf16 %v4192_v26, %v4189_v33 }
 0x6ba   : > { %v4194_v62 = vpop.f32.mrf.mxu0 }
 0x6bb   : > { %4329 = vmatprep.mubr.msk.bf16.mxu1 %vm1109_vm2, %v3217_v37  ;;  %v4195_v24 = vadd.f32 %v4194_v62, %v4193_v45 }
 0x6bc   : > { %v4196_v21 = vpop.f32.mrf.mxu0 }
 0x6be   : > { %v4197_v46 = vpop.f32.mrf.mxu0 }
 0x6bf   : > { %v4198_v13 = vadd.f32 %v4197_v46, %v4196_v21 }
 0x6c0   : > { %v4199_v1 = vpop.f32.mrf.mxu0 }
 0x6c1   : > { %v3218_v43 = vpack.c.bf16 %v4198_v13, %v4195_v24  ;;  %v7281_v24 = vld [vmem:[%s7427_s6] ss:$0 sm:$0xff] }
 0x6c2   : > { %v4200_v10 = vpop.f32.mrf.mxu0 }
 0x6c3   : > { %4330 = vmatmul.mubr.msk.bf16.gmra.mxu1 %vm1109_vm2, %v3218_v43  ;;  %v4201_v20 = vadd.f32 %v4200_v10, %v4199_v1  ;;  %v4863_v1 = vld [vmem:[%s4964_s29 + $0x10] sm:$0xff] }
 0x6c4   : > { %v4202_v60 = vpop.f32.mrf.mxu0 }
 0x6c6   : > { %v4203_v18 = vpop.f32.mrf.mxu0 }
 0x6c7   : > { %v4204_v29 = vadd.f32 %v4203_v18, %v4202_v60 }
 0x6c8   : > { %v4205_v32 = vpop.f32.mrf.mxu0 }
 0x6c9   : > { %v3219_v44 = vpack.c.bf16 %v4204_v29, %v4201_v20  ;;  %v4864_v20 = vld [vmem:[%s4964_s29] sm:$0xff] }
 0x6ca   : > { %v4206_v58 = vpop.f32.mrf.mxu0 }
 0x6cb   : > { %4333 = vmatprep.mubr.msk.bf16.mxu1 %vm1109_vm2, %v3219_v44  ;;  %v4207_v31 = vadd.f32 %v4206_v58, %v4205_v32 }
 0x6cc   : > { %v4208_v51 = vpop.f32.mrf.mxu0 }
 0x6ce   : > { %v4209_v12 = vpop.f32.mrf.mxu0 }
 0x6cf   : > { %v4210_v25 = vadd.f32 %v4209_v12, %v4208_v51  ;;  %v4865_v12 = vld [vmem:[%s4964_s29 + $0x18] sm:$0xff] }
 0x6d0   : > { %v4211_v40 = vpop.f32.mrf.mxu0 }
 0x6d1   : > { %v3220_v55 = vpack.c.bf16 %v4210_v25, %v4207_v31 }
 0x6d2   : > { %v4212_v17 = vpop.f32.mrf.mxu0 }
 0x6d3   : > { %4334 = vmatmul.mubr.msk.bf16.gmra.mxu1 %vm1109_vm2, %v3220_v55  ;;  %v4213_v14 = vadd.f32 %v4212_v17, %v4211_v40  ;;  %v4866_v55 = vld [vmem:[%s4964_s29 + $0x8] sm:$0xff] }
 0x6d4   : > { %v4214_v34 = vpop.f32.mrf.mxu0 }
 0x6d6   : > { %v4215_v57 = vpop.f32.mrf.mxu0 }
 0x6d7   : > { %v4216_v4 = vadd.f32 %v4215_v57, %v4214_v34 }
 0x6d8   : > { %v4217_v35 = vpop.f32.mrf.mxu0 }
 0x6d9   : > { %v3221_v50 = vpack.c.bf16 %v4216_v4, %v4213_v14 }
 0x6da   : > { %v4218_v42 = vpop.f32.mrf.mxu0 }
 0x6db   : > { %4337 = vmatprep.mubr.msk.bf16.mxu1 %vm1109_vm2, %v3221_v50  ;;  %v4219_v53 = vadd.f32 %v4218_v42, %v4217_v35 }
 0x6dc   : > { %v4220_v28 = vpop.f32.mrf.mxu0 }
 0x6de   : > { %v4221_v49 = vpop.f32.mrf.mxu0 }
 0x6df   : > { %v4222_v38 = vadd.f32 %v4221_v49, %v4220_v28  ;;  %v4867_v28 = vld [vmem:[%s4964_s29 + $0x30] sm:$0xff] }
 0x6e0   : > { %v4223_v16 = vpop.f32.mrf.mxu0 }
 0x6e1   : > { %v3222_v15 = vpack.c.bf16 %v4222_v38, %v4219_v53 }
 0x6e2   : > { %v4224_v5 = vpop.f32.mrf.mxu0 }
 0x6e3   : > { %4338 = vmatmul.mubr.msk.bf16.gmra.mxu1 %vm1109_vm2, %v3222_v15  ;;  %v4225_v59 = vadd.f32 %v4224_v5, %v4223_v16  ;;  %v4868_v15 = vld [vmem:[%s4964_s29 + $0x20] sm:$0xff] }
 0x6e4   : > { %v4226_v9 = vpop.f32.mrf.mxu0 }
 0x6e6   : > { %v4227_v8 = vpop.f32.mrf.mxu0 }
 0x6e7   : > { %v4228_v56 = vadd.f32 %v4227_v8, %v4226_v9 }
 0x6e8   : > { %v4229_v41 = vpop.f32.mrf.mxu0 }
 0x6e9   : > { %v3223_v48 = vpack.c.bf16 %v4228_v56, %v4225_v59 }
 0x6ea   : > { %v4230_v6 = vpop.f32.mrf.mxu0 }
 0x6eb   : > { %4341 = vmatprep.mubr.msk.bf16.mxu1 %vm1109_vm2, %v3223_v48  ;;  %v4231_v30 = vadd.f32 %v4230_v6, %v4229_v41  ;;  %v4869_v41 = vld [vmem:[%s4964_s29 + $0x38] sm:$0xff] }
 0x6ec   : > { %v4232_v11 = vpop.f32.mrf.mxu0 }
 0x6ee   : > { %v4233_v39 = vpop.f32.mrf.mxu0 }
 0x6ef   : > { %v4234_v7 = vadd.f32 %v4233_v39, %v4232_v11  ;;  %v4870_v39 = vld [vmem:[%s4964_s29 + $0x28] sm:$0xff] }
 0x6f0   : > { %v4235_v0 = vpop.f32.mrf.mxu0 }
 0x6f1   : > { %v3224_v2 = vpack.c.bf16 %v4234_v7, %v4231_v30 }
 0x6f2   : > { %v4236_v22 = vpop.f32.mrf.mxu0 }
 0x6f3   : > { %4342 = vmatmul.mubr.msk.bf16.gmra.mxu1 %vm1109_vm2, %v3224_v2  ;;  %v4237_v23 = vadd.f32 %v4236_v22, %v4235_v0 }
 0x6f4   : > { %v4238_v27 = vpop.f32.mrf.mxu0 }
 0x6f6   : > { %v4239_v61 = vpop.f32.mrf.mxu0 }
 0x6f7   : > { %v4240_v52 = vadd.f32 %v4239_v61, %v4238_v27 }
 0x6f9   : > { %v3225_v54 = vpack.c.bf16 %v4240_v52, %v4237_v23  ;;  %v4871_v52 = vld [vmem:[%s4964_s29 + $0x50] sm:$0xff] }
 0x6fb   : > { %4345 = vmatprep.mubr.msk.bf16.mxu1 %vm1109_vm2, %v3225_v54 }
 0x738   : > { %v4241_v19 = vpop.f32.mrf.mxu0 }
 0x73a   : > { %v4242_v3 = vpop.f32.mrf.mxu0 }
 0x73b   : > { %v4243_v47 = vadd.f32 %v4242_v3, %v4241_v19 }
 0x73c   : > { %v4244_v36 = vpop.f32.mrf.mxu0 }
 0x73e   : > { %v4245_v63 = vpop.f32.mrf.mxu0 }
 0x73f   : > { %v4246_v33 = vadd.f32 %v4245_v63, %v4244_v36  ;;  %v4872_v63 = vld [vmem:[%s4964_s29 + $0x40] sm:$0xff] }
 0x740   : > { %v4353_v45 = vpop.f32.mrf.mxu0 }
 0x741   : > { %v3226_v26 = vpack.c.bf16 %v4246_v33, %v4243_v47 }
 0x742   : > { %v3527_v37 = vpop.f32.mrf.mxu0 }
 0x743   : > { %4346 = vmatmul.mubr.msk.bf16.gmra.mxu1 %vm1109_vm2, %v3226_v26 }
 0x744   : > { %v4354_v46 = vpop.f32.mrf.mxu0 }
 0x746   : > { %v3530_v44 = vpop.f32.mrf.mxu0 }
 0x748   : > { %v4357_v34 = vpop.f32.mrf.mxu0 }
 0x74a   : > { %v3543_v14 = vpop.f32.mrf.mxu0 }
 0x74c   : > { %v4358_v50 = vpop.f32.mrf.mxu0 }
 0x74e   : > { %v3546_v8 = vpop.f32.mrf.mxu0 }
 0x750   : > { %v4361_v0 = vpop.f32.mrf.mxu0 }
 0x752   : > { %v4319_v62 = vpop.f32.mrf.mxu1  ;;  %v3559_v2 = vpop.f32.mrf.mxu0 }
 0x753   : > { %v3536_v21 = vadd.f32 %v4353_v45, %v4319_v62  ;;  %v4873_v62 = vld [vmem:[%s4964_s29 + $0x58] sm:$0xff] }
 0x754   : > { %v3315_v13 = vpop.f32.mrf.mxu1  ;;  %v4362_v61 = vpop.f32.mrf.mxu0 }
 0x755   : > { %v3656_v43 = vadd.f32 %v4863_v1, %v3536_v21  ;;  %v3528_v10 = vadd.f32 %v3527_v37, %v3315_v13  ;;  %v4874_v1 = vld [vmem:[%s4964_s29 + $0x48] sm:$0xff] }
 0x756   : > { %v4320_v60 = vpop.f32.mrf.mxu1  ;;  %v3562_v26 = vpop.f32.mrf.mxu0 }
 0x757   : > { %v3695_v18 = vadd.f32 %v7281_v24, %v3656_v43  ;;  %v3654_v29 = vadd.f32 %v4864_v20, %v3528_v10  ;;  %v3539_v32 = vadd.f32 %v4354_v46, %v4320_v60 }
 0x758   : > { %v3318_v58 = vpop.f32.mrf.mxu1  ;;  %v4365_v10 = vpop.f32.mrf.mxu0 }
 0x759   : > { %3727 = vst.msk [vmem:[%s7289_s9 + $0x10] sm:$0xff] %vm312_vm0, %v3695_v18  ;;  %v3693_v51 = vadd.f32 %v7281_v24, %v3654_v29  ;;  %v3657_v31 = vadd.f32 %v4865_v12, %v3539_v32  ;;  %v3531_v25 = vadd.f32 %v3530_v44, %v3318_v58  ;;  %v4875_v58 = vld [vmem:[%s4964_s29 + $0x70] sm:$0xff] }
 0x75a   : > { %v3575_v18 = vpop.f32.mrf.mxu0 }
 0x75b   : > { %3725 = vst.msk [vmem:[%s7289_s9] sm:$0xff] %vm312_vm0, %v3693_v51  ;;  %v3696_v40 = vadd.f32 %v7281_v24, %v3657_v31  ;;  %v3655_v17 = vadd.f32 %v4866_v55, %v3531_v25 }
 0x75c   : > { %v4366_v32 = vpop.f32.mrf.mxu0 }
 0x75d   : > { %3728 = vst.msk [vmem:[%s7289_s9 + $0x18] sm:$0xff] %vm312_vm0, %v3696_v40  ;;  %v3694_v57 = vadd.f32 %v7281_v24, %v3655_v17  ;;  %v4876_v40 = vld [vmem:[%s4964_s29 + $0x60] sm:$0xff] }
 0x75f   : > { %3726 = vst.msk [vmem:[%s7289_s9 + $0x8] sm:$0xff] %vm312_vm0, %v3694_v57 }
 0x762   : > { %v4323_v4 = vpop.f32.mrf.mxu1 }
 0x763   : > { %v3552_v35 = vadd.f32 %v4357_v34, %v4323_v4  ;;  %v3578_v34 = vpop.f32.mrf.mxu0  ;;  %v4877_v4 = vld [vmem:[%s4964_s29 + $0x78] sm:$0xff] }
 0x764   : > { %v3331_v42 = vpop.f32.mrf.mxu1 }
 0x765   : > { %v3660_v49 = vadd.f32 %v4867_v28, %v3552_v35  ;;  %v3544_v53 = vadd.f32 %v3543_v14, %v3331_v42  ;;  %v4878_v28 = vld [vmem:[%s4964_s29 + $0x68] sm:$0xff] }
 0x766   : > { %v4324_v38 = vpop.f32.mrf.mxu1 }
 0x767   : > { %v3699_v16 = vadd.f32 %v7281_v24, %v3660_v49  ;;  %v3658_v5 = vadd.f32 %v4868_v15, %v3544_v53  ;;  %v3555_v9 = vadd.f32 %v4358_v50, %v4324_v38  ;;  %v4369_v53 = vpop.f32.mrf.mxu0 }
 0x768   : > { %v3334_v59 = vpop.f32.mrf.mxu1 }
 0x769   : > { %3731 = vst.msk [vmem:[%s7289_s9 + $0x30] sm:$0xff] %vm312_vm0, %v3699_v16  ;;  %v3697_v56 = vadd.f32 %v7281_v24, %v3658_v5  ;;  %v3661_v48 = vadd.f32 %v4869_v41, %v3555_v9  ;;  %v3547_v6 = vadd.f32 %v3546_v8, %v3334_v59  ;;  %v3591_v16 = vpop.f32.mrf.mxu0  ;;  %v4879_v59 = vld [vmem:[%s4964_s29 + $0x90] sm:$0xff] }
 0x76b   : > { %3729 = vst.msk [vmem:[%s7289_s9 + $0x20] sm:$0xff] %vm312_vm0, %v3697_v56  ;;  %v3700_v11 = vadd.f32 %v7281_v24, %v3661_v48  ;;  %v3659_v30 = vadd.f32 %v4870_v39, %v3547_v6  ;;  %v4370_v9 = vpop.f32.mrf.mxu0 }
 0x76d   : > { %3732 = vst.msk [vmem:[%s7289_s9 + $0x38] sm:$0xff] %vm312_vm0, %v3700_v11  ;;  %v3698_v7 = vadd.f32 %v7281_v24, %v3659_v30  ;;  %v4880_v11 = vld [vmem:[%s4964_s29 + $0x80] sm:$0xff] }
 0x76f   : > { %3730 = vst.msk [vmem:[%s7289_s9 + $0x28] sm:$0xff] %vm312_vm0, %v3698_v7  ;;  %v3594_v7 = vpop.f32.mrf.mxu0 }
 0x773   : > { %v4327_v22 = vpop.f32.mrf.mxu1 }
 0x774   : > { %v3568_v27 = vadd.f32 %v4361_v0, %v4327_v22  ;;  %v4881_v22 = vld [vmem:[%s4964_s29 + $0x98] sm:$0xff] }
 0x775   : > { %v3347_v23 = vpop.f32.mrf.mxu1 }
 0x776   : > { %v3664_v54 = vadd.f32 %v4871_v52, %v3568_v27  ;;  %v3560_v19 = vadd.f32 %v3559_v2, %v3347_v23  ;;  %v4882_v52 = vld [vmem:[%s4964_s29 + $0x88] sm:$0xff] }
 0x777   : > { %v4328_v3 = vpop.f32.mrf.mxu1 }
 0x778   : > { %v3703_v36 = vadd.f32 %v7281_v24, %v3664_v54  ;;  %v3662_v47 = vadd.f32 %v4872_v63, %v3560_v19  ;;  %v3571_v33 = vadd.f32 %v4362_v61, %v4328_v3  ;;  %v4373_v19 = vpop.f32.mrf.mxu0 }
 0x779   : > { %v3350_v45 = vpop.f32.mrf.mxu1 }
 0x77a   : > { %3735 = vst.msk [vmem:[%s7289_s9 + $0x50] sm:$0xff] %vm312_vm0, %v3703_v36  ;;  %v3701_v37 = vadd.f32 %v7281_v24, %v3662_v47  ;;  %v3665_v21 = vadd.f32 %v4873_v62, %v3571_v33  ;;  %v3563_v46 = vadd.f32 %v3562_v26, %v3350_v45  ;;  %v3607_v36 = vpop.f32.mrf.mxu0  ;;  %v4883_v45 = vld [vmem:[%s4964_s29 + $0xb0] sm:$0xff] }
 0x77c   : > { %3733 = vst.msk [vmem:[%s7289_s9 + $0x40] sm:$0xff] %vm312_vm0, %v3701_v37  ;;  %v3704_v13 = vadd.f32 %v7281_v24, %v3665_v21  ;;  %v3663_v43 = vadd.f32 %v4874_v1, %v3563_v46  ;;  %v4374_v33 = vpop.f32.mrf.mxu0 }
 0x77e   : > { %3736 = vst.msk [vmem:[%s7289_s9 + $0x58] sm:$0xff] %vm312_vm0, %v3704_v13  ;;  %v3702_v60 = vadd.f32 %v7281_v24, %v3663_v43  ;;  %v4884_v13 = vld [vmem:[%s4964_s29 + $0xa0] sm:$0xff] }
 0x780   : > { %3734 = vst.msk [vmem:[%s7289_s9 + $0x48] sm:$0xff] %vm312_vm0, %v3702_v60 }
 0x783   : > { %v4331_v20 = vpop.f32.mrf.mxu1 }
 0x784   : > { %v3584_v29 = vadd.f32 %v4365_v10, %v4331_v20  ;;  %v3610_v10 = vpop.f32.mrf.mxu0  ;;  %v4885_v20 = vld [vmem:[%s4964_s29 + $0xb8] sm:$0xff] }
 0x785   : > { %v3363_v44 = vpop.f32.mrf.mxu1 }
 0x786   : > { %v3668_v51 = vadd.f32 %v4875_v58, %v3584_v29  ;;  %v3576_v12 = vadd.f32 %v3575_v18, %v3363_v44  ;;  %v4886_v58 = vld [vmem:[%s4964_s29 + $0xa8] sm:$0xff] }
 0x787   : > { %v4332_v31 = vpop.f32.mrf.mxu1 }
 0x788   : > { %v3707_v25 = vadd.f32 %v7281_v24, %v3668_v51  ;;  %v3666_v55 = vadd.f32 %v4876_v40, %v3576_v12  ;;  %v3587_v17 = vadd.f32 %v4366_v32, %v4332_v31  ;;  %v4377_v12 = vpop.f32.mrf.mxu0 }
 0x789   : > { %v3366_v57 = vpop.f32.mrf.mxu1 }
 0x78a   : > { %3739 = vst.msk [vmem:[%s7289_s9 + $0x70] sm:$0xff] %vm312_vm0, %v3707_v25  ;;  %v3705_v14 = vadd.f32 %v7281_v24, %v3666_v55  ;;  %v3669_v35 = vadd.f32 %v4877_v4, %v3587_v17  ;;  %v3579_v50 = vadd.f32 %v3578_v34, %v3366_v57  ;;  %v3623_v25 = vpop.f32.mrf.mxu0  ;;  %v4887_v57 = vld [vmem:[%s4964_s29 + $0xd0] sm:$0xff] }
 0x78c   : > { %3737 = vst.msk [vmem:[%s7289_s9 + $0x60] sm:$0xff] %vm312_vm0, %v3705_v14  ;;  %v3708_v42 = vadd.f32 %v7281_v24, %v3669_v35  ;;  %v3667_v49 = vadd.f32 %v4878_v28, %v3579_v50  ;;  %v4378_v17 = vpop.f32.mrf.mxu0 }
 0x78e   : > { %3740 = vst.msk [vmem:[%s7289_s9 + $0x78] sm:$0xff] %vm312_vm0, %v3708_v42  ;;  %v3706_v38 = vadd.f32 %v7281_v24, %v3667_v49  ;;  %v4888_v42 = vld [vmem:[%s4964_s29 + $0xc0] sm:$0xff] }
 0x790   : > { %3738 = vst.msk [vmem:[%s7289_s9 + $0x68] sm:$0xff] %vm312_vm0, %v3706_v38 }
 0x793   : > { %v4335_v15 = vpop.f32.mrf.mxu1 }
 0x794   : > { %v3600_v5 = vadd.f32 %v4369_v53, %v4335_v15  ;;  %v3626_v53 = vpop.f32.mrf.mxu0  ;;  %v4889_v15 = vld [vmem:[%s4964_s29 + $0xd8] sm:$0xff] }
 0x795   : > { %v3379_v8 = vpop.f32.mrf.mxu1 }
 0x796   : > { %v3672_v56 = vadd.f32 %v4879_v59, %v3600_v5  ;;  %v3592_v41 = vadd.f32 %v3591_v16, %v3379_v8  ;;  %v4890_v59 = vld [vmem:[%s4964_s29 + $0xc8] sm:$0xff] }
 0x797   : > { %v4336_v48 = vpop.f32.mrf.mxu1 }
 0x798   : > { %v3711_v6 = vadd.f32 %v7281_v24, %v3672_v56  ;;  %v3670_v39 = vadd.f32 %v4880_v11, %v3592_v41  ;;  %v3603_v30 = vadd.f32 %v4370_v9, %v4336_v48  ;;  %v4381_v48 = vpop.f32.mrf.mxu0 }
 0x799   : > { %v3382_v0 = vpop.f32.mrf.mxu1 }
 0x79a   : > { %3743 = vst.msk [vmem:[%s7289_s9 + $0x90] sm:$0xff] %vm312_vm0, %v3711_v6  ;;  %v3709_v2 = vadd.f32 %v7281_v24, %v3670_v39  ;;  %v3673_v27 = vadd.f32 %v4881_v22, %v3603_v30  ;;  %v3595_v61 = vadd.f32 %v3594_v7, %v3382_v0  ;;  %v3639_v6 = vpop.f32.mrf.mxu0  ;;  %v4891_v0 = vld [vmem:[%s4964_s29 + $0xf0] sm:$0xff] }
 0x79c   : > { %3741 = vst.msk [vmem:[%s7289_s9 + $0x80] sm:$0xff] %vm312_vm0, %v3709_v2  ;;  %v3712_v23 = vadd.f32 %v7281_v24, %v3673_v27  ;;  %v3671_v54 = vadd.f32 %v4882_v52, %v3595_v61  ;;  %v4382_v30 = vpop.f32.mrf.mxu0 }
 0x79e   : > { %3744 = vst.msk [vmem:[%s7289_s9 + $0x98] sm:$0xff] %vm312_vm0, %v3712_v23  ;;  %v3710_v3 = vadd.f32 %v7281_v24, %v3671_v54  ;;  %v4892_v23 = vld [vmem:[%s4964_s29 + $0xe0] sm:$0xff] }
 0x7a0   : > { %3742 = vst.msk [vmem:[%s7289_s9 + $0x88] sm:$0xff] %vm312_vm0, %v3710_v3 }
 0x7a3   : > { %v4339_v63 = vpop.f32.mrf.mxu1 }
 0x7a4   : > { %v3616_v47 = vadd.f32 %v4373_v19, %v4339_v63  ;;  %v3642_v19 = vpop.f32.mrf.mxu0  ;;  %v4893_v63 = vld [vmem:[%s4964_s29 + $0xf8] sm:$0xff] }
 0x7a5   : > { %v3395_v26 = vpop.f32.mrf.mxu1 }
 0x7a6   : > { %v3676_v37 = vadd.f32 %v4883_v45, %v3616_v47  ;;  %v3608_v62 = vadd.f32 %v3607_v36, %v3395_v26  ;;  %v4894_v45 = vld [vmem:[%s4964_s29 + $0xe8] sm:$0xff] }
 0x7a7   : > { %v4340_v21 = vpop.f32.mrf.mxu1 }
 0x7a8   : > { %v3715_v46 = vadd.f32 %v7281_v24, %v3676_v37  ;;  %v3674_v1 = vadd.f32 %v4884_v13, %v3608_v62  ;;  %v3619_v43 = vadd.f32 %v4374_v33, %v4340_v21 }
 0x7a9   : > { %v3398_v60 = vpop.f32.mrf.mxu1 }
 0x7aa   : > { %3747 = vst.msk [vmem:[%s7289_s9 + $0xb0] sm:$0xff] %vm312_vm0, %v3715_v46  ;;  %v3713_v18 = vadd.f32 %v7281_v24, %v3674_v1  ;;  %v3677_v29 = vadd.f32 %v4885_v20, %v3619_v43  ;;  %v3611_v32 = vadd.f32 %v3610_v10, %v3398_v60 }
 0x7ac   : > { %3745 = vst.msk [vmem:[%s7289_s9 + $0xa0] sm:$0xff] %vm312_vm0, %v3713_v18  ;;  %v3716_v44 = vadd.f32 %v7281_v24, %v3677_v29  ;;  %v3675_v51 = vadd.f32 %v4886_v58, %v3611_v32 }
 0x7ae   : > { %3748 = vst.msk [vmem:[%s7289_s9 + $0xb8] sm:$0xff] %vm312_vm0, %v3716_v44  ;;  %v3714_v31 = vadd.f32 %v7281_v24, %v3675_v51 }
 0x7b0   : > { %3746 = vst.msk [vmem:[%s7289_s9 + $0xa8] sm:$0xff] %vm312_vm0, %v3714_v31 }
 0x7b3   : > { %v4343_v40 = vpop.f32.mrf.mxu1 }
 0x7b4   : > { %v3632_v55 = vadd.f32 %v4377_v12, %v4343_v40 }
 0x7b5   : > { %v3411_v34 = vpop.f32.mrf.mxu1 }
 0x7b6   : > { %v3680_v14 = vadd.f32 %v4887_v57, %v3632_v55  ;;  %v3624_v4 = vadd.f32 %v3623_v25, %v3411_v34 }
 0x7b7   : > { %v4344_v35 = vpop.f32.mrf.mxu1 }
 0x7b8   : > { %v3719_v50 = vadd.f32 %v7281_v24, %v3680_v14  ;;  %v3678_v28 = vadd.f32 %v4888_v42, %v3624_v4  ;;  %v3635_v49 = vadd.f32 %v4378_v17, %v4344_v35 }
 0x7b9   : > { %v3414_v38 = vpop.f32.mrf.mxu1 }
 0x7ba   : > { %3751 = vst.msk [vmem:[%s7289_s9 + $0xd0] sm:$0xff] %vm312_vm0, %v3719_v50  ;;  %v3717_v16 = vadd.f32 %v7281_v24, %v3678_v28  ;;  %v3681_v5 = vadd.f32 %v4889_v15, %v3635_v49  ;;  %v3627_v9 = vadd.f32 %v3626_v53, %v3414_v38 }
 0x7bc   : > { %3749 = vst.msk [vmem:[%s7289_s9 + $0xc0] sm:$0xff] %vm312_vm0, %v3717_v16  ;;  %v3720_v8 = vadd.f32 %v7281_v24, %v3681_v5  ;;  %v3679_v56 = vadd.f32 %v4890_v59, %v3627_v9 }
 0x7be   : > { %3752 = vst.msk [vmem:[%s7289_s9 + $0xd8] sm:$0xff] %vm312_vm0, %v3720_v8  ;;  %v3718_v41 = vadd.f32 %v7281_v24, %v3679_v56 }
 0x7c0   : > { %3750 = vst.msk [vmem:[%s7289_s9 + $0xc8] sm:$0xff] %vm312_vm0, %v3718_v41 }
 0x803   : > { %v4347_v11 = vpop.f32.mrf.mxu1 }
 0x804   : > { %v3648_v39 = vadd.f32 %v4381_v48, %v4347_v11 }
 0x805   : > { %v3427_v7 = vpop.f32.mrf.mxu1 }
 0x806   : > { %v3684_v2 = vadd.f32 %v4891_v0, %v3648_v39  ;;  %v3640_v22 = vadd.f32 %v3639_v6, %v3427_v7 }
 0x807   : > { %v4348_v27 = vpop.f32.mrf.mxu1 }
 0x808   : > { %v3723_v61 = vadd.f32 %v7281_v24, %v3684_v2  ;;  %v3682_v52 = vadd.f32 %v4892_v23, %v3640_v22  ;;  %v3651_v54 = vadd.f32 %v4382_v30, %v4348_v27 }
 0x809   : > { %v3430_v3 = vpop.f32.mrf.mxu1 }
 0x80a   : > { %3755 = vst.msk [vmem:[%s7289_s9 + $0xf0] sm:$0xff] %vm312_vm0, %v3723_v61  ;;  %v3721_v36 = vadd.f32 %v7281_v24, %v3682_v52  ;;  %v3685_v47 = vadd.f32 %v4893_v63, %v3651_v54  ;;  %v3643_v33 = vadd.f32 %v3642_v19, %v3430_v3 }
 0x80c   : > { %3753 = vst.msk [vmem:[%s7289_s9 + $0xe0] sm:$0xff] %vm312_vm0, %v3721_v36  ;;  %v3724_v26 = vadd.f32 %v7281_v24, %v3685_v47  ;;  %v3683_v37 = vadd.f32 %v4894_v45, %v3643_v33 }
 0x80e   : > { %3756 = vst.msk [vmem:[%s7289_s9 + $0xf8] sm:$0xff] %vm312_vm0, %v3724_v26  ;;  %v3722_v62 = vadd.f32 %v7281_v24, %v3683_v37 }
 0x810   : > { %3754 = vst.msk [vmem:[%s7289_s9 + $0xe8] sm:$0xff] %vm312_vm0, %v3722_v62 }
 0x811 PF: > { %s17_s24 = sadd.s32 1, %s4901_s24  }
 0x812   : > { %p14_p4 = scmp.ge.s32.totalorder %s17_s24, 4  }
 0x814   :  { %16 = sbr.rel (!%p14_p4) target bundleno = 1 (0x1), region = 79 }

// kernel: down_block_forward.9
= control target key start
LH: loop header
LB: loop body
LE: loop exit
PB: predicated region body
PF: predicated region fallthrough
CT: control target
= control target key end

     0   :  { %s727_s15 = smov 0   ;;  %s840_s0 = inlined_call_operand.vmem [shape: f32[16,128], index: 0, kind: input, shape index: {}]   ;;  %s841_s1 = inlined_call_operand.vmem [shape: f32[16,128], index: 1, kind: input, shape index: {}]   ;;  %s842_s2 = inlined_call_operand.vmem [shape: bf16[384,64], index: 2, kind: input, shape index: {}]   ;;  %s843_s3 = inlined_call_operand.vmem [shape: f32[1,64], index: 3, kind: input, shape index: {}]   ;;  %s844_s4 = inlined_call_operand.vmem [shape: f32[16,64], index: 4, kind: output, shape index: {}]  }
   0x1 LB: > { %s567_s16 = sadd.s32 4294967295, %s698_s15   ;;  %p571_p0 = scmp.ge.s32.totalorder %s698_s15, 1  ;;  %s698_s15 = sphi %s727_s15, %s14_s15  }
   0x2   : > { %p170_p1 = scmp.lt.s32.totalorder %s698_s15, 3 }
   0x4   : > { %p171_p2 = pnand %p571_p0, %p170_p1 }
   0x5   : > { %p198_p3 = scmp.lt.s32.totalorder (!%p171_p2), %s567_s16, 1 }
   0x6   : > { %174 = sbr.rel (%p171_p2) target bundleno = 247 (0xf7), region = 36 }
   0xb   : > { %v668_v0 = vld [vmem:[%s842_s2 + $0x78] sm:$0xff]   ;;  %v700_v1 = vmov 0.0   ;;  %vm701_vm0 = vmmov 0   ;;  %v671_v4 = vld [vmem:[%s842_s2 + $0x70] sm:$0xff]   ;;  %v674_v7 = vld [vmem:[%s842_s2 + $0x68] sm:$0xff]   ;;  %s846_s16 = smov (!%p198_p3, %s567_s16), 1 }
   0xc   : > { %638 = vmatprep.subr.bf16.mxu1 %v700_v1  ;;  %v669_v2 = vld [vmem:[%s842_s2 + $0xb8] sm:$0xff]   ;;  %607 = vmatprep.subr.bf16.mxu0 %v668_v0  ;;  %v672_v5 = vld [vmem:[%s842_s2 + $0xb0] sm:$0xff]   ;;  %v675_v8 = vld [vmem:[%s842_s2 + $0xa8] sm:$0xff]   ;;  %s793_s25 = sshll.u32 %s846_s16, 3  ;;  %vm216_vm1 = vcmask 1040384   ;;  %vm500_vm4 = vcmask 523264  }
   0xd   : > { %v670_v3 = vld [vmem:[%s842_s2 + $0x38] sm:$0xff]   ;;  %654 = vmatprep.mubr.msk.bf16.mxu1 %vm701_vm0, %v700_v1  ;;  %639 = vmatpush3.bf16.msra.mxu1 %v669_v2  ;;  %v673_v6 = vld [vmem:[%s842_s2 + $0x30] sm:$0xff]   ;;  %v676_v9 = vld [vmem:[%s842_s2 + $0x28] sm:$0xff]   ;;  %s201_s7 = scalar_lea.vmem %s840_s0, %s793_s25  ;;  %s205_s10 = scalar_lea.vmem %s841_s1, %s793_s25 }
   0xe   : > { %608 = vmatpush3.bf16.msra.mxu0 %v670_v3  ;;  %640 = vmatprep.subr.bf16.mxu1 %v700_v1  ;;  %v677_v10 = vld [vmem:[%s842_s2 + $0x60] sm:$0xff]   ;;  %v680_v13 = vld [vmem:[%s842_s2 + $0x58] sm:$0xff]   ;;  %v683_v16 = vld [vmem:[%s842_s2 + $0x50] sm:$0xff]   ;;  %s209_s28 = scalar_lea.vmem %s844_s4, %s793_s25 }
   0xf   : > { %609 = vmatprep.subr.bf16.mxu0 %v671_v4  ;;  %v678_v11 = vld [vmem:[%s842_s2 + $0xa0] sm:$0xff]   ;;  %v681_v14 = vld [vmem:[%s842_s2 + $0x98] sm:$0xff]   ;;  %v684_v17 = vld [vmem:[%s842_s2 + $0x90] sm:$0xff]  }
  0x10   : > { %v679_v12 = vld [vmem:[%s842_s2 + $0x20] sm:$0xff]   ;;  %v682_v15 = vld [vmem:[%s842_s2 + $0x18] sm:$0xff]   ;;  %v685_v18 = vld [vmem:[%s842_s2 + $0x10] sm:$0xff]  }
  0x11   : > { %641 = vmatpush3.bf16.msra.mxu1 %v672_v5  ;;  %v686_v19 = vld [vmem:[%s842_s2 + $0x48] sm:$0xff]   ;;  %v211_v22 = vld [vmem:[%s201_s7] sm:$0xff]  ;;  %vm600_vm2 = vmneg %vm216_vm1 }
  0x12   : > { %610 = vmatpush3.bf16.msra.mxu0 %v673_v6  ;;  %642 = vmatprep.subr.bf16.mxu1 %v700_v1  ;;  %v687_v20 = vld [vmem:[%s842_s2 + $0x88] sm:$0xff]   ;;  %v212_v23 = vld [vmem:[%s205_s10] sm:$0xff]  ;;  %v219_v25 = vpack.c.bf16 %v211_v22, %v211_v22  ;;  %vm602_vm3 = vmpackc.low %vm600_vm2, %vm600_vm2 }
  0x13   : > { %611 = vmatprep.subr.bf16.mxu0 %v674_v7  ;;  %v688_v21 = vld [vmem:[%s842_s2 + $0x8] sm:$0xff]   ;;  %v689_v24 = vld [vmem:[%s842_s2 + $0x40] sm:$0xff]   ;;  %v214_v27 = vrot.slane %v212_v23, 7  ;;  %v220_v29 = vpack.c.bf16 %v212_v23, %v212_v23 }
  0x14   : > { %v690_v26 = vld [vmem:[%s842_s2 + $0x80] sm:$0xff]   ;;  %452 = vmatprep.mubr.bf16.mxu0 %v219_v25 }
  0x15   : > { %643 = vmatpush3.bf16.msra.mxu1 %v675_v8  ;;  %v691_v28 = vld [vmem:[%s842_s2] sm:$0xff]   ;;  %v603_v30 = vpack.c.bf16 %v214_v27, %v214_v27 }
  0x16   : > { %612 = vmatpush3.bf16.msra.mxu0 %v676_v9  ;;  %644 = vmatprep.subr.bf16.mxu1 %v700_v1  ;;  %v575_v34 = vld [vmem:[%s843_s3] ss:$0 sm:$0xff] }
  0x17   : > { %613 = vmatprep.subr.bf16.mxu0 %v677_v10 }
  0x19   : > { %645 = vmatpush3.bf16.msra.mxu1 %v678_v11 }
  0x1a   : > { %614 = vmatpush3.bf16.msra.mxu0 %v679_v12  ;;  %646 = vmatprep.subr.bf16.mxu1 %v700_v1 }
  0x1b   : > { %615 = vmatprep.subr.bf16.mxu0 %v680_v13 }
  0x1d   : > { %647 = vmatpush3.bf16.msra.mxu1 %v681_v14 }
  0x1e   : > { %616 = vmatpush3.bf16.msra.mxu0 %v682_v15  ;;  %648 = vmatprep.subr.bf16.mxu1 %v700_v1 }
  0x1f   : > { %617 = vmatprep.subr.bf16.mxu0 %v683_v16 }
  0x21   : > { %649 = vmatpush3.bf16.msra.mxu1 %v684_v17 }
  0x22   : > { %618 = vmatpush3.bf16.msra.mxu0 %v685_v18  ;;  %650 = vmatprep.subr.bf16.mxu1 %v700_v1 }
  0x23   : > { %619 = vmatprep.subr.bf16.mxu0 %v686_v19 }
  0x25   : > { %651 = vmatpush3.bf16.msra.mxu1 %v687_v20 }
  0x26   : > { %620 = vmatpush3.bf16.msra.mxu0 %v688_v21  ;;  %652 = vmatprep.subr.bf16.mxu1 %v700_v1 }
  0x27   : > { %621 = vmatprep.subr.bf16.mxu0 %v689_v24 }
  0x29   : > { %653 = vmatpush3.bf16.msra.mxu1 %v690_v26 }
  0x2a   : > { %622 = vmatpush3.bf16.msra.mxu0 %v691_v28 }
  0x2c   : > { %655 = vmatmul.mubr.bf16.vlgmr.msra.gmra.mxu1 %v220_v29 }
  0x2d   : > { %604 = vmatmul.mubr.msk.bf16.vlgmr.msra.gmra.mxu0 %vm602_vm3, %v603_v30 }
  0xec   : > { %v494_v31 = vpop.f32.mrf.mxu1 }
  0xed   : > { %v623_v32 = vpop.f32.mrf.mxu0 }
  0xee   : > { %v656_v33 = vpop.f32.mrf.mxu1 }
  0xef   : > { %v624_v35 = vpop.f32.mrf.mxu0 }
  0xf0   : > { %v625_v36 = vadd.f32 %v624_v35, %v623_v32  ;;  %v497_v37 = vpop.f32.mrf.mxu1 }
  0xf1   : > { %v626_v38 = vpop.f32.mrf.mxu0 }
  0xf2   : > { %v455_v39 = vadd.f32 %v625_v36, %v575_v34  ;;  %v657_v40 = vpop.f32.mrf.mxu1 }
  0xf3   : > { %v627_v41 = vpop.f32.mrf.mxu0 }
  0xf4   : > { %v495_v42 = vadd.f32 %v494_v31, %v455_v39 }
  0xf6   : > { %501 = vst.msk [vmem:[%s209_s28] sm:$0xff] %vm500_vm4, %v495_v42 }
  0xf7 PF: > { %s14_s15 = sadd.s32 1, %s698_s15  }
  0xf8   : > { %p11_p4 = scmp.ge.s32.totalorder %s14_s15, 4  }
  0xfa   :  { %13 = sbr.rel (!%p11_p4) target bundleno = 1 (0x1), region = 69 }

</bundles_post_ra>
